<compile_context>
chip_gen: v7x
topology: tpu7x:2x2x1
jax: 0.10.0
libtpu: 0.0.40
codegen_flags: <defaults>
</compile_context>

<pallas_src>
import functools

import jax
import jax.numpy as jnp
from jax.experimental import pallas as pl
from jax.experimental.pallas import tpu as pltpu

KERNEL_LIST = [3, 5, 7, 9]
EXPANSION_RATE = [3, 6]
BN_EPS = 1e-5
LANE = 128


def _round_up(x, m):
    return (x + m - 1) // m * m


def _pad_axis(a, axis, size):
    if a.shape[axis] == size:
        return a
    pad = [(0, 0)] * a.ndim
    pad[axis] = (0, size - a.shape[axis])
    return jnp.pad(a, pad)


# ------------------------------ fused kernel --------------------------------

def _fused_ib_kernel(x_ref, pw_w_ref, pw_b_ref, *rest,
                     nb, ks, H, W, Hout, Wout, stride, padH, padW, residual):
    """One batch element of the full inverted bottleneck, all in VMEM."""
    dw_refs = rest[:2 * nb]
    pwl_w_ref, bn_b_ref, o_ref = rest[2 * nb:2 * nb + 3]
    mid_ref, col_ref = rest[2 * nb + 3:2 * nb + 5]

    Hp, Wp, Cm = mid_ref.shape          # padded spatial, padded mid channels
    Co = pwl_w_ref.shape[1]             # padded output channels
    dw_dtype = mid_ref.dtype            # bf16 scratch / depthwise compute

    # ---- pw: 1x1 conv (MXU, bf16 in / f32 acc) + folded-BN bias + ReLU6 -----
    # BN scale is folded into pw_w in the wrapper; only bias-add + clip remain.
    x2d = x_ref[0].reshape(H * W, x_ref.shape[-1])            # bf16
    y = jnp.dot(x2d, pw_w_ref[...], preferred_element_type=jnp.float32)
    y = jnp.clip(y + pw_b_ref[...], 0.0, 6.0)

    # ---- halo-only zeroing of the spatially padded buffer -------------------
    # Zeroed every step (not once under program_id==0): scratch is per-core and
    # with a "parallel" batch axis the second TensorCore never sees id 0.
    mid_ref[0:padH] = jnp.zeros((padH, Wp, Cm), dw_dtype)
    mid_ref[padH + H:Hp] = jnp.zeros((Hp - padH - H, Wp, Cm), dw_dtype)
    mid_ref[:, 0:padW] = jnp.zeros((Hp, padW, Cm), dw_dtype)
    mid_ref[:, padW + W:Wp] = jnp.zeros((Hp, Wp - padW - W, Cm), dw_dtype)

    # Interior = pw output (true zero padding of the pw OUTPUT around it).
    mid_ref[padH:padH + H, padW:padW + W, :] = (
        y.reshape(H, W, Cm).astype(dw_dtype))

    # ---- depthwise mix_conv branches (value accumulation), summed -----------
    acc = None
    for b in range(nb):
        k = ks[b]
        p = k // 2
        w_ref, bias_ref = dw_refs[2 * b], dw_refs[2 * b + 1]
        w_taps = w_ref[...]                          # (k*k, Cm) bf16, BN-scaled
        bias = bias_ref[...].reshape(1, 1, Cm)       # bf16
        offH = padH - p
        offW = padW - p
        colH = (Hout - 1) * stride + k

        br = None
        for dx in range(k):
            # One sublane-offset (possibly strided) column strip per dx; the dy
            # shifts below are cheap outer-dim slices of aligned scratch.
            if stride == 1:
                strip = mid_ref[offH:offH + colH,
                                offW + dx:offW + dx + Wout, :]
            else:
                # TODO(synk): for stride==2, a one-time even/odd deinterleave of
                # the interior along W would replace these strided gathers.
                strip = mid_ref[pl.ds(offH, colH),
                                pl.ds(offW + dx, Wout, stride), :]
            col_ref[0:colH] = strip
            # dy taps accumulate in VALUES (no per-tap read-modify-write of a
            # VMEM accumulator); fold into the branch sum once per dx.
            dy_sum = None
            for dy in range(k):
                if stride == 1:
                    patch = col_ref[dy:dy + Hout]
                else:
                    patch = col_ref[pl.ds(dy, Hout, stride)]
                term = patch * w_taps[dy * k + dx]
                dy_sum = term if dy_sum is None else dy_sum + term
            br = dy_sum if br is None else br + dy_sum
        branch = jnp.clip(br + bias, 0.0, 6.0)       # folded BN bias + ReLU6
        acc = branch if acc is None else acc + branch

    # ---- pw_linear (MXU) + mix_bn bias (+ residual) --------------------------
    a2d = acc.reshape(Hout * Wout, Cm)               # bf16, feeds MXU directly
    z = jnp.dot(a2d, pwl_w_ref[...], preferred_element_type=jnp.float32)
    z = z + bn_b_ref[...]
    if residual:
        # stride==1 and Cin_p == Co: re-read the still-resident input block.
        z = z + x_ref[0].reshape(Hout * Wout, Co).astype(jnp.float32)
    o_ref[0] = z.reshape(Hout, Wout, Co)


# ---------------------------- parameter setup --------------------------------

def init_params(key, inplanes, outplanes, shadow_bn):
    def conv_init(k, shape, fan_in):
        return jax.random.normal(k, shape, jnp.float32) * (2.0 / fan_in) ** 0.5

    def bn_fold(k, c):
        kg, kb = jax.random.split(k)
        gamma = 1.0 + 0.1 * jax.random.normal(kg, (c,), jnp.float32)
        beta = 0.1 * jax.random.normal(kb, (c,), jnp.float32)
        mean = jnp.zeros((c,), jnp.float32)   # inference-mode running stats
        var = jnp.ones((c,), jnp.float32)
        scale = gamma / jnp.sqrt(var + BN_EPS)
        bias = beta - mean * scale
        return scale, bias

    params = []
    for ti, t in enumerate(EXPANSION_RATE):
        cmid = inplanes * t
        keys = jax.random.split(jax.random.fold_in(key, ti), 32)
        ki = iter(keys)
        p = {}
        # pw: Conv2d(inplanes, inplanes*t, 1) + BN + ReLU6
        p['pw_w'] = conv_init(next(ki), (inplanes, cmid), inplanes)
        p['pw_scale'], p['pw_bias'] = bn_fold(next(ki), cmid)
        # mix_conv: depthwise k x k conv + BN + ReLU6 per kernel size
        p['dw_w'], p['dw_scale'], p['dw_bias'] = [], [], []
        for kk in KERNEL_LIST:
            p['dw_w'].append(conv_init(next(ki), (kk * kk, cmid), kk * kk))
            s, b = bn_fold(next(ki), cmid)
            p['dw_scale'].append(s)
            p['dw_bias'].append(b)
        # pw_linear: Conv2d(inplanes*t, outplanes, 1, bias=False)
        p['pwl_w'] = conv_init(next(ki), (cmid, outplanes), cmid)
        # mix_bn
        if shadow_bn:
            p['bn_scale'], p['bn_bias'] = [], []
            for _ in KERNEL_LIST:
                s, b = bn_fold(next(ki), outplanes)
                p['bn_scale'].append(s)
                p['bn_bias'].append(b)
        else:
            p['bn_scale'], p['bn_bias'] = bn_fold(next(ki), outplanes)
        params.append(p)
    return params


# --------------------------------- forward -----------------------------------

def inverted_bottleneck_forward(params, x_nchw, choice, *, inplanes, outplanes,
                                stride, shadow_bn):
    conv_ids = list(choice['conv'])
    rate_id = choice['rate']
    m = len(conv_ids)
    assert m in (1, 2, 3, 4)
    assert rate_id in (0, 1)
    p = params[rate_id]

    N, C, H, W = x_nchw.shape
    assert C == inplanes
    ks = [KERNEL_LIST[c] for c in conv_ids]
    kmax = max(ks)
    # All odd-k branches with padding k//2 share this output size.
    Hout = (H - 1) // stride + 1
    Wout = (W - 1) // stride + 1

    cmid = inplanes * EXPANSION_RATE[rate_id]
    cin_p = _round_up(inplanes, LANE)
    cmid_p = _round_up(cmid, LANE)
    cout_p = _round_up(outplanes, LANE)

    # ---- BN scales folded into weights (wrapper-side, free at runtime);
    # lane-dense, bf16 weights. Padded channels keep zero weight/bias, so they
    # stay exactly zero through the whole block.
    pw_w = p['pw_w'] * p['pw_scale'][None, :]
    pw_w = _pad_axis(_pad_axis(pw_w, 0, cin_p), 1, cmid_p).astype(jnp.bfloat16)
    pw_b = _pad_axis(p['pw_bias'], 0, cmid_p).reshape(1, cmid_p)

    dw_flat = []
    for cid in conv_ids:
        w = p['dw_w'][cid] * p['dw_scale'][cid][None, :]
        dw_flat.append(_pad_axis(w, 1, cmid_p).astype(jnp.bfloat16))
        dw_flat.append(_pad_axis(p['dw_bias'][cid], 0, cmid_p)
                       .reshape(1, cmid_p).astype(jnp.bfloat16))

    if shadow_bn:
        bn_s_raw, bn_b_raw = p['bn_scale'][m - 1], p['bn_bias'][m - 1]
    else:
        bn_s_raw, bn_b_raw = p['bn_scale'], p['bn_bias']
    pwl_w = p['pwl_w'] * bn_s_raw[None, :]
    pwl_w = _pad_axis(_pad_axis(pwl_w, 0, cmid_p), 1, cout_p).astype(jnp.bfloat16)
    bn_b = _pad_axis(bn_b_raw, 0, cout_p).reshape(1, cout_p)

    # ---- lane-dense NHWC bf16 input (halves lane-padded HBM reads) -----------
    x = jnp.transpose(x_nchw, (0, 2, 3, 1)).astype(jnp.bfloat16)  # NCHW -> NHWC
    x = _pad_axis(x, 3, cin_p)                                    # (N,H,W,Cin_p)

    use_res = (stride == 1 and inplanes == outplanes)

    padH = kmax // 2          # halo rows (outer dim, no alignment constraint)
    padW = 8                  # halo cols, sublane-aligned (>= max pad of 4)
    Hp = H + 2 * padH
    Wp = W + 2 * padW
    colH_max = (Hout - 1) * stride + kmax

    nb = len(conv_ids)
    kern = functools.partial(
        _fused_ib_kernel, nb=nb, ks=tuple(ks), H=H, W=W, Hout=Hout, Wout=Wout,
        stride=stride, padH=padH, padW=padW, residual=use_res)

    def const_spec(shape):
        return pl.BlockSpec(shape, lambda n: (0,) * len(shape))

    in_specs = [pl.BlockSpec((1, H, W, cin_p), lambda n: (n, 0, 0, 0)),
                const_spec((cin_p, cmid_p)),
                const_spec((1, cmid_p))]
    for cid in conv_ids:
        k = KERNEL_LIST[cid]
        in_specs += [const_spec((k * k, cmid_p)),
                     const_spec((1, cmid_p))]
    in_specs += [const_spec((cmid_p, cout_p)),
                 const_spec((1, cout_p))]

    out_spec = pl.BlockSpec((1, Hout, Wout, cout_p), lambda n: (n, 0, 0, 0))

    # bf16 scratch: halves the dominant VMEM buffers (v7x 64 MiB budget) and
    # the vld/vst traffic of the depthwise stage.
    scratch = [pltpu.VMEM((Hp, Wp, cmid_p), jnp.bfloat16),          # padded pw out
               pltpu.VMEM((colH_max, Wout, cmid_p), jnp.bfloat16)]  # dx strip

    flops = 2 * N * H * W * cin_p * cmid_p
    for k in ks:
        flops += 2 * N * Hout * Wout * cmid_p * k * k
    flops += 2 * N * Hout * Wout * cmid_p * cout_p
    bytes_accessed = 2 * N * H * W * cin_p + 4 * N * Hout * Wout * cout_p
    bytes_accessed += 2 * (cin_p * cmid_p + cmid_p * cout_p)
    bytes_accessed += 2 * sum(k * k * cmid_p + cmid_p for k in ks)
    bytes_accessed += 4 * (cmid_p + cout_p)

    y = pl.pallas_call(
        kern,
        out_shape=jax.ShapeDtypeStruct((N, Hout, Wout, cout_p), jnp.float32),
        grid_spec=pltpu.PrefetchScalarGridSpec(
            num_scalar_prefetch=0,
            grid=(N,),
            in_specs=in_specs,
            out_specs=out_spec,
            scratch_shapes=scratch),
        compiler_params=pltpu.CompilerParams(
            dimension_semantics=("parallel",),
            vmem_limit_bytes=32 * 1024 * 1024),
        cost_estimate=pl.CostEstimate(flops=flops, transcendentals=0,
                                      bytes_accessed=bytes_accessed),
    )(x, pw_w, pw_b, *dw_flat, pwl_w, bn_b)

    # Strip channel padding, NHWC -> NCHW (layout glue).
    return jnp.transpose(y[..., :outplanes], (0, 3, 1, 2))


# ----------------------------------- main -------------------------------------

if __name__ == "__main__":
    key = jax.random.PRNGKey(0)
    N, C, Hs, Ws = 2, 4, 16, 16
    inplanes, outplanes, stride, shadow_bn = C, 4, 1, True

    kp, kx = jax.random.split(key)
    params = init_params(kp, inplanes, outplanes, shadow_bn)
    x = jax.random.normal(kx, (N, C, Hs, Ws), dtype=jnp.float32)

    # pick kernel sizes 3 and 7, expansion rate 6 (rate_id=1)
    choice = {'conv': [0, 2], 'rate': 1}

    out = inverted_bottleneck_forward(
        params, x, choice,
        inplanes=inplanes, outplanes=outplanes,
        stride=stride, shadow_bn=shadow_bn)
    jax.block_until_ready(out)

    assert out.shape == (N, outplanes, Hs, Ws), out.shape
    assert out.dtype == jnp.float32
    print("KERNEL_OK")
</pallas_src>

<mosaic_0001>
module attributes {stable_mosaic.version = 11 : i64} {
  func.func @_fused_ib_kernel(%arg0: i32, %arg1: memref<1x16x16x128xbf16, #tpu.memory_space<vmem>>, %arg2: memref<128x128xbf16, #tpu.memory_space<vmem>>, %arg3: memref<1x128xf32, #tpu.memory_space<vmem>>, %arg4: memref<9x128xbf16, #tpu.memory_space<vmem>>, %arg5: memref<1x128xbf16, #tpu.memory_space<vmem>>, %arg6: memref<49x128xbf16, #tpu.memory_space<vmem>>, %arg7: memref<1x128xbf16, #tpu.memory_space<vmem>>, %arg8: memref<128x128xbf16, #tpu.memory_space<vmem>>, %arg9: memref<1x128xf32, #tpu.memory_space<vmem>>, %arg10: memref<1x16x16x128xf32, #tpu.memory_space<vmem>>, %arg11: memref<22x32x128xbf16, #tpu.memory_space<vmem>>, %arg12: memref<22x16x128xbf16, #tpu.memory_space<vmem>>) attributes {dimension_semantics = [#tpu.dimension_semantics<parallel>], iteration_bounds = array<i64: 2>, scalar_prefetch = 0 : i64, scratch_operands = 2 : i64, tpu.core_type = #tpu.core_type<tc>, window_params = [{transform_indices = @transform_0, window_bounds = array<i64: 1, 16, 16, 128>}, {pipeline_mode = #tpu.pipeline_mode<synchronous>, transform_indices = @transform_1, window_bounds = array<i64: 128, 128>}, {pipeline_mode = #tpu.pipeline_mode<synchronous>, transform_indices = @transform_2, window_bounds = array<i64: 1, 128>}, {pipeline_mode = #tpu.pipeline_mode<synchronous>, transform_indices = @transform_3, window_bounds = array<i64: 9, 128>}, {pipeline_mode = #tpu.pipeline_mode<synchronous>, transform_indices = @transform_4, window_bounds = array<i64: 1, 128>}, {pipeline_mode = #tpu.pipeline_mode<synchronous>, transform_indices = @transform_5, window_bounds = array<i64: 49, 128>}, {pipeline_mode = #tpu.pipeline_mode<synchronous>, transform_indices = @transform_6, window_bounds = array<i64: 1, 128>}, {pipeline_mode = #tpu.pipeline_mode<synchronous>, transform_indices = @transform_7, window_bounds = array<i64: 128, 128>}, {pipeline_mode = #tpu.pipeline_mode<synchronous>, transform_indices = @transform_8, window_bounds = array<i64: 1, 128>}, {transform_indices = @transform_9, window_bounds = array<i64: 1, 16, 16, 128>}]} {
    %c0 = arith.constant 0 : index
    %c0_0 = arith.constant 0 : index
    %c0_1 = arith.constant 0 : index
    %c0_2 = arith.constant 0 : index
    %0 = vector.load %arg1[%c0, %c0_0, %c0_1, %c0_2] : memref<1x16x16x128xbf16, #tpu.memory_space<vmem>>, vector<1x16x16x128xbf16>
    %1 = vector.shape_cast %0 : vector<1x16x16x128xbf16> to vector<16x16x128xbf16>
    %2 = vector.shape_cast %1 : vector<16x16x128xbf16> to vector<256x128xbf16>
    %c0_3 = arith.constant 0 : index
    %c0_4 = arith.constant 0 : index
    %3 = vector.load %arg2[%c0_3, %c0_4] : memref<128x128xbf16, #tpu.memory_space<vmem>>, vector<128x128xbf16>
    %cst = arith.constant dense<0.000000e+00> : vector<256x128xf32>
    %4 = tpu.matmul %2, %3, %cst {dimension_numbers = #tpu.dot_dimension_numbers<[1], [0], [0], [1], [0, 0, 1, 1], [], []>} : vector<256x128xbf16>, vector<128x128xbf16>, vector<256x128xf32> -> vector<256x128xf32>
    %c0_5 = arith.constant 0 : index
    %c0_6 = arith.constant 0 : index
    %5 = vector.load %arg3[%c0_5, %c0_6] : memref<1x128xf32, #tpu.memory_space<vmem>>, vector<1x128xf32>
    %6 = vector.broadcast %5 : vector<1x128xf32> to vector<256x128xf32>
    %7 = arith.addf %4, %6 : vector<256x128xf32>
    %cst_7 = arith.constant 0.000000e+00 : f32
    %cst_8 = arith.constant 6.000000e+00 : f32
    %8 = vector.broadcast %cst_7 : f32 to vector<256x128xf32>
    %9 = arith.maximumf %8, %7 : vector<256x128xf32>
    %10 = vector.broadcast %cst_8 : f32 to vector<256x128xf32>
    %11 = arith.minimumf %10, %9 : vector<256x128xf32>
    %cst_9 = arith.constant 0.000000e+00 : bf16
    %12 = vector.broadcast %cst_9 : bf16 to vector<3x32x128xbf16>
    %c0_10 = arith.constant 0 : index
    %c0_11 = arith.constant 0 : index
    %c0_12 = arith.constant 0 : index
    %13 = vector.load %arg11[%c0_10, %c0_11, %c0_12] : memref<22x32x128xbf16, #tpu.memory_space<vmem>>, vector<3x32x128xbf16>
    tpu.vector_store %arg11[%c0_10, %c0_11, %c0_12], %12 {strides = array<i32>} : memref<22x32x128xbf16, #tpu.memory_space<vmem>>, vector<3x32x128xbf16>,
    %cst_13 = arith.constant 0.000000e+00 : bf16
    %14 = vector.broadcast %cst_13 : bf16 to vector<3x32x128xbf16>
    %c19 = arith.constant 19 : index
    %c0_14 = arith.constant 0 : index
    %c0_15 = arith.constant 0 : index
    %15 = vector.load %arg11[%c19, %c0_14, %c0_15] : memref<22x32x128xbf16, #tpu.memory_space<vmem>>, vector<3x32x128xbf16>
    tpu.vector_store %arg11[%c19, %c0_14, %c0_15], %14 {strides = array<i32>} : memref<22x32x128xbf16, #tpu.memory_space<vmem>>, vector<3x32x128xbf16>,
    %cst_16 = arith.constant 0.000000e+00 : bf16
    %16 = vector.broadcast %cst_16 : bf16 to vector<22x8x128xbf16>
    %c0_17 = arith.constant 0 : index
    %c0_18 = arith.constant 0 : index
    %c0_19 = arith.constant 0 : index
    %17 = vector.load %arg11[%c0_17, %c0_18, %c0_19] : memref<22x32x128xbf16, #tpu.memory_space<vmem>>, vector<22x8x128xbf16>
    tpu.vector_store %arg11[%c0_17, %c0_18, %c0_19], %16 {strides = array<i32>} : memref<22x32x128xbf16, #tpu.memory_space<vmem>>, vector<22x8x128xbf16>,
    %cst_20 = arith.constant 0.000000e+00 : bf16
    %18 = vector.broadcast %cst_20 : bf16 to vector<22x8x128xbf16>
    %c0_21 = arith.constant 0 : index
    %c24 = arith.constant 24 : index
    %c0_22 = arith.constant 0 : index
    %19 = vector.load %arg11[%c0_21, %c24, %c0_22] : memref<22x32x128xbf16, #tpu.memory_space<vmem>>, vector<22x8x128xbf16>
    tpu.vector_store %arg11[%c0_21, %c24, %c0_22], %18 {strides = array<i32>} : memref<22x32x128xbf16, #tpu.memory_space<vmem>>, vector<22x8x128xbf16>,
    %20 = vector.shape_cast %11 : vector<256x128xf32> to vector<16x16x128xf32>
    %21 = arith.truncf %20 : vector<16x16x128xf32> to vector<16x16x128xbf16>
    %c3 = arith.constant 3 : index
    %c8 = arith.constant 8 : index
    %c0_23 = arith.constant 0 : index
    %22 = vector.load %arg11[%c3, %c8, %c0_23] : memref<22x32x128xbf16, #tpu.memory_space<vmem>>, vector<16x16x128xbf16>
    tpu.vector_store %arg11[%c3, %c8, %c0_23], %21 {strides = array<i32>} : memref<22x32x128xbf16, #tpu.memory_space<vmem>>, vector<16x16x128xbf16>,
    %c0_24 = arith.constant 0 : index
    %c0_25 = arith.constant 0 : index
    %23 = vector.load %arg4[%c0_24, %c0_25] : memref<9x128xbf16, #tpu.memory_space<vmem>>, vector<9x128xbf16>
    %c0_26 = arith.constant 0 : index
    %c0_27 = arith.constant 0 : index
    %24 = vector.load %arg5[%c0_26, %c0_27] : memref<1x128xbf16, #tpu.memory_space<vmem>>, vector<1x128xbf16>
    %25 = vector.shape_cast %24 : vector<1x128xbf16> to vector<1x1x128xbf16>
    %c2 = arith.constant 2 : index
    %c7 = arith.constant 7 : index
    %c0_28 = arith.constant 0 : index
    %26 = vector.load %arg11[%c2, %c7, %c0_28] : memref<22x32x128xbf16, #tpu.memory_space<vmem>>, vector<18x16x128xbf16>
    %c0_29 = arith.constant 0 : index
    %c0_30 = arith.constant 0 : index
    %c0_31 = arith.constant 0 : index
    %27 = vector.load %arg12[%c0_29, %c0_30, %c0_31] : memref<22x16x128xbf16, #tpu.memory_space<vmem>>, vector<18x16x128xbf16>
    tpu.vector_store %arg12[%c0_29, %c0_30, %c0_31], %26 {strides = array<i32>} : memref<22x16x128xbf16, #tpu.memory_space<vmem>>, vector<18x16x128xbf16>,
    %c0_32 = arith.constant 0 : index
    %c0_33 = arith.constant 0 : index
    %c0_34 = arith.constant 0 : index
    %28 = vector.load %arg12[%c0_32, %c0_33, %c0_34] : memref<22x16x128xbf16, #tpu.memory_space<vmem>>, vector<16x16x128xbf16>
    %29 = vector.extract_strided_slice %23 {offsets = [0, 0], sizes = [1, 128], strides = [1, 1]} : vector<9x128xbf16> to vector<1x128xbf16>
    %30 = vector.shape_cast %29 : vector<1x128xbf16> to vector<128xbf16>
    %31 = vector.shape_cast %30 : vector<128xbf16> to vector<1x1x128xbf16>
    %32 = vector.broadcast %31 : vector<1x1x128xbf16> to vector<16x16x128xbf16>
    %33 = arith.mulf %28, %32 : vector<16x16x128xbf16>
    %c1 = arith.constant 1 : index
    %c0_35 = arith.constant 0 : index
    %c0_36 = arith.constant 0 : index
    %34 = vector.load %arg12[%c1, %c0_35, %c0_36] : memref<22x16x128xbf16, #tpu.memory_space<vmem>>, vector<16x16x128xbf16>
    %35 = vector.extract_strided_slice %23 {offsets = [3, 0], sizes = [1, 128], strides = [1, 1]} : vector<9x128xbf16> to vector<1x128xbf16>
    %36 = vector.shape_cast %35 : vector<1x128xbf16> to vector<128xbf16>
    %37 = vector.shape_cast %36 : vector<128xbf16> to vector<1x1x128xbf16>
    %38 = vector.broadcast %37 : vector<1x1x128xbf16> to vector<16x16x128xbf16>
    %39 = arith.mulf %34, %38 : vector<16x16x128xbf16>
    %40 = arith.addf %33, %39 : vector<16x16x128xbf16>
    %c2_37 = arith.constant 2 : index
    %c0_38 = arith.constant 0 : index
    %c0_39 = arith.constant 0 : index
    %41 = vector.load %arg12[%c2_37, %c0_38, %c0_39] : memref<22x16x128xbf16, #tpu.memory_space<vmem>>, vector<16x16x128xbf16>
    %42 = vector.extract_strided_slice %23 {offsets = [6, 0], sizes = [1, 128], strides = [1, 1]} : vector<9x128xbf16> to vector<1x128xbf16>
    %43 = vector.shape_cast %42 : vector<1x128xbf16> to vector<128xbf16>
    %44 = vector.shape_cast %43 : vector<128xbf16> to vector<1x1x128xbf16>
    %45 = vector.broadcast %44 : vector<1x1x128xbf16> to vector<16x16x128xbf16>
    %46 = arith.mulf %41, %45 : vector<16x16x128xbf16>
    %47 = arith.addf %40, %46 : vector<16x16x128xbf16>
    %c2_40 = arith.constant 2 : index
    %c8_41 = arith.constant 8 : index
    %c0_42 = arith.constant 0 : index
    %48 = vector.load %arg11[%c2_40, %c8_41, %c0_42] : memref<22x32x128xbf16, #tpu.memory_space<vmem>>, vector<18x16x128xbf16>
    %c0_43 = arith.constant 0 : index
    %c0_44 = arith.constant 0 : index
    %c0_45 = arith.constant 0 : index
    %49 = vector.load %arg12[%c0_43, %c0_44, %c0_45] : memref<22x16x128xbf16, #tpu.memory_space<vmem>>, vector<18x16x128xbf16>
    tpu.vector_store %arg12[%c0_43, %c0_44, %c0_45], %48 {strides = array<i32>} : memref<22x16x128xbf16, #tpu.memory_space<vmem>>, vector<18x16x128xbf16>,
    %c0_46 = arith.constant 0 : index
    %c0_47 = arith.constant 0 : index
    %c0_48 = arith.constant 0 : index
    %50 = vector.load %arg12[%c0_46, %c0_47, %c0_48] : memref<22x16x128xbf16, #tpu.memory_space<vmem>>, vector<16x16x128xbf16>
    %51 = vector.extract_strided_slice %23 {offsets = [1, 0], sizes = [1, 128], strides = [1, 1]} : vector<9x128xbf16> to vector<1x128xbf16>
    %52 = vector.shape_cast %51 : vector<1x128xbf16> to vector<128xbf16>
    %53 = vector.shape_cast %52 : vector<128xbf16> to vector<1x1x128xbf16>
    %54 = vector.broadcast %53 : vector<1x1x128xbf16> to vector<16x16x128xbf16>
    %55 = arith.mulf %50, %54 : vector<16x16x128xbf16>
    %c1_49 = arith.constant 1 : index
    %c0_50 = arith.constant 0 : index
    %c0_51 = arith.constant 0 : index
    %56 = vector.load %arg12[%c1_49, %c0_50, %c0_51] : memref<22x16x128xbf16, #tpu.memory_space<vmem>>, vector<16x16x128xbf16>
    %57 = vector.extract_strided_slice %23 {offsets = [4, 0], sizes = [1, 128], strides = [1, 1]} : vector<9x128xbf16> to vector<1x128xbf16>
    %58 = vector.shape_cast %57 : vector<1x128xbf16> to vector<128xbf16>
    %59 = vector.shape_cast %58 : vector<128xbf16> to vector<1x1x128xbf16>
    %60 = vector.broadcast %59 : vector<1x1x128xbf16> to vector<16x16x128xbf16>
    %61 = arith.mulf %56, %60 : vector<16x16x128xbf16>
    %62 = arith.addf %55, %61 : vector<16x16x128xbf16>
    %c2_52 = arith.constant 2 : index
    %c0_53 = arith.constant 0 : index
    %c0_54 = arith.constant 0 : index
    %63 = vector.load %arg12[%c2_52, %c0_53, %c0_54] : memref<22x16x128xbf16, #tpu.memory_space<vmem>>, vector<16x16x128xbf16>
    %64 = vector.extract_strided_slice %23 {offsets = [7, 0], sizes = [1, 128], strides = [1, 1]} : vector<9x128xbf16> to vector<1x128xbf16>
    %65 = vector.shape_cast %64 : vector<1x128xbf16> to vector<128xbf16>
    %66 = vector.shape_cast %65 : vector<128xbf16> to vector<1x1x128xbf16>
    %67 = vector.broadcast %66 : vector<1x1x128xbf16> to vector<16x16x128xbf16>
    %68 = arith.mulf %63, %67 : vector<16x16x128xbf16>
    %69 = arith.addf %62, %68 : vector<16x16x128xbf16>
    %70 = arith.addf %47, %69 : vector<16x16x128xbf16>
    %c2_55 = arith.constant 2 : index
    %c9 = arith.constant 9 : index
    %c0_56 = arith.constant 0 : index
    %71 = vector.load %arg11[%c2_55, %c9, %c0_56] : memref<22x32x128xbf16, #tpu.memory_space<vmem>>, vector<18x16x128xbf16>
    %c0_57 = arith.constant 0 : index
    %c0_58 = arith.constant 0 : index
    %c0_59 = arith.constant 0 : index
    %72 = vector.load %arg12[%c0_57, %c0_58, %c0_59] : memref<22x16x128xbf16, #tpu.memory_space<vmem>>, vector<18x16x128xbf16>
    tpu.vector_store %arg12[%c0_57, %c0_58, %c0_59], %71 {strides = array<i32>} : memref<22x16x128xbf16, #tpu.memory_space<vmem>>, vector<18x16x128xbf16>,
    %c0_60 = arith.constant 0 : index
    %c0_61 = arith.constant 0 : index
    %c0_62 = arith.constant 0 : index
    %73 = vector.load %arg12[%c0_60, %c0_61, %c0_62] : memref<22x16x128xbf16, #tpu.memory_space<vmem>>, vector<16x16x128xbf16>
    %74 = vector.extract_strided_slice %23 {offsets = [2, 0], sizes = [1, 128], strides = [1, 1]} : vector<9x128xbf16> to vector<1x128xbf16>
    %75 = vector.shape_cast %74 : vector<1x128xbf16> to vector<128xbf16>
    %76 = vector.shape_cast %75 : vector<128xbf16> to vector<1x1x128xbf16>
    %77 = vector.broadcast %76 : vector<1x1x128xbf16> to vector<16x16x128xbf16>
    %78 = arith.mulf %73, %77 : vector<16x16x128xbf16>
    %c1_63 = arith.constant 1 : index
    %c0_64 = arith.constant 0 : index
    %c0_65 = arith.constant 0 : index
    %79 = vector.load %arg12[%c1_63, %c0_64, %c0_65] : memref<22x16x128xbf16, #tpu.memory_space<vmem>>, vector<16x16x128xbf16>
    %80 = vector.extract_strided_slice %23 {offsets = [5, 0], sizes = [1, 128], strides = [1, 1]} : vector<9x128xbf16> to vector<1x128xbf16>
    %81 = vector.shape_cast %80 : vector<1x128xbf16> to vector<128xbf16>
    %82 = vector.shape_cast %81 : vector<128xbf16> to vector<1x1x128xbf16>
    %83 = vector.broadcast %82 : vector<1x1x128xbf16> to vector<16x16x128xbf16>
    %84 = arith.mulf %79, %83 : vector<16x16x128xbf16>
    %85 = arith.addf %78, %84 : vector<16x16x128xbf16>
    %c2_66 = arith.constant 2 : index
    %c0_67 = arith.constant 0 : index
    %c0_68 = arith.constant 0 : index
    %86 = vector.load %arg12[%c2_66, %c0_67, %c0_68] : memref<22x16x128xbf16, #tpu.memory_space<vmem>>, vector<16x16x128xbf16>
    %87 = vector.extract_strided_slice %23 {offsets = [8, 0], sizes = [1, 128], strides = [1, 1]} : vector<9x128xbf16> to vector<1x128xbf16>
    %88 = vector.shape_cast %87 : vector<1x128xbf16> to vector<128xbf16>
    %89 = vector.shape_cast %88 : vector<128xbf16> to vector<1x1x128xbf16>
    %90 = vector.broadcast %89 : vector<1x1x128xbf16> to vector<16x16x128xbf16>
    %91 = arith.mulf %86, %90 : vector<16x16x128xbf16>
    %92 = arith.addf %85, %91 : vector<16x16x128xbf16>
    %93 = arith.addf %70, %92 : vector<16x16x128xbf16>
    %94 = vector.broadcast %25 : vector<1x1x128xbf16> to vector<16x16x128xbf16>
    %95 = arith.addf %93, %94 : vector<16x16x128xbf16>
    %cst_69 = arith.constant 0.000000e+00 : f32
    %cst_70 = arith.constant 6.000000e+00 : f32
    %96 = arith.truncf %cst_69 : f32 to bf16
    %97 = vector.broadcast %96 : bf16 to vector<16x16x128xbf16>
    %98 = arith.maximumf %97, %95 : vector<16x16x128xbf16>
    %99 = arith.truncf %cst_70 : f32 to bf16
    %100 = vector.broadcast %99 : bf16 to vector<16x16x128xbf16>
    %101 = arith.minimumf %100, %98 : vector<16x16x128xbf16>
    %c0_71 = arith.constant 0 : index
    %c0_72 = arith.constant 0 : index
    %102 = vector.load %arg6[%c0_71, %c0_72] : memref<49x128xbf16, #tpu.memory_space<vmem>>, vector<49x128xbf16>
    %c0_73 = arith.constant 0 : index
    %c0_74 = arith.constant 0 : index
    %103 = vector.load %arg7[%c0_73, %c0_74] : memref<1x128xbf16, #tpu.memory_space<vmem>>, vector<1x128xbf16>
    %104 = vector.shape_cast %103 : vector<1x128xbf16> to vector<1x1x128xbf16>
    %c0_75 = arith.constant 0 : index
    %c5 = arith.constant 5 : index
    %c0_76 = arith.constant 0 : index
    %105 = vector.load %arg11[%c0_75, %c5, %c0_76] : memref<22x32x128xbf16, #tpu.memory_space<vmem>>, vector<22x16x128xbf16>
    %c0_77 = arith.constant 0 : index
    %c0_78 = arith.constant 0 : index
    %c0_79 = arith.constant 0 : index
    %106 = vector.load %arg12[%c0_77, %c0_78, %c0_79] : memref<22x16x128xbf16, #tpu.memory_space<vmem>>, vector<22x16x128xbf16>
    tpu.vector_store %arg12[%c0_77, %c0_78, %c0_79], %105 {strides = array<i32>} : memref<22x16x128xbf16, #tpu.memory_space<vmem>>, vector<22x16x128xbf16>,
    %c0_80 = arith.constant 0 : index
    %c0_81 = arith.constant 0 : index
    %c0_82 = arith.constant 0 : index
    %107 = vector.load %arg12[%c0_80, %c0_81, %c0_82] : memref<22x16x128xbf16, #tpu.memory_space<vmem>>, vector<16x16x128xbf16>
    %108 = vector.extract_strided_slice %102 {offsets = [0, 0], sizes = [1, 128], strides = [1, 1]} : vector<49x128xbf16> to vector<1x128xbf16>
    %109 = vector.shape_cast %108 : vector<1x128xbf16> to vector<128xbf16>
    %110 = vector.shape_cast %109 : vector<128xbf16> to vector<1x1x128xbf16>
    %111 = vector.broadcast %110 : vector<1x1x128xbf16> to vector<16x16x128xbf16>
    %112 = arith.mulf %107, %111 : vector<16x16x128xbf16>
    %c1_83 = arith.constant 1 : index
    %c0_84 = arith.constant 0 : index
    %c0_85 = arith.constant 0 : index
    %113 = vector.load %arg12[%c1_83, %c0_84, %c0_85] : memref<22x16x128xbf16, #tpu.memory_space<vmem>>, vector<16x16x128xbf16>
    %114 = vector.extract_strided_slice %102 {offsets = [7, 0], sizes = [1, 128], strides = [1, 1]} : vector<49x128xbf16> to vector<1x128xbf16>
    %115 = vector.shape_cast %114 : vector<1x128xbf16> to vector<128xbf16>
    %116 = vector.shape_cast %115 : vector<128xbf16> to vector<1x1x128xbf16>
    %117 = vector.broadcast %116 : vector<1x1x128xbf16> to vector<16x16x128xbf16>
    %118 = arith.mulf %113, %117 : vector<16x16x128xbf16>
    %119 = arith.addf %112, %118 : vector<16x16x128xbf16>
    %c2_86 = arith.constant 2 : index
    %c0_87 = arith.constant 0 : index
    %c0_88 = arith.constant 0 : index
    %120 = vector.load %arg12[%c2_86, %c0_87, %c0_88] : memref<22x16x128xbf16, #tpu.memory_space<vmem>>, vector<16x16x128xbf16>
    %121 = vector.extract_strided_slice %102 {offsets = [14, 0], sizes = [1, 128], strides = [1, 1]} : vector<49x128xbf16> to vector<1x128xbf16>
    %122 = vector.shape_cast %121 : vector<1x128xbf16> to vector<128xbf16>
    %123 = vector.shape_cast %122 : vector<128xbf16> to vector<1x1x128xbf16>
    %124 = vector.broadcast %123 : vector<1x1x128xbf16> to vector<16x16x128xbf16>
    %125 = arith.mulf %120, %124 : vector<16x16x128xbf16>
    %126 = arith.addf %119, %125 : vector<16x16x128xbf16>
    %c3_89 = arith.constant 3 : index
    %c0_90 = arith.constant 0 : index
    %c0_91 = arith.constant 0 : index
    %127 = vector.load %arg12[%c3_89, %c0_90, %c0_91] : memref<22x16x128xbf16, #tpu.memory_space<vmem>>, vector<16x16x128xbf16>
    %128 = vector.extract_strided_slice %102 {offsets = [21, 0], sizes = [1, 128], strides = [1, 1]} : vector<49x128xbf16> to vector<1x128xbf16>
    %129 = vector.shape_cast %128 : vector<1x128xbf16> to vector<128xbf16>
    %130 = vector.shape_cast %129 : vector<128xbf16> to vector<1x1x128xbf16>
    %131 = vector.broadcast %130 : vector<1x1x128xbf16> to vector<16x16x128xbf16>
    %132 = arith.mulf %127, %131 : vector<16x16x128xbf16>
    %133 = arith.addf %126, %132 : vector<16x16x128xbf16>
    %c4 = arith.constant 4 : index
    %c0_92 = arith.constant 0 : index
    %c0_93 = arith.constant 0 : index
    %134 = vector.load %arg12[%c4, %c0_92, %c0_93] : memref<22x16x128xbf16, #tpu.memory_space<vmem>>, vector<16x16x128xbf16>
    %135 = vector.extract_strided_slice %102 {offsets = [28, 0], sizes = [1, 128], strides = [1, 1]} : vector<49x128xbf16> to vector<1x128xbf16>
    %136 = vector.shape_cast %135 : vector<1x128xbf16> to vector<128xbf16>
    %137 = vector.shape_cast %136 : vector<128xbf16> to vector<1x1x128xbf16>
    %138 = vector.broadcast %137 : vector<1x1x128xbf16> to vector<16x16x128xbf16>
    %139 = arith.mulf %134, %138 : vector<16x16x128xbf16>
    %140 = arith.addf %133, %139 : vector<16x16x128xbf16>
    %c5_94 = arith.constant 5 : index
    %c0_95 = arith.constant 0 : index
    %c0_96 = arith.constant 0 : index
    %141 = vector.load %arg12[%c5_94, %c0_95, %c0_96] : memref<22x16x128xbf16, #tpu.memory_space<vmem>>, vector<16x16x128xbf16>
    %142 = vector.extract_strided_slice %102 {offsets = [35, 0], sizes = [1, 128], strides = [1, 1]} : vector<49x128xbf16> to vector<1x128xbf16>
    %143 = vector.shape_cast %142 : vector<1x128xbf16> to vector<128xbf16>
    %144 = vector.shape_cast %143 : vector<128xbf16> to vector<1x1x128xbf16>
    %145 = vector.broadcast %144 : vector<1x1x128xbf16> to vector<16x16x128xbf16>
    %146 = arith.mulf %141, %145 : vector<16x16x128xbf16>
    %147 = arith.addf %140, %146 : vector<16x16x128xbf16>
    %c6 = arith.constant 6 : index
    %c0_97 = arith.constant 0 : index
    %c0_98 = arith.constant 0 : index
    %148 = vector.load %arg12[%c6, %c0_97, %c0_98] : memref<22x16x128xbf16, #tpu.memory_space<vmem>>, vector<16x16x128xbf16>
    %149 = vector.extract_strided_slice %102 {offsets = [42, 0], sizes = [1, 128], strides = [1, 1]} : vector<49x128xbf16> to vector<1x128xbf16>
    %150 = vector.shape_cast %149 : vector<1x128xbf16> to vector<128xbf16>
    %151 = vector.shape_cast %150 : vector<128xbf16> to vector<1x1x128xbf16>
    %152 = vector.broadcast %151 : vector<1x1x128xbf16> to vector<16x16x128xbf16>
    %153 = arith.mulf %148, %152 : vector<16x16x128xbf16>
    %154 = arith.addf %147, %153 : vector<16x16x128xbf16>
    %c0_99 = arith.constant 0 : index
    %c6_100 = arith.constant 6 : index
    %c0_101 = arith.constant 0 : index
    %155 = vector.load %arg11[%c0_99, %c6_100, %c0_101] : memref<22x32x128xbf16, #tpu.memory_space<vmem>>, vector<22x16x128xbf16>
    %c0_102 = arith.constant 0 : index
    %c0_103 = arith.constant 0 : index
    %c0_104 = arith.constant 0 : index
    %156 = vector.load %arg12[%c0_102, %c0_103, %c0_104] : memref<22x16x128xbf16, #tpu.memory_space<vmem>>, vector<22x16x128xbf16>
    tpu.vector_store %arg12[%c0_102, %c0_103, %c0_104], %155 {strides = array<i32>} : memref<22x16x128xbf16, #tpu.memory_space<vmem>>, vector<22x16x128xbf16>,
    %c0_105 = arith.constant 0 : index
    %c0_106 = arith.constant 0 : index
    %c0_107 = arith.constant 0 : index
    %157 = vector.load %arg12[%c0_105, %c0_106, %c0_107] : memref<22x16x128xbf16, #tpu.memory_space<vmem>>, vector<16x16x128xbf16>
    %158 = vector.extract_strided_slice %102 {offsets = [1, 0], sizes = [1, 128], strides = [1, 1]} : vector<49x128xbf16> to vector<1x128xbf16>
    %159 = vector.shape_cast %158 : vector<1x128xbf16> to vector<128xbf16>
    %160 = vector.shape_cast %159 : vector<128xbf16> to vector<1x1x128xbf16>
    %161 = vector.broadcast %160 : vector<1x1x128xbf16> to vector<16x16x128xbf16>
    %162 = arith.mulf %157, %161 : vector<16x16x128xbf16>
    %c1_108 = arith.constant 1 : index
    %c0_109 = arith.constant 0 : index
    %c0_110 = arith.constant 0 : index
    %163 = vector.load %arg12[%c1_108, %c0_109, %c0_110] : memref<22x16x128xbf16, #tpu.memory_space<vmem>>, vector<16x16x128xbf16>
    %164 = vector.extract_strided_slice %102 {offsets = [8, 0], sizes = [1, 128], strides = [1, 1]} : vector<49x128xbf16> to vector<1x128xbf16>
    %165 = vector.shape_cast %164 : vector<1x128xbf16> to vector<128xbf16>
    %166 = vector.shape_cast %165 : vector<128xbf16> to vector<1x1x128xbf16>
    %167 = vector.broadcast %166 : vector<1x1x128xbf16> to vector<16x16x128xbf16>
    %168 = arith.mulf %163, %167 : vector<16x16x128xbf16>
    %169 = arith.addf %162, %168 : vector<16x16x128xbf16>
    %c2_111 = arith.constant 2 : index
    %c0_112 = arith.constant 0 : index
    %c0_113 = arith.constant 0 : index
    %170 = vector.load %arg12[%c2_111, %c0_112, %c0_113] : memref<22x16x128xbf16, #tpu.memory_space<vmem>>, vector<16x16x128xbf16>
    %171 = vector.extract_strided_slice %102 {offsets = [15, 0], sizes = [1, 128], strides = [1, 1]} : vector<49x128xbf16> to vector<1x128xbf16>
    %172 = vector.shape_cast %171 : vector<1x128xbf16> to vector<128xbf16>
    %173 = vector.shape_cast %172 : vector<128xbf16> to vector<1x1x128xbf16>
    %174 = vector.broadcast %173 : vector<1x1x128xbf16> to vector<16x16x128xbf16>
    %175 = arith.mulf %170, %174 : vector<16x16x128xbf16>
    %176 = arith.addf %169, %175 : vector<16x16x128xbf16>
    %c3_114 = arith.constant 3 : index
    %c0_115 = arith.constant 0 : index
    %c0_116 = arith.constant 0 : index
    %177 = vector.load %arg12[%c3_114, %c0_115, %c0_116] : memref<22x16x128xbf16, #tpu.memory_space<vmem>>, vector<16x16x128xbf16>
    %178 = vector.extract_strided_slice %102 {offsets = [22, 0], sizes = [1, 128], strides = [1, 1]} : vector<49x128xbf16> to vector<1x128xbf16>
    %179 = vector.shape_cast %178 : vector<1x128xbf16> to vector<128xbf16>
    %180 = vector.shape_cast %179 : vector<128xbf16> to vector<1x1x128xbf16>
    %181 = vector.broadcast %180 : vector<1x1x128xbf16> to vector<16x16x128xbf16>
    %182 = arith.mulf %177, %181 : vector<16x16x128xbf16>
    %183 = arith.addf %176, %182 : vector<16x16x128xbf16>
    %c4_117 = arith.constant 4 : index
    %c0_118 = arith.constant 0 : index
    %c0_119 = arith.constant 0 : index
    %184 = vector.load %arg12[%c4_117, %c0_118, %c0_119] : memref<22x16x128xbf16, #tpu.memory_space<vmem>>, vector<16x16x128xbf16>
    %185 = vector.extract_strided_slice %102 {offsets = [29, 0], sizes = [1, 128], strides = [1, 1]} : vector<49x128xbf16> to vector<1x128xbf16>
    %186 = vector.shape_cast %185 : vector<1x128xbf16> to vector<128xbf16>
    %187 = vector.shape_cast %186 : vector<128xbf16> to vector<1x1x128xbf16>
    %188 = vector.broadcast %187 : vector<1x1x128xbf16> to vector<16x16x128xbf16>
    %189 = arith.mulf %184, %188 : vector<16x16x128xbf16>
    %190 = arith.addf %183, %189 : vector<16x16x128xbf16>
    %c5_120 = arith.constant 5 : index
    %c0_121 = arith.constant 0 : index
    %c0_122 = arith.constant 0 : index
    %191 = vector.load %arg12[%c5_120, %c0_121, %c0_122] : memref<22x16x128xbf16, #tpu.memory_space<vmem>>, vector<16x16x128xbf16>
    %192 = vector.extract_strided_slice %102 {offsets = [36, 0], sizes = [1, 128], strides = [1, 1]} : vector<49x128xbf16> to vector<1x128xbf16>
    %193 = vector.shape_cast %192 : vector<1x128xbf16> to vector<128xbf16>
    %194 = vector.shape_cast %193 : vector<128xbf16> to vector<1x1x128xbf16>
    %195 = vector.broadcast %194 : vector<1x1x128xbf16> to vector<16x16x128xbf16>
    %196 = arith.mulf %191, %195 : vector<16x16x128xbf16>
    %197 = arith.addf %190, %196 : vector<16x16x128xbf16>
    %c6_123 = arith.constant 6 : index
    %c0_124 = arith.constant 0 : index
    %c0_125 = arith.constant 0 : index
    %198 = vector.load %arg12[%c6_123, %c0_124, %c0_125] : memref<22x16x128xbf16, #tpu.memory_space<vmem>>, vector<16x16x128xbf16>
    %199 = vector.extract_strided_slice %102 {offsets = [43, 0], sizes = [1, 128], strides = [1, 1]} : vector<49x128xbf16> to vector<1x128xbf16>
    %200 = vector.shape_cast %199 : vector<1x128xbf16> to vector<128xbf16>
    %201 = vector.shape_cast %200 : vector<128xbf16> to vector<1x1x128xbf16>
    %202 = vector.broadcast %201 : vector<1x1x128xbf16> to vector<16x16x128xbf16>
    %203 = arith.mulf %198, %202 : vector<16x16x128xbf16>
    %204 = arith.addf %197, %203 : vector<16x16x128xbf16>
    %205 = arith.addf %154, %204 : vector<16x16x128xbf16>
    %c0_126 = arith.constant 0 : index
    %c7_127 = arith.constant 7 : index
    %c0_128 = arith.constant 0 : index
    %206 = vector.load %arg11[%c0_126, %c7_127, %c0_128] : memref<22x32x128xbf16, #tpu.memory_space<vmem>>, vector<22x16x128xbf16>
    %c0_129 = arith.constant 0 : index
    %c0_130 = arith.constant 0 : index
    %c0_131 = arith.constant 0 : index
    %207 = vector.load %arg12[%c0_129, %c0_130, %c0_131] : memref<22x16x128xbf16, #tpu.memory_space<vmem>>, vector<22x16x128xbf16>
    tpu.vector_store %arg12[%c0_129, %c0_130, %c0_131], %206 {strides = array<i32>} : memref<22x16x128xbf16, #tpu.memory_space<vmem>>, vector<22x16x128xbf16>,
    %c0_132 = arith.constant 0 : index
    %c0_133 = arith.constant 0 : index
    %c0_134 = arith.constant 0 : index
    %208 = vector.load %arg12[%c0_132, %c0_133, %c0_134] : memref<22x16x128xbf16, #tpu.memory_space<vmem>>, vector<16x16x128xbf16>
    %209 = vector.extract_strided_slice %102 {offsets = [2, 0], sizes = [1, 128], strides = [1, 1]} : vector<49x128xbf16> to vector<1x128xbf16>
    %210 = vector.shape_cast %209 : vector<1x128xbf16> to vector<128xbf16>
    %211 = vector.shape_cast %210 : vector<128xbf16> to vector<1x1x128xbf16>
    %212 = vector.broadcast %211 : vector<1x1x128xbf16> to vector<16x16x128xbf16>
    %213 = arith.mulf %208, %212 : vector<16x16x128xbf16>
    %c1_135 = arith.constant 1 : index
    %c0_136 = arith.constant 0 : index
    %c0_137 = arith.constant 0 : index
    %214 = vector.load %arg12[%c1_135, %c0_136, %c0_137] : memref<22x16x128xbf16, #tpu.memory_space<vmem>>, vector<16x16x128xbf16>
    %215 = vector.extract_strided_slice %102 {offsets = [9, 0], sizes = [1, 128], strides = [1, 1]} : vector<49x128xbf16> to vector<1x128xbf16>
    %216 = vector.shape_cast %215 : vector<1x128xbf16> to vector<128xbf16>
    %217 = vector.shape_cast %216 : vector<128xbf16> to vector<1x1x128xbf16>
    %218 = vector.broadcast %217 : vector<1x1x128xbf16> to vector<16x16x128xbf16>
    %219 = arith.mulf %214, %218 : vector<16x16x128xbf16>
    %220 = arith.addf %213, %219 : vector<16x16x128xbf16>
    %c2_138 = arith.constant 2 : index
    %c0_139 = arith.constant 0 : index
    %c0_140 = arith.constant 0 : index
    %221 = vector.load %arg12[%c2_138, %c0_139, %c0_140] : memref<22x16x128xbf16, #tpu.memory_space<vmem>>, vector<16x16x128xbf16>
    %222 = vector.extract_strided_slice %102 {offsets = [16, 0], sizes = [1, 128], strides = [1, 1]} : vector<49x128xbf16> to vector<1x128xbf16>
    %223 = vector.shape_cast %222 : vector<1x128xbf16> to vector<128xbf16>
    %224 = vector.shape_cast %223 : vector<128xbf16> to vector<1x1x128xbf16>
    %225 = vector.broadcast %224 : vector<1x1x128xbf16> to vector<16x16x128xbf16>
    %226 = arith.mulf %221, %225 : vector<16x16x128xbf16>
    %227 = arith.addf %220, %226 : vector<16x16x128xbf16>
    %c3_141 = arith.constant 3 : index
    %c0_142 = arith.constant 0 : index
    %c0_143 = arith.constant 0 : index
    %228 = vector.load %arg12[%c3_141, %c0_142, %c0_143] : memref<22x16x128xbf16, #tpu.memory_space<vmem>>, vector<16x16x128xbf16>
    %229 = vector.extract_strided_slice %102 {offsets = [23, 0], sizes = [1, 128], strides = [1, 1]} : vector<49x128xbf16> to vector<1x128xbf16>
    %230 = vector.shape_cast %229 : vector<1x128xbf16> to vector<128xbf16>
    %231 = vector.shape_cast %230 : vector<128xbf16> to vector<1x1x128xbf16>
    %232 = vector.broadcast %231 : vector<1x1x128xbf16> to vector<16x16x128xbf16>
    %233 = arith.mulf %228, %232 : vector<16x16x128xbf16>
    %234 = arith.addf %227, %233 : vector<16x16x128xbf16>
    %c4_144 = arith.constant 4 : index
    %c0_145 = arith.constant 0 : index
    %c0_146 = arith.constant 0 : index
    %235 = vector.load %arg12[%c4_144, %c0_145, %c0_146] : memref<22x16x128xbf16, #tpu.memory_space<vmem>>, vector<16x16x128xbf16>
    %236 = vector.extract_strided_slice %102 {offsets = [30, 0], sizes = [1, 128], strides = [1, 1]} : vector<49x128xbf16> to vector<1x128xbf16>
    %237 = vector.shape_cast %236 : vector<1x128xbf16> to vector<128xbf16>
    %238 = vector.shape_cast %237 : vector<128xbf16> to vector<1x1x128xbf16>
    %239 = vector.broadcast %238 : vector<1x1x128xbf16> to vector<16x16x128xbf16>
    %240 = arith.mulf %235, %239 : vector<16x16x128xbf16>
    %241 = arith.addf %234, %240 : vector<16x16x128xbf16>
    %c5_147 = arith.constant 5 : index
    %c0_148 = arith.constant 0 : index
    %c0_149 = arith.constant 0 : index
    %242 = vector.load %arg12[%c5_147, %c0_148, %c0_149] : memref<22x16x128xbf16, #tpu.memory_space<vmem>>, vector<16x16x128xbf16>
    %243 = vector.extract_strided_slice %102 {offsets = [37, 0], sizes = [1, 128], strides = [1, 1]} : vector<49x128xbf16> to vector<1x128xbf16>
    %244 = vector.shape_cast %243 : vector<1x128xbf16> to vector<128xbf16>
    %245 = vector.shape_cast %244 : vector<128xbf16> to vector<1x1x128xbf16>
    %246 = vector.broadcast %245 : vector<1x1x128xbf16> to vector<16x16x128xbf16>
    %247 = arith.mulf %242, %246 : vector<16x16x128xbf16>
    %248 = arith.addf %241, %247 : vector<16x16x128xbf16>
    %c6_150 = arith.constant 6 : index
    %c0_151 = arith.constant 0 : index
    %c0_152 = arith.constant 0 : index
    %249 = vector.load %arg12[%c6_150, %c0_151, %c0_152] : memref<22x16x128xbf16, #tpu.memory_space<vmem>>, vector<16x16x128xbf16>
    %250 = vector.extract_strided_slice %102 {offsets = [44, 0], sizes = [1, 128], strides = [1, 1]} : vector<49x128xbf16> to vector<1x128xbf16>
    %251 = vector.shape_cast %250 : vector<1x128xbf16> to vector<128xbf16>
    %252 = vector.shape_cast %251 : vector<128xbf16> to vector<1x1x128xbf16>
    %253 = vector.broadcast %252 : vector<1x1x128xbf16> to vector<16x16x128xbf16>
    %254 = arith.mulf %249, %253 : vector<16x16x128xbf16>
    %255 = arith.addf %248, %254 : vector<16x16x128xbf16>
    %256 = arith.addf %205, %255 : vector<16x16x128xbf16>
    %c0_153 = arith.constant 0 : index
    %c8_154 = arith.constant 8 : index
    %c0_155 = arith.constant 0 : index
    %257 = vector.load %arg11[%c0_153, %c8_154, %c0_155] : memref<22x32x128xbf16, #tpu.memory_space<vmem>>, vector<22x16x128xbf16>
    %c0_156 = arith.constant 0 : index
    %c0_157 = arith.constant 0 : index
    %c0_158 = arith.constant 0 : index
    %258 = vector.load %arg12[%c0_156, %c0_157, %c0_158] : memref<22x16x128xbf16, #tpu.memory_space<vmem>>, vector<22x16x128xbf16>
    tpu.vector_store %arg12[%c0_156, %c0_157, %c0_158], %257 {strides = array<i32>} : memref<22x16x128xbf16, #tpu.memory_space<vmem>>, vector<22x16x128xbf16>,
    %c0_159 = arith.constant 0 : index
    %c0_160 = arith.constant 0 : index
    %c0_161 = arith.constant 0 : index
    %259 = vector.load %arg12[%c0_159, %c0_160, %c0_161] : memref<22x16x128xbf16, #tpu.memory_space<vmem>>, vector<16x16x128xbf16>
    %260 = vector.extract_strided_slice %102 {offsets = [3, 0], sizes = [1, 128], strides = [1, 1]} : vector<49x128xbf16> to vector<1x128xbf16>
    %261 = vector.shape_cast %260 : vector<1x128xbf16> to vector<128xbf16>
    %262 = vector.shape_cast %261 : vector<128xbf16> to vector<1x1x128xbf16>
    %263 = vector.broadcast %262 : vector<1x1x128xbf16> to vector<16x16x128xbf16>
    %264 = arith.mulf %259, %263 : vector<16x16x128xbf16>
    %c1_162 = arith.constant 1 : index
    %c0_163 = arith.constant 0 : index
    %c0_164 = arith.constant 0 : index
    %265 = vector.load %arg12[%c1_162, %c0_163, %c0_164] : memref<22x16x128xbf16, #tpu.memory_space<vmem>>, vector<16x16x128xbf16>
    %266 = vector.extract_strided_slice %102 {offsets = [10, 0], sizes = [1, 128], strides = [1, 1]} : vector<49x128xbf16> to vector<1x128xbf16>
    %267 = vector.shape_cast %266 : vector<1x128xbf16> to vector<128xbf16>
    %268 = vector.shape_cast %267 : vector<128xbf16> to vector<1x1x128xbf16>
    %269 = vector.broadcast %268 : vector<1x1x128xbf16> to vector<16x16x128xbf16>
    %270 = arith.mulf %265, %269 : vector<16x16x128xbf16>
    %271 = arith.addf %264, %270 : vector<16x16x128xbf16>
    %c2_165 = arith.constant 2 : index
    %c0_166 = arith.constant 0 : index
    %c0_167 = arith.constant 0 : index
    %272 = vector.load %arg12[%c2_165, %c0_166, %c0_167] : memref<22x16x128xbf16, #tpu.memory_space<vmem>>, vector<16x16x128xbf16>
    %273 = vector.extract_strided_slice %102 {offsets = [17, 0], sizes = [1, 128], strides = [1, 1]} : vector<49x128xbf16> to vector<1x128xbf16>
    %274 = vector.shape_cast %273 : vector<1x128xbf16> to vector<128xbf16>
    %275 = vector.shape_cast %274 : vector<128xbf16> to vector<1x1x128xbf16>
    %276 = vector.broadcast %275 : vector<1x1x128xbf16> to vector<16x16x128xbf16>
    %277 = arith.mulf %272, %276 : vector<16x16x128xbf16>
    %278 = arith.addf %271, %277 : vector<16x16x128xbf16>
    %c3_168 = arith.constant 3 : index
    %c0_169 = arith.constant 0 : index
    %c0_170 = arith.constant 0 : index
    %279 = vector.load %arg12[%c3_168, %c0_169, %c0_170] : memref<22x16x128xbf16, #tpu.memory_space<vmem>>, vector<16x16x128xbf16>
    %280 = vector.extract_strided_slice %102 {offsets = [24, 0], sizes = [1, 128], strides = [1, 1]} : vector<49x128xbf16> to vector<1x128xbf16>
    %281 = vector.shape_cast %280 : vector<1x128xbf16> to vector<128xbf16>
    %282 = vector.shape_cast %281 : vector<128xbf16> to vector<1x1x128xbf16>
    %283 = vector.broadcast %282 : vector<1x1x128xbf16> to vector<16x16x128xbf16>
    %284 = arith.mulf %279, %283 : vector<16x16x128xbf16>
    %285 = arith.addf %278, %284 : vector<16x16x128xbf16>
    %c4_171 = arith.constant 4 : index
    %c0_172 = arith.constant 0 : index
    %c0_173 = arith.constant 0 : index
    %286 = vector.load %arg12[%c4_171, %c0_172, %c0_173] : memref<22x16x128xbf16, #tpu.memory_space<vmem>>, vector<16x16x128xbf16>
    %287 = vector.extract_strided_slice %102 {offsets = [31, 0], sizes = [1, 128], strides = [1, 1]} : vector<49x128xbf16> to vector<1x128xbf16>
    %288 = vector.shape_cast %287 : vector<1x128xbf16> to vector<128xbf16>
    %289 = vector.shape_cast %288 : vector<128xbf16> to vector<1x1x128xbf16>
    %290 = vector.broadcast %289 : vector<1x1x128xbf16> to vector<16x16x128xbf16>
    %291 = arith.mulf %286, %290 : vector<16x16x128xbf16>
    %292 = arith.addf %285, %291 : vector<16x16x128xbf16>
    %c5_174 = arith.constant 5 : index
    %c0_175 = arith.constant 0 : index
    %c0_176 = arith.constant 0 : index
    %293 = vector.load %arg12[%c5_174, %c0_175, %c0_176] : memref<22x16x128xbf16, #tpu.memory_space<vmem>>, vector<16x16x128xbf16>
    %294 = vector.extract_strided_slice %102 {offsets = [38, 0], sizes = [1, 128], strides = [1, 1]} : vector<49x128xbf16> to vector<1x128xbf16>
    %295 = vector.shape_cast %294 : vector<1x128xbf16> to vector<128xbf16>
    %296 = vector.shape_cast %295 : vector<128xbf16> to vector<1x1x128xbf16>
    %297 = vector.broadcast %296 : vector<1x1x128xbf16> to vector<16x16x128xbf16>
    %298 = arith.mulf %293, %297 : vector<16x16x128xbf16>
    %299 = arith.addf %292, %298 : vector<16x16x128xbf16>
    %c6_177 = arith.constant 6 : index
    %c0_178 = arith.constant 0 : index
    %c0_179 = arith.constant 0 : index
    %300 = vector.load %arg12[%c6_177, %c0_178, %c0_179] : memref<22x16x128xbf16, #tpu.memory_space<vmem>>, vector<16x16x128xbf16>
    %301 = vector.extract_strided_slice %102 {offsets = [45, 0], sizes = [1, 128], strides = [1, 1]} : vector<49x128xbf16> to vector<1x128xbf16>
    %302 = vector.shape_cast %301 : vector<1x128xbf16> to vector<128xbf16>
    %303 = vector.shape_cast %302 : vector<128xbf16> to vector<1x1x128xbf16>
    %304 = vector.broadcast %303 : vector<1x1x128xbf16> to vector<16x16x128xbf16>
    %305 = arith.mulf %300, %304 : vector<16x16x128xbf16>
    %306 = arith.addf %299, %305 : vector<16x16x128xbf16>
    %307 = arith.addf %256, %306 : vector<16x16x128xbf16>
    %c0_180 = arith.constant 0 : index
    %c9_181 = arith.constant 9 : index
    %c0_182 = arith.constant 0 : index
    %308 = vector.load %arg11[%c0_180, %c9_181, %c0_182] : memref<22x32x128xbf16, #tpu.memory_space<vmem>>, vector<22x16x128xbf16>
    %c0_183 = arith.constant 0 : index
    %c0_184 = arith.constant 0 : index
    %c0_185 = arith.constant 0 : index
    %309 = vector.load %arg12[%c0_183, %c0_184, %c0_185] : memref<22x16x128xbf16, #tpu.memory_space<vmem>>, vector<22x16x128xbf16>
    tpu.vector_store %arg12[%c0_183, %c0_184, %c0_185], %308 {strides = array<i32>} : memref<22x16x128xbf16, #tpu.memory_space<vmem>>, vector<22x16x128xbf16>,
    %c0_186 = arith.constant 0 : index
    %c0_187 = arith.constant 0 : index
    %c0_188 = arith.constant 0 : index
    %310 = vector.load %arg12[%c0_186, %c0_187, %c0_188] : memref<22x16x128xbf16, #tpu.memory_space<vmem>>, vector<16x16x128xbf16>
    %311 = vector.extract_strided_slice %102 {offsets = [4, 0], sizes = [1, 128], strides = [1, 1]} : vector<49x128xbf16> to vector<1x128xbf16>
    %312 = vector.shape_cast %311 : vector<1x128xbf16> to vector<128xbf16>
    %313 = vector.shape_cast %312 : vector<128xbf16> to vector<1x1x128xbf16>
    %314 = vector.broadcast %313 : vector<1x1x128xbf16> to vector<16x16x128xbf16>
    %315 = arith.mulf %310, %314 : vector<16x16x128xbf16>
    %c1_189 = arith.constant 1 : index
    %c0_190 = arith.constant 0 : index
    %c0_191 = arith.constant 0 : index
    %316 = vector.load %arg12[%c1_189, %c0_190, %c0_191] : memref<22x16x128xbf16, #tpu.memory_space<vmem>>, vector<16x16x128xbf16>
    %317 = vector.extract_strided_slice %102 {offsets = [11, 0], sizes = [1, 128], strides = [1, 1]} : vector<49x128xbf16> to vector<1x128xbf16>
    %318 = vector.shape_cast %317 : vector<1x128xbf16> to vector<128xbf16>
    %319 = vector.shape_cast %318 : vector<128xbf16> to vector<1x1x128xbf16>
    %320 = vector.broadcast %319 : vector<1x1x128xbf16> to vector<16x16x128xbf16>
    %321 = arith.mulf %316, %320 : vector<16x16x128xbf16>
    %322 = arith.addf %315, %321 : vector<16x16x128xbf16>
    %c2_192 = arith.constant 2 : index
    %c0_193 = arith.constant 0 : index
    %c0_194 = arith.constant 0 : index
    %323 = vector.load %arg12[%c2_192, %c0_193, %c0_194] : memref<22x16x128xbf16, #tpu.memory_space<vmem>>, vector<16x16x128xbf16>
    %324 = vector.extract_strided_slice %102 {offsets = [18, 0], sizes = [1, 128], strides = [1, 1]} : vector<49x128xbf16> to vector<1x128xbf16>
    %325 = vector.shape_cast %324 : vector<1x128xbf16> to vector<128xbf16>
    %326 = vector.shape_cast %325 : vector<128xbf16> to vector<1x1x128xbf16>
    %327 = vector.broadcast %326 : vector<1x1x128xbf16> to vector<16x16x128xbf16>
    %328 = arith.mulf %323, %327 : vector<16x16x128xbf16>
    %329 = arith.addf %322, %328 : vector<16x16x128xbf16>
    %c3_195 = arith.constant 3 : index
    %c0_196 = arith.constant 0 : index
    %c0_197 = arith.constant 0 : index
    %330 = vector.load %arg12[%c3_195, %c0_196, %c0_197] : memref<22x16x128xbf16, #tpu.memory_space<vmem>>, vector<16x16x128xbf16>
    %331 = vector.extract_strided_slice %102 {offsets = [25, 0], sizes = [1, 128], strides = [1, 1]} : vector<49x128xbf16> to vector<1x128xbf16>
    %332 = vector.shape_cast %331 : vector<1x128xbf16> to vector<128xbf16>
    %333 = vector.shape_cast %332 : vector<128xbf16> to vector<1x1x128xbf16>
    %334 = vector.broadcast %333 : vector<1x1x128xbf16> to vector<16x16x128xbf16>
    %335 = arith.mulf %330, %334 : vector<16x16x128xbf16>
    %336 = arith.addf %329, %335 : vector<16x16x128xbf16>
    %c4_198 = arith.constant 4 : index
    %c0_199 = arith.constant 0 : index
    %c0_200 = arith.constant 0 : index
    %337 = vector.load %arg12[%c4_198, %c0_199, %c0_200] : memref<22x16x128xbf16, #tpu.memory_space<vmem>>, vector<16x16x128xbf16>
    %338 = vector.extract_strided_slice %102 {offsets = [32, 0], sizes = [1, 128], strides = [1, 1]} : vector<49x128xbf16> to vector<1x128xbf16>
    %339 = vector.shape_cast %338 : vector<1x128xbf16> to vector<128xbf16>
    %340 = vector.shape_cast %339 : vector<128xbf16> to vector<1x1x128xbf16>
    %341 = vector.broadcast %340 : vector<1x1x128xbf16> to vector<16x16x128xbf16>
    %342 = arith.mulf %337, %341 : vector<16x16x128xbf16>
    %343 = arith.addf %336, %342 : vector<16x16x128xbf16>
    %c5_201 = arith.constant 5 : index
    %c0_202 = arith.constant 0 : index
    %c0_203 = arith.constant 0 : index
    %344 = vector.load %arg12[%c5_201, %c0_202, %c0_203] : memref<22x16x128xbf16, #tpu.memory_space<vmem>>, vector<16x16x128xbf16>
    %345 = vector.extract_strided_slice %102 {offsets = [39, 0], sizes = [1, 128], strides = [1, 1]} : vector<49x128xbf16> to vector<1x128xbf16>
    %346 = vector.shape_cast %345 : vector<1x128xbf16> to vector<128xbf16>
    %347 = vector.shape_cast %346 : vector<128xbf16> to vector<1x1x128xbf16>
    %348 = vector.broadcast %347 : vector<1x1x128xbf16> to vector<16x16x128xbf16>
    %349 = arith.mulf %344, %348 : vector<16x16x128xbf16>
    %350 = arith.addf %343, %349 : vector<16x16x128xbf16>
    %c6_204 = arith.constant 6 : index
    %c0_205 = arith.constant 0 : index
    %c0_206 = arith.constant 0 : index
    %351 = vector.load %arg12[%c6_204, %c0_205, %c0_206] : memref<22x16x128xbf16, #tpu.memory_space<vmem>>, vector<16x16x128xbf16>
    %352 = vector.extract_strided_slice %102 {offsets = [46, 0], sizes = [1, 128], strides = [1, 1]} : vector<49x128xbf16> to vector<1x128xbf16>
    %353 = vector.shape_cast %352 : vector<1x128xbf16> to vector<128xbf16>
    %354 = vector.shape_cast %353 : vector<128xbf16> to vector<1x1x128xbf16>
    %355 = vector.broadcast %354 : vector<1x1x128xbf16> to vector<16x16x128xbf16>
    %356 = arith.mulf %351, %355 : vector<16x16x128xbf16>
    %357 = arith.addf %350, %356 : vector<16x16x128xbf16>
    %358 = arith.addf %307, %357 : vector<16x16x128xbf16>
    %c0_207 = arith.constant 0 : index
    %c10 = arith.constant 10 : index
    %c0_208 = arith.constant 0 : index
    %359 = vector.load %arg11[%c0_207, %c10, %c0_208] : memref<22x32x128xbf16, #tpu.memory_space<vmem>>, vector<22x16x128xbf16>
    %c0_209 = arith.constant 0 : index
    %c0_210 = arith.constant 0 : index
    %c0_211 = arith.constant 0 : index
    %360 = vector.load %arg12[%c0_209, %c0_210, %c0_211] : memref<22x16x128xbf16, #tpu.memory_space<vmem>>, vector<22x16x128xbf16>
    tpu.vector_store %arg12[%c0_209, %c0_210, %c0_211], %359 {strides = array<i32>} : memref<22x16x128xbf16, #tpu.memory_space<vmem>>, vector<22x16x128xbf16>,
    %c0_212 = arith.constant 0 : index
    %c0_213 = arith.constant 0 : index
    %c0_214 = arith.constant 0 : index
    %361 = vector.load %arg12[%c0_212, %c0_213, %c0_214] : memref<22x16x128xbf16, #tpu.memory_space<vmem>>, vector<16x16x128xbf16>
    %362 = vector.extract_strided_slice %102 {offsets = [5, 0], sizes = [1, 128], strides = [1, 1]} : vector<49x128xbf16> to vector<1x128xbf16>
    %363 = vector.shape_cast %362 : vector<1x128xbf16> to vector<128xbf16>
    %364 = vector.shape_cast %363 : vector<128xbf16> to vector<1x1x128xbf16>
    %365 = vector.broadcast %364 : vector<1x1x128xbf16> to vector<16x16x128xbf16>
    %366 = arith.mulf %361, %365 : vector<16x16x128xbf16>
    %c1_215 = arith.constant 1 : index
    %c0_216 = arith.constant 0 : index
    %c0_217 = arith.constant 0 : index
    %367 = vector.load %arg12[%c1_215, %c0_216, %c0_217] : memref<22x16x128xbf16, #tpu.memory_space<vmem>>, vector<16x16x128xbf16>
    %368 = vector.extract_strided_slice %102 {offsets = [12, 0], sizes = [1, 128], strides = [1, 1]} : vector<49x128xbf16> to vector<1x128xbf16>
    %369 = vector.shape_cast %368 : vector<1x128xbf16> to vector<128xbf16>
    %370 = vector.shape_cast %369 : vector<128xbf16> to vector<1x1x128xbf16>
    %371 = vector.broadcast %370 : vector<1x1x128xbf16> to vector<16x16x128xbf16>
    %372 = arith.mulf %367, %371 : vector<16x16x128xbf16>
    %373 = arith.addf %366, %372 : vector<16x16x128xbf16>
    %c2_218 = arith.constant 2 : index
    %c0_219 = arith.constant 0 : index
    %c0_220 = arith.constant 0 : index
    %374 = vector.load %arg12[%c2_218, %c0_219, %c0_220] : memref<22x16x128xbf16, #tpu.memory_space<vmem>>, vector<16x16x128xbf16>
    %375 = vector.extract_strided_slice %102 {offsets = [19, 0], sizes = [1, 128], strides = [1, 1]} : vector<49x128xbf16> to vector<1x128xbf16>
    %376 = vector.shape_cast %375 : vector<1x128xbf16> to vector<128xbf16>
    %377 = vector.shape_cast %376 : vector<128xbf16> to vector<1x1x128xbf16>
    %378 = vector.broadcast %377 : vector<1x1x128xbf16> to vector<16x16x128xbf16>
    %379 = arith.mulf %374, %378 : vector<16x16x128xbf16>
    %380 = arith.addf %373, %379 : vector<16x16x128xbf16>
    %c3_221 = arith.constant 3 : index
    %c0_222 = arith.constant 0 : index
    %c0_223 = arith.constant 0 : index
    %381 = vector.load %arg12[%c3_221, %c0_222, %c0_223] : memref<22x16x128xbf16, #tpu.memory_space<vmem>>, vector<16x16x128xbf16>
    %382 = vector.extract_strided_slice %102 {offsets = [26, 0], sizes = [1, 128], strides = [1, 1]} : vector<49x128xbf16> to vector<1x128xbf16>
    %383 = vector.shape_cast %382 : vector<1x128xbf16> to vector<128xbf16>
    %384 = vector.shape_cast %383 : vector<128xbf16> to vector<1x1x128xbf16>
    %385 = vector.broadcast %384 : vector<1x1x128xbf16> to vector<16x16x128xbf16>
    %386 = arith.mulf %381, %385 : vector<16x16x128xbf16>
    %387 = arith.addf %380, %386 : vector<16x16x128xbf16>
    %c4_224 = arith.constant 4 : index
    %c0_225 = arith.constant 0 : index
    %c0_226 = arith.constant 0 : index
    %388 = vector.load %arg12[%c4_224, %c0_225, %c0_226] : memref<22x16x128xbf16, #tpu.memory_space<vmem>>, vector<16x16x128xbf16>
    %389 = vector.extract_strided_slice %102 {offsets = [33, 0], sizes = [1, 128], strides = [1, 1]} : vector<49x128xbf16> to vector<1x128xbf16>
    %390 = vector.shape_cast %389 : vector<1x128xbf16> to vector<128xbf16>
    %391 = vector.shape_cast %390 : vector<128xbf16> to vector<1x1x128xbf16>
    %392 = vector.broadcast %391 : vector<1x1x128xbf16> to vector<16x16x128xbf16>
    %393 = arith.mulf %388, %392 : vector<16x16x128xbf16>
    %394 = arith.addf %387, %393 : vector<16x16x128xbf16>
    %c5_227 = arith.constant 5 : index
    %c0_228 = arith.constant 0 : index
    %c0_229 = arith.constant 0 : index
    %395 = vector.load %arg12[%c5_227, %c0_228, %c0_229] : memref<22x16x128xbf16, #tpu.memory_space<vmem>>, vector<16x16x128xbf16>
    %396 = vector.extract_strided_slice %102 {offsets = [40, 0], sizes = [1, 128], strides = [1, 1]} : vector<49x128xbf16> to vector<1x128xbf16>
    %397 = vector.shape_cast %396 : vector<1x128xbf16> to vector<128xbf16>
    %398 = vector.shape_cast %397 : vector<128xbf16> to vector<1x1x128xbf16>
    %399 = vector.broadcast %398 : vector<1x1x128xbf16> to vector<16x16x128xbf16>
    %400 = arith.mulf %395, %399 : vector<16x16x128xbf16>
    %401 = arith.addf %394, %400 : vector<16x16x128xbf16>
    %c6_230 = arith.constant 6 : index
    %c0_231 = arith.constant 0 : index
    %c0_232 = arith.constant 0 : index
    %402 = vector.load %arg12[%c6_230, %c0_231, %c0_232] : memref<22x16x128xbf16, #tpu.memory_space<vmem>>, vector<16x16x128xbf16>
    %403 = vector.extract_strided_slice %102 {offsets = [47, 0], sizes = [1, 128], strides = [1, 1]} : vector<49x128xbf16> to vector<1x128xbf16>
    %404 = vector.shape_cast %403 : vector<1x128xbf16> to vector<128xbf16>
    %405 = vector.shape_cast %404 : vector<128xbf16> to vector<1x1x128xbf16>
    %406 = vector.broadcast %405 : vector<1x1x128xbf16> to vector<16x16x128xbf16>
    %407 = arith.mulf %402, %406 : vector<16x16x128xbf16>
    %408 = arith.addf %401, %407 : vector<16x16x128xbf16>
    %409 = arith.addf %358, %408 : vector<16x16x128xbf16>
    %c0_233 = arith.constant 0 : index
    %c11 = arith.constant 11 : index
    %c0_234 = arith.constant 0 : index
    %410 = vector.load %arg11[%c0_233, %c11, %c0_234] : memref<22x32x128xbf16, #tpu.memory_space<vmem>>, vector<22x16x128xbf16>
    %c0_235 = arith.constant 0 : index
    %c0_236 = arith.constant 0 : index
    %c0_237 = arith.constant 0 : index
    %411 = vector.load %arg12[%c0_235, %c0_236, %c0_237] : memref<22x16x128xbf16, #tpu.memory_space<vmem>>, vector<22x16x128xbf16>
    tpu.vector_store %arg12[%c0_235, %c0_236, %c0_237], %410 {strides = array<i32>} : memref<22x16x128xbf16, #tpu.memory_space<vmem>>, vector<22x16x128xbf16>,
    %c0_238 = arith.constant 0 : index
    %c0_239 = arith.constant 0 : index
    %c0_240 = arith.constant 0 : index
    %412 = vector.load %arg12[%c0_238, %c0_239, %c0_240] : memref<22x16x128xbf16, #tpu.memory_space<vmem>>, vector<16x16x128xbf16>
    %413 = vector.extract_strided_slice %102 {offsets = [6, 0], sizes = [1, 128], strides = [1, 1]} : vector<49x128xbf16> to vector<1x128xbf16>
    %414 = vector.shape_cast %413 : vector<1x128xbf16> to vector<128xbf16>
    %415 = vector.shape_cast %414 : vector<128xbf16> to vector<1x1x128xbf16>
    %416 = vector.broadcast %415 : vector<1x1x128xbf16> to vector<16x16x128xbf16>
    %417 = arith.mulf %412, %416 : vector<16x16x128xbf16>
    %c1_241 = arith.constant 1 : index
    %c0_242 = arith.constant 0 : index
    %c0_243 = arith.constant 0 : index
    %418 = vector.load %arg12[%c1_241, %c0_242, %c0_243] : memref<22x16x128xbf16, #tpu.memory_space<vmem>>, vector<16x16x128xbf16>
    %419 = vector.extract_strided_slice %102 {offsets = [13, 0], sizes = [1, 128], strides = [1, 1]} : vector<49x128xbf16> to vector<1x128xbf16>
    %420 = vector.shape_cast %419 : vector<1x128xbf16> to vector<128xbf16>
    %421 = vector.shape_cast %420 : vector<128xbf16> to vector<1x1x128xbf16>
    %422 = vector.broadcast %421 : vector<1x1x128xbf16> to vector<16x16x128xbf16>
    %423 = arith.mulf %418, %422 : vector<16x16x128xbf16>
    %424 = arith.addf %417, %423 : vector<16x16x128xbf16>
    %c2_244 = arith.constant 2 : index
    %c0_245 = arith.constant 0 : index
    %c0_246 = arith.constant 0 : index
    %425 = vector.load %arg12[%c2_244, %c0_245, %c0_246] : memref<22x16x128xbf16, #tpu.memory_space<vmem>>, vector<16x16x128xbf16>
    %426 = vector.extract_strided_slice %102 {offsets = [20, 0], sizes = [1, 128], strides = [1, 1]} : vector<49x128xbf16> to vector<1x128xbf16>
    %427 = vector.shape_cast %426 : vector<1x128xbf16> to vector<128xbf16>
    %428 = vector.shape_cast %427 : vector<128xbf16> to vector<1x1x128xbf16>
    %429 = vector.broadcast %428 : vector<1x1x128xbf16> to vector<16x16x128xbf16>
    %430 = arith.mulf %425, %429 : vector<16x16x128xbf16>
    %431 = arith.addf %424, %430 : vector<16x16x128xbf16>
    %c3_247 = arith.constant 3 : index
    %c0_248 = arith.constant 0 : index
    %c0_249 = arith.constant 0 : index
    %432 = vector.load %arg12[%c3_247, %c0_248, %c0_249] : memref<22x16x128xbf16, #tpu.memory_space<vmem>>, vector<16x16x128xbf16>
    %433 = vector.extract_strided_slice %102 {offsets = [27, 0], sizes = [1, 128], strides = [1, 1]} : vector<49x128xbf16> to vector<1x128xbf16>
    %434 = vector.shape_cast %433 : vector<1x128xbf16> to vector<128xbf16>
    %435 = vector.shape_cast %434 : vector<128xbf16> to vector<1x1x128xbf16>
    %436 = vector.broadcast %435 : vector<1x1x128xbf16> to vector<16x16x128xbf16>
    %437 = arith.mulf %432, %436 : vector<16x16x128xbf16>
    %438 = arith.addf %431, %437 : vector<16x16x128xbf16>
    %c4_250 = arith.constant 4 : index
    %c0_251 = arith.constant 0 : index
    %c0_252 = arith.constant 0 : index
    %439 = vector.load %arg12[%c4_250, %c0_251, %c0_252] : memref<22x16x128xbf16, #tpu.memory_space<vmem>>, vector<16x16x128xbf16>
    %440 = vector.extract_strided_slice %102 {offsets = [34, 0], sizes = [1, 128], strides = [1, 1]} : vector<49x128xbf16> to vector<1x128xbf16>
    %441 = vector.shape_cast %440 : vector<1x128xbf16> to vector<128xbf16>
    %442 = vector.shape_cast %441 : vector<128xbf16> to vector<1x1x128xbf16>
    %443 = vector.broadcast %442 : vector<1x1x128xbf16> to vector<16x16x128xbf16>
    %444 = arith.mulf %439, %443 : vector<16x16x128xbf16>
    %445 = arith.addf %438, %444 : vector<16x16x128xbf16>
    %c5_253 = arith.constant 5 : index
    %c0_254 = arith.constant 0 : index
    %c0_255 = arith.constant 0 : index
    %446 = vector.load %arg12[%c5_253, %c0_254, %c0_255] : memref<22x16x128xbf16, #tpu.memory_space<vmem>>, vector<16x16x128xbf16>
    %447 = vector.extract_strided_slice %102 {offsets = [41, 0], sizes = [1, 128], strides = [1, 1]} : vector<49x128xbf16> to vector<1x128xbf16>
    %448 = vector.shape_cast %447 : vector<1x128xbf16> to vector<128xbf16>
    %449 = vector.shape_cast %448 : vector<128xbf16> to vector<1x1x128xbf16>
    %450 = vector.broadcast %449 : vector<1x1x128xbf16> to vector<16x16x128xbf16>
    %451 = arith.mulf %446, %450 : vector<16x16x128xbf16>
    %452 = arith.addf %445, %451 : vector<16x16x128xbf16>
    %c6_256 = arith.constant 6 : index
    %c0_257 = arith.constant 0 : index
    %c0_258 = arith.constant 0 : index
    %453 = vector.load %arg12[%c6_256, %c0_257, %c0_258] : memref<22x16x128xbf16, #tpu.memory_space<vmem>>, vector<16x16x128xbf16>
    %454 = vector.extract_strided_slice %102 {offsets = [48, 0], sizes = [1, 128], strides = [1, 1]} : vector<49x128xbf16> to vector<1x128xbf16>
    %455 = vector.shape_cast %454 : vector<1x128xbf16> to vector<128xbf16>
    %456 = vector.shape_cast %455 : vector<128xbf16> to vector<1x1x128xbf16>
    %457 = vector.broadcast %456 : vector<1x1x128xbf16> to vector<16x16x128xbf16>
    %458 = arith.mulf %453, %457 : vector<16x16x128xbf16>
    %459 = arith.addf %452, %458 : vector<16x16x128xbf16>
    %460 = arith.addf %409, %459 : vector<16x16x128xbf16>
    %461 = vector.broadcast %104 : vector<1x1x128xbf16> to vector<16x16x128xbf16>
    %462 = arith.addf %460, %461 : vector<16x16x128xbf16>
    %cst_259 = arith.constant 0.000000e+00 : f32
    %cst_260 = arith.constant 6.000000e+00 : f32
    %463 = arith.truncf %cst_259 : f32 to bf16
    %464 = vector.broadcast %463 : bf16 to vector<16x16x128xbf16>
    %465 = arith.maximumf %464, %462 : vector<16x16x128xbf16>
    %466 = arith.truncf %cst_260 : f32 to bf16
    %467 = vector.broadcast %466 : bf16 to vector<16x16x128xbf16>
    %468 = arith.minimumf %467, %465 : vector<16x16x128xbf16>
    %469 = arith.addf %101, %468 : vector<16x16x128xbf16>
    %470 = vector.shape_cast %469 : vector<16x16x128xbf16> to vector<256x128xbf16>
    %c0_261 = arith.constant 0 : index
    %c0_262 = arith.constant 0 : index
    %471 = vector.load %arg8[%c0_261, %c0_262] : memref<128x128xbf16, #tpu.memory_space<vmem>>, vector<128x128xbf16>
    %cst_263 = arith.constant dense<0.000000e+00> : vector<256x128xf32>
    %472 = tpu.matmul %470, %471, %cst_263 {dimension_numbers = #tpu.dot_dimension_numbers<[1], [0], [0], [1], [0, 0, 1, 1], [], []>} : vector<256x128xbf16>, vector<128x128xbf16>, vector<256x128xf32> -> vector<256x128xf32>
    %c0_264 = arith.constant 0 : index
    %c0_265 = arith.constant 0 : index
    %473 = vector.load %arg9[%c0_264, %c0_265] : memref<1x128xf32, #tpu.memory_space<vmem>>, vector<1x128xf32>
    %474 = vector.broadcast %473 : vector<1x128xf32> to vector<256x128xf32>
    %475 = arith.addf %472, %474 : vector<256x128xf32>
    %c0_266 = arith.constant 0 : index
    %c0_267 = arith.constant 0 : index
    %c0_268 = arith.constant 0 : index
    %c0_269 = arith.constant 0 : index
    %476 = vector.load %arg1[%c0_266, %c0_267, %c0_268, %c0_269] : memref<1x16x16x128xbf16, #tpu.memory_space<vmem>>, vector<1x16x16x128xbf16>
    %477 = vector.shape_cast %476 : vector<1x16x16x128xbf16> to vector<16x16x128xbf16>
    %478 = vector.shape_cast %477 : vector<16x16x128xbf16> to vector<256x128xbf16>
    %479 = arith.extf %478 : vector<256x128xbf16> to vector<256x128xf32>
    %480 = arith.addf %475, %479 : vector<256x128xf32>
    %481 = vector.shape_cast %480 : vector<256x128xf32> to vector<16x16x128xf32>
    %c0_270 = arith.constant 0 : index
    %c0_271 = arith.constant 0 : index
    %c0_272 = arith.constant 0 : index
    %c0_273 = arith.constant 0 : index
    %482 = vector.load %arg10[%c0_270, %c0_271, %c0_272, %c0_273] : memref<1x16x16x128xf32, #tpu.memory_space<vmem>>, vector<1x16x16x128xf32>
    %483 = vector.shape_cast %482 : vector<1x16x16x128xf32> to vector<16x16x128xf32>
    %484 = vector.shape_cast %481 : vector<16x16x128xf32> to vector<1x16x16x128xf32>
    tpu.vector_store %arg10[%c0_270, %c0_271, %c0_272, %c0_273], %484 {strides = array<i32>} : memref<1x16x16x128xf32, #tpu.memory_space<vmem>>, vector<1x16x16x128xf32>,
    return
  }
  func.func @transform_0(%arg0: i32) -> (i32, i32, i32, i32) {
    %c0_i32 = arith.constant 0 : i32
    %c0_i32_0 = arith.constant 0 : i32
    %c0_i32_1 = arith.constant 0 : i32
    %c0_i32_2 = arith.constant 0 : i32
    return %arg0, %c0_i32, %c0_i32_0, %c0_i32_1 : i32, i32, i32, i32
  }
  func.func @transform_1(%arg0: i32) -> (i32, i32) {
    %c0_i32 = arith.constant 0 : i32
    %c0_i32_0 = arith.constant 0 : i32
    %c0_i32_1 = arith.constant 0 : i32
    return %c0_i32, %c0_i32_0 : i32, i32
  }
  func.func @transform_2(%arg0: i32) -> (i32, i32) {
    %c0_i32 = arith.constant 0 : i32
    %c0_i32_0 = arith.constant 0 : i32
    %c0_i32_1 = arith.constant 0 : i32
    return %c0_i32, %c0_i32_0 : i32, i32
  }
  func.func @transform_3(%arg0: i32) -> (i32, i32) {
    %c0_i32 = arith.constant 0 : i32
    %c0_i32_0 = arith.constant 0 : i32
    %c0_i32_1 = arith.constant 0 : i32
    return %c0_i32, %c0_i32_0 : i32, i32
  }
  func.func @transform_4(%arg0: i32) -> (i32, i32) {
    %c0_i32 = arith.constant 0 : i32
    %c0_i32_0 = arith.constant 0 : i32
    %c0_i32_1 = arith.constant 0 : i32
    return %c0_i32, %c0_i32_0 : i32, i32
  }
  func.func @transform_5(%arg0: i32) -> (i32, i32) {
    %c0_i32 = arith.constant 0 : i32
    %c0_i32_0 = arith.constant 0 : i32
    %c0_i32_1 = arith.constant 0 : i32
    return %c0_i32, %c0_i32_0 : i32, i32
  }
  func.func @transform_6(%arg0: i32) -> (i32, i32) {
    %c0_i32 = arith.constant 0 : i32
    %c0_i32_0 = arith.constant 0 : i32
    %c0_i32_1 = arith.constant 0 : i32
    return %c0_i32, %c0_i32_0 : i32, i32
  }
  func.func @transform_7(%arg0: i32) -> (i32, i32) {
    %c0_i32 = arith.constant 0 : i32
    %c0_i32_0 = arith.constant 0 : i32
    %c0_i32_1 = arith.constant 0 : i32
    return %c0_i32, %c0_i32_0 : i32, i32
  }
  func.func @transform_8(%arg0: i32) -> (i32, i32) {
    %c0_i32 = arith.constant 0 : i32
    %c0_i32_0 = arith.constant 0 : i32
    %c0_i32_1 = arith.constant 0 : i32
    return %c0_i32, %c0_i32_0 : i32, i32
  }
  func.func @transform_9(%arg0: i32) -> (i32, i32, i32, i32) {
    %c0_i32 = arith.constant 0 : i32
    %c0_i32_0 = arith.constant 0 : i32
    %c0_i32_1 = arith.constant 0 : i32
    %c0_i32_2 = arith.constant 0 : i32
    return %arg0, %c0_i32, %c0_i32_0, %c0_i32_1 : i32, i32, i32, i32
  }
}

</mosaic_0001>

<bundles_post_ra>
// kernel: tpu_custom_call.1
= control target key start
LH: loop header
LB: loop body
LE: loop exit
PB: predicated region body
PF: predicated region fallthrough
CT: control target
= control target key end

     0   :  { %s13009_s0 = inlined_call_operand.hbm [shape: bf16[2,16,16,128], index: 0, kind: input, shape index: {}]   ;;  %s13010_s1 = inlined_call_operand.hbm [shape: bf16[128,128], index: 1, kind: input, shape index: {}]   ;;  %s13011_s2 = inlined_call_operand.vmem [shape: f32[1,128], index: 2, kind: input, shape index: {}]   ;;  %s13012_s3 = inlined_call_operand.vmem [shape: bf16[9,128], index: 3, kind: input, shape index: {}]   ;;  %s13013_s4 = inlined_call_operand.vmem [shape: bf16[1,128], index: 4, kind: input, shape index: {}]   ;;  %s13014_s5 = inlined_call_operand.hbm [shape: bf16[49,128], index: 5, kind: input, shape index: {}]   ;;  %s13015_s6 = inlined_call_operand.vmem [shape: bf16[1,128], index: 6, kind: input, shape index: {}]   ;;  %s13016_s7 = inlined_call_operand.hbm [shape: bf16[128,128], index: 7, kind: input, shape index: {}]   ;;  %s13017_s8 = inlined_call_operand.vmem [shape: f32[1,128], index: 8, kind: input, shape index: {}]   ;;  %s13018_s9 = inlined_call_operand.hbm [shape: f32[2,16,16,128], index: 9, kind: output, shape index: {}]  }
   0x1   :  { %13635 = sst [smem:[#allocation253_spill]] %s13018_s9 }
   0x2   :  { %14 = vsyncpa [#allocation5], 0 }
   0x3   :  { %16 = vsyncpa [#allocation5 + $0x1], 0 }
   0x4   :  { %17 = vsyncpa [#allocation8], 0 }
   0x5   :  { %18 = vsyncpa [#allocation11], 0 }
   0x6   :  { %19 = vsyncpa [#allocation6], 0 }
   0x7   :  { %21 = vsyncpa [#allocation6 + $0x1], 0  ;;  %s8644_s30 = smov 0   ;;  %s8646_s10 = smov 0  }
   0x8   :  { %s8648_s11 = smov 0   ;;  %s8650_s12 = smov 0  }
   0x9 LB: > { %13636 = sst [smem:[#allocation17_spill]] %s8569_s30  ;;  %s8665_s13 = sadd.s32 4294967295, %s8581_s12   ;;  %s8581_s12 = sphi %s8650_s12, %s15539_s12   ;;  %s8577_s11 = sphi %s8648_s11, %s15538_s11   ;;  %s8573_s10 = sphi %s8646_s10, %s15537_s10   ;;  %s8569_s30 = sphi %s8644_s30, %s15536_s30  }
   0xa   : > { %s7994_s14 = sadd.s32 4294967294, %s8581_s12   ;;  %p47_p0 = scmp.ne.s32.totalorder %s8573_s10, %s8569_s30 }
   0xb   : > { %p13019_p1 = scmp.eq.s32.totalorder %s8665_s13, 0  ;;  %p245_p3 = scmp.eq.s32.totalorder %s7994_s14, 1 }
   0xc   : > { %p7995_p5 = scmp.ge.s32.totalorder %s8581_s12, 1  ;;  %p252_p7 = scmp.lt.s32.totalorder %s8581_s12, 3 }
   0xd   : > { %p8674_p4 = por %p13019_p1, %p47_p0  ;;  %p8679_p6 = por %p245_p3, %p47_p0 }
   0xe   : > { %p8684_p8 = pnand %p7995_p5, %p252_p7  ;;  %s8583_s18 = smov [#allocation7]  }
   0xf   : > { %s13637_s15 = scalar_select %p8674_p4, 1, 0 }
  0x10   : > { %s13638_s16 = scalar_select %p8679_p6, 1, 0 }
  0x11   : > { %s13640_s17 = scalar_select %p8684_p8, 1, 0 }
  0x12   : > { %13639 = sst [smem:[#allocation18_spill]] %s13638_s16  ;;  %s264_s19 = sshll.u32 %s8583_s18, 4  ;;  %s8688_s19 = int_to_ptr.vmem [resolvable:$true] %s264_s19 }
  0x13   : > { %p8289_p9 = pneg %p8684_p8  ;;  %s8584_s21 = smov [#allocation9]  }
  0x14   : > { %s286_s22 = sshll.u32 %s8584_s21, 4  ;;  %s8585_s23 = smov [#allocation10]   ;;  %s8699_s22 = int_to_ptr.vmem [resolvable:$true] %s286_s22 }
  0x15   : > { %p8695_p11 = pnand %p8289_p9, %p13019_p1  ;;  %s8701_s24 = sshll.u32 %s8585_s23, 4  ;;  %s303_s24 = int_to_ptr.vmem [resolvable:$true] %s8701_s24 }
  0x16   : > { %s8393_s27 = scalar_lea.hbm %s13010_s1, 1024 }
  0x17   : > { %p8394_p12 = scmp.ne.s32.totalorder %s13010_s1, %s8393_s27  ;;  %p8711_p13 = pneg %p8695_p11 }
  0x18   : > { %p8400_p5 = scmp.lt.u32.totalorder %s8393_s27, %s13010_s1 }
  0x19   : > { %p8396_p0 = pnand %p8711_p13, %p8394_p12 }
  0x1b   : > { %p8397_p3 = pneg %p8396_p0 }
  0x1d   : > { %p8402_p7 = pnand %p8400_p5, %p8397_p3 }
  0x1f   : > { %8405 = shalt.err (!%p8402_p7)
}
  0x20   : > { %s8406_s23 = scalar_lea.vmem %s8688_s19, 1024  ;;  %p8414_p2 = scmp.lt.s32.totalorder %s8688_s19, %s8688_s19 }
  0x21   : > { %p8407_p9 = scmp.ne.s32.totalorder %s8688_s19, %s8406_s23  ;;  %p8415_p6 = scmp.lt.s32.totalorder %s8406_s23, %s8406_s23 }
  0x23   : > { %p8409_p10 = pnand %p8407_p9, %p8711_p13  ;;  %p8416_p12 = por %p8415_p6, %p8414_p2 }
  0x25   : > { %p8410_p1 = pneg %p8409_p10 }
  0x27   : > { %p8417_p0 = pnand %p8416_p12, %p8410_p1 }
  0x29   : > { %8420 = shalt.err (!%p8417_p0)
}
  0x2a   : > { %s8586_s25 = smov 64   ;;  %s8587_s26 = smov 4  }
  0x2b   : > { %8292 = dma.hbm_to_vmem [thread:$0]  (!%p8695_p11), %s13010_s1, 1024, %s8688_s19, [#allocation8], %s8586_s25, %s8586_s25, %s8587_s26  }
  0x2c   : > { %s8421_s21 = scalar_lea.hbm %s13014_s5, 448 }
  0x2d   : > { %p8422_p1 = scmp.ne.s32.totalorder %s13014_s5, %s8421_s21  ;;  %p8428_p10 = scmp.lt.u32.totalorder %s8421_s21, %s13014_s5 }
  0x2f   : > { %p8424_p2 = pnand %p8422_p1, %p8711_p13 }
  0x31   : > { %p8425_p6 = pneg %p8424_p2 }
  0x33   : > { %p8430_p3 = pnand %p8428_p10, %p8425_p6 }
  0x35   : > { %8433 = shalt.err (!%p8430_p3)
}
  0x36   : > { %s8434_s19 = scalar_lea.vmem %s8699_s22, 448  ;;  %p8442_p12 = scmp.lt.s32.totalorder %s8699_s22, %s8699_s22 }
  0x37   : > { %p8435_p5 = scmp.ne.s32.totalorder %s8699_s22, %s8434_s19  ;;  %p8443_p0 = scmp.lt.s32.totalorder %s8434_s19, %s8434_s19 }
  0x39   : > { %p8437_p7 = pnand %p8435_p5, %p8711_p13  ;;  %p8444_p1 = por %p8443_p0, %p8442_p12 }
  0x3b   : > { %p8438_p9 = pneg %p8437_p7 }
  0x3d   : > { %p8445_p2 = pnand %p8444_p1, %p8438_p9 }
  0x3f   : > { %8448 = shalt.err (!%p8445_p2)
}
  0x40   : > { %8295 = dma.hbm_to_vmem [thread:$0]  (!%p8695_p11), %s13014_s5, 448, %s8699_s22, [#allocation8], %s8586_s25, %s8586_s25, %s8587_s26  }
  0x41   : > { %s8449_s28 = scalar_lea.hbm %s13016_s7, 1024 }
  0x42   : > { %p8450_p6 = scmp.ne.s32.totalorder %s13016_s7, %s8449_s28  ;;  %p8456_p5 = scmp.lt.u32.totalorder %s8449_s28, %s13016_s7 }
  0x44   : > { %p8452_p10 = pnand %p8450_p6, %p8711_p13 }
  0x46   : > { %p8453_p3 = pneg %p8452_p10 }
  0x48   : > { %p8458_p7 = pnand %p8456_p5, %p8453_p3 }
  0x4a   : > { %8461 = shalt.err (!%p8458_p7)
}
  0x4b   : > { %s8462_s19 = scalar_lea.vmem %s303_s24, 1024  ;;  %p8470_p1 = scmp.lt.s32.totalorder %s303_s24, %s303_s24 }
  0x4c   : > { %p8463_p9 = scmp.ne.s32.totalorder %s303_s24, %s8462_s19  ;;  %p8471_p2 = scmp.lt.s32.totalorder %s8462_s19, %s8462_s19 }
  0x4e   : > { %p8465_p12 = pnand %p8463_p9, %p8711_p13  ;;  %p8472_p4 = por %p8471_p2, %p8470_p1 }
  0x50   : > { %p8466_p0 = pneg %p8465_p12 }
  0x52   : > { %p8473_p8 = pnand %p8472_p4, %p8466_p0 }
  0x54   : > { %8476 = shalt.err (!%p8473_p8)
}
  0x55   : > { %8298 = dma.hbm_to_vmem [thread:$0]  (!%p8695_p11), %s13016_s7, 1024, %s303_s24, [#allocation11], %s8586_s25, %s8586_s25, %s8587_s26  }
  0x56   : > { %s8784_s14 = sadd.s32 1, %s8581_s12   ;;  %s34_s30 = sadd.s32 1, %s8577_s11 }
  0x57   : > { %s31_s20 = ssub.s32 %s8581_s12, %s8784_s14  ;;  %p41_p8 = scmp.ne.s32.totalorder %s8577_s11, %s8573_s10 }
  0x58   : > { %p32_p4 = scmp.eq.s32.totalorder %s31_s20, 0  ;;  %p42_p13 = scmp.eq.s32.totalorder %s8581_s12, 0 }
  0x59   : > { %p8310_p6 = scmp.lt.s32.totalorder %s8581_s12, 2  ;;  %p13643_p3 = scmp.eq.s32.totalorder %s8665_s13, 1 }
  0x5a   : > { %s8794_s16 = scalar_select %p32_p4, %s8577_s11, %s34_s30  }
  0x5b   : > { %p43_p10 = por %p42_p13, %p41_p8  ;;  %p8798_p5 = por %p13643_p3, %p41_p8 }
  0x5c   : > { %s319_s28 = sand.u32 1, %s8577_s11   ;;  %s8048_s29 = sshll.u32 %s8581_s12, 11 }
  0x5d   : > { %s8000_s24 = sshll.u32 %s319_s28, 7  ;;  %s8807_s23 = scalar_lea.hbm %s13009_s0, %s8048_s29 }
  0x5e   : > { %s323_s19 = scalar_lea.vmem [#allocation4], %s8000_s24  ;;  %p8809_p11 = pnand %p8310_p6, %p43_p10 }
  0x5f   : > { %s330_s22 = sshll.u32 %s323_s19, 4  ;;  %s8815_s20 = scalar_lea.sflag [#allocation5], %s319_s28  ;;  %s8813_s22 = int_to_ptr.vmem [resolvable:$true] %s330_s22 }
  0x60   : > { %s8477_s30 = scalar_lea.hbm %s8807_s23, 2048  ;;  %p8479_p9 = pneg %p8809_p11 }
  0x61   : > { %p8478_p7 = scmp.ne.s32.totalorder %s8807_s23, %s8477_s30  ;;  %s8482_s18 = scalar_lea.hbm %s13009_s0, 4096 }
  0x62   : > { %p8483_p1 = scmp.lt.u32.totalorder %s8807_s23, %s13009_s0  ;;  %p8484_p2 = scmp.lt.u32.totalorder %s8482_s18, %s8477_s30 }
  0x63   : > { %p8480_p12 = pnand %p8479_p9, %p8478_p7  ;;  %p8486_p8 = scmp.lt.u32.totalorder %s8477_s30, %s8807_s23 }
  0x64   : > { %p8485_p4 = por %p8484_p2, %p8483_p1 }
  0x65   : > { %p8481_p0 = pneg %p8480_p12 }
  0x66   : > { %p8487_p13 = por %p8486_p8, %p8485_p4 }
  0x68   : > { %p8488_p6 = pnand %p8487_p13, %p8481_p0 }
  0x6a   : > { %8491 = shalt.err (!%p8488_p6)
}
  0x6b   : > { %s8492_s28 = scalar_lea.vmem %s8813_s22, 2048  ;;  %s8588_s29 = smov [#allocation4]  }
  0x6c   : > { %p8493_p10 = scmp.ne.s32.totalorder %s8813_s22, %s8492_s28  ;;  %s8497_s24 = sshll.u32 %s8588_s29, 4  ;;  %s8498_s24 = int_to_ptr.vmem [resolvable:$false] %s8497_s24 }
  0x6d   : > { %s8499_s21 = scalar_lea.vmem %s8498_s24, 4096  ;;  %p8500_p12 = scmp.lt.s32.totalorder %s8813_s22, %s8498_s24 }
  0x6e   : > { %p8495_p3 = pnand %p8493_p10, %p8479_p9  ;;  %p8501_p1 = scmp.lt.s32.totalorder %s8499_s21, %s8492_s28 }
  0x70   : > { %p8496_p7 = pneg %p8495_p3  ;;  %p8502_p2 = por %p8501_p1, %p8500_p12 }
  0x72   : > { %p8503_p4 = pnand %p8502_p2, %p8496_p7 }
  0x74   : > { %8506 = shalt.err (!%p8503_p4)
}
  0x75   : > { %8302 = dma.hbm_to_vmem [thread:$0]  (!%p8809_p11), %s8807_s23, 2048, %s8813_s22, %s8815_s20, %s8586_s25, %s8586_s25, %s8587_s26  }
  0x76   : > { %p13646_p9 = scmp.ne.s32.totalorder %s13640_s17, 0 }
  0x78   : > { %342 = sbr.rel (%p13646_p9) target bundleno = 1628 (0x65c), region = 56 }
  0x7f   : > { %s8849_s30 = sand.u32 1, %s8573_s10   ;;  %p13647_p0 = scmp.ne.s32.totalorder %s13637_s15, 0 }
  0x80   : > { %s8004_s18 = sshll.u32 %s8849_s30, 7  ;;  %s345_s19 = scalar_lea.sflag [#allocation5], %s8849_s30 }
  0x81   : > { %s8853_s28 = scalar_lea.vmem [#allocation4], %s8004_s18 }
  0x82   : > { %8552 = dma.done.wait (%p13647_p0), %s345_s19, 2048  }
  0x83   : > { %8554 = vsyncadd (%p13647_p0), %s345_s19, 4294965248  ;;  %p13648_p11 = scmp.eq.s32.totalorder %s8665_s13, 0 }
  0x85   : > { %8556 = dma.done.wait (%p13648_p11), [#allocation8], 1472   ;;  %p13649_p8 = pmov %p13648_p11 }
  0x87   : > { %8558 = vsyncadd (%p13649_p8), [#allocation8], 4294965824  ;;  %p13650_p13 = pmov %p13649_p8 }
  0x88   : > { %p13651_p6 = pmov %p13649_p8 }
  0x89   : > { %8560 = dma.done.wait (%p13650_p13), [#allocation11], 1024  }
  0x8a   : > { %8562 = vsyncadd (%p13651_p6), [#allocation11], 4294966272  ;;  %v8356_v0 = vld [vmem:[#allocation7] sm:$0xff]   ;;  %v8357_v1 = vld [vmem:[#allocation7 + $0x8] sm:$0xff]   ;;  %v13025_v24 = vmov 0   ;;  %v1377_v38 = vlaneseq  ;;  %vm1578_vm1 = vcmask 1043456  }
  0x8b   : > { %8177 = vmatprep.subr.bf16.mxu0 %v8356_v0  ;;  %v8358_v2 = vld [vmem:[#allocation7 + $0x10] sm:$0xff]   ;;  %v8359_v3 = vld [vmem:[#allocation7 + $0x18] sm:$0xff]   ;;  %v8364_v4 = vld [vmem:[%s8853_s28] sm:$0xff]   ;;  %838 = vst [vmem:[#allocation2 + $0x40] sm:$0xf] %v13025_v24  ;;  %vm3352_vm4 = vcmask 1044480  }
  0x8c   : > { %8178 = vmatpush3.bf16.msra.mxu0 %v8356_v0  ;;  %8193 = vmatprep.mubr.bf16.mxu0 %v8364_v4  ;;  %v8360_v5 = vld [vmem:[#allocation7 + $0x20] sm:$0xff]   ;;  %v8361_v6 = vld [vmem:[#allocation7 + $0x28] sm:$0xff]   ;;  %v8362_v7 = vld [vmem:[#allocation7 + $0x30] sm:$0xff]   ;;  %821 = vst [vmem:[#allocation2] sm:$0xff] %v13025_v24  ;;  %v1378_v45 = vshrl.u32 %v1377_v38, 7  ;;  %vm6142_vm5 = vcmask 1042432  }
  0x8d   : > { %8179 = vmatprep.subr.bf16.mxu0 %v8357_v1  ;;  %v8363_v8 = vld [vmem:[#allocation7 + $0x38] sm:$0xff]   ;;  %v8365_v9 = vld [vmem:[%s8853_s28 + $0x8] sm:$0xff]   ;;  %v8366_v10 = vld [vmem:[%s8853_s28 + $0x10] sm:$0xff]   ;;  %822 = vst [vmem:[#allocation2 + $0x8] sm:$0xff] %v13025_v24  ;;  %vm1015_vm0 = vsmask.f32 4352 }
  0x8e   : > { %v8367_v11 = vld [vmem:[%s8853_s28 + $0x18] sm:$0xff]   ;;  %v8368_v12 = vld [vmem:[%s8853_s28 + $0x20] sm:$0xff]   ;;  %v8369_v13 = vld [vmem:[%s8853_s28 + $0x28] sm:$0xff]   ;;  %823 = vst [vmem:[#allocation2 + $0x10] sm:$0xff] %v13025_v24  ;;  %v8951_v55 = vsub.s32 3, %v1378_v45  ;;  %v8953_v56 = vsub.s32 0, %v1378_v45 }
  0x8f   : > { %v8370_v14 = vld [vmem:[%s8853_s28 + $0x30] sm:$0xff]   ;;  %v8371_v15 = vld [vmem:[%s8853_s28 + $0x38] sm:$0xff]   ;;  %v8372_v16 = vld [vmem:[%s8853_s28 + $0x40] sm:$0xff]   ;;  %824 = vst [vmem:[#allocation2 + $0x18] sm:$0xff] %v13025_v24  ;;  %v8955_v57 = vsub.s32 2, %v1378_v45  ;;  %v8960_v63 = vsub.s32 1, %v1378_v45 }
  0x90   : > { %8180 = vmatpush3.bf16.msra.mxu0 %v8357_v1  ;;  %v8373_v17 = vld [vmem:[%s8853_s28 + $0x48] sm:$0xff]   ;;  %v8374_v18 = vld [vmem:[%s8853_s28 + $0x50] sm:$0xff]   ;;  %v8375_v19 = vld [vmem:[%s8853_s28 + $0x58] sm:$0xff]   ;;  %825 = vst [vmem:[#allocation2 + $0x20] sm:$0xff] %v13025_v24  ;;  %vm1861_vm2 = vsmask.f32 3328 }
  0x91   : > { %8181 = vmatprep.subr.bf16.mxu0 %v8358_v2  ;;  %v8376_v20 = vld [vmem:[%s8853_s28 + $0x60] sm:$0xff]   ;;  %v8377_v21 = vld [vmem:[%s8853_s28 + $0x68] sm:$0xff]   ;;  %v8378_v22 = vld [vmem:[%s8853_s28 + $0x70] sm:$0xff]   ;;  %826 = vst [vmem:[#allocation2 + $0x28] sm:$0xff] %v13025_v24  ;;  %vm2470_vm3 = vsmask.f32 5376 }
  0x92   : > { %v8379_v23 = vld [vmem:[%s8853_s28 + $0x78] sm:$0xff]   ;;  %828 = vst [vmem:[#allocation2 + $0x130] sm:$0xff] %v13025_v24  ;;  %829 = vst [vmem:[#allocation2 + $0x138] sm:$0xff] %v13025_v24  ;;  %v8381_v26 = vld [vmem:[#allocation10 + $0x8] sm:$0xff]   ;;  %vm6661_vm6 = vsmask.f32 2304 }
  0x93   : > { %830 = vst [vmem:[#allocation2 + $0x140] sm:$0xff] %v13025_v24  ;;  %831 = vst [vmem:[#allocation2 + $0x148] sm:$0xff] %v13025_v24  ;;  %v8380_v25 = vld [vmem:[#allocation10] sm:$0xff]   ;;  %v8382_v27 = vld [vmem:[#allocation10 + $0x10] sm:$0xff]   ;;  %s8008_s17 = sshll.u32 %s8849_s30, 8  ;;  %s8049_s26 = sshll.u32 %s8665_s13, 12 }
  0x94   : > { %8182 = vmatpush3.bf16.msra.mxu0 %v8358_v2  ;;  %832 = vst [vmem:[#allocation2 + $0x150] sm:$0xff] %v13025_v24  ;;  %833 = vst [vmem:[#allocation2 + $0x158] sm:$0xff] %v13025_v24  ;;  %8225 = vmatprep.subr.bf16.mxu1 %v8380_v25  ;;  %v8383_v28 = vld [vmem:[#allocation10 + $0x18] sm:$0xff]   ;;  %v8384_v29 = vld [vmem:[#allocation10 + $0x20] sm:$0xff]   ;;  %s12864_s25 = scalar_lea.vmem [#allocation12], %s8008_s17  ;;  %s15531_s9 = sld [smem:[#allocation253_spill]] }
  0x95   : > { %8183 = vmatprep.subr.bf16.mxu0 %v8359_v3  ;;  %837 = vst [vmem:[#allocation2 + $0x30] sm:$0xf] %v13025_v24  ;;  %839 = vst [vmem:[#allocation2 + $0x50] sm:$0xf] %v13025_v24  ;;  %8226 = vmatpush3.bf16.msra.mxu1 %v8380_v25  ;;  %v8385_v30 = vld [vmem:[#allocation10 + $0x28] sm:$0xff]   ;;  %v8386_v39 = vld [vmem:[#allocation10 + $0x30] sm:$0xff]  }
  0x96   : > { %840 = vst [vmem:[#allocation2 + $0x60] sm:$0xf] %v13025_v24  ;;  %841 = vst [vmem:[#allocation2 + $0x70] sm:$0xf] %v13025_v24  ;;  %8227 = vmatprep.subr.bf16.mxu1 %v8381_v26  ;;  %v975_v37 = vld [vmem:[%s13012_s3] sm:$0xf] }
  0x97   : > { %842 = vst [vmem:[#allocation2 + $0x80] sm:$0xf] %v13025_v24  ;;  %843 = vst [vmem:[#allocation2 + $0x90] sm:$0xf] %v13025_v24  ;;  %v1414_v44 = vshrl.u32 %v975_v37, 16  ;;  %v8942_v50 = vpack.i.b16 %v975_v37, %v975_v37  ;;  %s7892_s23 = sshll.u32 %s12864_s25, 4  ;;  %s12962_s23 = int_to_ptr.vmem [resolvable:$true] %s7892_s23 }
  0x98   : > { %8184 = vmatpush3.bf16.msra.mxu0 %v8359_v3  ;;  %844 = vst [vmem:[#allocation2 + $0xa0] sm:$0xf] %v13025_v24  ;;  %845 = vst [vmem:[#allocation2 + $0xb0] sm:$0xf] %v13025_v24  ;;  %v980_v32 = vld [vmem:[#allocation2 + $0x28] sm:$0xf] }
  0x99   : > { %8185 = vmatprep.subr.bf16.mxu0 %v8360_v5  ;;  %846 = vst [vmem:[#allocation2 + $0xc0] sm:$0xf] %v13025_v24  ;;  %847 = vst [vmem:[#allocation2 + $0xd0] sm:$0xf] %v13025_v24  ;;  %8228 = vmatpush3.bf16.msra.mxu1 %v8381_v26  ;;  %v1025_v35 = vshrl.u32 %v980_v32, 16  ;;  %v1028_v36 = vshll.u32 %v980_v32, 16  ;;  %v8944_v51 = vpack.i.b16 %v1414_v44, %v1414_v44 }
  0x9a   : > { %848 = vst [vmem:[#allocation2 + $0xe0] sm:$0xf] %v13025_v24  ;;  %849 = vst [vmem:[#allocation2 + $0xf0] sm:$0xf] %v13025_v24  ;;  %8229 = vmatprep.subr.bf16.mxu1 %v8382_v27  ;;  %v1506_v48 = vld [vmem:[#allocation2 + $0x20] sm:$0xf0]  ;;  %v8971_v2 = vrot.slane %v8942_v50, %v8955_v57  ;;  %v8994_v26 = vrot.slane %v8942_v50, %v8951_v55  ;;  %s12960_s20 = scalar_lea.hbm %s15531_s9, %s8049_s26 }
  0x9b   : > { %850 = vst [vmem:[#allocation2 + $0x100] sm:$0xf] %v13025_v24  ;;  %851 = vst [vmem:[#allocation2 + $0x110] sm:$0xf] %v13025_v24  ;;  %v1027_v42 = vrot.slane %v1025_v35, 3  ;;  %v1030_v43 = vrot.slane %v1028_v36, 4  ;;  %v8967_v1 = vrot.slane %v8944_v51, %v8953_v56 }
  0x9c   : > { %8186 = vmatpush3.bf16.msra.mxu0 %v8360_v5  ;;  %852 = vst [vmem:[#allocation2 + $0x120] sm:$0xf] %v13025_v24  ;;  %859 = vst [vmem:[#allocation2 + $0x38] sm:$0xf0] %v13025_v24  ;;  %v1507_v49 = vld [vmem:[#allocation2 + $0x28] sm:$0xf]  ;;  %v8976_v5 = vrot.slane %v8944_v51, %v8951_v55 }
  0x9d   : > { %8187 = vmatprep.subr.bf16.mxu0 %v8361_v6  ;;  %860 = vst [vmem:[#allocation2 + $0x48] sm:$0xf0] %v13025_v24  ;;  %861 = vst [vmem:[#allocation2 + $0x58] sm:$0xf0] %v13025_v24  ;;  %8230 = vmatpush3.bf16.msra.mxu1 %v8382_v27  ;;  %v1031_v47 = vor.u32 %v1030_v43, %v1027_v42  ;;  %v1579_v52 = vrot.slane %v1506_v48, 4  ;;  %v1580_v53 = vrot.slane %v1507_v49, 4 }
  0x9e   : > { %862 = vst [vmem:[#allocation2 + $0x68] sm:$0xf0] %v13025_v24  ;;  %863 = vst [vmem:[#allocation2 + $0x78] sm:$0xf0] %v13025_v24  ;;  %8231 = vmatprep.subr.bf16.mxu1 %v8383_v28  ;;  %v8949_v54 = vld [vmem:[%s13011_s2] ss:$0 sm:$0xff] }
  0x9f   : > { %864 = vst [vmem:[#allocation2 + $0x88] sm:$0xf0] %v13025_v24  ;;  %865 = vst [vmem:[#allocation2 + $0x98] sm:$0xf0] %v13025_v24  ;;  %v1825_v58 = vld [vmem:[#allocation2 + $0x20] sm:$0xf0]  ;;  %v8963_v0 = vsel %vm1578_vm1, %v1579_v52, %v1580_v53 }
  0xa0   : > { %8188 = vmatpush3.bf16.msra.mxu0 %v8361_v6  ;;  %866 = vst [vmem:[#allocation2 + $0xa8] sm:$0xf0] %v13025_v24  ;;  %867 = vst [vmem:[#allocation2 + $0xb8] sm:$0xf0] %v13025_v24  ;;  %v1863_v61 = vshrl.u32 %v1825_v58, 16  ;;  %v1866_v6 = vshll.u32 %v1825_v58, 16 }
  0xa1   : > { %8189 = vmatprep.subr.bf16.mxu0 %v8362_v7  ;;  %868 = vst [vmem:[#allocation2 + $0xc8] sm:$0xf0] %v13025_v24  ;;  %869 = vst [vmem:[#allocation2 + $0xd8] sm:$0xf0] %v13025_v24  ;;  %8232 = vmatpush3.bf16.msra.mxu1 %v8383_v28  ;;  %v976_v25 = vld [vmem:[%s13012_s3 + $0x4] sm:$0x1] }
  0xa2   : > { %870 = vst [vmem:[#allocation2 + $0xe8] sm:$0xf0] %v13025_v24  ;;  %871 = vst [vmem:[#allocation2 + $0xf8] sm:$0xf0] %v13025_v24  ;;  %8233 = vmatprep.subr.bf16.mxu1 %v8384_v29  ;;  %v2427_v32 = vld [vmem:[#allocation2 + $0x8] sm:$0x7] }
  0xa3   : > { %872 = vst [vmem:[#allocation2 + $0x108] sm:$0xf0] %v13025_v24  ;;  %873 = vst [vmem:[#allocation2 + $0x118] sm:$0xf0] %v13025_v24  ;;  %v2480_v44 = vshrl.u32 %v2427_v32, 16  ;;  %v2483_v45 = vshll.u32 %v2427_v32, 16 }
  0xa4   : > { %8190 = vmatpush3.bf16.msra.mxu0 %v8362_v7  ;;  %874 = vst [vmem:[#allocation2 + $0x128] sm:$0xf0] %v13025_v24  ;;  %834 = vst [vmem:[#allocation2] sm:$0xf] %v13025_v24  ;;  %s7879_s13 = scalar_lea.sflag [#allocation6], %s8849_s30  ;;  %s8507_s29 = scalar_lea.vmem %s12962_s23, 4096 }
  0xa5   : > { %8191 = vmatprep.subr.bf16.mxu0 %v8363_v8  ;;  %835 = vst [vmem:[#allocation2 + $0x10] sm:$0xf] %v13025_v24  ;;  %836 = vst [vmem:[#allocation2 + $0x20] sm:$0xf] %v13025_v24  ;;  %8234 = vmatpush3.bf16.msra.mxu1 %v8384_v29  ;;  %p8508_p10 = scmp.ne.s32.totalorder %s12962_s23, %s8507_s29  ;;  %s8591_s24 = smov [#allocation12]  }
  0xa6   : > { %853 = vst [vmem:[#allocation2 + $0x130] sm:$0xf] %v13025_v24  ;;  %854 = vst [vmem:[#allocation2 + $0x140] sm:$0xf] %v13025_v24  ;;  %8235 = vmatprep.subr.bf16.mxu1 %v8385_v30  ;;  %s8511_s21 = sshll.u32 %s8591_s24, 4  ;;  %s8512_s21 = int_to_ptr.vmem [resolvable:$false] %s8511_s21 }
  0xa7   : > { %855 = vst [vmem:[#allocation2 + $0x150] sm:$0xf] %v13025_v24  ;;  %856 = vst [vmem:[#allocation2 + $0x8] sm:$0xf0] %v13025_v24  ;;  %p8509_p3 = pnand %p8508_p10, %p8798_p5  ;;  %s8513_s18 = scalar_lea.vmem %s8512_s21, 8192 }
  0xa8   : > { %8192 = vmatpush3.bf16.msra.mxu0 %v8363_v8  ;;  %857 = vst [vmem:[#allocation2 + $0x18] sm:$0xf0] %v13025_v24  ;;  %858 = vst [vmem:[#allocation2 + $0x28] sm:$0xf0] %v13025_v24  ;;  %p8514_p12 = scmp.lt.s32.totalorder %s12962_s23, %s8512_s21  ;;  %p8515_p1 = scmp.lt.s32.totalorder %s8513_s18, %s8507_s29 }
  0xa9   : > { %875 = vst [vmem:[#allocation2 + $0x138] sm:$0xf0] %v13025_v24  ;;  %876 = vst [vmem:[#allocation2 + $0x148] sm:$0xf0] %v13025_v24  ;;  %8236 = vmatpush3.bf16.msra.mxu1 %v8385_v30  ;;  %p8510_p7 = pneg %p8509_p3 }
  0xaa   : > { %877 = vst [vmem:[#allocation2 + $0x158] sm:$0xf0] %v13025_v24  ;;  %8237 = vmatprep.subr.bf16.mxu1 %v8386_v39  ;;  %13652 = vst [vmem:[#allocation19_spill] sm:$0xff] %v8967_v1  ;;  %p8516_p2 = por %p8515_p1, %p8514_p12 }
  0xab   : > { %8194 = vmatmul.mubr.bf16.vlgmr.msra.gmra.mrb[0].mxu0 %v8365_v9  ;;  %13653 = vst [vmem:[#allocation20_spill] sm:$0xff] %v8971_v2  ;;  %13654 = vst [vmem:[#allocation21_spill] sm:$0xff] %v8976_v5 }
  0xac   : > { %8197 = vmatprep.mubr.bf16.mxu0 %v8366_v10  ;;  %v979_v31 = vld [vmem:[#allocation2 + $0x20] sm:$0xf8]  ;;  %v8981_v10 = vrot.slane %v8942_v50, %v8953_v56  ;;  %13657 = vst [vmem:[#allocation24_spill] sm:$0xff] %v8994_v26  ;;  %p8517_p4 = pnand %p8516_p2, %p8510_p7 }
  0xad   : > { %v1017_v33 = vshrl.u32 %v979_v31, 16  ;;  %v1020_v34 = vshll.u32 %v979_v31, 16  ;;  %8238 = vmatpush3.bf16.msra.mxu1 %v8386_v39  ;;  %v2309_v39 = vpack.i.b16 %v976_v25, %v976_v25 }
  0xae   : > { %13655 = vst [vmem:[#allocation22_spill] sm:$0xff] %v8981_v10 }
  0xaf   : > { %v1019_v40 = vrot.slane %v1017_v33, 3  ;;  %v1022_v41 = vrot.slane %v1020_v34, 4  ;;  %v1826_v59 = vld [vmem:[#allocation2 + $0x28] sm:$0x1f] }
  0xb0   : > { %v1871_v7 = vshrl.u32 %v1826_v59, 16 }
  0xb1   : > { %v1023_v46 = vor.u32 %v1022_v41, %v1019_v40 }
  0xb3   : > { %8198 = vmatmul.mubr.bf16.gmra.mrb[4].mxu0 %v8367_v11  ;;  %v8958_v60 = vsel %vm1015_vm0, %v1023_v46, %v1031_v47  ;;  %v1865_v11 = vrot.slane %v1863_v61, 4 }
  0xb4   : > { %8201 = vmatprep.mubr.bf16.mxu0 %v8368_v12  ;;  %v1874_v12 = vshll.u32 %v1826_v59, 16 }
  0xbb   : > { %8202 = vmatmul.mubr.bf16.gmra.mrb[8].mxu0 %v8369_v13 }
  0xbc   : > { %8205 = vmatprep.mubr.bf16.mxu0 %v8370_v14 }
  0xc3   : > { %8206 = vmatmul.mubr.bf16.gmra.mrb[12].mxu0 %v8371_v15 }
  0xc4   : > { %8209 = vmatprep.mubr.bf16.mxu0 %v8372_v16  ;;  %v8986_v16 = vrot.slane %v8944_v51, %v8960_v63 }
  0xc6   : > { %13656 = vst [vmem:[#allocation23_spill] sm:$0xff] %v8986_v16 }
  0xcb   : > { %8210 = vmatmul.mubr.bf16.gmra.mrb[16].mxu0 %v8373_v17  ;;  %v1868_v17 = vrot.slane %v1866_v6, 5 }
  0xcc   : > { %8213 = vmatprep.mubr.bf16.mxu0 %v8374_v18 }
  0xcd   : > { %v1869_v30 = vor.u32 %v1868_v17, %v1865_v11 }
  0xd3   : > { %8214 = vmatmul.mubr.bf16.gmra.mrb[20].mxu0 %v8375_v19 }
  0xd4   : > { %8217 = vmatprep.mubr.bf16.mxu0 %v8376_v20  ;;  %v1873_v20 = vrot.slane %v1871_v7, 4 }
  0xdb   : > { %8218 = vmatmul.mubr.bf16.gmra.mrb[24].mxu0 %v8377_v21  ;;  %v1876_v21 = vrot.slane %v1874_v12, 5  ;;  %v9016_v12 = vrot.slane %v8944_v51, %v8955_v57 }
  0xdc   : > { %8221 = vmatprep.mubr.bf16.mxu0 %v8378_v22  ;;  %v2426_v22 = vld [vmem:[#allocation2] sm:$0xfc] }
  0xdd   : > { %v1877_v31 = vor.u32 %v1876_v21, %v1873_v20  ;;  %v2472_v36 = vshrl.u32 %v2426_v22, 16  ;;  %v2475_v40 = vshll.u32 %v2426_v22, 16  ;;  %13659 = vst [vmem:[#allocation26_spill] sm:$0xff] %v9016_v12 }
  0xdf   : > { %v9003_v49 = vsel %vm1861_vm2, %v1869_v30, %v1877_v31  ;;  %v2474_v52 = vrot.slane %v2472_v36, 2  ;;  %v9019_v31 = vrot.slane %v2309_v39, %v8953_v56 }
  0xe1   : > { %13660 = vst [vmem:[#allocation27_spill] sm:$0xff] %v9019_v31 }
  0xe3   : > { %8222 = vmatmul.mubr.bf16.gmra.mrb[28].mxu0 %v8379_v23 }
 0x17e   : > { %v8195_v62 = vpop.f32.mrb[0].mxu0 }
 0x17f   : > { %v639_v3 = vadd.f32 %v8195_v62, %v8949_v54  ;;  %v630_v4 = vpop.f32.mrb[1].mxu0  ;;  %v9008_v62 = vrot.slane %v8942_v50, %v8960_v63  ;;  %v2485_v50 = vrot.slane %v2483_v45, 3 }
 0x180   : > { %v631_v8 = vadd.f32 %v8949_v54, %v630_v4  ;;  %v8196_v9 = vpop.f32.mrb[2].mxu0 }
 0x181   : > { %v759_v13 = vmax.f32 %v639_v3, 0.0  ;;  %v642_v14 = vadd.f32 %v8196_v9, %v8949_v54  ;;  %v633_v15 = vpop.f32.mrb[3].mxu0  ;;  %13658 = vst [vmem:[#allocation25_spill] sm:$0xff] %v9008_v62  ;;  %v2428_v3 = vld [vmem:[#allocation2 + $0x10] sm:$0xfc]  ;;  %v2477_v9 = vrot.slane %v2475_v40, 3 }
 0x182   : > { %v757_v18 = vmax.f32 %v631_v8, 0.0  ;;  %v634_v19 = vadd.f32 %v8949_v54, %v633_v15  ;;  %v977_v8 = vld [vmem:[%s13013_s4] sm:$0x1] }
 0x183   : > { %v760_v23 = vmax.f32 %v642_v14, 0.0  ;;  %v791_v33 = vmin.f32 %v759_v13, 6.0  ;;  %v2429_v13 = vld [vmem:[#allocation2 + $0x18] sm:$0x7]  ;;  %v2482_v14 = vrot.slane %v2480_v44, 2  ;;  %v2364_v21 = vpack.i.b16 %v977_v8, %v977_v8 }
 0x184   : > { %v758_v28 = vmax.f32 %v634_v19, 0.0  ;;  %v789_v34 = vmin.f32 %v757_v18, 6.0  ;;  %v2478_v18 = vor.u32 %v2477_v9, %v2474_v52  ;;  %v2489_v19 = vshrl.u32 %v2428_v3, 16 }
 0x185   : > { %v792_v35 = vmin.f32 %v760_v23, 6.0  ;;  %v2486_v22 = vor.u32 %v2485_v50, %v2482_v14  ;;  %v2492_v23 = vshll.u32 %v2428_v3, 16  ;;  %v2497_v51 = vshrl.u32 %v2429_v13, 16 }
 0x186   : > { %v790_v37 = vmin.f32 %v758_v28, 6.0  ;;  %v8199_v38 = vpop.f32.mrb[4].mxu0  ;;  %v9024_v36 = vrot.slane %v2489_v19, 2  ;;  %v9027_v40 = vrot.slane %v2364_v21, %v8953_v56  ;;  %v2500_v39 = vshll.u32 %v2429_v13, 16 }
 0x187   : > { %v879_v41 = vpack.c.bf16 %v792_v35, %v791_v33  ;;  %v655_v42 = vadd.f32 %v8199_v38, %v8949_v54  ;;  %v646_v43 = vpop.f32.mrb[5].mxu0 }
 0x188   : > { %v878_v46 = vpack.c.bf16 %v790_v37, %v789_v34  ;;  %v647_v47 = vadd.f32 %v8949_v54, %v646_v43  ;;  %v8200_v48 = vpop.f32.mrb[6].mxu0  ;;  %13661 = vst [vmem:[#allocation28_spill] sm:$0xff] %v9027_v40 }
 0x189   : > { %v911_v53 = vrot.slane %v879_v41, 4  ;;  %v763_v58 = vmax.f32 %v655_v42, 0.0  ;;  %v658_v59 = vadd.f32 %v8200_v48, %v8949_v54  ;;  %v649_v61 = vpop.f32.mrb[7].mxu0  ;;  %v2419_v41 = vld [vmem:[#allocation9 + $0x4] sm:$0xf]  ;;  %v9029_v42 = vrot.slane %v2492_v23, 3 }
 0x18a   : > { %v910_v4 = vrot.slane %v878_v46, 4  ;;  %v761_v6 = vmax.f32 %v647_v47, 0.0  ;;  %v650_v7 = vadd.f32 %v8949_v54, %v649_v61  ;;  %v2418_v47 = vld [vmem:[#allocation9] sm:$0xf]  ;;  %v9034_v48 = vsel %vm2470_vm3, %v2478_v18, %v2486_v22 }
 0x18b   : > { %945 = vst [vmem:[#allocation2 + $0x48] ss:$-4 sps:$4 sm:$0xff] %v911_v53   ;;  %v764_v11 = vmax.f32 %v658_v59, 0.0  ;;  %v795_v15 = vmin.f32 %v763_v58, 6.0  ;;  %v2499_v61 = vrot.slane %v2497_v51, 2  ;;  %v9041_v3 = vpack.i.b16 %v2418_v47, %v2418_v47 }
 0x18c   : > { %943 = vst [vmem:[#allocation2 + $0x38] ss:$-4 sps:$4 sm:$0xff] %v910_v4   ;;  %v762_v17 = vmax.f32 %v650_v7, 0.0  ;;  %v793_v25 = vmin.f32 %v761_v6, 6.0  ;;  %v2495_v6 = vor.u32 %v9029_v42, %v9024_v36  ;;  %v9046_v7 = vpack.i.b16 %v2419_v41, %v2419_v41 }
 0x18d   : > { %v796_v20 = vmin.f32 %v764_v11, 6.0  ;;  %13662 = vst [vmem:[#allocation29_spill] sm:$0xff] %v9041_v3  ;;  %v9052_v13 = vrot.slane %v9041_v3, %v8953_v56  ;;  %v2502_v23 = vrot.slane %v2500_v39, 3 }
 0x18e   : > { %v794_v28 = vmin.f32 %v762_v17, 6.0  ;;  %v8203_v30 = vpop.f32.mrb[8].mxu0  ;;  %13663 = vst [vmem:[#allocation30_spill] sm:$0xff] %v9046_v7 }
 0x18f   : > { %v881_v32 = vpack.c.bf16 %v796_v20, %v795_v15  ;;  %v671_v33 = vadd.f32 %v8203_v30, %v8949_v54  ;;  %v662_v34 = vpop.f32.mrb[9].mxu0  ;;  %13664 = vst [vmem:[#allocation31_spill] sm:$0xff] %v9052_v13 }
 0x190   : > { %v880_v37 = vpack.c.bf16 %v794_v28, %v793_v25  ;;  %v8204_v38 = vpop.f32.mrb[10].mxu0  ;;  %v663_v44 = vadd.f32 %v8949_v54, %v662_v34  ;;  %v2421_v34 = vld [vmem:[#allocation9 + $0xc] sm:$0xf] }
 0x191   : > { %v913_v43 = vrot.slane %v881_v32, 4  ;;  %v674_v45 = vadd.f32 %v8204_v38, %v8949_v54  ;;  %v665_v46 = vpop.f32.mrb[11].mxu0  ;;  %v767_v58 = vmax.f32 %v671_v33, 0.0  ;;  %v9067_v42 = vpack.i.b16 %v2421_v34, %v2421_v34 }
 0x192   : > { %v9036_v52 = vld [vmem:[#allocation2 + $0x40] sm:$0xfc]  ;;  %v9038_v53 = vld [vmem:[#allocation2 + $0x48] sm:$0x7]  ;;  %v666_v59 = vadd.f32 %v8949_v54, %v665_v46  ;;  %v912_v11 = vrot.slane %v880_v37, 4  ;;  %v765_v50 = vmax.f32 %v663_v44, 0.0 }
 0x193   : > { %949 = vst [vmem:[#allocation2 + $0x68] ss:$-4 sps:$4 sm:$0xff] %v913_v43   ;;  %v768_v15 = vmax.f32 %v674_v45, 0.0  ;;  %v9055_v18 = vld [vmem:[#allocation2 + $0x30] sm:$0xf8]  ;;  %v799_v19 = vmin.f32 %v767_v58, 6.0 }
 0x194   : > { %v766_v17 = vmax.f32 %v666_v59, 0.0  ;;  %947 = vst [vmem:[#allocation2 + $0x58] ss:$-4 sps:$4 sm:$0xff] %v912_v11   ;;  %v9057_v21 = vld [vmem:[#allocation2 + $0x38] sm:$0xf]  ;;  %v1034_v22 = vshrl.u32 %v9055_v18, 16 }
 0x195   : > { %v797_v28 = vmin.f32 %v765_v50, 6.0  ;;  %v800_v30 = vmin.f32 %v768_v15, 6.0  ;;  %v1037_v41 = vshll.u32 %v9055_v18, 16  ;;  %13665 = vst [vmem:[#allocation32_spill] sm:$0xff] %v9067_v42  ;;  %v1042_v46 = vshrl.u32 %v9057_v21, 16 }
 0x196   : > { %v8207_v20 = vpop.f32.mrb[12].mxu0  ;;  %v798_v51 = vmin.f32 %v766_v17, 6.0  ;;  %v9064_v38 = vrot.slane %v1034_v22, 3  ;;  %v2503_v15 = vor.u32 %v2502_v23, %v2499_v61  ;;  %v9076_v17 = vrot.slane %v9046_v7, %v8951_v55  ;;  %v9113_v24 = vld [vmem:[#allocation2 + $0x40] sm:$0xf8] }
 0x197   : > { %v687_v32 = vadd.f32 %v8207_v20, %v8949_v54  ;;  %v678_v33 = vpop.f32.mrb[13].mxu0  ;;  %v883_v39 = vpack.c.bf16 %v800_v30, %v799_v19  ;;  %v9091_v23 = vrot.slane %v9067_v42, %v8955_v57  ;;  %v1044_v35 = vrot.slane %v1042_v46, 3 }
 0x198   : > { %v679_v36 = vadd.f32 %v8949_v54, %v678_v33  ;;  %v8208_v37 = vpop.f32.mrb[14].mxu0  ;;  %v882_v43 = vpack.c.bf16 %v798_v51, %v797_v28  ;;  %13666 = vst [vmem:[#allocation33_spill] sm:$0xff] %v9076_v17  ;;  %v9087_v61 = vsel %vm2470_vm3, %v2495_v6, %v2503_v15  ;;  %v1039_v15 = vrot.slane %v1037_v41, 4 }
 0x199   : > { %v771_v44 = vmax.f32 %v687_v32, 0.0  ;;  %v681_v45 = vpop.f32.mrb[15].mxu0  ;;  %v690_v11 = vadd.f32 %v8208_v37, %v8949_v54  ;;  %13669 = vst [vmem:[#allocation36_spill] sm:$0xff] %v9091_v23  ;;  %v915_v14 = vrot.slane %v883_v39, 4 }
 0x19a   : > { %v2438_v47 = vld [vmem:[#allocation2 + $0x60] sm:$0xfc]  ;;  %v2439_v58 = vld [vmem:[#allocation2 + $0x68] sm:$0x7]  ;;  %v682_v50 = vadd.f32 %v8949_v54, %v681_v45  ;;  %v914_v30 = vrot.slane %v882_v43, 4  ;;  %v769_v51 = vmax.f32 %v679_v36, 0.0 }
 0x19b   : > { %v9070_v59 = vld [vmem:[#allocation2 + $0x60] sm:$0xf8]  ;;  %v2574_v18 = vshrl.u32 %v2438_v47, 16  ;;  %v2577_v19 = vshll.u32 %v2438_v47, 16  ;;  %v2582_v20 = vshrl.u32 %v2439_v58, 16  ;;  %v2585_v22 = vshll.u32 %v2439_v58, 16 }
 0x19c   : > { %v9078_v28 = vld [vmem:[#allocation2 + $0x68] sm:$0x7]  ;;  %v9082_v32 = vld [vmem:[#allocation2 + $0x60] sm:$0xf8]  ;;  %v9101_v58 = vld [vmem:[#allocation2 + $0x50] sm:$0xfc] }
 0x19d   : > { %13667 = vst [vmem:[#allocation34_spill] sm:$0xff] %v9082_v32  ;;  %v9084_v33 = vld [vmem:[#allocation2 + $0x68] sm:$0xf]  ;;  %v9093_v34 = vrot.slane %v2574_v18, 2  ;;  %v9095_v37 = vrot.slane %v2577_v19, 3  ;;  %v9097_v45 = vrot.slane %v2582_v20, 2 }
 0x19e   : > { %13668 = vst [vmem:[#allocation35_spill] sm:$0xff] %v9084_v33  ;;  %v9099_v47 = vrot.slane %v2585_v22, 3  ;;  %v9107_v25 = vld [vmem:[#allocation2 + $0x58] sm:$0x7]  ;;  %v803_v9 = vmin.f32 %v771_v44, 6.0  ;;  %v772_v8 = vmax.f32 %v690_v11, 0.0  ;;  %v1040_v44 = vor.u32 %v1039_v15, %v9064_v38 }
 0x19f   : > { %v770_v6 = vmax.f32 %v682_v50, 0.0  ;;  %v8211_v4 = vpop.f32.mrb[16].mxu0  ;;  %953 = vst [vmem:[#allocation2 + $0x88] ss:$-4 sps:$4 sm:$0xff] %v915_v14   ;;  %951 = vst [vmem:[#allocation2 + $0x78] ss:$-4 sps:$4 sm:$0xff] %v914_v30   ;;  %v13673_v38 = vmul.bf16 %v8981_v10, %v8958_v60 }
 0x1a0   : > { %v801_v18 = vmin.f32 %v769_v51, 6.0  ;;  %v703_v19 = vadd.f32 %v8211_v4, %v8949_v54  ;;  %v694_v27 = vpop.f32.mrb[17].mxu0  ;;  %v1045_v20 = vshll.u32 %v9057_v21, 16  ;;  %v1051_v22 = vshrl.u32 %v9113_v24, 16 }
 0x1a1   : > { %v804_v29 = vmin.f32 %v772_v8, 6.0  ;;  %v802_v39 = vmin.f32 %v770_v6, 6.0  ;;  %v695_v43 = vadd.f32 %v8949_v54, %v694_v27  ;;  %v8212_v36 = vpop.f32.mrb[18].mxu0 }
 0x1a2   : > { %v775_v11 = vmax.f32 %v703_v19, 0.0  ;;  %v706_v41 = vadd.f32 %v8212_v36, %v8949_v54  ;;  %v697_v14 = vpop.f32.mrb[19].mxu0  ;;  %v1047_v46 = vrot.slane %v1045_v20, 4  ;;  %v9121_v50 = vrot.slane %v1051_v22, 3 }
 0x1a3   : > { %v885_v4 = vpack.c.bf16 %v804_v29, %v803_v9  ;;  %v884_v30 = vpack.c.bf16 %v802_v39, %v801_v18  ;;  %v773_v51 = vmax.f32 %v695_v43, 0.0  ;;  %v9124_v21 = vadd.f32 %v8949_v54, %v697_v14 }
 0x1a4   : > { %v9126_v8 = vmin.f32 %v775_v11, 6.0  ;;  %v776_v6 = vmax.f32 %v706_v41, 0.0  ;;  %v1048_v33 = vor.u32 %v1047_v46, %v1044_v35 }
 0x1a5   : > { %v917_v15 = vrot.slane %v885_v4, 4  ;;  %v916_v19 = vrot.slane %v884_v30, 4  ;;  %v9129_v36 = vmin.f32 %v773_v51, 6.0 }
 0x1a6   : > { %v8215_v27 = vpop.f32.mrb[20].mxu0  ;;  %v808_v29 = vmin.f32 %v776_v6, 6.0  ;;  %v9139_v43 = vsel %vm1015_vm0, %v1040_v44, %v1048_v33  ;;  %v2442_v35 = vld [vmem:[#allocation2 + $0x80] sm:$0xfc]  ;;  %v2443_v11 = vld [vmem:[#allocation2 + $0x88] sm:$0x7] }
 0x1a7   : > { %v710_v22 = vpop.f32.mrb[21].mxu0  ;;  %v9133_v9 = vadd.f32 %v8215_v27, %v8949_v54  ;;  %13670 = vst [vmem:[#allocation37_spill] sm:$0xff] %v9139_v43  ;;  %v9141_v41 = vld [vmem:[#allocation2 + $0x80] sm:$0xf8]  ;;  %957 = vst [vmem:[#allocation2 + $0xa8] ss:$-4 sps:$4 sm:$0xff] %v917_v15   ;;  %v1421_v4 = vmul.bf16 %v8986_v16, %v9139_v43 }
 0x1a8   : > { %v9136_v18 = vadd.f32 %v8949_v54, %v710_v22  ;;  %v8216_v39 = vpop.f32.mrb[22].mxu0  ;;  %13671 = vst [vmem:[#allocation38_spill] sm:$0xff] %v9141_v41  ;;  %955 = vst [vmem:[#allocation2 + $0x98] ss:$-4 sps:$4 sm:$0xff] %v916_v19   ;;  %v2608_v33 = vshrl.u32 %v2442_v35, 16  ;;  %v2611_v44 = vshll.u32 %v2442_v35, 16  ;;  %v887_v46 = vpack.c.bf16 %v808_v29, %v9126_v8 }
 0x1a9   : > { %v9144_v14 = vadd.f32 %v8216_v39, %v8949_v54  ;;  %v2616_v51 = vshrl.u32 %v2443_v11, 16  ;;  %v2619_v6 = vshll.u32 %v2443_v11, 16  ;;  %v9152_v27 = vld [vmem:[#allocation2 + $0x88] sm:$0x7]  ;;  %v3856_v22 = vld [vmem:[#allocation2 + $0x80] sm:$0xf8]  ;;  %v9160_v20 = vadd.bf16 %v1421_v4, %v13673_v38 }
 0x1aa   : > { %13672 = vst [vmem:[#allocation39_spill] sm:$0xff] %v9152_v27  ;;  %v3857_v39 = vld [vmem:[#allocation2 + $0x88] sm:$0xf]  ;;  %v9162_v30 = vrot.slane %v2608_v33, 2  ;;  %v9164_v35 = vrot.slane %v2611_v44, 3  ;;  %v4021_v19 = vshrl.u32 %v3856_v22, 16  ;;  %v2588_v38 = vor.u32 %v9099_v47, %v9097_v45 }
 0x1ab   : > { %v9166_v11 = vrot.slane %v2616_v51, 2  ;;  %v9168_v43 = vrot.slane %v2619_v6, 3  ;;  %v9170_v15 = vld [vmem:[#allocation2 + $0x80] sm:$0xf0]  ;;  %v4024_v41 = vshll.u32 %v3856_v22, 16  ;;  %v4029_v27 = vshrl.u32 %v3857_v39, 16 }
 0x1ac   : > { %13674 = vst [vmem:[#allocation40_spill] sm:$0xff] %v9162_v30  ;;  %13675 = vst [vmem:[#allocation41_spill] sm:$0xff] %v9164_v35  ;;  %v4032_v32 = vshll.u32 %v3857_v39, 16  ;;  %v9172_v8 = vld [vmem:[#allocation2 + $0x88] sm:$0xf]  ;;  %v9184_v51 = vrot.slane %v4021_v19, 3  ;;  %v13703_v47 = vor.u32 %v9095_v37, %v9093_v34 }
 0x1ad   : > { %13676 = vst [vmem:[#allocation42_spill] sm:$0xff] %v9166_v11  ;;  %13677 = vst [vmem:[#allocation43_spill] sm:$0xff] %v9168_v43  ;;  %v9180_v33 = vld [vmem:[#allocation2 + $0x80] sm:$0xf0]  ;;  %v9182_v44 = vld [vmem:[#allocation2 + $0x88] sm:$0x1f] }
 0x1ae   : > { %13678 = vst [vmem:[#allocation44_spill] sm:$0xff] %v9170_v15  ;;  %13679 = vst [vmem:[#allocation45_spill] sm:$0xff] %v9172_v8  ;;  %v9186_v6 = vrot.slane %v4024_v41, 4  ;;  %v9188_v22 = vrot.slane %v4029_v27, 3  ;;  %v9190_v39 = vrot.slane %v4032_v32, 4 }
 0x1af   : > { %13680 = vst [vmem:[#allocation46_spill] sm:$0xff] %v9180_v33  ;;  %13681 = vst [vmem:[#allocation47_spill] sm:$0xff] %v9182_v44  ;;  %v2440_v60 = vld [vmem:[#allocation2 + $0x70] sm:$0xfc]  ;;  %v2441_v15 = vld [vmem:[#allocation2 + $0x78] sm:$0x7] }
 0x1b0   : > { %13682 = vst [vmem:[#allocation48_spill] sm:$0xff] %v9184_v51  ;;  %13683 = vst [vmem:[#allocation49_spill] sm:$0xff] %v9186_v6  ;;  %v2591_v8 = vshrl.u32 %v2440_v60, 16  ;;  %v2594_v35 = vshll.u32 %v2440_v60, 16  ;;  %v2599_v19 = vshrl.u32 %v2441_v15, 16  ;;  %v2602_v51 = vshll.u32 %v2441_v15, 16 }
 0x1b1   : > { %13684 = vst [vmem:[#allocation50_spill] sm:$0xff] %v9188_v22  ;;  %13685 = vst [vmem:[#allocation51_spill] sm:$0xff] %v9190_v39  ;;  %v9196_v41 = vld [vmem:[#allocation2 + $0x70] sm:$0xf8]  ;;  %v9198_v27 = vld [vmem:[#allocation2 + $0x78] sm:$0x7] }
 0x1b2   : > { %13686 = vst [vmem:[#allocation52_spill] sm:$0xff] %v9196_v41  ;;  %13687 = vst [vmem:[#allocation53_spill] sm:$0xff] %v9198_v27  ;;  %v3854_v39 = vld [vmem:[#allocation2 + $0x70] sm:$0xf8]  ;;  %v919_v22 = vrot.slane %v887_v46, 4  ;;  %v9205_v4 = vrot.slane %v2591_v8, 2 }
 0x1b3   : > { %v9207_v30 = vrot.slane %v2594_v35, 3  ;;  %v9209_v60 = vrot.slane %v2599_v19, 2  ;;  %v9211_v15 = vrot.slane %v2602_v51, 3  ;;  %v3855_v44 = vld [vmem:[#allocation2 + $0x78] sm:$0xf]  ;;  %v4004_v32 = vshrl.u32 %v3854_v39, 16 }
 0x1b4   : > { %13688 = vst [vmem:[#allocation54_spill] sm:$0xff] %v9205_v4  ;;  %v4007_v6 = vshll.u32 %v3854_v39, 16  ;;  %v4012_v46 = vshrl.u32 %v3855_v44, 16  ;;  %v9214_v11 = vld [vmem:[#allocation2 + $0x70] sm:$0xf0]  ;;  %v4015_v35 = vshll.u32 %v3855_v44, 16  ;;  %v9250_v51 = vsel %vm2470_vm3, %v13703_v47, %v2588_v38 }
 0x1b5   : > { %13689 = vst [vmem:[#allocation55_spill] sm:$0xff] %v9207_v30  ;;  %13690 = vst [vmem:[#allocation56_spill] sm:$0xff] %v9209_v60  ;;  %v9220_v8 = vld [vmem:[#allocation2 + $0x78] sm:$0xf]  ;;  %v9223_v19 = vld [vmem:[#allocation2 + $0x70] sm:$0xf0] }
 0x1b6   : > { %13691 = vst [vmem:[#allocation57_spill] sm:$0xff] %v9211_v15  ;;  %13692 = vst [vmem:[#allocation58_spill] sm:$0xff] %v9214_v11  ;;  %v9225_v33 = vrot.slane %v4004_v32, 3  ;;  %v9227_v39 = vrot.slane %v4007_v6, 4  ;;  %v9229_v29 = vrot.slane %v4012_v46, 3  ;;  %v9234_v41 = vrot.slane %v4015_v35, 4 }
 0x1b7   : > { %961 = vst [vmem:[#allocation2 + $0xc8] ss:$-4 sps:$4 sm:$0xff] %v919_v22   ;;  %13693 = vst [vmem:[#allocation59_spill] sm:$0xff] %v9220_v8  ;;  %v9232_v43 = vld [vmem:[#allocation2 + $0x78] sm:$0x1f]  ;;  %v713_v38 = vpop.f32.mrb[23].mxu0 }
 0x1b8   : > { %13694 = vst [vmem:[#allocation60_spill] sm:$0xff] %v9223_v19  ;;  %13695 = vst [vmem:[#allocation61_spill] sm:$0xff] %v9225_v33  ;;  %v2423_v45 = vld [vmem:[#allocation9 + $0x14] sm:$0xf]  ;;  %v2446_v11 = vld [vmem:[#allocation2 + $0xa0] sm:$0xfc] }
 0x1b9   : > { %13696 = vst [vmem:[#allocation62_spill] sm:$0xff] %v9227_v39  ;;  %13697 = vst [vmem:[#allocation63_spill] sm:$0xff] %v9229_v29  ;;  %v2447_v6 = vld [vmem:[#allocation2 + $0xa8] sm:$0x7]  ;;  %v2642_v39 = vshrl.u32 %v2446_v11, 16  ;;  %v2645_v46 = vshll.u32 %v2446_v11, 16  ;;  %v9252_v44 = vpack.i.b16 %v2423_v45, %v2423_v45 }
 0x1ba   : > { %13698 = vst [vmem:[#allocation64_spill] sm:$0xff] %v9232_v43  ;;  %13699 = vst [vmem:[#allocation65_spill] sm:$0xff] %v9234_v41  ;;  %v13700_v29 = vmax.f32 %v9124_v21, 0.0  ;;  %v2650_v8 = vshrl.u32 %v2447_v6, 16  ;;  %v2653_v33 = vshll.u32 %v2447_v6, 16 }
 0x1bb   : > { %v9242_v27 = vld [vmem:[#allocation2 + $0xa0] sm:$0xf8]  ;;  %v9244_v35 = vld [vmem:[#allocation2 + $0xa8] sm:$0x7]  ;;  %13704 = vst [vmem:[#allocation68_spill] sm:$0xff] %v9250_v51  ;;  %13705 = vst [vmem:[#allocation69_spill] sm:$0xff] %v9252_v44 }
 0x1bc   : > { %v806_v22 = vmin.f32 %v13700_v29, 6.0  ;;  %13701 = vst [vmem:[#allocation66_spill] sm:$0xff] %v9242_v27  ;;  %13702 = vst [vmem:[#allocation67_spill] sm:$0xff] %v9244_v35  ;;  %v9254_v32 = vrot.slane %v2642_v39, 2  ;;  %v9256_v11 = vrot.slane %v2645_v46, 3  ;;  %v9260_v43 = vrot.slane %v2650_v8, 2 }
 0x1bd   : > { %v3860_v6 = vld [vmem:[#allocation2 + $0xa0] sm:$0xf8]  ;;  %v9262_v19 = vrot.slane %v2653_v33, 3  ;;  %v3861_v41 = vld [vmem:[#allocation2 + $0xa8] sm:$0xf] }
 0x1be   : > { %13706 = vst [vmem:[#allocation70_spill] sm:$0xff] %v9254_v32  ;;  %13707 = vst [vmem:[#allocation71_spill] sm:$0xff] %v9256_v11  ;;  %v4055_v34 = vshrl.u32 %v3860_v6, 16  ;;  %v4058_v37 = vshll.u32 %v3860_v6, 16  ;;  %v4063_v45 = vshrl.u32 %v3861_v41, 16  ;;  %v4066_v47 = vshll.u32 %v3861_v41, 16 }
 0x1bf   : > { %13708 = vst [vmem:[#allocation72_spill] sm:$0xff] %v9260_v43  ;;  %13709 = vst [vmem:[#allocation73_spill] sm:$0xff] %v9262_v19  ;;  %v9266_v39 = vld [vmem:[#allocation2 + $0xa0] sm:$0xf0]  ;;  %v9268_v46 = vld [vmem:[#allocation2 + $0xa8] sm:$0xf]  ;;  %v886_v21 = vpack.c.bf16 %v806_v22, %v9129_v36  ;;  %v9298_v32 = vrot.slane %v9252_v44, %v8960_v63 }
 0x1c0   : > { %13710 = vst [vmem:[#allocation74_spill] sm:$0xff] %v9266_v39  ;;  %13711 = vst [vmem:[#allocation75_spill] sm:$0xff] %v9268_v46  ;;  %v9273_v29 = vrot.slane %v4055_v34, 3  ;;  %v9275_v33 = vrot.slane %v4058_v37, 4  ;;  %v9278_v27 = vld [vmem:[#allocation2 + $0xa0] sm:$0xf0] }
 0x1c1   : > { %13714 = vst [vmem:[#allocation78_spill] sm:$0xff] %v9278_v27  ;;  %v9280_v35 = vrot.slane %v4063_v45, 3  ;;  %v9282_v41 = vrot.slane %v4066_v47, 4  ;;  %v9285_v11 = vld [vmem:[#allocation2 + $0xa8] sm:$0x1f]  ;;  %v918_v8 = vrot.slane %v886_v21, 4  ;;  %v9294_v47 = vadd.f32 %v8949_v54, %v713_v38 }
 0x1c2   : > { %13712 = vst [vmem:[#allocation76_spill] sm:$0xff] %v9273_v29  ;;  %13713 = vst [vmem:[#allocation77_spill] sm:$0xff] %v9275_v33  ;;  %v2444_v6 = vld [vmem:[#allocation2 + $0x90] sm:$0xfc]  ;;  %v2445_v39 = vld [vmem:[#allocation2 + $0x98] sm:$0x7]  ;;  %v9351_v38 = vrot.slane %v9046_v7, %v8953_v56 }
 0x1c3   : > { %13715 = vst [vmem:[#allocation79_spill] sm:$0xff] %v9280_v35  ;;  %13716 = vst [vmem:[#allocation80_spill] sm:$0xff] %v9282_v41  ;;  %v2625_v33 = vshrl.u32 %v2444_v6, 16  ;;  %v2628_v45 = vshll.u32 %v2444_v6, 16  ;;  %v9291_v35 = vld [vmem:[#allocation2 + $0x90] sm:$0xf8] }
 0x1c4   : > { %13717 = vst [vmem:[#allocation81_spill] sm:$0xff] %v9285_v11  ;;  %13718 = vst [vmem:[#allocation82_spill] sm:$0xff] %v9291_v35  ;;  %v2633_v36 = vshrl.u32 %v2445_v39, 16  ;;  %v2636_v22 = vshll.u32 %v2445_v39, 16  ;;  %v9300_v27 = vld [vmem:[#allocation2 + $0x98] sm:$0x7] }
 0x1c5   : > { %13719 = vst [vmem:[#allocation83_spill] sm:$0xff] %v9298_v32  ;;  %13720 = vst [vmem:[#allocation84_spill] sm:$0xff] %v9300_v27  ;;  %v779_v21 = vmax.f32 %v9133_v9, 0.0  ;;  %v9304_v34 = vrot.slane %v2625_v33, 2  ;;  %v9306_v6 = vrot.slane %v2628_v45, 3  ;;  %v777_v46 = vmax.f32 %v9136_v18, 0.0 }
 0x1c6   : > { %959 = vst [vmem:[#allocation2 + $0xb8] ss:$-4 sps:$4 sm:$0xff] %v918_v8   ;;  %v3858_v11 = vld [vmem:[#allocation2 + $0x90] sm:$0xf8]  ;;  %v9310_v41 = vrot.slane %v2633_v36, 2  ;;  %v9312_v29 = vrot.slane %v2636_v22, 3 }
 0x1c7   : > { %13721 = vst [vmem:[#allocation85_spill] sm:$0xff] %v9304_v34  ;;  %13722 = vst [vmem:[#allocation86_spill] sm:$0xff] %v9306_v6  ;;  %v3859_v39 = vld [vmem:[#allocation2 + $0x98] sm:$0xf]  ;;  %v4038_v43 = vshrl.u32 %v3858_v11, 16  ;;  %v4041_v19 = vshll.u32 %v3858_v11, 16 }
 0x1c8   : > { %13723 = vst [vmem:[#allocation87_spill] sm:$0xff] %v9310_v41  ;;  %13724 = vst [vmem:[#allocation88_spill] sm:$0xff] %v9312_v29  ;;  %v4046_v9 = vshrl.u32 %v3859_v39, 16  ;;  %v4049_v33 = vshll.u32 %v3859_v39, 16  ;;  %v9316_v37 = vld [vmem:[#allocation2 + $0x90] sm:$0xf0] }
 0x1c9   : > { %13725 = vst [vmem:[#allocation89_spill] sm:$0xff] %v9316_v37  ;;  %v9318_v45 = vld [vmem:[#allocation2 + $0x98] sm:$0xf]  ;;  %v9324_v36 = vrot.slane %v4038_v43, 3  ;;  %v9326_v22 = vrot.slane %v4041_v19, 4  ;;  %v8219_v8 = vpop.f32.mrb[24].mxu0 }
 0x1ca   : > { %13726 = vst [vmem:[#allocation90_spill] sm:$0xff] %v9318_v45  ;;  %v9329_v35 = vld [vmem:[#allocation2 + $0x90] sm:$0xf0]  ;;  %v9331_v39 = vrot.slane %v4046_v9, 3  ;;  %v9333_v27 = vrot.slane %v4049_v33, 4  ;;  %v9342_v37 = vmin.f32 %v779_v21, 6.0  ;;  %v9347_v34 = vadd.f32 %v8219_v8, %v8949_v54 }
 0x1cb   : > { %13727 = vst [vmem:[#allocation91_spill] sm:$0xff] %v9324_v36  ;;  %13728 = vst [vmem:[#allocation92_spill] sm:$0xff] %v9326_v22  ;;  %v9336_v6 = vld [vmem:[#allocation2 + $0x98] sm:$0x1f]  ;;  %v2450_v11 = vld [vmem:[#allocation2 + $0xc0] sm:$0xfc] }
 0x1cc   : > { %13729 = vst [vmem:[#allocation93_spill] sm:$0xff] %v9329_v35  ;;  %13730 = vst [vmem:[#allocation94_spill] sm:$0xff] %v9331_v39  ;;  %v2451_v22 = vld [vmem:[#allocation2 + $0xc8] sm:$0x7]  ;;  %v2676_v9 = vshrl.u32 %v2450_v11, 16  ;;  %v2679_v39 = vshll.u32 %v2450_v11, 16 }
 0x1cd   : > { %13731 = vst [vmem:[#allocation95_spill] sm:$0xff] %v9333_v27  ;;  %13732 = vst [vmem:[#allocation96_spill] sm:$0xff] %v9336_v6  ;;  %v9344_v33 = vld [vmem:[#allocation2 + $0xc0] sm:$0xf8]  ;;  %v2684_v43 = vshrl.u32 %v2451_v22, 16  ;;  %v2687_v35 = vshll.u32 %v2451_v22, 16 }
 0x1ce   : > { %13733 = vst [vmem:[#allocation97_spill] sm:$0xff] %v9344_v33  ;;  %13734 = vst [vmem:[#allocation98_spill] sm:$0xff] %v9351_v38  ;;  %v9353_v19 = vld [vmem:[#allocation2 + $0xc8] sm:$0x7]  ;;  %v9356_v21 = vmin.f32 %v777_v46, 6.0  ;;  %v9360_v11 = vrot.slane %v2676_v9, 2 }
 0x1cf   : > { %13735 = vst [vmem:[#allocation99_spill] sm:$0xff] %v9353_v19  ;;  %v9358_v6 = vld [vmem:[#allocation9 + $0x8] sm:$0xf]  ;;  %v9362_v45 = vrot.slane %v2679_v39, 3  ;;  %v3864_v27 = vld [vmem:[#allocation2 + $0xc0] sm:$0xf8] }
 0x1d0   : > { %13736 = vst [vmem:[#allocation100_spill] sm:$0xff] %v9360_v11  ;;  %v780_v36 = vmax.f32 %v9144_v14, 0.0  ;;  %v9366_v41 = vrot.slane %v2684_v43, 2  ;;  %v9368_v22 = vrot.slane %v2687_v35, 3  ;;  %v3865_v29 = vld [vmem:[#allocation2 + $0xc8] sm:$0xf]  ;;  %v9378_v8 = vpack.i.b16 %v9358_v6, %v9358_v6 }
 0x1d1   : > { %13737 = vst [vmem:[#allocation101_spill] sm:$0xff] %v9362_v45  ;;  %v4089_v4 = vshrl.u32 %v3864_v27, 16  ;;  %v4092_v18 = vshll.u32 %v3864_v27, 16  ;;  %v4097_v33 = vshrl.u32 %v3865_v29, 16  ;;  %v4100_v9 = vshll.u32 %v3865_v29, 16  ;;  %v726_v29 = vpop.f32.mrb[25].mxu0 }
 0x1d2   : > { %13738 = vst [vmem:[#allocation102_spill] sm:$0xff] %v9366_v41  ;;  %13739 = vst [vmem:[#allocation103_spill] sm:$0xff] %v9368_v22  ;;  %v9372_v30 = vld [vmem:[#allocation2 + $0xc0] sm:$0xf0]  ;;  %v9374_v39 = vld [vmem:[#allocation2 + $0xc8] sm:$0xf]  ;;  %v9405_v45 = vrot.slane %v9378_v8, %v8951_v55 }
 0x1d3   : > { %13740 = vst [vmem:[#allocation104_spill] sm:$0xff] %v9372_v30  ;;  %13741 = vst [vmem:[#allocation105_spill] sm:$0xff] %v9374_v39  ;;  %v9382_v35 = vrot.slane %v4089_v4, 3  ;;  %v9384_v43 = vrot.slane %v4092_v18, 4  ;;  %v9387_v46 = vld [vmem:[#allocation2 + $0xc0] sm:$0xf0] }
 0x1d4   : > { %13742 = vst [vmem:[#allocation106_spill] sm:$0xff] %v9378_v8  ;;  %13745 = vst [vmem:[#allocation109_spill] sm:$0xff] %v9387_v46  ;;  %v9389_v19 = vrot.slane %v4097_v33, 3  ;;  %v9391_v11 = vrot.slane %v4100_v9, 4  ;;  %v9394_v60 = vld [vmem:[#allocation2 + $0xc8] sm:$0x1f]  ;;  %v727_v9 = vadd.f32 %v8949_v54, %v726_v29 }
 0x1d5   : > { %13743 = vst [vmem:[#allocation107_spill] sm:$0xff] %v9382_v35  ;;  %13744 = vst [vmem:[#allocation108_spill] sm:$0xff] %v9384_v43  ;;  %v2448_v27 = vld [vmem:[#allocation2 + $0xb0] sm:$0xfc]  ;;  %v812_v30 = vmin.f32 %v780_v36, 6.0  ;;  %v8220_v36 = vpop.f32.mrb[26].mxu0 }
 0x1d6   : > { %13746 = vst [vmem:[#allocation110_spill] sm:$0xff] %v9389_v19  ;;  %13747 = vst [vmem:[#allocation111_spill] sm:$0xff] %v9391_v11  ;;  %v2449_v43 = vld [vmem:[#allocation2 + $0xb8] sm:$0x7]  ;;  %v2659_v35 = vshrl.u32 %v2448_v27, 16  ;;  %v2662_v33 = vshll.u32 %v2448_v27, 16  ;;  %v738_v46 = vadd.f32 %v8220_v36, %v8949_v54 }
 0x1d7   : > { %13748 = vst [vmem:[#allocation112_spill] sm:$0xff] %v9394_v60  ;;  %v9400_v19 = vld [vmem:[#allocation2 + $0xb0] sm:$0xf8]  ;;  %13750 = vst [vmem:[#allocation114_spill] sm:$0xff] %v9405_v45  ;;  %v2667_v15 = vshrl.u32 %v2449_v43, 16  ;;  %v2670_v39 = vshll.u32 %v2449_v43, 16  ;;  %v889_v14 = vpack.c.bf16 %v812_v30, %v9342_v37 }
 0x1d8   : > { %13749 = vst [vmem:[#allocation113_spill] sm:$0xff] %v9400_v19  ;;  %v9407_v4 = vld [vmem:[#allocation2 + $0xb8] sm:$0x7]  ;;  %v9411_v60 = vrot.slane %v2659_v35, 2  ;;  %v9413_v27 = vrot.slane %v2662_v33, 3  ;;  %v778_v11 = vmax.f32 %v9294_v47, 0.0 }
 0x1d9   : > { %13751 = vst [vmem:[#allocation115_spill] sm:$0xff] %v9407_v4  ;;  %v3862_v29 = vld [vmem:[#allocation2 + $0xb0] sm:$0xf8]  ;;  %v9417_v41 = vrot.slane %v2667_v15, 2  ;;  %v9419_v22 = vrot.slane %v2670_v39, 3  ;;  %v729_v30 = vpop.f32.mrb[27].mxu0 }
 0x1da   : > { %13752 = vst [vmem:[#allocation116_spill] sm:$0xff] %v9411_v60  ;;  %13753 = vst [vmem:[#allocation117_spill] sm:$0xff] %v9413_v27  ;;  %v3863_v43 = vld [vmem:[#allocation2 + $0xb8] sm:$0xf]  ;;  %v4072_v51 = vshrl.u32 %v3862_v29, 16  ;;  %v4075_v32 = vshll.u32 %v3862_v29, 16  ;;  %v730_v60 = vadd.f32 %v8949_v54, %v729_v30 }
 0x1db   : > { %13754 = vst [vmem:[#allocation118_spill] sm:$0xff] %v9417_v41  ;;  %13755 = vst [vmem:[#allocation119_spill] sm:$0xff] %v9419_v22  ;;  %v4080_v37 = vshrl.u32 %v3863_v43, 16  ;;  %v4083_v35 = vshll.u32 %v3863_v43, 16  ;;  %v9423_v18 = vld [vmem:[#allocation2 + $0xb0] sm:$0xf0] }
 0x1dc   : > { %13756 = vst [vmem:[#allocation120_spill] sm:$0xff] %v9423_v18  ;;  %v9425_v33 = vld [vmem:[#allocation2 + $0xb8] sm:$0xf]  ;;  %v9430_v47 = vrot.slane %v4072_v51, 3  ;;  %v9432_v39 = vrot.slane %v4075_v32, 4  ;;  %v921_v29 = vrot.slane %v889_v14, 4 }
 0x1dd   : > { %13757 = vst [vmem:[#allocation121_spill] sm:$0xff] %v9425_v33  ;;  %v9435_v19 = vld [vmem:[#allocation2 + $0xb0] sm:$0xf0]  ;;  %v9437_v4 = vrot.slane %v4080_v37, 3  ;;  %v9439_v43 = vrot.slane %v4083_v35, 4  ;;  %v8223_v18 = vpop.f32.mrb[28].mxu0 }
 0x1de   : > { %13758 = vst [vmem:[#allocation122_spill] sm:$0xff] %v9430_v47  ;;  %13759 = vst [vmem:[#allocation123_spill] sm:$0xff] %v9432_v39  ;;  %v9442_v27 = vld [vmem:[#allocation2 + $0xb8] sm:$0x1f]  ;;  %v810_v39 = vmin.f32 %v778_v11, 6.0  ;;  %v783_v37 = vmax.f32 %v9347_v34, 0.0  ;;  %v751_v33 = vadd.f32 %v8223_v18, %v8949_v54 }
 0x1df   : > { %13760 = vst [vmem:[#allocation124_spill] sm:$0xff] %v9435_v19  ;;  %13761 = vst [vmem:[#allocation125_spill] sm:$0xff] %v9437_v4  ;;  %v781_v4 = vmax.f32 %v727_v9, 0.0  ;;  %v784_v35 = vmax.f32 %v738_v46, 0.0  ;;  %v13764_v32 = vshll.u32 %v9113_v24, 16  ;;  %v782_v9 = vmax.f32 %v730_v60, 0.0 }
 0x1e0   : > { %13762 = vst [vmem:[#allocation126_spill] sm:$0xff] %v9439_v43  ;;  %13763 = vst [vmem:[#allocation127_spill] sm:$0xff] %v9442_v27  ;;  %v742_v43 = vpop.f32.mrb[29].mxu0  ;;  %v888_v14 = vpack.c.bf16 %v810_v39, %v9356_v21  ;;  %v815_v11 = vmin.f32 %v783_v37, 6.0  ;;  %v8388_v18 = vld [vmem:[%s13011_s2] ss:$0 sm:$0xff] }
 0x1e1   : > { %965 = vst [vmem:[#allocation2 + $0xe8] ss:$-4 sps:$4 sm:$0xff] %v921_v29   ;;  %v743_v36 = vadd.f32 %v8949_v54, %v742_v43  ;;  %v8224_v51 = vpop.f32.mrb[30].mxu0  ;;  %v9454_v19 = vrot.slane %v13764_v32, 4  ;;  %v9457_v15 = vmin.f32 %v781_v4, 6.0  ;;  %v816_v34 = vmin.f32 %v784_v35, 6.0 }
 0x1e2   : > { %v745_v46 = vpop.f32.mrb[31].mxu0  ;;  %v787_v29 = vmax.f32 %v751_v33, 0.0  ;;  %v754_v54 = vadd.f32 %v8388_v18, %v8224_v51  ;;  %v9462_v30 = vld [vmem:[#allocation2 + $0x48] sm:$0xf]  ;;  %v920_v24 = vrot.slane %v888_v14, 4  ;;  %v9468_v37 = vmin.f32 %v782_v9, 6.0 }
 0x1e3   : > { %v785_v27 = vmax.f32 %v743_v36, 0.0  ;;  %v891_v43 = vpack.c.bf16 %v816_v34, %v815_v11  ;;  %v9464_v32 = vadd.f32 %v8388_v18, %v745_v46  ;;  %v1508_v4 = vld [vmem:[#allocation2 + $0x30] sm:$0xf0]  ;;  %v1509_v39 = vld [vmem:[#allocation2 + $0x38] sm:$0xf] }
 0x1e4   : > { %v9470_v60 = vmin.f32 %v787_v29, 6.0  ;;  %v788_v36 = vmax.f32 %v754_v54, 0.0  ;;  %963 = vst [vmem:[#allocation2 + $0xd8] ss:$-4 sps:$4 sm:$0xff] %v920_v24   ;;  %v890_v34 = vpack.c.bf16 %v9468_v37, %v9457_v15  ;;  %v1582_v9 = vrot.slane %v1508_v4, 4 }
 0x1e5   : > { %v9472_v33 = vmin.f32 %v785_v27, 6.0  ;;  %v923_v51 = vrot.slane %v891_v43, 4  ;;  %v1583_v18 = vrot.slane %v1509_v39, 4  ;;  %v9481_v29 = vld [vmem:[#allocation9 + $0x10] sm:$0xf]  ;;  %v9491_v43 = vrot.slane %v9041_v3, %v8960_v63 }
 0x1e6   : > { %v9479_v46 = vmin.f32 %v788_v36, 6.0  ;;  %v9487_v24 = vpack.i.b16 %v9481_v29, %v9481_v29  ;;  %v9495_v15 = vrot.slane %v9378_v8, %v8953_v56  ;;  %v9499_v4 = vrot.slane %v9067_v42, %v8951_v55 }
 0x1e7   : > { %969 = vst [vmem:[#allocation2 + $0x108] ss:$-4 sps:$4 sm:$0xff] %v923_v51   ;;  %13767 = vst [vmem:[#allocation130_spill] sm:$0xff] %v9491_v43  ;;  %v9508_v8 = vsel %vm1578_vm1, %v1582_v9, %v1583_v18 }
 0x1e8   : > { %v2454_v27 = vld [vmem:[#allocation2 + $0xe0] sm:$0xfc]  ;;  %v2455_v21 = vld [vmem:[#allocation2 + $0xe8] sm:$0x7]  ;;  %13766 = vst [vmem:[#allocation129_spill] sm:$0xff] %v9487_v24  ;;  %13768 = vst [vmem:[#allocation131_spill] sm:$0xff] %v9495_v15 }
 0x1e9   : > { %v9483_v54 = vld [vmem:[#allocation2 + $0xe0] sm:$0xf8]  ;;  %13769 = vst [vmem:[#allocation132_spill] sm:$0xff] %v9499_v4  ;;  %v2710_v39 = vshrl.u32 %v2454_v27, 16  ;;  %v2713_v37 = vshll.u32 %v2454_v27, 16  ;;  %v2718_v36 = vshrl.u32 %v2455_v21, 16 }
 0x1ea   : > { %13765 = vst [vmem:[#allocation128_spill] sm:$0xff] %v9483_v54  ;;  %v2721_v51 = vshll.u32 %v2455_v21, 16  ;;  %v9501_v11 = vld [vmem:[#allocation2 + $0xe8] sm:$0x7]  ;;  %v3868_v47 = vld [vmem:[#allocation2 + $0xe0] sm:$0xf8] }
 0x1eb   : > { %13770 = vst [vmem:[#allocation133_spill] sm:$0xff] %v9501_v11  ;;  %v3869_v41 = vld [vmem:[#allocation2 + $0xe8] sm:$0xf]  ;;  %13771 = vst [vmem:[#allocation134_spill] sm:$0xff] %v9508_v8  ;;  %v9510_v3 = vrot.slane %v2710_v39, 2  ;;  %v9512_v4 = vrot.slane %v2713_v37, 3  ;;  %v1725_v39 = vmul.bf16 %v8971_v2, %v9508_v8 }
 0x1ec   : > { %v9514_v27 = vrot.slane %v2718_v36, 2  ;;  %v9516_v21 = vrot.slane %v2721_v51, 3  ;;  %v9518_v15 = vld [vmem:[#allocation2 + $0xe0] sm:$0xf0]  ;;  %v4123_v14 = vshrl.u32 %v3868_v47, 16  ;;  %v4126_v35 = vshll.u32 %v3868_v47, 16 }
 0x1ed   : > { %13772 = vst [vmem:[#allocation135_spill] sm:$0xff] %v9510_v3  ;;  %13773 = vst [vmem:[#allocation136_spill] sm:$0xff] %v9512_v4  ;;  %v4131_v54 = vshrl.u32 %v3869_v41, 16  ;;  %v4134_v11 = vshll.u32 %v3869_v41, 16  ;;  %v9520_v43 = vld [vmem:[#allocation2 + $0xe8] sm:$0xf] }
 0x1ee   : > { %13774 = vst [vmem:[#allocation137_spill] sm:$0xff] %v9514_v27  ;;  %13775 = vst [vmem:[#allocation138_spill] sm:$0xff] %v9516_v21  ;;  %v9528_v36 = vld [vmem:[#allocation2 + $0xe0] sm:$0xf0]  ;;  %v9530_v51 = vld [vmem:[#allocation2 + $0xe8] sm:$0x1f] }
 0x1ef   : > { %13776 = vst [vmem:[#allocation139_spill] sm:$0xff] %v9518_v15  ;;  %13777 = vst [vmem:[#allocation140_spill] sm:$0xff] %v9520_v43  ;;  %v9532_v22 = vrot.slane %v4123_v14, 3  ;;  %v9534_v47 = vrot.slane %v4126_v35, 4  ;;  %v9536_v41 = vrot.slane %v4131_v54, 3  ;;  %v9538_v45 = vrot.slane %v4134_v11, 4 }
 0x1f0   : > { %13778 = vst [vmem:[#allocation141_spill] sm:$0xff] %v9528_v36  ;;  %13779 = vst [vmem:[#allocation142_spill] sm:$0xff] %v9530_v51  ;;  %v2452_v9 = vld [vmem:[#allocation2 + $0xd0] sm:$0xfc]  ;;  %v2453_v15 = vld [vmem:[#allocation2 + $0xd8] sm:$0x7] }
 0x1f1   : > { %13780 = vst [vmem:[#allocation143_spill] sm:$0xff] %v9532_v22  ;;  %13781 = vst [vmem:[#allocation144_spill] sm:$0xff] %v9534_v47  ;;  %v2693_v43 = vshrl.u32 %v2452_v9, 16  ;;  %v2696_v4 = vshll.u32 %v2452_v9, 16  ;;  %v2701_v14 = vshrl.u32 %v2453_v15, 16  ;;  %v2704_v22 = vshll.u32 %v2453_v15, 16 }
 0x1f2   : > { %13782 = vst [vmem:[#allocation145_spill] sm:$0xff] %v9536_v41  ;;  %13783 = vst [vmem:[#allocation146_spill] sm:$0xff] %v9538_v45  ;;  %v9544_v35 = vld [vmem:[#allocation2 + $0xd0] sm:$0xf8]  ;;  %v9546_v54 = vld [vmem:[#allocation2 + $0xd8] sm:$0x7] }
 0x1f3   : > { %13784 = vst [vmem:[#allocation147_spill] sm:$0xff] %v9544_v35  ;;  %13785 = vst [vmem:[#allocation148_spill] sm:$0xff] %v9546_v54  ;;  %v3866_v45 = vld [vmem:[#allocation2 + $0xd0] sm:$0xf8]  ;;  %v922_v41 = vrot.slane %v890_v34, 4  ;;  %v9553_v37 = vrot.slane %v2693_v43, 2  ;;  %v13801_v43 = vmul.bf16 %v8967_v1, %v8963_v0 }
 0x1f4   : > { %v9555_v3 = vrot.slane %v2696_v4, 3  ;;  %v9557_v9 = vrot.slane %v2701_v14, 2  ;;  %v9559_v15 = vrot.slane %v2704_v22, 3  ;;  %v3867_v51 = vld [vmem:[#allocation2 + $0xd8] sm:$0xf]  ;;  %v4106_v11 = vshrl.u32 %v3866_v45, 16 }
 0x1f5   : > { %13786 = vst [vmem:[#allocation149_spill] sm:$0xff] %v9553_v37  ;;  %v4109_v47 = vshll.u32 %v3866_v45, 16  ;;  %v4114_v34 = vshrl.u32 %v3867_v51, 16  ;;  %v9562_v27 = vld [vmem:[#allocation2 + $0xd0] sm:$0xf0]  ;;  %v4117_v4 = vshll.u32 %v3867_v51, 16  ;;  %v9598_v22 = vadd.bf16 %v1725_v39, %v13801_v43 }
 0x1f6   : > { %13787 = vst [vmem:[#allocation150_spill] sm:$0xff] %v9555_v3  ;;  %13788 = vst [vmem:[#allocation151_spill] sm:$0xff] %v9557_v9  ;;  %v9568_v14 = vld [vmem:[#allocation2 + $0xd8] sm:$0xf]  ;;  %v9571_v21 = vld [vmem:[#allocation2 + $0xd0] sm:$0xf0] }
 0x1f7   : > { %13789 = vst [vmem:[#allocation152_spill] sm:$0xff] %v9559_v15  ;;  %13790 = vst [vmem:[#allocation153_spill] sm:$0xff] %v9562_v27  ;;  %v9573_v36 = vrot.slane %v4106_v11, 3  ;;  %v9575_v45 = vrot.slane %v4109_v47, 4  ;;  %v9577_v35 = vrot.slane %v4114_v34, 3  ;;  %v9582_v18 = vrot.slane %v4117_v4, 4 }
 0x1f8   : > { %967 = vst [vmem:[#allocation2 + $0xf8] ss:$-4 sps:$4 sm:$0xff] %v922_v41   ;;  %13791 = vst [vmem:[#allocation154_spill] sm:$0xff] %v9568_v14  ;;  %v9580_v54 = vld [vmem:[#allocation2 + $0xd8] sm:$0x1f]  ;;  %v13798_v34 = vpack.c.bf16 %v9479_v46, %v9470_v60  ;;  %v9602_v11 = vrot.slane %v9487_v24, %v8955_v57  ;;  %v9624_v46 = vrot.slane %v9252_v44, %v8955_v57  ;;  %v13829_v44 = vshll.u32 %v9462_v30, 16 }
 0x1f9   : > { %13792 = vst [vmem:[#allocation155_spill] sm:$0xff] %v9571_v21  ;;  %13793 = vst [vmem:[#allocation156_spill] sm:$0xff] %v9573_v36  ;;  %v2458_v27 = vld [vmem:[#allocation2 + $0x100] sm:$0xfc]  ;;  %v2459_v36 = vld [vmem:[#allocation2 + $0x108] sm:$0x7] }
 0x1fa   : > { %13794 = vst [vmem:[#allocation157_spill] sm:$0xff] %v9575_v45  ;;  %13795 = vst [vmem:[#allocation158_spill] sm:$0xff] %v9577_v35  ;;  %v2744_v47 = vshrl.u32 %v2458_v27, 16  ;;  %v2747_v45 = vshll.u32 %v2458_v27, 16  ;;  %v925_v41 = vrot.slane %v13798_v34, 4  ;;  %v2752_v14 = vshrl.u32 %v2459_v36, 16 }
 0x1fb   : > { %13796 = vst [vmem:[#allocation159_spill] sm:$0xff] %v9580_v54  ;;  %13797 = vst [vmem:[#allocation160_spill] sm:$0xff] %v9582_v18  ;;  %v2755_v35 = vshll.u32 %v2459_v36, 16  ;;  %v9591_v4 = vld [vmem:[#allocation2 + $0x100] sm:$0xf8] }
 0x1fc   : > { %13799 = vst [vmem:[#allocation161_spill] sm:$0xff] %v9591_v4  ;;  %v9593_v18 = vld [vmem:[#allocation2 + $0x108] sm:$0x7]  ;;  %13802 = vst [vmem:[#allocation163_spill] sm:$0xff] %v9602_v11  ;;  %v9604_v27 = vrot.slane %v2744_v47, 2  ;;  %v9606_v51 = vrot.slane %v2747_v45, 3 }
 0x1fd   : > { %13800 = vst [vmem:[#allocation162_spill] sm:$0xff] %v9593_v18  ;;  %v9610_v36 = vld [vmem:[#allocation2 + $0x100] sm:$0xf8]  ;;  %973 = vst [vmem:[#allocation2 + $0x128] ss:$-4 sps:$4 sm:$0xff] %v925_v41   ;;  %v9612_v34 = vrot.slane %v2752_v14, 2 }
 0x1fe   : > { %13803 = vst [vmem:[#allocation164_spill] sm:$0xff] %v9604_v27  ;;  %13804 = vst [vmem:[#allocation165_spill] sm:$0xff] %v9606_v51  ;;  %v9614_v0 = vrot.slane %v2755_v35, 3  ;;  %v9616_v39 = vld [vmem:[#allocation2 + $0x108] sm:$0xf]  ;;  %v9628_v35 = vrot.slane %v9046_v7, %v8960_v63  ;;  %v9643_v27 = vrot.slane %v9487_v24, %v8951_v55 }
 0x1ff   : > { %13805 = vst [vmem:[#allocation166_spill] sm:$0xff] %v9610_v36  ;;  %13806 = vst [vmem:[#allocation167_spill] sm:$0xff] %v9612_v34  ;;  %v2456_v60 = vld [vmem:[#allocation2 + $0xf0] sm:$0xfc]  ;;  %v2457_v4 = vld [vmem:[#allocation2 + $0xf8] sm:$0x7]  ;;  %v9639_v34 = vrot.slane %v9067_v42, %v8953_v56 }
 0x200   : > { %13807 = vst [vmem:[#allocation168_spill] sm:$0xff] %v9614_v0  ;;  %13808 = vst [vmem:[#allocation169_spill] sm:$0xff] %v9616_v39  ;;  %v2727_v14 = vshrl.u32 %v2456_v60, 16  ;;  %v2730_v41 = vshll.u32 %v2456_v60, 16  ;;  %v2735_v18 = vshrl.u32 %v2457_v4, 16  ;;  %v2738_v43 = vshll.u32 %v2457_v4, 16 }
 0x201   : > { %13809 = vst [vmem:[#allocation170_spill] sm:$0xff] %v9624_v46  ;;  %13810 = vst [vmem:[#allocation171_spill] sm:$0xff] %v9628_v35  ;;  %v9630_v0 = vld [vmem:[#allocation2 + $0xf0] sm:$0xf8]  ;;  %v9632_v47 = vld [vmem:[#allocation2 + $0xf8] sm:$0x7] }
 0x202   : > { %13811 = vst [vmem:[#allocation172_spill] sm:$0xff] %v9630_v0  ;;  %13812 = vst [vmem:[#allocation173_spill] sm:$0xff] %v9632_v47  ;;  %v3870_v45 = vld [vmem:[#allocation2 + $0xf0] sm:$0xf8]  ;;  %v13813_v39 = vmax.f32 %v9464_v32, 0.0  ;;  %v9645_v60 = vrot.slane %v2727_v14, 2 }
 0x203   : > { %13814 = vst [vmem:[#allocation174_spill] sm:$0xff] %v9639_v34  ;;  %13815 = vst [vmem:[#allocation175_spill] sm:$0xff] %v9643_v27  ;;  %v9647_v4 = vrot.slane %v2730_v41, 3  ;;  %v9649_v54 = vrot.slane %v2735_v18, 2  ;;  %v9651_v21 = vrot.slane %v2738_v43, 3  ;;  %v4143_v0 = vshll.u32 %v3870_v45, 16 }
 0x204   : > { %v818_v36 = vmin.f32 %v13813_v39, 6.0  ;;  %13816 = vst [vmem:[#allocation176_spill] sm:$0xff] %v9645_v60  ;;  %v3871_v51 = vld [vmem:[#allocation2 + $0xf8] sm:$0xf]  ;;  %v4140_v39 = vshrl.u32 %v3870_v45, 16 }
 0x205   : > { %13817 = vst [vmem:[#allocation177_spill] sm:$0xff] %v9647_v4  ;;  %13818 = vst [vmem:[#allocation178_spill] sm:$0xff] %v9649_v54  ;;  %v4148_v37 = vshrl.u32 %v3871_v51, 16  ;;  %v9654_v3 = vld [vmem:[#allocation2 + $0xf0] sm:$0xf0]  ;;  %v4151_v41 = vshll.u32 %v3871_v51, 16 }
 0x206   : > { %13819 = vst [vmem:[#allocation179_spill] sm:$0xff] %v9651_v21  ;;  %13820 = vst [vmem:[#allocation180_spill] sm:$0xff] %v9654_v3  ;;  %v1510_v9 = vld [vmem:[#allocation2 + $0x40] sm:$0xf0]  ;;  %v1511_v15 = vld [vmem:[#allocation2 + $0x48] sm:$0xf] }
 0x207   : > { %v1827_v8 = vld [vmem:[#allocation2 + $0x30] sm:$0xf0]  ;;  %v9660_v43 = vld [vmem:[#allocation2 + $0xf8] sm:$0xf]  ;;  %v9665_v45 = vrot.slane %v4140_v39, 3  ;;  %v9667_v47 = vrot.slane %v4143_v0, 4  ;;  %v892_v0 = vpack.c.bf16 %v818_v36, %v9472_v33 }
 0x208   : > { %13821 = vst [vmem:[#allocation181_spill] sm:$0xff] %v9660_v43  ;;  %v9663_v32 = vld [vmem:[#allocation2 + $0xf0] sm:$0xf0]  ;;  %v9669_v7 = vrot.slane %v4148_v37, 3  ;;  %v9672_v24 = vld [vmem:[#allocation2 + $0xf8] sm:$0x1f] }
 0x209   : > { %13822 = vst [vmem:[#allocation182_spill] sm:$0xff] %v9663_v32  ;;  %13823 = vst [vmem:[#allocation183_spill] sm:$0xff] %v9665_v45  ;;  %v9674_v14 = vrot.slane %v4151_v41, 4  ;;  %v1828_v3 = vld [vmem:[#allocation2 + $0x38] sm:$0x1f]  ;;  %v13828_v37 = vshrl.u32 %v9462_v30, 16  ;;  %v13830_v30 = vor.u32 %v9454_v19, %v9121_v50 }
 0x20a   : > { %13824 = vst [vmem:[#allocation184_spill] sm:$0xff] %v9667_v47  ;;  %13825 = vst [vmem:[#allocation185_spill] sm:$0xff] %v9669_v7  ;;  %v1064_v43 = vrot.slane %v13829_v44, 4  ;;  %v1829_v47 = vld [vmem:[#allocation2 + $0x40] sm:$0xf0]  ;;  %v1585_v41 = vrot.slane %v1510_v9, 4 }
 0x20b   : > { %13826 = vst [vmem:[#allocation186_spill] sm:$0xff] %v9672_v24  ;;  %13827 = vst [vmem:[#allocation187_spill] sm:$0xff] %v9674_v14  ;;  %v1061_v7 = vrot.slane %v13828_v37, 3  ;;  %v1586_v14 = vrot.slane %v1511_v15, 4  ;;  %v1880_v45 = vshrl.u32 %v1827_v8, 16  ;;  %v1883_v51 = vshll.u32 %v1827_v8, 16 }
 0x20c   : > { %v924_v60 = vrot.slane %v892_v0, 4  ;;  %v1888_v32 = vshrl.u32 %v1828_v3, 16  ;;  %v1891_v42 = vshll.u32 %v1828_v3, 16  ;;  %v1897_v36 = vshrl.u32 %v1829_v47, 16  ;;  %v1830_v9 = vld [vmem:[#allocation2 + $0x48] sm:$0x1f] }
 0x20d   : > { %v1065_v18 = vor.u32 %v1064_v43, %v1061_v7  ;;  %v9686_v4 = vsel %vm1578_vm1, %v1585_v41, %v1586_v14  ;;  %v1882_v39 = vrot.slane %v1880_v45, 4  ;;  %v1885_v33 = vrot.slane %v1883_v51, 5  ;;  %v2430_v14 = vld [vmem:[#allocation2 + $0x20] sm:$0xfc] }
 0x20e   : > { %971 = vst [vmem:[#allocation2 + $0x118] ss:$-4 sps:$4 sm:$0xff] %v924_v60   ;;  %v1777_v3 = vmul.bf16 %v8976_v5, %v9686_v4  ;;  %v1890_v45 = vrot.slane %v1888_v32, 4  ;;  %v1893_v51 = vrot.slane %v1891_v42, 5  ;;  %v1899_v0 = vrot.slane %v1897_v36, 4 }
 0x20f   : > { %v9692_v44 = vsel %vm1015_vm0, %v13830_v30, %v1065_v18  ;;  %v1886_v19 = vor.u32 %v1885_v33, %v1882_v39  ;;  %v2431_v18 = vld [vmem:[#allocation2 + $0x28] sm:$0x7]  ;;  %v1900_v41 = vshll.u32 %v1829_v47, 16  ;;  %v1905_v30 = vshrl.u32 %v1830_v9, 16  ;;  %v2432_v36 = vld [vmem:[#allocation2 + $0x30] sm:$0xfc] }
 0x210   : > { %v1474_v50 = vmul.bf16 %v8994_v26, %v9692_v44  ;;  %v1793_v43 = vadd.bf16 %v1777_v3, %v9598_v22  ;;  %v1908_v8 = vshll.u32 %v1830_v9, 16  ;;  %v1894_v15 = vor.u32 %v1893_v51, %v1890_v45 }
 0x211   : > { %v2506_v7 = vshrl.u32 %v2430_v14, 16  ;;  %v2509_v24 = vshll.u32 %v2430_v14, 16  ;;  %v2514_v60 = vshrl.u32 %v2431_v18, 16  ;;  %v1902_v21 = vrot.slane %v1900_v41, 5 }
 0x212   : > { %v1490_v37 = vadd.bf16 %v1474_v50, %v9160_v20  ;;  %v1907_v26 = vrot.slane %v1905_v30, 4  ;;  %v1910_v39 = vrot.slane %v1908_v8, 5  ;;  %v9709_v33 = vsel %vm1861_vm2, %v1886_v19, %v1894_v15  ;;  %v2433_v8 = vld [vmem:[#allocation2 + $0x38] sm:$0x7] }
 0x213   : > { %v2508_v22 = vrot.slane %v2506_v7, 2  ;;  %v2511_v32 = vrot.slane %v2509_v24, 3  ;;  %v2516_v42 = vrot.slane %v2514_v60, 2  ;;  %v1903_v47 = vor.u32 %v1902_v21, %v1899_v0 }
 0x214   : > { %v1809_v54 = vadd.bf16 %v1793_v43, %v1490_v37  ;;  %v1911_v9 = vor.u32 %v1910_v39, %v1907_v26  ;;  %v2260_v14 = vmul.bf16 %v9016_v12, %v9709_v33  ;;  %v13834_v26 = vmul.bf16 %v9008_v62, %v9003_v49 }
 0x215   : > { %v9711_v3 = vld [vmem:[#allocation2 + $0x110] sm:$0xfc]  ;;  %v9713_v20 = vld [vmem:[#allocation2 + $0x118] sm:$0x7]  ;;  %v2512_v43 = vor.u32 %v2511_v32, %v2508_v22  ;;  %v2517_v45 = vshll.u32 %v2431_v18, 16  ;;  %v2523_v41 = vshrl.u32 %v2432_v36, 16 }
 0x216   : > { %13831 = vst [vmem:[#allocation188_spill] sm:$0xff] %v9711_v3  ;;  %13832 = vst [vmem:[#allocation189_spill] sm:$0xff] %v9713_v20  ;;  %v9724_v19 = vsel %vm1861_vm2, %v1903_v47, %v1911_v9  ;;  %v2276_v21 = vadd.bf16 %v2260_v14, %v13834_v26  ;;  %v2526_v39 = vshll.u32 %v2432_v36, 16  ;;  %v2531_v47 = vshrl.u32 %v2433_v8, 16 }
 0x217   : > { %13833 = vst [vmem:[#allocation190_spill] sm:$0xff] %v9724_v19  ;;  %v2315_v37 = vmul.bf16 %v9019_v31, %v9724_v19  ;;  %v2519_v30 = vrot.slane %v2517_v45, 3  ;;  %v2534_v9 = vshll.u32 %v2433_v8, 16  ;;  %v2525_v24 = vrot.slane %v2523_v41, 2 }
 0x218   : > { %v13835_v49 = vshrl.u32 %v9036_v52, 16  ;;  %v13836_v18 = vshll.u32 %v9036_v52, 16  ;;  %v2528_v26 = vrot.slane %v2526_v39, 3  ;;  %v2533_v7 = vrot.slane %v2531_v47, 2 }
 0x219   : > { %v2331_v60 = vadd.bf16 %v2315_v37, %v2276_v21  ;;  %v2520_v14 = vor.u32 %v2519_v30, %v2516_v42  ;;  %v2536_v15 = vrot.slane %v2534_v9, 3  ;;  %v13837_v50 = vshrl.u32 %v9038_v53, 16  ;;  %v3264_v9 = vld [vmem:[#allocation2] sm:$0xf8] }
 0x21a   : > { %v2542_v22 = vrot.slane %v13835_v49, 2  ;;  %v2545_v32 = vrot.slane %v13836_v18, 3  ;;  %v13838_v36 = vshll.u32 %v9038_v53, 16  ;;  %v2529_v37 = vor.u32 %v2528_v26, %v2525_v24  ;;  %v3266_v26 = vld [vmem:[#allocation2 + $0x10] sm:$0xf8] }
 0x21b   : > { %v2347_v51 = vadd.bf16 %v2331_v60, %v1809_v54  ;;  %v2550_v45 = vrot.slane %v13837_v50, 2  ;;  %v9744_v21 = vsel %vm2470_vm3, %v2512_v43, %v2520_v14  ;;  %v2537_v41 = vor.u32 %v2536_v15, %v2533_v7  ;;  %v8389_v7 = vld [vmem:[#allocation9] sm:$0xf]  ;;  %v3265_v14 = vld [vmem:[#allocation2 + $0x8] sm:$0x7] }
 0x21c   : > { %v2546_v0 = vor.u32 %v2545_v32, %v2542_v22  ;;  %v2553_v8 = vrot.slane %v13838_v36, 3  ;;  %13839 = vst [vmem:[#allocation191_spill] sm:$0xff] %v9744_v21  ;;  %v13840_v52 = vshrl.u32 %v9101_v58, 16  ;;  %v13841_v54 = vshll.u32 %v9101_v58, 16  ;;  %v3274_v15 = vld [vmem:[#allocation2 + $0x50] sm:$0xf8] }
 0x21d   : > { %v2370_v42 = vadd.bf16 %v9027_v40, %v2347_v51  ;;  %v13842_v39 = vshrl.u32 %v9107_v25, 16  ;;  %v9754_v53 = vsel %vm2470_vm3, %v2529_v37, %v2537_v41  ;;  %v13844_v43 = vshll.u32 %v9107_v25, 16  ;;  %v3267_v37 = vld [vmem:[#allocation2 + $0x18] sm:$0x7]  ;;  %v3268_v41 = vld [vmem:[#allocation2 + $0x20] sm:$0xf8] }
 0x21e   : > { %v2559_v49 = vrot.slane %v13840_v52, 2  ;;  %v2554_v30 = vor.u32 %v2553_v8, %v2550_v45  ;;  %v2562_v60 = vrot.slane %v13841_v54, 3  ;;  %13843 = vst [vmem:[#allocation192_spill] sm:$0xff] %v9754_v53  ;;  %v2944_v24 = vshrl.u32 %v8389_v7, 16  ;;  %v3272_v7 = vld [vmem:[#allocation2 + $0x40] sm:$0xf8] }
 0x21f   : > { %v2567_v50 = vrot.slane %v13842_v39, 2  ;;  %v2570_v47 = vrot.slane %v13844_v43, 3  ;;  %v13845_v51 = vmov 0   ;;  %v3006_v32 = vmul.bf16 %v9076_v17, %v9744_v21  ;;  %v3270_v39 = vld [vmem:[#allocation2 + $0x30] sm:$0xf8] }
 0x220   : > { %v2386_v22 = vmax.bf16 %v13845_v51, %v2370_v42  ;;  %v9762_v58 = vsel %vm2470_vm3, %v2546_v0, %v2554_v30  ;;  %v2563_v18 = vor.u32 %v2562_v60, %v2559_v49  ;;  %v9766_v25 = vpack.i.b16 %v2944_v24, %v2944_v24  ;;  %v3269_v42 = vld [vmem:[#allocation2 + $0x28] sm:$0x7] }
 0x221   : > { %13846 = vst [vmem:[#allocation193_spill] sm:$0xff] %v9762_v58  ;;  %v2571_v45 = vor.u32 %v2570_v47, %v2567_v50  ;;  %v3056_v36 = vshrl.u32 %v9358_v6, 16  ;;  %v3119_v8 = vmul.bf16 %v9091_v23, %v9762_v58  ;;  %v13167_v52 = vmov 1086341312   ;;  %v3271_v50 = vld [vmem:[#allocation2 + $0x38] sm:$0x7] }
 0x222   : > { %v9772_v0 = vmin.bf16 %v13167_v52, %v2386_v22  ;;  %v3169_v49 = vshrl.u32 %v9481_v29, 16  ;;  %v3353_v30 = vrot.slane %v3264_v9, 3  ;;  %v9780_v6 = vrot.slane %v9766_v25, %v8951_v55 }
 0x223   : > { %v9776_v54 = vsel %vm2470_vm3, %v2563_v18, %v2571_v45  ;;  %v9782_v60 = vpack.i.b16 %v3056_v36, %v3056_v36  ;;  %v3354_v43 = vrot.slane %v3265_v14, 3  ;;  %v3356_v24 = vrot.slane %v3266_v26, 3  ;;  %v3273_v36 = vld [vmem:[#allocation2 + $0x48] sm:$0x7]  ;;  %v3275_v26 = vld [vmem:[#allocation2 + $0x58] sm:$0x7] }
 0x224   : > { %13847 = vst [vmem:[#allocation194_spill] sm:$0xff] %v9772_v0  ;;  %13848 = vst [vmem:[#allocation195_spill] sm:$0xff] %v9776_v54  ;;  %v9784_v47 = vpack.i.b16 %v3169_v49, %v3169_v49  ;;  %v3357_v29 = vrot.slane %v3267_v37, 3  ;;  %v3359_v22 = vrot.slane %v3268_v41, 3  ;;  %v2951_v9 = vmul.bf16 %v9780_v6, %v9087_v61 }
 0x225   : > { %13849 = vst [vmem:[#allocation196_spill] sm:$0xff] %v9780_v6  ;;  %v9792_v45 = vrot.slane %v9782_v60, %v8955_v57  ;;  %v3355_v14 = vsel %vm3352_vm4, %v3353_v30, %v3354_v43  ;;  %v3360_v41 = vrot.slane %v3269_v42, 3  ;;  %v3362_v52 = vrot.slane %v3270_v39, 3 }
 0x226   : > { %v9797_v49 = vrot.slane %v9784_v47, %v8960_v63  ;;  %v9800_v37 = vsel %vm3352_vm4, %v3356_v24, %v3357_v29  ;;  %v13853_v18 = vmul.bf16 %v9052_v13, %v9034_v48  ;;  %v3363_v40 = vrot.slane %v3271_v50, 3 }
 0x227   : > { %13850 = vst [vmem:[#allocation197_spill] sm:$0xff] %v9792_v45  ;;  %13852 = vst [vmem:[#allocation199_spill] sm:$0xff] %v9800_v37  ;;  %v3063_v3 = vmul.bf16 %v9792_v45, %v9754_v53  ;;  %v3365_v0 = vrot.slane %v3272_v7, 3  ;;  %v9810_v43 = vsel %vm3352_vm4, %v3359_v22, %v3360_v41  ;;  %v3366_v51 = vrot.slane %v3273_v36, 3  ;;  %v8387_v7 = vld [vmem:[#allocation10 + $0x38] sm:$0xff]  }
 0x228   : > { %13851 = vst [vmem:[#allocation198_spill] sm:$0xff] %v9797_v49  ;;  %v2967_v20 = vadd.bf16 %v2951_v9, %v13853_v18  ;;  %v3176_v30 = vmul.bf16 %v9797_v49, %v9776_v54  ;;  %13854 = vst [vmem:[#allocation200_spill] sm:$0xff] %v9810_v43  ;;  %v3368_v24 = vrot.slane %v3274_v15, 3  ;;  %v9813_v42 = vsel %vm3352_vm4, %v3362_v52, %v3363_v40  ;;  %v8390_v15 = vld [vmem:[#allocation9 + $0x4] sm:$0xf]  ;;  %v13862_v52 = vld [vmem:[#allocation114_spill] sm:$0xff] }
 0x229   : > { %13855 = vst [vmem:[#allocation201_spill] sm:$0xff] %v9813_v42  ;;  %v3369_v39 = vrot.slane %v3275_v26, 3  ;;  %v13856_v48 = vrot.slane %v9078_v28, 3  ;;  %v13857_v9 = vrot.slane %v9070_v59, 3  ;;  %v9823_v18 = vsel %vm3352_vm4, %v3365_v0, %v3366_v51  ;;  %v3840_v0 = vld [vmem:[#allocation2] sm:$0xf8]  ;;  %8239 = vmatprep.subr.bf16.mxu1 %v8387_v7 }
 0x22a   : > { %v3022_v29 = vadd.bf16 %v3006_v32, %v2967_v20  ;;  %13859 = vst [vmem:[#allocation203_spill] sm:$0xff] %v9823_v18  ;;  %v9827_v22 = vrot.slane %v9766_v25, %v8953_v56  ;;  %v3519_v40 = vmul.bf16 %v9351_v38, %v9800_v37  ;;  %v3567_v32 = vshrl.u32 %v8390_v15, 16  ;;  %8240 = vmatpush3.bf16.msra.mxu1 %v8387_v7  ;;  %v8392_v15 = vld [vmem:[#allocation9 + $0x14] sm:$0xf] }
 0x22b   : > { %v9820_v50 = vsel %vm3352_vm4, %v13857_v9, %v13856_v48  ;;  %v9834_v59 = vsel %vm3352_vm4, %v3368_v24, %v3369_v39  ;;  %v3628_v51 = vmul.bf16 %v13862_v52, %v9813_v42  ;;  %v8391_v48 = vld [vmem:[#allocation9 + $0xc] sm:$0xf]  ;;  %v3785_v20 = vshrl.u32 %v8392_v15, 16  ;;  %v3846_v45 = vld [vmem:[#allocation2 + $0x30] sm:$0xf8] }
 0x22c   : > { %13858 = vst [vmem:[#allocation202_spill] sm:$0xff] %v9820_v50  ;;  %13860 = vst [vmem:[#allocation204_spill] sm:$0xff] %v9827_v22  ;;  %v3079_v28 = vadd.bf16 %v3063_v3, %v3022_v29  ;;  %v3483_v36 = vmul.bf16 %v9827_v22, %v3355_v14  ;;  %v3676_v3 = vshrl.u32 %v8391_v48, 16  ;;  %v3841_v29 = vld [vmem:[#allocation2 + $0x8] sm:$0xf]  ;;  %v9843_v39 = vpack.i.b16 %v3567_v32, %v3567_v32 }
 0x22d   : > { %13861 = vst [vmem:[#allocation205_spill] sm:$0xff] %v9834_v59  ;;  %v3737_v9 = vmul.bf16 %v9602_v11, %v9834_v59  ;;  %v3885_v42 = vshrl.u32 %v3840_v0, 16  ;;  %v3888_v26 = vshll.u32 %v3840_v0, 16  ;;  %v9853_v48 = vpack.i.b16 %v3785_v20, %v3785_v20  ;;  %v3843_v32 = vld [vmem:[#allocation2 + $0x18] sm:$0xf]  ;;  %v13866_v11 = vld [vmem:[#allocation68_spill] sm:$0xff] }
 0x22e   : > { %v3135_v24 = vadd.bf16 %v3119_v8, %v3079_v28  ;;  %v3535_v52 = vadd.bf16 %v3519_v40, %v3483_v36  ;;  %v9847_v14 = vpack.i.b16 %v3676_v3, %v3676_v3  ;;  %v9851_v41 = vrot.slane %v9843_v39, %v8951_v55  ;;  %v3842_v8 = vld [vmem:[#allocation2 + $0x10] sm:$0xf8]  ;;  %v13865_v3 = vld [vmem:[#allocation83_spill] sm:$0xff] }
 0x22f   : > { %v3893_v7 = vshrl.u32 %v3841_v29, 16  ;;  %v3887_v15 = vrot.slane %v3885_v42, 3  ;;  %v3890_v40 = vrot.slane %v3888_v26, 4  ;;  %v3896_v36 = vshll.u32 %v3841_v29, 16  ;;  %v3844_v59 = vld [vmem:[#allocation2 + $0x20] sm:$0xf8] }
 0x230   : > { %v3192_v38 = vadd.bf16 %v3176_v30, %v3135_v24  ;;  %13863 = vst [vmem:[#allocation206_spill] sm:$0xff] %v9851_v41  ;;  %v9857_v28 = vrot.slane %v9847_v14, %v8955_v57  ;;  %v13867_v0 = vmul.bf16 %v13865_v3, %v13866_v11  ;;  %v3574_v24 = vmul.bf16 %v9851_v41, %v9810_v43 }
 0x231   : > { %v9868_v20 = vrot.slane %v9853_v48, %v8960_v63  ;;  %v3895_v37 = vrot.slane %v3893_v7, 3  ;;  %v3891_v42 = vor.u32 %v3890_v40, %v3887_v15  ;;  %v3898_v26 = vrot.slane %v3896_v36, 4 }
 0x232   : > { %13864 = vst [vmem:[#allocation207_spill] sm:$0xff] %v9857_v28  ;;  %v9862_v30 = vadd.bf16 %v13867_v0, %v3192_v38  ;;  %v3683_v22 = vmul.bf16 %v9857_v28, %v9823_v18  ;;  %v3902_v29 = vshrl.u32 %v3842_v8, 16  ;;  %v3590_v31 = vadd.bf16 %v3574_v24, %v3535_v52  ;;  %v3845_v0 = vld [vmem:[#allocation2 + $0x28] sm:$0xf]  ;;  %v3847_v28 = vld [vmem:[#allocation2 + $0x38] sm:$0xf] }
 0x233   : > { %13868 = vst [vmem:[#allocation208_spill] sm:$0xff] %v9868_v20  ;;  %v3792_v38 = vmul.bf16 %v9868_v20, %v9820_v50  ;;  %v3905_v3 = vshll.u32 %v3842_v8, 16  ;;  %v3910_v49 = vshrl.u32 %v3843_v32, 16  ;;  %v3899_v41 = vor.u32 %v3898_v26, %v3895_v37  ;;  %v3848_v37 = vld [vmem:[#allocation2 + $0x40] sm:$0xf8] }
 0x234   : > { %v3904_v43 = vrot.slane %v3902_v29, 3  ;;  %v3913_v11 = vshll.u32 %v3843_v32, 16  ;;  %v3919_v23 = vshrl.u32 %v3844_v59, 16  ;;  %v3644_v54 = vadd.bf16 %v3628_v51, %v3590_v31  ;;  %v3849_v51 = vld [vmem:[#allocation2 + $0x48] sm:$0xf] }
 0x235   : > { %v3907_v7 = vrot.slane %v3905_v3, 4  ;;  %v3912_v58 = vrot.slane %v3910_v49, 3  ;;  %v3922_v17 = vshll.u32 %v3844_v59, 16  ;;  %v9875_v15 = vsel %vm1015_vm0, %v3891_v42, %v3899_v41 }
 0x236   : > { %v3915_v52 = vrot.slane %v3913_v11, 4  ;;  %v3921_v40 = vrot.slane %v3919_v23, 3  ;;  %v3927_v36 = vshrl.u32 %v3845_v0, 16  ;;  %v3699_v24 = vadd.bf16 %v3683_v22, %v3644_v54  ;;  %v3850_v54 = vld [vmem:[#allocation2 + $0x50] sm:$0xf8] }
 0x237   : > { %v3908_v20 = vor.u32 %v3907_v7, %v3904_v43  ;;  %v3924_v8 = vrot.slane %v3922_v17, 4  ;;  %v3930_v50 = vshll.u32 %v3845_v0, 16  ;;  %v3936_v29 = vshrl.u32 %v3846_v45, 16  ;;  %v3851_v0 = vld [vmem:[#allocation2 + $0x58] sm:$0xf] }
 0x238   : > { %v3916_v26 = vor.u32 %v3915_v52, %v3912_v58  ;;  %v3929_v32 = vrot.slane %v3927_v36, 3  ;;  %v3939_v31 = vshll.u32 %v3846_v45, 16  ;;  %v3753_v3 = vadd.bf16 %v3737_v9, %v3699_v24 }
 0x239   : > { %v3925_v49 = vor.u32 %v3924_v8, %v3921_v40  ;;  %v3932_v59 = vrot.slane %v3930_v50, 4  ;;  %v3944_v18 = vshrl.u32 %v3847_v28, 16  ;;  %v3938_v11 = vrot.slane %v3936_v29, 3 }
 0x23a   : > { %v9878_v41 = vsel %vm1015_vm0, %v3908_v20, %v3916_v26  ;;  %v3941_v23 = vrot.slane %v3939_v31, 4  ;;  %v3947_v42 = vshll.u32 %v3847_v28, 16  ;;  %v9880_v43 = vadd.bf16 %v3792_v38, %v3753_v3 }
 0x23b   : > { %13869 = vst [vmem:[#allocation209_spill] sm:$0xff] %v9878_v41  ;;  %v3933_v17 = vor.u32 %v3932_v59, %v3929_v32  ;;  %v3946_v22 = vrot.slane %v3944_v18, 3  ;;  %v3953_v58 = vshrl.u32 %v3848_v37, 16  ;;  %v3956_v52 = vshll.u32 %v3848_v37, 16  ;;  %v13872_v59 = vld [vmem:[#allocation34_spill] sm:$0xff] }
 0x23c   : > { %v3942_v7 = vor.u32 %v3941_v23, %v3938_v11  ;;  %v3949_v45 = vrot.slane %v3947_v42, 4  ;;  %v3961_v9 = vshrl.u32 %v3849_v51, 16  ;;  %v3964_v36 = vshll.u32 %v3849_v51, 16 }
 0x23d   : > { %v9885_v20 = vsel %vm1015_vm0, %v3925_v49, %v3933_v17  ;;  %v3955_v40 = vrot.slane %v3953_v58, 3  ;;  %v3958_v24 = vrot.slane %v3956_v52, 4  ;;  %v3970_v8 = vshrl.u32 %v3850_v54, 16 }
 0x23e   : > { %13870 = vst [vmem:[#allocation210_spill] sm:$0xff] %v9885_v20  ;;  %v3950_v28 = vor.u32 %v3949_v45, %v3946_v22  ;;  %v3963_v38 = vrot.slane %v3961_v9, 3  ;;  %v3966_v26 = vrot.slane %v3964_v36, 4  ;;  %v3973_v18 = vshll.u32 %v3850_v54, 16  ;;  %v13875_v45 = vld [vmem:[#allocation35_spill] sm:$0xff] }
 0x23f   : > { %v3978_v32 = vshrl.u32 %v3851_v0, 16  ;;  %v3981_v29 = vshll.u32 %v3851_v0, 16  ;;  %v3959_v37 = vor.u32 %v3958_v24, %v3955_v40  ;;  %v3972_v3 = vrot.slane %v3970_v8, 3 }
 0x240   : > { %v9888_v31 = vsel %vm1015_vm0, %v3942_v7, %v3950_v28  ;;  %v13873_v11 = vshrl.u32 %v13872_v59, 16  ;;  %v3967_v49 = vor.u32 %v3966_v26, %v3963_v38  ;;  %v3975_v42 = vrot.slane %v3973_v18, 4  ;;  %v13878_v7 = vld [vmem:[#allocation130_spill] sm:$0xff] }
 0x241   : > { %13871 = vst [vmem:[#allocation211_spill] sm:$0xff] %v9888_v31  ;;  %v3980_v17 = vrot.slane %v3978_v32, 3  ;;  %v3983_v51 = vrot.slane %v3981_v29, 4  ;;  %v13874_v22 = vshll.u32 %v13872_v59, 16  ;;  %v13876_v52 = vshrl.u32 %v13875_v45, 16 }
 0x242   : > { %v3989_v23 = vrot.slane %v13873_v11, 3  ;;  %v13877_v0 = vshll.u32 %v13875_v45, 16  ;;  %v4322_v40 = vmul.bf16 %v13878_v7, %v9875_v15  ;;  %v9901_v36 = vsel %vm1015_vm0, %v3959_v37, %v3967_v49  ;;  %v4666_v29 = vld [vmem:[#allocation2] sm:$0xf0]  ;;  %v4667_v59 = vld [vmem:[#allocation2 + $0x8] sm:$0xf] }
 0x243   : > { %v3992_v58 = vrot.slane %v13874_v22, 4  ;;  %v3997_v54 = vrot.slane %v13876_v52, 3  ;;  %13879 = vst [vmem:[#allocation34_spill] sm:$0xff] %v9901_v36  ;;  %v3976_v28 = vor.u32 %v3975_v42, %v3972_v3  ;;  %v3984_v24 = vor.u32 %v3983_v51, %v3980_v17  ;;  %v4668_v15 = vld [vmem:[#allocation2 + $0x10] sm:$0xf0]  ;;  %v13882_v3 = vld [vmem:[#allocation131_spill] sm:$0xff] }
 0x244   : > { %v4000_v9 = vrot.slane %v13877_v0, 4  ;;  %v9909_v32 = vrot.slane %v9843_v39, %v8953_v56  ;;  %v4410_v11 = vmul.bf16 %v13882_v3, %v9885_v20  ;;  %v13884_v49 = vld [vmem:[#allocation132_spill] sm:$0xff]  ;;  %v4669_v17 = vld [vmem:[#allocation2 + $0x18] sm:$0xf]  ;;  %v4672_v0 = vld [vmem:[#allocation2 + $0x30] sm:$0xf0] }
 0x245   : > { %v3993_v8 = vor.u32 %v3992_v58, %v3989_v23  ;;  %v9912_v37 = vsel %vm1015_vm0, %v3976_v28, %v3984_v24  ;;  %v9918_v23 = vrot.slane %v9782_v60, %v8951_v55  ;;  %v4514_v42 = vmul.bf16 %v13884_v49, %v9901_v36  ;;  %v4670_v51 = vld [vmem:[#allocation2 + $0x20] sm:$0xf0]  ;;  %v4671_v22 = vld [vmem:[#allocation2 + $0x28] sm:$0xf]  ;;  %v4676_v18 = vld [vmem:[#allocation2 + $0x50] sm:$0xf0] }
 0x246   : > { %v4001_v26 = vor.u32 %v4000_v9, %v3997_v54  ;;  %13880 = vst [vmem:[#allocation35_spill] sm:$0xff] %v9909_v32  ;;  %13881 = vst [vmem:[#allocation212_spill] sm:$0xff] %v9912_v37  ;;  %v4358_v45 = vmul.bf16 %v9909_v32, %v9878_v41  ;;  %v9931_v54 = vrot.slane %v9784_v47, %v8955_v57  ;;  %v4673_v9 = vld [vmem:[#allocation2 + $0x38] sm:$0xf]  ;;  %v4674_v28 = vld [vmem:[#allocation2 + $0x40] sm:$0xf0] }
 0x247   : > { %13883 = vst [vmem:[#allocation213_spill] sm:$0xff] %v9918_v23  ;;  %v4462_v24 = vmul.bf16 %v9918_v23, %v9888_v31  ;;  %v4754_v38 = vrot.slane %v4666_v29, 4  ;;  %v4755_v50 = vrot.slane %v4667_v59, 4  ;;  %v4677_v36 = vld [vmem:[#allocation2 + $0x58] sm:$0xf]  ;;  %v4757_v20 = vrot.slane %v4668_v15, 4 }
 0x248   : > { %v9923_v58 = vsel %vm1015_vm0, %v3993_v8, %v4001_v26  ;;  %13886 = vst [vmem:[#allocation215_spill] sm:$0xff] %v9931_v54  ;;  %v4675_v26 = vld [vmem:[#allocation2 + $0x48] sm:$0xf]  ;;  %v4374_v49 = vadd.bf16 %v4358_v45, %v4322_v40  ;;  %v4566_v52 = vmul.bf16 %v9931_v54, %v9912_v37  ;;  %v4678_v3 = vld [vmem:[#allocation2 + $0x60] sm:$0xf0]  ;;  %v4758_v32 = vrot.slane %v4669_v17, 4 }
 0x249   : > { %13885 = vst [vmem:[#allocation214_spill] sm:$0xff] %v9923_v58  ;;  %v4618_v8 = vmul.bf16 %v9624_v46, %v9923_v58  ;;  %v4679_v41 = vld [vmem:[#allocation2 + $0x68] sm:$0xf]  ;;  %v4756_v7 = vsel %vm1578_vm1, %v4754_v38, %v4755_v50  ;;  %v4760_v53 = vrot.slane %v4670_v51, 4  ;;  %v4761_v23 = vrot.slane %v4671_v22, 4 }
 0x24a   : > { %v4763_v31 = vrot.slane %v4672_v0, 4  ;;  %v4426_v21 = vadd.bf16 %v4410_v11, %v4374_v49  ;;  %v9941_v46 = vsel %vm1578_vm1, %v4757_v20, %v4758_v32  ;;  %v4764_v29 = vrot.slane %v4673_v9, 4 }
 0x24b   : > { %13887 = vst [vmem:[#allocation216_spill] sm:$0xff] %v9941_v46  ;;  %v4766_v59 = vrot.slane %v4674_v28, 4  ;;  %v9944_v40 = vsel %vm1578_vm1, %v4760_v53, %v4761_v23  ;;  %v4767_v45 = vrot.slane %v4675_v26, 4  ;;  %v4769_v54 = vrot.slane %v4676_v18, 4  ;;  %v5228_v18 = vld [vmem:[#allocation2] sm:$0xf0] }
 0x24c   : > { %13888 = vst [vmem:[#allocation217_spill] sm:$0xff] %v9944_v40  ;;  %v4770_v58 = vrot.slane %v4677_v36, 4  ;;  %v4478_v15 = vadd.bf16 %v4462_v24, %v4426_v21  ;;  %v9947_v17 = vsel %vm1578_vm1, %v4763_v31, %v4764_v29  ;;  %v4772_v50 = vrot.slane %v4678_v3, 4  ;;  %v5230_v28 = vld [vmem:[#allocation2 + $0x10] sm:$0xf0] }
 0x24d   : > { %13889 = vst [vmem:[#allocation218_spill] sm:$0xff] %v9947_v17  ;;  %v4773_v38 = vrot.slane %v4679_v41, 4  ;;  %v9950_v51 = vsel %vm1578_vm1, %v4766_v59, %v4767_v45  ;;  %v9957_v32 = vrot.slane %v9766_v25, %v8960_v63  ;;  %v4920_v53 = vmul.bf16 %v9628_v35, %v9941_v46  ;;  %v5231_v59 = vld [vmem:[#allocation2 + $0x18] sm:$0x1f]  ;;  %v6066_v35 = vld [vmem:[#allocation2 + $0x60] sm:$0xe0] }
 0x24e   : > { %13890 = vst [vmem:[#allocation219_spill] sm:$0xff] %v9950_v51  ;;  %v9953_v20 = vsel %vm1578_vm1, %v4769_v54, %v4770_v58  ;;  %v4530_v36 = vadd.bf16 %v4514_v42, %v4478_v15  ;;  %v9968_v31 = vrot.slane %v9782_v60, %v8953_v56  ;;  %v5024_v49 = vmul.bf16 %v9639_v34, %v9947_v17  ;;  %v5229_v42 = vld [vmem:[#allocation2 + $0x8] sm:$0x1f] }
 0x24f   : > { %13891 = vst [vmem:[#allocation220_spill] sm:$0xff] %v9953_v20  ;;  %13892 = vst [vmem:[#allocation221_spill] sm:$0xff] %v9957_v32  ;;  %v9962_v21 = vsel %vm1578_vm1, %v4772_v50, %v4773_v38  ;;  %v4884_v3 = vmul.bf16 %v9957_v32, %v4756_v7  ;;  %v9981_v54 = vrot.slane %v9847_v14, %v8951_v55  ;;  %v5273_v24 = vshrl.u32 %v5228_v18, 16 }
 0x250   : > { %13893 = vst [vmem:[#allocation222_spill] sm:$0xff] %v9962_v21  ;;  %13894 = vst [vmem:[#allocation223_spill] sm:$0xff] %v9968_v31  ;;  %v4582_v22 = vadd.bf16 %v4566_v52, %v4530_v36  ;;  %v4972_v58 = vmul.bf16 %v9968_v31, %v9944_v40  ;;  %v5128_v7 = vmul.bf16 %v9643_v27, %v9953_v20  ;;  %v5276_v26 = vshll.u32 %v5228_v18, 16  ;;  %v5232_v36 = vld [vmem:[#allocation2 + $0x20] sm:$0xf0] }
 0x251   : > { %13895 = vst [vmem:[#allocation224_spill] sm:$0xff] %v9981_v54  ;;  %v4936_v0 = vadd.bf16 %v4920_v53, %v4884_v3  ;;  %v9987_v9 = vrot.slane %v9853_v48, %v8955_v57  ;;  %v5076_v52 = vmul.bf16 %v9981_v54, %v9950_v51  ;;  %v5281_v45 = vshrl.u32 %v5229_v42, 16  ;;  %v5233_v27 = vld [vmem:[#allocation2 + $0x28] sm:$0x1f] }
 0x252   : > { %v4634_v29 = vadd.bf16 %v4618_v8, %v4582_v22  ;;  %v5284_v15 = vshll.u32 %v5229_v42, 16  ;;  %v5275_v53 = vrot.slane %v5273_v24, 4  ;;  %v5278_v3 = vrot.slane %v5276_v26, 5  ;;  %v5234_v24 = vld [vmem:[#allocation2 + $0x30] sm:$0xf0] }
 0x253   : > { %13896 = vst [vmem:[#allocation225_spill] sm:$0xff] %v9987_v9  ;;  %v4988_v50 = vadd.bf16 %v4972_v58, %v4936_v0  ;;  %v5180_v38 = vmul.bf16 %v9987_v9, %v9962_v21  ;;  %v13897_v23 = vadd.bf16 %v9880_v43, %v9862_v30  ;;  %v5283_v18 = vrot.slane %v5281_v45, 4  ;;  %v5235_v30 = vld [vmem:[#allocation2 + $0x38] sm:$0x1f] }
 0x254   : > { %v5286_v8 = vrot.slane %v5284_v15, 5  ;;  %v5290_v22 = vshrl.u32 %v5230_v28, 16  ;;  %v5279_v54 = vor.u32 %v5278_v3, %v5275_v53  ;;  %v5293_v20 = vshll.u32 %v5230_v28, 16  ;;  %v5236_v53 = vld [vmem:[#allocation2 + $0x40] sm:$0xf0] }
 0x255   : > { %v9996_v41 = vadd.bf16 %v4634_v29, %v13897_v23  ;;  %v5040_v11 = vadd.bf16 %v5024_v49, %v4988_v50  ;;  %v5298_v42 = vshrl.u32 %v5231_v59, 16  ;;  %v5301_v34 = vshll.u32 %v5231_v59, 16 }
 0x256   : > { %v5287_v58 = vor.u32 %v5286_v8, %v5283_v18  ;;  %v5292_v0 = vrot.slane %v5290_v22, 4  ;;  %v5307_v9 = vshrl.u32 %v5232_v36, 16  ;;  %v5295_v26 = vrot.slane %v5293_v20, 5  ;;  %v5237_v20 = vld [vmem:[#allocation2 + $0x48] sm:$0x1f] }
 0x257   : > { %v5092_v21 = vadd.bf16 %v5076_v52, %v5040_v11  ;;  %v5300_v51 = vrot.slane %v5298_v42, 4  ;;  %v5310_v31 = vshll.u32 %v5232_v36, 16  ;;  %v5303_v23 = vrot.slane %v5301_v34, 5 }
 0x258   : > { %v9999_v43 = vsel %vm1861_vm2, %v5279_v54, %v5287_v58  ;;  %v5309_v29 = vrot.slane %v5307_v9, 4  ;;  %v5315_v49 = vshrl.u32 %v5233_v27, 16  ;;  %v5296_v15 = vor.u32 %v5295_v26, %v5292_v0  ;;  %v5238_v54 = vld [vmem:[#allocation2 + $0x50] sm:$0xf0]  ;;  %v5239_v58 = vld [vmem:[#allocation2 + $0x58] sm:$0x1f] }
 0x259   : > { %v5144_v45 = vadd.bf16 %v5128_v7, %v5092_v21  ;;  %v5312_v28 = vrot.slane %v5310_v31, 5  ;;  %v5318_v50 = vshll.u32 %v5233_v27, 16  ;;  %v5304_v3 = vor.u32 %v5303_v23, %v5300_v51  ;;  %v5240_v23 = vld [vmem:[#allocation2 + $0x60] sm:$0xf0] }
 0x25a   : > { %v5317_v59 = vrot.slane %v5315_v49, 4  ;;  %v5324_v18 = vshrl.u32 %v5234_v24, 16  ;;  %v5327_v11 = vshll.u32 %v5234_v24, 16  ;;  %v5332_v22 = vshrl.u32 %v5235_v30, 16 }
 0x25b   : > { %v10001_v52 = vadd.bf16 %v5180_v38, %v5144_v45  ;;  %v5313_v36 = vor.u32 %v5312_v28, %v5309_v29  ;;  %v5320_v8 = vrot.slane %v5318_v50, 5  ;;  %v10004_v34 = vsel %vm1861_vm2, %v5296_v15, %v5304_v3 }
 0x25c   : > { %13898 = vst [vmem:[#allocation226_spill] sm:$0xff] %v10004_v34  ;;  %v5326_v9 = vrot.slane %v5324_v18, 4  ;;  %v5329_v21 = vrot.slane %v5327_v11, 5  ;;  %v5335_v7 = vshll.u32 %v5235_v30, 16  ;;  %v5334_v31 = vrot.slane %v5332_v22, 4 }
 0x25d   : > { %v5321_v51 = vor.u32 %v5320_v8, %v5317_v59  ;;  %v5341_v42 = vshrl.u32 %v5236_v53, 16  ;;  %v5344_v24 = vshll.u32 %v5236_v53, 16  ;;  %v5349_v26 = vshrl.u32 %v5237_v20, 16  ;;  %v5241_v18 = vld [vmem:[#allocation2 + $0x68] sm:$0x1f] }
 0x25e   : > { %v5330_v38 = vor.u32 %v5329_v21, %v5326_v9  ;;  %v5337_v0 = vrot.slane %v5335_v7, 5  ;;  %v5352_v45 = vshll.u32 %v5237_v20, 16  ;;  %v5358_v15 = vshrl.u32 %v5238_v54, 16 }
 0x25f   : > { %v10009_v29 = vsel %vm1861_vm2, %v5313_v36, %v5321_v51  ;;  %v5343_v49 = vrot.slane %v5341_v42, 4  ;;  %v5346_v30 = vrot.slane %v5344_v24, 5  ;;  %v5351_v50 = vrot.slane %v5349_v26, 4 }
 0x260   : > { %13899 = vst [vmem:[#allocation227_spill] sm:$0xff] %v10009_v29  ;;  %v5338_v28 = vor.u32 %v5337_v0, %v5334_v31  ;;  %v5361_v3 = vshll.u32 %v5238_v54, 16  ;;  %v5354_v59 = vrot.slane %v5352_v45, 5  ;;  %v5360_v11 = vrot.slane %v5358_v15, 4 }
 0x261   : > { %v5366_v8 = vshrl.u32 %v5239_v58, 16  ;;  %v5369_v22 = vshll.u32 %v5239_v58, 16  ;;  %v5347_v53 = vor.u32 %v5346_v30, %v5343_v49  ;;  %v5375_v7 = vshrl.u32 %v5240_v23, 16  ;;  %v13902_v58 = vld [vmem:[#allocation29_spill] sm:$0xff] }
 0x262   : > { %v10012_v9 = vsel %vm1861_vm2, %v5330_v38, %v5338_v28  ;;  %v5363_v21 = vrot.slane %v5361_v3, 5  ;;  %v5355_v36 = vor.u32 %v5354_v59, %v5351_v50  ;;  %v5378_v20 = vshll.u32 %v5240_v23, 16  ;;  %v13905_v23 = vld [vmem:[#allocation106_spill] sm:$0xff] }
 0x263   : > { %13900 = vst [vmem:[#allocation228_spill] sm:$0xff] %v10012_v9  ;;  %v5368_v51 = vrot.slane %v5366_v8, 4  ;;  %v5371_v42 = vrot.slane %v5369_v22, 5  ;;  %v5377_v31 = vrot.slane %v5375_v7, 4  ;;  %v5383_v0 = vshrl.u32 %v5241_v18, 16 }
 0x264   : > { %v5364_v27 = vor.u32 %v5363_v21, %v5360_v11  ;;  %v5386_v24 = vshll.u32 %v5241_v18, 16  ;;  %v10015_v54 = vsel %vm1861_vm2, %v5347_v53, %v5355_v36  ;;  %v5380_v45 = vrot.slane %v5378_v20, 5  ;;  %v6054_v21 = vld [vmem:[#allocation2] sm:$0xe0]  ;;  %v6056_v7 = vld [vmem:[#allocation2 + $0x10] sm:$0xe0] }
 0x265   : > { %13901 = vst [vmem:[#allocation229_spill] sm:$0xff] %v10015_v54  ;;  %v5372_v26 = vor.u32 %v5371_v42, %v5368_v51  ;;  %v10019_v38 = vrot.slane %v13902_v58, %v8955_v57  ;;  %v5385_v49 = vrot.slane %v5383_v0, 4  ;;  %v10023_v28 = vrot.slane %v9843_v39, %v8960_v63  ;;  %v13909_v51 = vld [vmem:[#allocation129_spill] sm:$0xff]  ;;  %v6058_v0 = vld [vmem:[#allocation2 + $0x20] sm:$0xe0] }
 0x266   : > { %v5388_v15 = vrot.slane %v5386_v24, 5  ;;  %v10027_v30 = vrot.slane %v13905_v23, %v8960_v63  ;;  %v5381_v3 = vor.u32 %v5380_v45, %v5377_v31  ;;  %v10050_v42 = vrot.slane %v13909_v51, %v8953_v56  ;;  %v6057_v31 = vld [vmem:[#allocation2 + $0x18] sm:$0x1f]  ;;  %v6059_v24 = vld [vmem:[#allocation2 + $0x28] sm:$0x1f] }
 0x267   : > { %13903 = vst [vmem:[#allocation29_spill] sm:$0xff] %v10019_v38  ;;  %13904 = vst [vmem:[#allocation230_spill] sm:$0xff] %v10023_v28  ;;  %v10030_v50 = vsel %vm1861_vm2, %v5364_v27, %v5372_v26  ;;  %v5710_v18 = vmul.bf16 %v10019_v38, %v9999_v43  ;;  %v5746_v22 = vmul.bf16 %v10023_v28, %v10004_v34  ;;  %v6055_v27 = vld [vmem:[#allocation2 + $0x8] sm:$0x1f]  ;;  %v6060_v8 = vld [vmem:[#allocation2 + $0x30] sm:$0xe0] }
 0x268   : > { %13906 = vst [vmem:[#allocation106_spill] sm:$0xff] %v10027_v30  ;;  %13907 = vst [vmem:[#allocation231_spill] sm:$0xff] %v10030_v50  ;;  %v5389_v11 = vor.u32 %v5388_v15, %v5385_v49  ;;  %v5798_v36 = vmul.bf16 %v10027_v30, %v10009_v29  ;;  %v10046_v43 = vrot.slane %v9847_v14, %v8953_v56  ;;  %v13912_v49 = vld [vmem:[#allocation69_spill] sm:$0xff]  ;;  %v6061_v53 = vld [vmem:[#allocation2 + $0x38] sm:$0x1f]  ;;  %v6144_v17 = vrot.slane %v6055_v27, 5 }
 0x269   : > { %13910 = vst [vmem:[#allocation129_spill] sm:$0xff] %v10050_v42  ;;  %v10054_v20 = vrot.slane %v9784_v47, %v8951_v55  ;;  %v5762_v45 = vadd.bf16 %v5746_v22, %v5710_v18  ;;  %v10061_v15 = vrot.slane %v13912_v49, %v8951_v55  ;;  %v5902_v30 = vmul.bf16 %v10050_v42, %v10015_v54  ;;  %v6062_v28 = vld [vmem:[#allocation2 + $0x40] sm:$0xe0]  ;;  %v6064_v34 = vld [vmem:[#allocation2 + $0x50] sm:$0xe0] }
 0x26a   : > { %13908 = vst [vmem:[#allocation232_spill] sm:$0xff] %v10046_v43  ;;  %v10057_v26 = vsel %vm1861_vm2, %v5381_v3, %v5389_v11  ;;  %v5850_v59 = vmul.bf16 %v10046_v43, %v10012_v9  ;;  %v6063_v3 = vld [vmem:[#allocation2 + $0x48] sm:$0x1f]  ;;  %v6143_v11 = vrot.slane %v6054_v21, 5  ;;  %v6065_v38 = vld [vmem:[#allocation2 + $0x58] sm:$0x1f] }
 0x26b   : > { %13911 = vst [vmem:[#allocation233_spill] sm:$0xff] %v10054_v20  ;;  %13913 = vst [vmem:[#allocation69_spill] sm:$0xff] %v10061_v15  ;;  %v5954_v29 = vmul.bf16 %v10054_v20, %v10030_v50  ;;  %v5814_v18 = vadd.bf16 %v5798_v36, %v5762_v45  ;;  %v6006_v22 = vmul.bf16 %v10061_v15, %v10057_v26  ;;  %v6146_v40 = vrot.slane %v6056_v7, 5  ;;  %v6067_v54 = vld [vmem:[#allocation2 + $0x68] sm:$0x1f] }
 0x26c   : > { %v6147_v46 = vrot.slane %v6057_v31, 5  ;;  %v6149_v43 = vrot.slane %v6058_v0, 5  ;;  %v6150_v9 = vrot.slane %v6059_v24, 5  ;;  %v6152_v32 = vrot.slane %v6060_v8, 5 }
 0x26d   : > { %v5866_v42 = vadd.bf16 %v5850_v59, %v5814_v18  ;;  %v6145_v20 = vsel %vm6142_vm5, %v6143_v11, %v6144_v17  ;;  %v6153_v50 = vrot.slane %v6061_v53, 5  ;;  %v6155_v37 = vrot.slane %v6062_v28, 5  ;;  %v6618_v11 = vld [vmem:[#allocation2 + $0x8] sm:$0x3f]  ;;  %v6619_v18 = vld [vmem:[#allocation2 + $0x10] sm:$0xe0] }
 0x26e   : > { %v10073_v21 = vsel %vm6142_vm5, %v6146_v40, %v6147_v46  ;;  %v10076_v36 = vsel %vm6142_vm5, %v6149_v43, %v6150_v9  ;;  %v6156_v45 = vrot.slane %v6063_v3, 5  ;;  %v6158_v27 = vrot.slane %v6064_v34, 5  ;;  %v13918_v46 = vld [vmem:[#allocation30_spill] sm:$0xff]  ;;  %v6622_v53 = vld [vmem:[#allocation2 + $0x28] sm:$0x3f] }
 0x26f   : > { %13914 = vst [vmem:[#allocation234_spill] sm:$0xff] %v10076_v36  ;;  %v5918_v7 = vadd.bf16 %v5902_v30, %v5866_v42  ;;  %v10079_v31 = vsel %vm6142_vm5, %v6152_v32, %v6153_v50  ;;  %v6159_v0 = vrot.slane %v6065_v38, 5  ;;  %v6161_v8 = vrot.slane %v6066_v35, 5  ;;  %v13922_v35 = vld [vmem:[#allocation32_spill] sm:$0xff] }
 0x270   : > { %13915 = vst [vmem:[#allocation235_spill] sm:$0xff] %v10079_v31  ;;  %v10082_v59 = vsel %vm6142_vm5, %v6155_v37, %v6156_v45  ;;  %v6162_v17 = vrot.slane %v6067_v54, 5  ;;  %v10086_v28 = vrot.slane %v9766_v25, %v8955_v57  ;;  %v10090_v40 = vrot.slane %v13918_v46, %v8955_v57  ;;  %v6617_v30 = vld [vmem:[#allocation2] sm:$0xe0] }
 0x271   : > { %13916 = vst [vmem:[#allocation236_spill] sm:$0xff] %v10082_v59  ;;  %v5970_v9 = vadd.bf16 %v5954_v29, %v5918_v7  ;;  %v10093_v34 = vsel %vm6142_vm5, %v6158_v27, %v6159_v0  ;;  %v10097_v32 = vrot.slane %v9782_v60, %v8960_v63  ;;  %v10101_v37 = vrot.slane %v13922_v35, %v8960_v63  ;;  %v6620_v7 = vld [vmem:[#allocation2 + $0x18] sm:$0x3f] }
 0x272   : > { %13917 = vst [vmem:[#allocation237_spill] sm:$0xff] %v10086_v28  ;;  %13919 = vst [vmem:[#allocation30_spill] sm:$0xff] %v10090_v40  ;;  %v10104_v54 = vsel %vm6142_vm5, %v6161_v8, %v6162_v17  ;;  %v6273_v25 = vmul.bf16 %v10086_v28, %v6145_v20  ;;  %v6309_v60 = vmul.bf16 %v10090_v40, %v10073_v21  ;;  %v6666_v17 = vshll.u32 %v6617_v30, 16 }
 0x273   : > { %13920 = vst [vmem:[#allocation238_spill] sm:$0xff] %v10093_v34  ;;  %13921 = vst [vmem:[#allocation239_spill] sm:$0xff] %v10097_v32  ;;  %v6022_v50 = vadd.bf16 %v6006_v22, %v5970_v9  ;;  %v6361_v43 = vmul.bf16 %v10097_v32, %v10076_v36  ;;  %v6413_v42 = vmul.bf16 %v10101_v37, %v10079_v31  ;;  %v6671_v35 = vshrl.u32 %v6618_v11, 16 }
 0x274   : > { %13923 = vst [vmem:[#allocation32_spill] sm:$0xff] %v10101_v37  ;;  %13924 = vst [vmem:[#allocation240_spill] sm:$0xff] %v10104_v54  ;;  %v10121_v20 = vrot.slane %v9784_v47, %v8953_v56  ;;  %v10125_v24 = vrot.slane %v13912_v49, %v8953_v56  ;;  %v10129_v3 = vrot.slane %v9853_v48, %v8951_v55  ;;  %v6663_v47 = vshrl.u32 %v6617_v30, 16  ;;  %v6623_v30 = vld [vmem:[#allocation2 + $0x30] sm:$0xe0] }
 0x275   : > { %v13928_v22 = vadd.bf16 %v10001_v52, %v9996_v41  ;;  %v6325_v27 = vadd.bf16 %v6309_v60, %v6273_v25  ;;  %v6674_v41 = vshll.u32 %v6618_v11, 16  ;;  %v6621_v52 = vld [vmem:[#allocation2 + $0x20] sm:$0xe0]  ;;  %v6680_v25 = vshrl.u32 %v6619_v18, 16  ;;  %v6624_v11 = vld [vmem:[#allocation2 + $0x38] sm:$0x3f] }
 0x276   : > { %13925 = vst [vmem:[#allocation241_spill] sm:$0xff] %v10121_v20  ;;  %13926 = vst [vmem:[#allocation242_spill] sm:$0xff] %v10125_v24  ;;  %v6465_v0 = vmul.bf16 %v10121_v20, %v10082_v59  ;;  %v6517_v49 = vmul.bf16 %v10125_v24, %v10093_v34  ;;  %v6569_v8 = vmul.bf16 %v10129_v3, %v10104_v54  ;;  %v6665_v9 = vrot.slane %v6663_v47, 5 }
 0x277   : > { %13927 = vst [vmem:[#allocation243_spill] sm:$0xff] %v10129_v3  ;;  %v10134_v45 = vadd.bf16 %v6022_v50, %v13928_v22  ;;  %v6377_v46 = vadd.bf16 %v6361_v43, %v6325_v27  ;;  %v6668_v50 = vrot.slane %v6666_v17, 6  ;;  %v6683_v60 = vshll.u32 %v6619_v18, 16 }
 0x278   : > { %v6688_v22 = vshrl.u32 %v6620_v7, 16  ;;  %v6673_v38 = vrot.slane %v6671_v35, 5  ;;  %v6676_v20 = vrot.slane %v6674_v41, 6  ;;  %v6691_v37 = vshll.u32 %v6620_v7, 16 }
 0x279   : > { %v6429_v29 = vadd.bf16 %v6413_v42, %v6377_v46  ;;  %v6669_v59 = vor.u32 %v6668_v50, %v6665_v9  ;;  %v6682_v24 = vrot.slane %v6680_v25, 5  ;;  %v6685_v34 = vrot.slane %v6683_v60, 6  ;;  %v6625_v9 = vld [vmem:[#allocation2 + $0x40] sm:$0xe0]  ;;  %v6628_v60 = vld [vmem:[#allocation2 + $0x58] sm:$0x3f] }
 0x27a   : > { %v6690_v32 = vrot.slane %v6688_v22, 5  ;;  %v6677_v43 = vor.u32 %v6676_v20, %v6673_v38  ;;  %v6693_v27 = vrot.slane %v6691_v37, 6  ;;  %v6697_v47 = vshrl.u32 %v6621_v52, 16  ;;  %v6626_v37 = vld [vmem:[#allocation2 + $0x48] sm:$0x3f] }
 0x27b   : > { %v6481_v3 = vadd.bf16 %v6465_v0, %v6429_v29  ;;  %v6686_v54 = vor.u32 %v6685_v34, %v6682_v24  ;;  %v6700_v17 = vshll.u32 %v6621_v52, 16  ;;  %v6705_v31 = vshrl.u32 %v6622_v53, 16 }
 0x27c   : > { %v6708_v18 = vshll.u32 %v6622_v53, 16  ;;  %v10143_v42 = vsel %vm6661_vm6, %v6669_v59, %v6677_v43  ;;  %v6694_v46 = vor.u32 %v6693_v27, %v6690_v32  ;;  %v6699_v7 = vrot.slane %v6697_v47, 5  ;;  %v6627_v53 = vld [vmem:[#allocation2 + $0x50] sm:$0xe0] }
 0x27d   : > { %v6533_v15 = vadd.bf16 %v6517_v49, %v6481_v3  ;;  %v6702_v35 = vrot.slane %v6700_v17, 6  ;;  %v6707_v41 = vrot.slane %v6705_v31, 5  ;;  %v6714_v29 = vshrl.u32 %v6623_v30, 16 }
 0x27e   : > { %v6710_v50 = vrot.slane %v6708_v18, 6  ;;  %v10148_v38 = vsel %vm6661_vm6, %v6686_v54, %v6694_v46  ;;  %v6717_v34 = vshll.u32 %v6623_v30, 16  ;;  %v6722_v20 = vshrl.u32 %v6624_v11, 16  ;;  %v6629_v30 = vld [vmem:[#allocation2 + $0x60] sm:$0xe0] }
 0x27f   : > { %v10145_v0 = vadd.bf16 %v6569_v8, %v6533_v15  ;;  %v6703_v24 = vor.u32 %v6702_v35, %v6699_v7  ;;  %v6716_v59 = vrot.slane %v6714_v29, 5  ;;  %v6725_v49 = vshll.u32 %v6624_v11, 16  ;;  %v6630_v35 = vld [vmem:[#allocation2 + $0x68] sm:$0x3f] }
 0x280   : > { %v6711_v3 = vor.u32 %v6710_v50, %v6707_v41  ;;  %v6719_v52 = vrot.slane %v6717_v34, 6  ;;  %v6724_v31 = vrot.slane %v6722_v20, 5  ;;  %v6731_v25 = vshrl.u32 %v6625_v9, 16 }
 0x281   : > { %v6727_v8 = vrot.slane %v6725_v49, 6  ;;  %v6734_v54 = vshll.u32 %v6625_v9, 16  ;;  %v6739_v22 = vshrl.u32 %v6626_v37, 16  ;;  %v6742_v47 = vshll.u32 %v6626_v37, 16 }
 0x282   : > { %v10153_v15 = vsel %vm6661_vm6, %v6703_v24, %v6711_v3  ;;  %v6720_v43 = vor.u32 %v6719_v52, %v6716_v59  ;;  %v6733_v27 = vrot.slane %v6731_v25, 5  ;;  %v6748_v17 = vshrl.u32 %v6627_v53, 16 }
 0x283   : > { %v6728_v18 = vor.u32 %v6727_v8, %v6724_v31  ;;  %v6736_v11 = vrot.slane %v6734_v54, 6  ;;  %v6741_v46 = vrot.slane %v6739_v22, 5  ;;  %v6751_v7 = vshll.u32 %v6627_v53, 16 }
 0x284   : > { %v6744_v41 = vrot.slane %v6742_v47, 6  ;;  %v6750_v50 = vrot.slane %v6748_v17, 5  ;;  %v6756_v29 = vshrl.u32 %v6628_v60, 16  ;;  %v6759_v34 = vshll.u32 %v6628_v60, 16 }
 0x285   : > { %v10156_v20 = vsel %vm6661_vm6, %v6720_v43, %v6728_v18  ;;  %v6737_v24 = vor.u32 %v6736_v11, %v6733_v27  ;;  %v6753_v9 = vrot.slane %v6751_v7, 6  ;;  %v6765_v3 = vshrl.u32 %v6629_v30, 16  ;;  %v2424_v18 = vld [vmem:[#allocation9 + $0x18] sm:$0x1]  ;;  %v2425_v11 = vld [vmem:[%s13015_s6] sm:$0x1] }
 0x286   : > { %v6745_v49 = vor.u32 %v6744_v41, %v6741_v46  ;;  %v6758_v59 = vrot.slane %v6756_v29, 5  ;;  %v6761_v52 = vrot.slane %v6759_v34, 6  ;;  %v6768_v37 = vshll.u32 %v6629_v30, 16  ;;  %v985_v41 = vld [vmem:[#allocation2 + $0x50] sm:$0xf8] }
 0x287   : > { %v6754_v25 = vor.u32 %v6753_v9, %v6750_v50  ;;  %v6767_v31 = vrot.slane %v6765_v3, 5  ;;  %v6773_v8 = vshrl.u32 %v6630_v35, 16  ;;  %v6776_v54 = vshll.u32 %v6630_v35, 16 }
 0x288   : > { %v10159_v53 = vsel %vm6661_vm6, %v6737_v24, %v6745_v49  ;;  %v6762_v22 = vor.u32 %v6761_v52, %v6758_v59  ;;  %v6770_v47 = vrot.slane %v6768_v37, 6  ;;  %v10163_v60 = vrot.slane %v13902_v58, %v8951_v55  ;;  %v986_v59 = vld [vmem:[#allocation2 + $0x58] sm:$0xf]  ;;  %v1512_v37 = vld [vmem:[#allocation2 + $0x50] sm:$0xf0] }
 0x289   : > { %v6775_v43 = vrot.slane %v6773_v8, 5  ;;  %v6778_v27 = vrot.slane %v6776_v54, 6  ;;  %v10167_v17 = vrot.slane %v9843_v39, %v8955_v57  ;;  %v10171_v30 = vrot.slane %v13905_v23, %v8955_v57  ;;  %v1513_v54 = vld [vmem:[#allocation2 + $0x58] sm:$0xf] }
 0x28a   : > { %13929 = vst [vmem:[#allocation244_spill] sm:$0xff] %v10163_v60  ;;  %v10177_v46 = vsel %vm6661_vm6, %v6754_v25, %v6762_v22  ;;  %v6771_v55 = vor.u32 %v6770_v47, %v6767_v31  ;;  %v7100_v58 = vmul.bf16 %v10163_v60, %v10143_v42  ;;  %v10193_v42 = vrot.slane %v9847_v14, %v8960_v63 }
 0x28b   : > { %13930 = vst [vmem:[#allocation245_spill] sm:$0xff] %v10167_v17  ;;  %13931 = vst [vmem:[#allocation246_spill] sm:$0xff] %v10171_v30  ;;  %v6779_v7 = vor.u32 %v6778_v27, %v6775_v43  ;;  %v7136_v23 = vmul.bf16 %v10167_v17, %v10148_v38  ;;  %v7188_v50 = vmul.bf16 %v10171_v30, %v10153_v15  ;;  %v1071_v8 = vshll.u32 %v985_v41, 16  ;;  %v13938_v27 = vld [vmem:[#allocation37_spill] sm:$0xff] }
 0x28c   : > { %13932 = vst [vmem:[#allocation247_spill] sm:$0xff] %v10193_v42  ;;  %v10197_v29 = vrot.slane %v13909_v51, %v8960_v63  ;;  %v10201_v34 = vrot.slane %v9853_v48, %v8953_v56  ;;  %v7393_v3 = vpack.i.b16 %v2424_v18, %v2424_v18  ;;  %v7448_v49 = vpack.i.b16 %v2425_v11, %v2425_v11 }
 0x28d   : > { %v10204_v24 = vsel %vm6661_vm6, %v6771_v55, %v6779_v7  ;;  %v7152_v9 = vadd.bf16 %v7136_v23, %v7100_v58  ;;  %v7240_v52 = vmul.bf16 %v10193_v42, %v10156_v20  ;;  %v1068_v51 = vshrl.u32 %v985_v41, 16  ;;  %v1831_v58 = vld [vmem:[#allocation2 + $0x50] sm:$0xf0] }
 0x28e   : > { %13933 = vst [vmem:[#allocation248_spill] sm:$0xff] %v10197_v29  ;;  %13934 = vst [vmem:[#allocation249_spill] sm:$0xff] %v10201_v34  ;;  %v7292_v14 = vmul.bf16 %v10197_v29, %v10159_v53  ;;  %v7344_v63 = vmul.bf16 %v10201_v34, %v10177_v46  ;;  %v10213_v25 = vrot.slane %v7393_v3, %v8953_v56  ;;  %v1076_v47 = vshrl.u32 %v986_v59, 16 }
 0x28f   : > { %13935 = vst [vmem:[#allocation250_spill] sm:$0xff] %v10204_v24  ;;  %v7204_v48 = vadd.bf16 %v7188_v50, %v7152_v9  ;;  %v10216_v31 = vrot.slane %v7448_v49, %v8953_v56  ;;  %v1070_v22 = vrot.slane %v1068_v51, 3  ;;  %v1079_v43 = vshll.u32 %v986_v59, 16  ;;  %v1832_v9 = vld [vmem:[#allocation2 + $0x58] sm:$0x1f] }
 0x290   : > { %13936 = vst [vmem:[#allocation251_spill] sm:$0xff] %v10213_v25  ;;  %v13939_v18 = vmul.bf16 %v8981_v10, %v13938_v27  ;;  %v13940_v11 = vmul.bf16 %v8986_v16, %v9692_v44  ;;  %v7399_v23 = vmul.bf16 %v10213_v25, %v10204_v24  ;;  %v1073_v50 = vrot.slane %v1071_v8, 4  ;;  %v13941_v59 = vld [vmem:[#allocation134_spill] sm:$0xff] }
 0x291   : > { %13937 = vst [vmem:[#allocation252_spill] sm:$0xff] %v10216_v31  ;;  %v7256_v7 = vadd.bf16 %v7240_v52, %v7204_v48  ;;  %v1588_v56 = vrot.slane %v1512_v37, 4  ;;  %v1078_v41 = vrot.slane %v1076_v47, 3  ;;  %v1081_v3 = vrot.slane %v1079_v43, 4 }
 0x292   : > { %v1438_v55 = vadd.bf16 %v13940_v11, %v13939_v18  ;;  %v1589_v49 = vrot.slane %v1513_v54, 4  ;;  %v13942_v51 = vmul.bf16 %v8967_v1, %v13941_v59  ;;  %v13943_v27 = vmul.bf16 %v8971_v2, %v9686_v4 }
 0x293   : > { %v7308_v35 = vadd.bf16 %v7292_v14, %v7256_v7  ;;  %v1074_v18 = vor.u32 %v1073_v50, %v1070_v22  ;;  %v1914_v11 = vshrl.u32 %v1831_v58, 16  ;;  %v1917_v52 = vshll.u32 %v1831_v58, 16 }
 0x294   : > { %v1742_v57 = vadd.bf16 %v13943_v27, %v13942_v51  ;;  %v1082_v48 = vor.u32 %v1081_v3, %v1078_v41  ;;  %v10233_v39 = vsel %vm1578_vm1, %v1588_v56, %v1589_v49  ;;  %v1922_v37 = vshrl.u32 %v1832_v9, 16  ;;  %v13948_v3 = vld [vmem:[#allocation57_spill] sm:$0xff]  ;;  %v13949_v49 = vld [vmem:[#allocation56_spill] sm:$0xff] }
 0x295   : > { %13944 = vst [vmem:[#allocation37_spill] sm:$0xff] %v10233_v39  ;;  %v1925_v8 = vshll.u32 %v1832_v9, 16  ;;  %v7360_v47 = vadd.bf16 %v7344_v63, %v7308_v35  ;;  %v1778_v54 = vmul.bf16 %v8976_v5, %v10233_v39  ;;  %v1916_v43 = vrot.slane %v1914_v11, 4  ;;  %v13947_v35 = vld [vmem:[#allocation24_spill] sm:$0xff]  ;;  %v13952_v11 = vld [vmem:[#allocation54_spill] sm:$0xff] }
 0x296   : > { %v1919_v59 = vrot.slane %v1917_v52, 5  ;;  %v10238_v32 = vsel %vm1015_vm0, %v1074_v18, %v1082_v48  ;;  %v1924_v51 = vrot.slane %v1922_v37, 4  ;;  %v13945_v22 = vmul.bf16 %v9008_v62, %v9709_v33  ;;  %v13951_v18 = vld [vmem:[#allocation55_spill] sm:$0xff] }
 0x297   : > { %v1927_v14 = vrot.slane %v1925_v8, 5  ;;  %v13946_v58 = vmul.bf16 %v9016_v12, %v9724_v19  ;;  %v7415_v50 = vadd.bf16 %v7399_v23, %v7360_v47  ;;  %v1475_v63 = vmul.bf16 %v13947_v35, %v10238_v32  ;;  %v13956_v23 = vld [vmem:[#allocation191_spill] sm:$0xff]  ;;  %v13958_v47 = vld [vmem:[#allocation192_spill] sm:$0xff]  ;;  %v13986_v19 = vld [vmem:[#allocation205_spill] sm:$0xff] }
 0x298   : > { %v1794_v56 = vadd.bf16 %v1778_v54, %v1742_v57  ;;  %v1920_v9 = vor.u32 %v1919_v59, %v1916_v43  ;;  %v13950_v27 = vor.u32 %v13948_v3, %v13949_v49  ;;  %v13953_v52 = vor.u32 %v13951_v18, %v13952_v11  ;;  %v13959_v57 = vld [vmem:[#allocation33_spill] sm:$0xff]  ;;  %v13963_v3 = vld [vmem:[#allocation195_spill] sm:$0xff]  ;;  %v13964_v49 = vld [vmem:[#allocation36_spill] sm:$0xff] }
 0x299   : > { %v2277_v7 = vadd.bf16 %v13946_v58, %v13945_v22  ;;  %v1928_v41 = vor.u32 %v1927_v14, %v1924_v51  ;;  %v13955_v33 = vmul.bf16 %v9052_v13, %v9087_v61  ;;  %v13957_v37 = vmul.bf16 %v9780_v6, %v13956_v23  ;;  %v13961_v14 = vld [vmem:[#allocation193_spill] sm:$0xff]  ;;  %v13966_v11 = vld [vmem:[#allocation68_spill] sm:$0xff] }
 0x29a   : > { %v10255_v48 = vsel %vm2470_vm3, %v13953_v52, %v13950_v27  ;;  %v3007_v54 = vmul.bf16 %v13959_v57, %v13958_v47  ;;  %v13960_v43 = vadd.bf16 %v10145_v0, %v10134_v45  ;;  %v1491_v51 = vadd.bf16 %v1475_v63, %v1438_v55  ;;  %v13962_v22 = vld [vmem:[#allocation197_spill] sm:$0xff]  ;;  %v13967_v52 = vld [vmem:[#allocation198_spill] sm:$0xff]  ;;  %v13969_v55 = vld [vmem:[#allocation27_spill] sm:$0xff] }
 0x29b   : > { %13954 = vst [vmem:[#allocation134_spill] sm:$0xff] %v10255_v48  ;;  %v2968_v8 = vadd.bf16 %v13957_v37, %v13955_v33  ;;  %v3064_v58 = vmul.bf16 %v13962_v22, %v13961_v14  ;;  %v3120_v27 = vmul.bf16 %v13964_v49, %v13963_v3  ;;  %v10273_v61 = vsel %vm1861_vm2, %v1920_v9, %v1928_v41  ;;  %v13968_v37 = vld [vmem:[#allocation83_spill] sm:$0xff]  ;;  %v13970_v63 = vld [vmem:[#allocation53_spill] sm:$0xff]  ;;  %v13972_v13 = vld [vmem:[#allocation52_spill] sm:$0xff] }
 0x29c   : > { %v7431_v59 = vadd.bf16 %v7415_v50, %v13960_v43  ;;  %13965 = vst [vmem:[#allocation57_spill] sm:$0xff] %v10273_v61  ;;  %v3177_v33 = vmul.bf16 %v13967_v52, %v13966_v11  ;;  %v3233_v23 = vmul.bf16 %v13968_v37, %v10255_v48  ;;  %v1810_v0 = vadd.bf16 %v1794_v56, %v1491_v51  ;;  %v13978_v11 = vld [vmem:[#allocation98_spill] sm:$0xff]  ;;  %v13979_v22 = vld [vmem:[#allocation200_spill] sm:$0xff]  ;;  %v13983_v3 = vld [vmem:[#allocation203_spill] sm:$0xff] }
 0x29d   : > { %v3023_v18 = vadd.bf16 %v3007_v54, %v2968_v8  ;;  %v2316_v50 = vmul.bf16 %v13969_v55, %v10273_v61  ;;  %v13971_v43 = vrot.slane %v13970_v63, 3  ;;  %v13973_v49 = vrot.slane %v13972_v13, 3  ;;  %v13975_v8 = vld [vmem:[#allocation204_spill] sm:$0xff]  ;;  %v13976_v54 = vld [vmem:[#allocation199_spill] sm:$0xff]  ;;  %v13982_v56 = vld [vmem:[#allocation206_spill] sm:$0xff] }
 0x29e   : > { %v7454_v45 = vadd.bf16 %v10216_v31, %v7431_v59  ;;  %v13977_v52 = vmul.bf16 %v13975_v8, %v13976_v54  ;;  %v13980_v37 = vmul.bf16 %v13978_v11, %v13979_v22  ;;  %v13981_v59 = vld [vmem:[#allocation201_spill] sm:$0xff]  ;;  %v13984_v55 = vld [vmem:[#allocation114_spill] sm:$0xff]  ;;  %v13985_v63 = vmov 0   ;;  %v13990_v22 = vld [vmem:[#allocation208_spill] sm:$0xff] }
 0x29f   : > { %v10287_v9 = vsel %vm3352_vm4, %v13973_v49, %v13971_v43  ;;  %v3080_v41 = vadd.bf16 %v3064_v58, %v3023_v18  ;;  %v3575_v51 = vmul.bf16 %v13982_v56, %v13981_v59  ;;  %v3629_v57 = vmul.bf16 %v13984_v55, %v13983_v3  ;;  %v13987_v49 = vld [vmem:[#allocation207_spill] sm:$0xff]  ;;  %v13988_v58 = vld [vmem:[#allocation202_spill] sm:$0xff]  ;;  %v13997_v6 = vld [vmem:[#allocation209_spill] sm:$0xff] }
 0x2a0   : > { %13974 = vst [vmem:[#allocation56_spill] sm:$0xff] %v10287_v9  ;;  %v3536_v48 = vadd.bf16 %v13980_v37, %v13977_v52  ;;  %v7470_v14 = vmax.bf16 %v13985_v63, %v7454_v45  ;;  %v2332_v13 = vadd.bf16 %v2316_v50, %v2277_v7  ;;  %v3684_v43 = vmul.bf16 %v13987_v49, %v13986_v19  ;;  %v13989_v18 = vld [vmem:[#allocation163_spill] sm:$0xff]  ;;  %v13991_v37 = vld [vmem:[#allocation61_spill] sm:$0xff]  ;;  %v13992_v11 = vld [vmem:[#allocation62_spill] sm:$0xff] }
 0x2a1   : > { %v3738_v62 = vmul.bf16 %v13989_v18, %v13988_v58  ;;  %v3136_v54 = vadd.bf16 %v3120_v27, %v3080_v41  ;;  %v3793_v52 = vmul.bf16 %v13990_v22, %v10287_v9  ;;  %v4010_v56 = vor.u32 %v13992_v11, %v13991_v37  ;;  %v13994_v3 = vld [vmem:[#allocation63_spill] sm:$0xff]  ;;  %v13995_v45 = vld [vmem:[#allocation65_spill] sm:$0xff]  ;;  %v13996_v50 = vld [vmem:[#allocation130_spill] sm:$0xff] }
 0x2a2   : > { %v3591_v8 = vadd.bf16 %v3575_v51, %v3536_v48  ;;  %v13993_v59 = vmov 1086341312   ;;  %v2348_v55 = vadd.bf16 %v2332_v13, %v1810_v0  ;;  %v4018_v7 = vor.u32 %v13995_v45, %v13994_v3  ;;  %v13999_v19 = vld [vmem:[#allocation35_spill] sm:$0xff]  ;;  %v14000_v47 = vld [vmem:[#allocation210_spill] sm:$0xff]  ;;  %v14005_v11 = vld [vmem:[#allocation213_spill] sm:$0xff] }
 0x2a3   : > { %v7486_v31 = vmin.bf16 %v13993_v59, %v7470_v14  ;;  %v13998_v49 = vmul.bf16 %v13996_v50, %v13997_v6  ;;  %v14001_v18 = vmul.bf16 %v13999_v19, %v14000_v47  ;;  %v3193_v48 = vadd.bf16 %v3177_v33, %v3136_v54  ;;  %v14002_v51 = vld [vmem:[#allocation211_spill] sm:$0xff]  ;;  %v14004_v58 = vld [vmem:[#allocation34_spill] sm:$0xff]  ;;  %v14007_v13 = vld [vmem:[#allocation28_spill] sm:$0xff] }
 0x2a4   : > { %v3645_v41 = vadd.bf16 %v3629_v57, %v3591_v8  ;;  %v14003_v22 = vld [vmem:[#allocation131_spill] sm:$0xff]  ;;  %v4463_v37 = vmul.bf16 %v14005_v11, %v14004_v58  ;;  %v14006_v14 = vld [vmem:[#allocation194_spill] sm:$0xff]  ;;  %v2371_v12 = vadd.bf16 %v14007_v13, %v2348_v55  ;;  %v10324_v3 = vsel %vm1015_vm0, %v4010_v56, %v4018_v7  ;;  %v14009_v6 = vld [vmem:[#allocation212_spill] sm:$0xff] }
 0x2a5   : > { %v4375_v27 = vadd.bf16 %v14001_v18, %v13998_v49  ;;  %v4411_v9 = vmul.bf16 %v14003_v22, %v14002_v51  ;;  %v7502_v0 = vadd.bf16 %v7486_v31, %v14006_v14  ;;  %14008 = vst [vmem:[#allocation55_spill] sm:$0xff] %v10324_v3  ;;  %v14010_v45 = vld [vmem:[#allocation132_spill] sm:$0xff]  ;;  %v3249_v47 = vadd.bf16 %v3233_v23, %v3193_v48  ;;  %v14011_v57 = vld [vmem:[#allocation214_spill] sm:$0xff]  ;;  %v14012_v8 = vld [vmem:[#allocation215_spill] sm:$0xff] }
 0x2a6   : > { %v4515_v50 = vmul.bf16 %v14010_v45, %v14009_v6  ;;  %v3700_v49 = vadd.bf16 %v3684_v43, %v3645_v41  ;;  %v4567_v18 = vmul.bf16 %v14012_v8, %v14011_v57  ;;  %v2387_v54 = vmax.bf16 %v13985_v63, %v2371_v12  ;;  %v14013_v11 = vld [vmem:[#allocation170_spill] sm:$0xff]  ;;  %v14014_v14 = vld [vmem:[#allocation59_spill] sm:$0xff]  ;;  %v14019_v45 = vld [vmem:[#allocation221_spill] sm:$0xff] }
 0x2a7   : > { %v4427_v33 = vadd.bf16 %v4411_v9, %v4375_v27  ;;  %8241 = vmatprep.mubr.bf16.mxu1 %v7502_v0  ;;  %v4619_v31 = vmul.bf16 %v14013_v11, %v10324_v3  ;;  %v14015_v55 = vrot.slane %v14014_v14, 4  ;;  %v14016_v13 = vld [vmem:[#allocation58_spill] sm:$0xff]  ;;  %v14020_v23 = vld [vmem:[#allocation216_spill] sm:$0xff]  ;;  %v14022_v9 = vld [vmem:[#allocation171_spill] sm:$0xff] }
 0x2a8   : > { %v14017_v56 = vrot.slane %v14016_v13, 4  ;;  %v14021_v43 = vmul.bf16 %v14019_v45, %v14020_v23  ;;  %v14023_v27 = vld [vmem:[#allocation217_spill] sm:$0xff]  ;;  %v3754_v0 = vadd.bf16 %v3738_v62, %v3700_v49  ;;  %v14025_v12 = vld [vmem:[#allocation218_spill] sm:$0xff]  ;;  %v14026_v57 = vld [vmem:[#allocation223_spill] sm:$0xff]  ;;  %v10351_v13 = vmin.bf16 %v13993_v59, %v2387_v54 }
 0x2a9   : > { %v14024_v48 = vmul.bf16 %v14022_v9, %v14023_v27  ;;  %v4479_v8 = vadd.bf16 %v4463_v37, %v4427_v33  ;;  %v4973_v6 = vmul.bf16 %v14026_v57, %v14025_v12  ;;  %v14027_v11 = vld [vmem:[#allocation219_spill] sm:$0xff]  ;;  %v14028_v3 = vld [vmem:[#allocation174_spill] sm:$0xff]  ;;  %v14034_v27 = vld [vmem:[#allocation225_spill] sm:$0xff] }
 0x2aa   : > { %v10338_v7 = vsel %vm1578_vm1, %v14017_v56, %v14015_v55  ;;  %v5025_v14 = vmul.bf16 %v14028_v3, %v14027_v11  ;;  %14029 = vst [vmem:[#allocation53_spill] sm:$0xff] %v10351_v13  ;;  %v14030_v55 = vld [vmem:[#allocation220_spill] sm:$0xff]  ;;  %v14032_v58 = vld [vmem:[#allocation222_spill] sm:$0xff]  ;;  %v14033_v23 = vld [vmem:[#allocation175_spill] sm:$0xff]  ;;  %v3809_v62 = vadd.bf16 %v3793_v52, %v3754_v0 }
 0x2ab   : > { %14018 = vst [vmem:[#allocation54_spill] sm:$0xff] %v10338_v7  ;;  %v4937_v41 = vadd.bf16 %v14024_v48, %v14021_v43  ;;  %v14031_v56 = vld [vmem:[#allocation224_spill] sm:$0xff]  ;;  %v5129_v45 = vmul.bf16 %v14033_v23, %v14032_v58  ;;  %v5181_v43 = vmul.bf16 %v14034_v27, %v10338_v7  ;;  %v4531_v37 = vadd.bf16 %v4515_v50, %v4479_v8  ;;  %v14041_v19 = vld [vmem:[#allocation29_spill] sm:$0xff]  ;;  %v14042_v23 = vld [vmem:[#allocation226_spill] sm:$0xff] }
 0x2ac   : > { %v5077_v22 = vmul.bf16 %v14031_v56, %v14030_v55  ;;  %v14035_v33 = vld [vmem:[#allocation60_spill] sm:$0xff]  ;;  %v14043_v58 = vmul.bf16 %v14041_v19, %v14042_v23  ;;  %v14044_v51 = vld [vmem:[#allocation230_spill] sm:$0xff]  ;;  %v14045_v27 = vld [vmem:[#allocation227_spill] sm:$0xff] }
 0x2ad   : > { %v4989_v49 = vadd.bf16 %v4973_v6, %v4937_v41  ;;  %v14036_v48 = vshrl.u32 %v14035_v33, 16  ;;  %v14037_v3 = vshll.u32 %v14035_v33, 16  ;;  %v14038_v54 = vld [vmem:[#allocation64_spill] sm:$0xff]  ;;  %v14046_v52 = vmul.bf16 %v14044_v51, %v14045_v27  ;;  %v6069_v7 = vld [vmem:[#allocation2 + $0x78] sm:$0x1f]  ;;  %v14049_v59 = vld [vmem:[#allocation229_spill] sm:$0xff] }
 0x2ae   : > { %v14039_v9 = vshrl.u32 %v14038_v54, 16  ;;  %v14040_v56 = vshll.u32 %v14038_v54, 16  ;;  %v3825_v6 = vadd.bf16 %v3809_v62, %v3249_v47  ;;  %v4583_v8 = vadd.bf16 %v4567_v18, %v4531_v37  ;;  %v14047_v0 = vld [vmem:[#allocation228_spill] sm:$0xff]  ;;  %v14051_v63 = vld [vmem:[#allocation231_spill] sm:$0xff]  ;;  %v14052_v61 = vld [vmem:[#allocation129_spill] sm:$0xff] }
 0x2af   : > { %v5394_v57 = vrot.slane %v14036_v48, 4  ;;  %v5397_v11 = vrot.slane %v14037_v3, 5  ;;  %v5763_v50 = vadd.bf16 %v14046_v52, %v14043_v58  ;;  %v5041_v41 = vadd.bf16 %v5025_v14, %v4989_v49  ;;  %v14048_v48 = vld [vmem:[#allocation106_spill] sm:$0xff]  ;;  %v14050_v54 = vld [vmem:[#allocation232_spill] sm:$0xff]  ;;  %v14053_v47 = vld [vmem:[#allocation233_spill] sm:$0xff] }
 0x2b0   : > { %v5402_v12 = vrot.slane %v14039_v9, 4  ;;  %v5405_v55 = vrot.slane %v14040_v56, 5  ;;  %v5799_v33 = vmul.bf16 %v14048_v48, %v14047_v0  ;;  %v6068_v3 = vld [vmem:[#allocation2 + $0x70] sm:$0xe0]  ;;  %v5851_v56 = vmul.bf16 %v14050_v54, %v14049_v59 }
 0x2b1   : > { %v5398_v13 = vor.u32 %v5397_v11, %v5394_v57  ;;  %v5903_v23 = vmul.bf16 %v14052_v61, %v14051_v63  ;;  %v4635_v19 = vadd.bf16 %v4619_v31, %v4583_v8  ;;  %v5093_v35 = vadd.bf16 %v5077_v22, %v5041_v41  ;;  %v14056_v22 = vld [vmem:[#allocation69_spill] sm:$0xff]  ;;  %v6631_v52 = vld [vmem:[#allocation2 + $0x70] sm:$0xe0]  ;;  %v14058_v8 = vld [vmem:[#allocation235_spill] sm:$0xff] }
 0x2b2   : > { %v5406_v9 = vor.u32 %v5405_v55, %v5402_v12  ;;  %v5815_v27 = vadd.bf16 %v5799_v33, %v5763_v50  ;;  %v5955_v58 = vmul.bf16 %v14053_v47, %v10057_v26  ;;  %v6164_v14 = vrot.slane %v6068_v3, 5  ;;  %v6632_v50 = vld [vmem:[#allocation2 + $0x78] sm:$0x3f]  ;;  %v14060_v33 = vld [vmem:[#allocation236_spill] sm:$0xff] }
 0x2b3   : > { %v6165_v62 = vrot.slane %v6069_v7, 5  ;;  %v14054_v11 = vmul.bf16 %v10086_v28, %v10073_v21  ;;  %v14055_v57 = vmul.bf16 %v10090_v40, %v10076_v36  ;;  %v4651_v55 = vadd.bf16 %v4635_v19, %v3825_v6  ;;  %v14059_v7 = vld [vmem:[#allocation239_spill] sm:$0xff]  ;;  %v14061_v21 = vld [vmem:[#allocation32_spill] sm:$0xff]  ;;  %v14063_v36 = vld [vmem:[#allocation241_spill] sm:$0xff] }
 0x2b4   : > { %v10382_v18 = vsel %vm1861_vm2, %v5398_v13, %v5406_v9  ;;  %v5145_v37 = vadd.bf16 %v5129_v45, %v5093_v35  ;;  %v5867_v31 = vadd.bf16 %v5851_v56, %v5815_v27  ;;  %v6362_v41 = vmul.bf16 %v14059_v7, %v14058_v8  ;;  %v14062_v9 = vld [vmem:[#allocation238_spill] sm:$0xff]  ;;  %v14064_v45 = vld [vmem:[#allocation240_spill] sm:$0xff]  ;;  %v14066_v56 = vld [vmem:[#allocation243_spill] sm:$0xff] }
 0x2b5   : > { %v6326_v12 = vadd.bf16 %v14055_v57, %v14054_v11  ;;  %v6007_v49 = vmul.bf16 %v14056_v22, %v10382_v18  ;;  %v10393_v13 = vsel %vm6142_vm5, %v6164_v14, %v6165_v62  ;;  %v6414_v3 = vmul.bf16 %v14061_v21, %v14060_v33  ;;  %v14065_v27 = vld [vmem:[#allocation242_spill] sm:$0xff] }
 0x2b6   : > { %14057 = vst [vmem:[#allocation52_spill] sm:$0xff] %v10393_v13  ;;  %v6466_v11 = vmul.bf16 %v14063_v36, %v14062_v9  ;;  %v5197_v19 = vadd.bf16 %v5181_v43, %v5145_v37  ;;  %v5919_v35 = vadd.bf16 %v5903_v23, %v5867_v31  ;;  %v6518_v6 = vmul.bf16 %v14065_v27, %v14064_v45  ;;  %v987_v45 = vld [vmem:[#allocation2 + $0x60] sm:$0xf8] }
 0x2b7   : > { %v6570_v57 = vmul.bf16 %v14066_v56, %v10393_v13  ;;  %v6378_v28 = vadd.bf16 %v6362_v41, %v6326_v12  ;;  %v6782_v14 = vshrl.u32 %v6631_v52, 16  ;;  %v6785_v62 = vshll.u32 %v6631_v52, 16 }
 0x2b8   : > { %v6790_v40 = vshrl.u32 %v6632_v50, 16  ;;  %v5213_v22 = vadd.bf16 %v5197_v19, %v4651_v55  ;;  %v5971_v7 = vadd.bf16 %v5955_v58, %v5919_v35  ;;  %v6793_v8 = vshll.u32 %v6632_v50, 16  ;;  %v988_v55 = vld [vmem:[#allocation2 + $0x68] sm:$0xf] }
 0x2b9   : > { %v14067_v21 = vmul.bf16 %v10163_v60, %v10148_v38  ;;  %v14068_v43 = vmul.bf16 %v10167_v17, %v10153_v15  ;;  %v6430_v37 = vadd.bf16 %v6414_v3, %v6378_v28  ;;  %v6784_v31 = vrot.slane %v6782_v14, 5  ;;  %v1514_v14 = vld [vmem:[#allocation2 + $0x60] sm:$0xf0] }
 0x2ba   : > { %v6787_v27 = vrot.slane %v6785_v62, 6  ;;  %v6792_v36 = vrot.slane %v6790_v40, 5  ;;  %v6023_v56 = vadd.bf16 %v6007_v49, %v5971_v7  ;;  %v6795_v12 = vrot.slane %v6793_v8, 6 }
 0x2bb   : > { %v7153_v23 = vadd.bf16 %v14068_v43, %v14067_v21  ;;  %v7189_v52 = vmul.bf16 %v10171_v30, %v10156_v20  ;;  %v7241_v58 = vmul.bf16 %v10193_v42, %v10159_v53  ;;  %v6482_v50 = vadd.bf16 %v6466_v11, %v6430_v37  ;;  %v1515_v37 = vld [vmem:[#allocation2 + $0x68] sm:$0xf] }
 0x2bc   : > { %v6788_v38 = vor.u32 %v6787_v27, %v6784_v31  ;;  %v7293_v41 = vmul.bf16 %v10197_v29, %v10177_v46  ;;  %v7345_v28 = vmul.bf16 %v10201_v34, %v10204_v24  ;;  %v6039_v21 = vadd.bf16 %v6023_v56, %v5213_v22 }
 0x2bd   : > { %v6796_v40 = vor.u32 %v6795_v12, %v6792_v36  ;;  %v7205_v3 = vadd.bf16 %v7189_v52, %v7153_v23  ;;  %v1085_v49 = vshrl.u32 %v987_v45, 16  ;;  %v6534_v8 = vadd.bf16 %v6518_v6, %v6482_v50  ;;  %v1833_v6 = vld [vmem:[#allocation2 + $0x60] sm:$0xf0] }
 0x2be   : > { %v1088_v7 = vshll.u32 %v987_v45, 16  ;;  %v1093_v19 = vshrl.u32 %v988_v55, 16  ;;  %v1096_v35 = vshll.u32 %v988_v55, 16  ;;  %v1423_v43 = vmul.bf16 %v8986_v16, %v10238_v32  ;;  %v14129_v16 = vld [vmem:[#allocation51_spill] sm:$0xff] }
 0x2bf   : > { %v10420_v62 = vsel %vm6661_vm6, %v6788_v38, %v6796_v40  ;;  %v7257_v11 = vadd.bf16 %v7241_v58, %v7205_v3  ;;  %v1087_v27 = vrot.slane %v1085_v49, 3  ;;  %v6586_v31 = vadd.bf16 %v6570_v57, %v6534_v8  ;;  %v1834_v58 = vld [vmem:[#allocation2 + $0x68] sm:$0x1f] }
 0x2c0   : > { %14069 = vst [vmem:[#allocation199_spill] sm:$0xff] %v10420_v62  ;;  %v7400_v36 = vmul.bf16 %v10213_v25, %v10420_v62  ;;  %v1090_v22 = vrot.slane %v1088_v7, 4  ;;  %v1095_v56 = vrot.slane %v1093_v19, 3  ;;  %v1098_v23 = vrot.slane %v1096_v35, 4 }
 0x2c1   : > { %v7309_v45 = vadd.bf16 %v7293_v41, %v7257_v11  ;;  %v14070_v12 = vmul.bf16 %v8981_v10, %v9692_v44  ;;  %v1591_v55 = vrot.slane %v1514_v14, 4  ;;  %v6602_v50 = vadd.bf16 %v6586_v31, %v6039_v21 }
 0x2c2   : > { %v1091_v38 = vor.u32 %v1090_v22, %v1087_v27  ;;  %v1592_v40 = vrot.slane %v1515_v37, 4  ;;  %v1727_v57 = vmul.bf16 %v8971_v2, %v10233_v39  ;;  %v1099_v49 = vor.u32 %v1098_v23, %v1095_v56  ;;  %v14076_v23 = vld [vmem:[#allocation26_spill] sm:$0xff]  ;;  %v14120_v2 = vld [vmem:[#allocation200_spill] sm:$0xff]  ;;  %v14127_v39 = vld [vmem:[#allocation49_spill] sm:$0xff] }
 0x2c3   : > { %v1439_v52 = vadd.bf16 %v1423_v43, %v14070_v12  ;;  %v7361_v3 = vadd.bf16 %v7345_v28, %v7309_v45  ;;  %v1931_v8 = vshrl.u32 %v1833_v6, 16  ;;  %v1934_v7 = vshll.u32 %v1833_v6, 16  ;;  %v14074_v43 = vld [vmem:[#allocation24_spill] sm:$0xff] }
 0x2c4   : > { %v10432_v19 = vsel %vm1578_vm1, %v1591_v55, %v1592_v40  ;;  %v14072_v41 = vmul.bf16 %v8967_v1, %v9686_v4  ;;  %v1939_v35 = vshrl.u32 %v1834_v58, 16  ;;  %v1942_v14 = vshll.u32 %v1834_v58, 16  ;;  %v14075_v4 = vld [vmem:[#allocation57_spill] sm:$0xff]  ;;  %v14077_v55 = vld [vmem:[#allocation43_spill] sm:$0xff]  ;;  %v14081_v40 = vld [vmem:[#allocation40_spill] sm:$0xff] }
 0x2c5   : > { %14071 = vst [vmem:[#allocation61_spill] sm:$0xff] %v10432_v19  ;;  %v7416_v11 = vadd.bf16 %v7400_v36, %v7361_v3  ;;  %v10438_v21 = vsel %vm1015_vm0, %v1091_v38, %v1099_v49  ;;  %v1779_v27 = vmul.bf16 %v8976_v5, %v10432_v19  ;;  %v1933_v28 = vrot.slane %v1931_v8, 4  ;;  %v14078_v36 = vld [vmem:[#allocation42_spill] sm:$0xff]  ;;  %v14080_v38 = vld [vmem:[#allocation41_spill] sm:$0xff]  ;;  %v14122_v19 = vld [vmem:[#allocation56_spill] sm:$0xff] }
 0x2c6   : > { %v1743_v44 = vadd.bf16 %v1727_v57, %v14072_v41  ;;  %14073 = vst [vmem:[#allocation62_spill] sm:$0xff] %v10438_v21  ;;  %v1476_v37 = vmul.bf16 %v14074_v43, %v10438_v21  ;;  %v1936_v31 = vrot.slane %v1934_v7, 5  ;;  %v1941_v22 = vrot.slane %v1939_v35, 4  ;;  %v14084_v7 = vld [vmem:[#allocation192_spill] sm:$0xff]  ;;  %v14090_v5 = vld [vmem:[#allocation193_spill] sm:$0xff]  ;;  %v14092_v43 = vld [vmem:[#allocation195_spill] sm:$0xff] }
 0x2c7   : > { %v1944_v56 = vrot.slane %v1942_v14, 5  ;;  %v7432_v6 = vadd.bf16 %v7416_v11, %v6602_v50  ;;  %v2262_v12 = vmul.bf16 %v14076_v23, %v14075_v4  ;;  %v14079_v58 = vor.u32 %v14077_v55, %v14078_v36  ;;  %v14085_v35 = vld [vmem:[#allocation196_spill] sm:$0xff]  ;;  %v14087_v11 = vld [vmem:[#allocation25_spill] sm:$0xff]  ;;  %v14123_v1 = vld [vmem:[#allocation163_spill] sm:$0xff] }
 0x2c8   : > { %v1795_v45 = vadd.bf16 %v1779_v27, %v1743_v44  ;;  %v14082_v57 = vor.u32 %v14080_v38, %v14081_v40  ;;  %v1492_v49 = vadd.bf16 %v1476_v37, %v1439_v52  ;;  %v1937_v8 = vor.u32 %v1936_v31, %v1933_v28  ;;  %v14086_v50 = vld [vmem:[#allocation252_spill] sm:$0xff]  ;;  %v14088_v27 = vld [vmem:[#allocation190_spill] sm:$0xff]  ;;  %v14091_v55 = vld [vmem:[#allocation33_spill] sm:$0xff] }
 0x2c9   : > { %v1945_v41 = vor.u32 %v1944_v56, %v1941_v22  ;;  %v2953_v14 = vmul.bf16 %v14085_v35, %v14084_v7  ;;  %v7455_v44 = vadd.bf16 %v14086_v50, %v7432_v6  ;;  %v14089_v23 = vmul.bf16 %v14087_v11, %v14088_v27  ;;  %v14093_v38 = vld [vmem:[#allocation197_spill] sm:$0xff]  ;;  %v14095_v28 = vld [vmem:[#allocation31_spill] sm:$0xff]  ;;  %v14098_v56 = vld [vmem:[#allocation68_spill] sm:$0xff] }
 0x2ca   : > { %v10453_v3 = vsel %vm2470_vm3, %v14082_v57, %v14079_v58  ;;  %v3008_v36 = vmul.bf16 %v14091_v55, %v14090_v5  ;;  %v3065_v40 = vmul.bf16 %v14093_v38, %v14092_v43  ;;  %v1811_v58 = vadd.bf16 %v1795_v45, %v1492_v49  ;;  %v14096_v37 = vld [vmem:[#allocation191_spill] sm:$0xff]  ;;  %v14099_v6 = vld [vmem:[#allocation36_spill] sm:$0xff]  ;;  %v14102_v55 = vld [vmem:[#allocation134_spill] sm:$0xff] }
 0x2cb   : > { %14083 = vst [vmem:[#allocation63_spill] sm:$0xff] %v10453_v3  ;;  %v2278_v4 = vadd.bf16 %v2262_v12, %v14089_v23  ;;  %v10466_v52 = vsel %vm1861_vm2, %v1937_v8, %v1945_v41  ;;  %v14097_v31 = vmul.bf16 %v14095_v28, %v14096_v37  ;;  %v3121_v57 = vmul.bf16 %v14099_v6, %v14098_v56  ;;  %v14101_v23 = vld [vmem:[#allocation27_spill] sm:$0xff]  ;;  %v14103_v5 = vld [vmem:[#allocation198_spill] sm:$0xff] }
 0x2cc   : > { %14094 = vst [vmem:[#allocation65_spill] sm:$0xff] %v10466_v52  ;;  %v14100_v35 = vmov 0   ;;  %v2317_v12 = vmul.bf16 %v14101_v23, %v10466_v52  ;;  %v3178_v7 = vmul.bf16 %v14103_v5, %v14102_v55  ;;  %v14104_v45 = vld [vmem:[#allocation83_spill] sm:$0xff]  ;;  %v14107_v43 = vld [vmem:[#allocation38_spill] sm:$0xff]  ;;  %v14114_v50 = vmov 1086341312  }
 0x2cd   : > { %v2969_v22 = vadd.bf16 %v2953_v14, %v14097_v31  ;;  %v7471_v27 = vmax.bf16 %v14100_v35, %v7455_v44  ;;  %v3234_v49 = vmul.bf16 %v14104_v45, %v10453_v3  ;;  %v14105_v41 = vld [vmem:[#allocation39_spill] sm:$0xff]  ;;  %v14108_v37 = vrot.slane %v14107_v43, 3  ;;  %v14110_v31 = vld [vmem:[#allocation201_spill] sm:$0xff]  ;;  %v14111_v6 = vld [vmem:[#allocation98_spill] sm:$0xff] }
 0x2ce   : > { %v14106_v38 = vrot.slane %v14105_v41, 3  ;;  %v3521_v44 = vmul.bf16 %v14111_v6, %v14110_v31  ;;  %v14112_v56 = vld [vmem:[#allocation203_spill] sm:$0xff]  ;;  %v14113_v28 = vld [vmem:[#allocation206_spill] sm:$0xff]  ;;  %v2333_v5 = vadd.bf16 %v2317_v12, %v2278_v4  ;;  %v14115_v55 = vld [vmem:[#allocation205_spill] sm:$0xff]  ;;  %v3739_v6 = vmul.bf16 %v14123_v1, %v14122_v19 }
 0x2cf   : > { %v3024_v8 = vadd.bf16 %v3008_v36, %v2969_v22  ;;  %v3576_v23 = vmul.bf16 %v14113_v28, %v14112_v56  ;;  %v7487_v52 = vmin.bf16 %v14114_v50, %v7471_v27  ;;  %v14116_v11 = vld [vmem:[#allocation114_spill] sm:$0xff]  ;;  %v14118_v22 = vld [vmem:[#allocation207_spill] sm:$0xff]  ;;  %v14119_v43 = vld [vmem:[#allocation204_spill] sm:$0xff] }
 0x2d0   : > { %v10485_v14 = vsel %vm3352_vm4, %v14108_v37, %v14106_v38  ;;  %v3630_v45 = vmul.bf16 %v14116_v11, %v14115_v55  ;;  %v14117_v36 = vld [vmem:[#allocation202_spill] sm:$0xff]  ;;  %v14121_v38 = vmul.bf16 %v14119_v43, %v14120_v2  ;;  %v14124_v31 = vld [vmem:[#allocation208_spill] sm:$0xff]  ;;  %v14125_v56 = vld [vmem:[#allocation53_spill] sm:$0xff]  ;;  %v2349_v4 = vadd.bf16 %v2333_v5, %v1811_v58 }
 0x2d1   : > { %14109 = vst [vmem:[#allocation209_spill] sm:$0xff] %v10485_v14  ;;  %v3685_v41 = vmul.bf16 %v14118_v22, %v14117_v36  ;;  %v3081_v3 = vadd.bf16 %v3065_v40, %v3024_v8  ;;  %v3794_v28 = vmul.bf16 %v14124_v31, %v10485_v14  ;;  %v7503_v27 = vadd.bf16 %v7487_v52, %v14125_v56  ;;  %v14126_v12 = vld [vmem:[#allocation48_spill] sm:$0xff]  ;;  %v14128_v55 = vld [vmem:[#allocation50_spill] sm:$0xff]  ;;  %v14130_v36 = vld [vmem:[#allocation211_spill] sm:$0xff] }
 0x2d2   : > { %v3537_v37 = vadd.bf16 %v3521_v44, %v14121_v38  ;;  %v4027_v11 = vor.u32 %v14127_v39, %v14126_v12  ;;  %v4035_v22 = vor.u32 %v14129_v16, %v14128_v55  ;;  %v14131_v2 = vld [vmem:[#allocation35_spill] sm:$0xff]  ;;  %v14132_v38 = vld [vmem:[#allocation34_spill] sm:$0xff]  ;;  %v14134_v19 = vld [vmem:[#allocation28_spill] sm:$0xff] }
 0x2d3   : > { %v3137_v40 = vadd.bf16 %v3121_v57, %v3081_v3  ;;  %v4360_v44 = vmul.bf16 %v14131_v2, %v14130_v36  ;;  %v14133_v43 = vld [vmem:[#allocation131_spill] sm:$0xff]  ;;  %8242 = vmatmul.mubr.bf16.vlgmr.msra.gmra.mrb[0].mxu1 %v7503_v27  ;;  %v2372_v31 = vadd.bf16 %v14134_v19, %v2349_v4  ;;  %v14136_v5 = vld [vmem:[#allocation212_spill] sm:$0xff]  ;;  %v14137_v58 = vld [vmem:[#allocation213_spill] sm:$0xff] }
 0x2d4   : > { %v3592_v8 = vadd.bf16 %v3576_v23, %v3537_v37  ;;  %v4412_v1 = vmul.bf16 %v14133_v43, %v14132_v38  ;;  %v10514_v52 = vsel %vm1015_vm0, %v4027_v11, %v4035_v22  ;;  %v4464_v39 = vmul.bf16 %v14137_v58, %v14136_v5  ;;  %v14138_v56 = vld [vmem:[#allocation214_spill] sm:$0xff]  ;;  %v14139_v12 = vld [vmem:[#allocation132_spill] sm:$0xff]  ;;  %v14143_v36 = vld [vmem:[#allocation55_spill] sm:$0xff] }
 0x2d5   : > { %14135 = vst [vmem:[#allocation194_spill] sm:$0xff] %v10514_v52  ;;  %v4516_v16 = vmul.bf16 %v14139_v12, %v14138_v56  ;;  %v3194_v3 = vadd.bf16 %v3178_v7, %v3137_v40  ;;  %v14140_v57 = vld [vmem:[#allocation130_spill] sm:$0xff]  ;;  %v14144_v43 = vld [vmem:[#allocation215_spill] sm:$0xff]  ;;  %v2388_v4 = vmax.bf16 %v14100_v35, %v2372_v31  ;;  %v14146_v19 = vld [vmem:[#allocation45_spill] sm:$0xff] }
 0x2d6   : > { %v3646_v55 = vadd.bf16 %v3630_v45, %v3592_v8  ;;  %v14141_v23 = vld [vmem:[#allocation210_spill] sm:$0xff]  ;;  %v4568_v27 = vmul.bf16 %v14144_v43, %v14143_v36  ;;  %v14147_v38 = vrot.slane %v14146_v19, 4  ;;  %v14148_v58 = vld [vmem:[#allocation44_spill] sm:$0xff]  ;;  %v14152_v45 = vld [vmem:[#allocation171_spill] sm:$0xff] }
 0x2d7   : > { %v14142_v37 = vmul.bf16 %v14140_v57, %v14141_v23  ;;  %v14145_v11 = vld [vmem:[#allocation170_spill] sm:$0xff]  ;;  %v14149_v5 = vrot.slane %v14148_v58, 4  ;;  %v3250_v8 = vadd.bf16 %v3234_v49, %v3194_v3  ;;  %v14154_v43 = vld [vmem:[#allocation223_spill] sm:$0xff]  ;;  %v10540_v31 = vmin.bf16 %v14114_v50, %v2388_v4  ;;  %v14158_v58 = vld [vmem:[#allocation220_spill] sm:$0xff] }
 0x2d8   : > { %v4620_v22 = vmul.bf16 %v14145_v11, %v10514_v52  ;;  %v14151_v7 = vld [vmem:[#allocation218_spill] sm:$0xff]  ;;  %v14155_v11 = vld [vmem:[#allocation221_spill] sm:$0xff]  ;;  %v14161_v14 = vld [vmem:[#allocation224_spill] sm:$0xff] }
 0x2d9   : > { %v4376_v2 = vadd.bf16 %v4360_v44, %v14142_v37  ;;  %v10533_v12 = vsel %vm1578_vm1, %v14149_v5, %v14147_v38  ;;  %v4922_v40 = vmul.bf16 %v14152_v45, %v14151_v7  ;;  %v3701_v44 = vadd.bf16 %v3685_v41, %v3646_v55  ;;  %v14153_v37 = vld [vmem:[#allocation219_spill] sm:$0xff]  ;;  %v14156_v52 = vld [vmem:[#allocation217_spill] sm:$0xff]  ;;  %v14159_v57 = vld [vmem:[#allocation174_spill] sm:$0xff] }
 0x2da   : > { %14150 = vst [vmem:[#allocation59_spill] sm:$0xff] %v10533_v12  ;;  %v4974_v36 = vmul.bf16 %v14154_v43, %v14153_v37  ;;  %v14157_v19 = vmul.bf16 %v14155_v11, %v14156_v52  ;;  %v5026_v38 = vmul.bf16 %v14159_v57, %v14158_v58  ;;  %v14160_v5 = vld [vmem:[#allocation222_spill] sm:$0xff]  ;;  %v14164_v3 = vld [vmem:[#allocation225_spill] sm:$0xff] }
 0x2db   : > { %v4428_v23 = vadd.bf16 %v4412_v1, %v4376_v2  ;;  %v5078_v35 = vmul.bf16 %v14161_v14, %v14160_v5  ;;  %v3755_v45 = vadd.bf16 %v3739_v6, %v3701_v44  ;;  %v14162_v41 = vld [vmem:[#allocation54_spill] sm:$0xff]  ;;  %v14163_v1 = vld [vmem:[#allocation175_spill] sm:$0xff]  ;;  %v5182_v55 = vmul.bf16 %v14164_v3, %v10533_v12 }
 0x2dc   : > { %v4938_v56 = vadd.bf16 %v4922_v40, %v14157_v19  ;;  %v5130_v2 = vmul.bf16 %v14163_v1, %v14162_v41  ;;  %v14165_v43 = vld [vmem:[#allocation46_spill] sm:$0xff]  ;;  %v14168_v19 = vld [vmem:[#allocation47_spill] sm:$0xff]  ;;  %v5748_v44 = vmul.bf16 %v14044_v51, %v14047_v0  ;;  %v5904_v51 = vmul.bf16 %v14052_v61, %v10057_v26 }
 0x2dd   : > { %v4480_v49 = vadd.bf16 %v4464_v39, %v4428_v23  ;;  %v14166_v37 = vshrl.u32 %v14165_v43, 16  ;;  %v14167_v52 = vshll.u32 %v14165_v43, 16  ;;  %v14169_v57 = vshrl.u32 %v14168_v19, 16  ;;  %v6070_v23 = vld [vmem:[#allocation2 + $0x80] sm:$0xe0] }
 0x2de   : > { %v4990_v4 = vadd.bf16 %v4974_v36, %v4938_v56  ;;  %v3810_v11 = vadd.bf16 %v3794_v28, %v3755_v45  ;;  %v14170_v6 = vshll.u32 %v14168_v19, 16  ;;  %v5800_v56 = vmul.bf16 %v14048_v48, %v14049_v59  ;;  %v14172_v45 = vld [vmem:[#allocation227_spill] sm:$0xff] }
 0x2df   : > { %v5411_v7 = vrot.slane %v14166_v37, 4  ;;  %v5414_v40 = vrot.slane %v14167_v52, 5  ;;  %v5419_v58 = vrot.slane %v14169_v57, 4  ;;  %v4532_v14 = vadd.bf16 %v4516_v16, %v4480_v49  ;;  %v6071_v37 = vld [vmem:[#allocation2 + $0x88] sm:$0x1f] }
 0x2e0   : > { %v5422_v39 = vrot.slane %v14170_v6, 5  ;;  %v5042_v3 = vadd.bf16 %v5026_v38, %v4990_v4  ;;  %v5852_v43 = vmul.bf16 %v14050_v54, %v14051_v63  ;;  %v3826_v52 = vadd.bf16 %v3810_v11, %v3250_v8  ;;  %v14171_v16 = vld [vmem:[#allocation29_spill] sm:$0xff] }
 0x2e1   : > { %v5415_v36 = vor.u32 %v5414_v40, %v5411_v7  ;;  %v4584_v57 = vadd.bf16 %v4568_v27, %v4532_v14  ;;  %v14173_v49 = vmul.bf16 %v14171_v16, %v14172_v45  ;;  %v5956_v7 = vmul.bf16 %v14053_v47, %v10382_v18  ;;  %v14174_v27 = vld [vmem:[#allocation69_spill] sm:$0xff]  ;;  %v6633_v45 = vld [vmem:[#allocation2 + $0x80] sm:$0xe0] }
 0x2e2   : > { %v5423_v28 = vor.u32 %v5422_v39, %v5419_v58  ;;  %v5094_v6 = vadd.bf16 %v5078_v35, %v5042_v3  ;;  %v6167_v38 = vrot.slane %v6070_v23, 5  ;;  %v6168_v11 = vrot.slane %v6071_v37, 5  ;;  %v14175_v58 = vld [vmem:[#allocation235_spill] sm:$0xff]  ;;  %v14176_v39 = vld [vmem:[#allocation30_spill] sm:$0xff]  ;;  %v14179_v23 = vld [vmem:[#allocation32_spill] sm:$0xff] }
 0x2e3   : > { %v5764_v19 = vadd.bf16 %v5748_v44, %v14173_v49  ;;  %v4636_v4 = vadd.bf16 %v4620_v22, %v4584_v57  ;;  %v6311_v35 = vmul.bf16 %v14176_v39, %v14175_v58  ;;  %v14177_v3 = vld [vmem:[#allocation239_spill] sm:$0xff]  ;;  %v14180_v37 = vld [vmem:[#allocation237_spill] sm:$0xff]  ;;  %v14181_v57 = vld [vmem:[#allocation234_spill] sm:$0xff] }
 0x2e4   : > { %v10575_v40 = vsel %vm1861_vm2, %v5415_v36, %v5423_v28  ;;  %v5146_v14 = vadd.bf16 %v5130_v2, %v5094_v6  ;;  %v6363_v44 = vmul.bf16 %v14177_v3, %v14060_v33  ;;  %v10584_v22 = vsel %vm6142_vm5, %v6167_v38, %v6168_v11  ;;  %v14183_v6 = vld [vmem:[#allocation240_spill] sm:$0xff]  ;;  %v14184_v39 = vld [vmem:[#allocation241_spill] sm:$0xff]  ;;  %v14185_v3 = vld [vmem:[#allocation242_spill] sm:$0xff] }
 0x2e5   : > { %v5816_v54 = vadd.bf16 %v5800_v56, %v5764_v19  ;;  %v6008_v8 = vmul.bf16 %v14174_v27, %v10575_v40  ;;  %v4652_v49 = vadd.bf16 %v4636_v4, %v3826_v52  ;;  %14178 = vst [vmem:[#allocation58_spill] sm:$0xff] %v10584_v22  ;;  %v6415_v36 = vmul.bf16 %v14179_v23, %v14062_v9  ;;  %v6634_v56 = vld [vmem:[#allocation2 + $0x88] sm:$0x3f] }
 0x2e6   : > { %v5198_v2 = vadd.bf16 %v5182_v55, %v5146_v14  ;;  %v14182_v28 = vmul.bf16 %v14180_v37, %v14181_v57  ;;  %v6467_v58 = vmul.bf16 %v14184_v39, %v14183_v6  ;;  %v6519_v33 = vmul.bf16 %v14185_v3, %v10393_v13 }
 0x2e7   : > { %v5868_v47 = vadd.bf16 %v5852_v43, %v5816_v54  ;;  %v14186_v54 = vld [vmem:[#allocation243_spill] sm:$0xff]  ;;  %v6799_v38 = vshrl.u32 %v6633_v45, 16  ;;  %v6802_v4 = vshll.u32 %v6633_v45, 16  ;;  %v6807_v9 = vshrl.u32 %v6634_v56, 16 }
 0x2e8   : > { %v6327_v19 = vadd.bf16 %v6311_v35, %v14182_v28  ;;  %v6571_v43 = vmul.bf16 %v14186_v54, %v10584_v22  ;;  %v5214_v11 = vadd.bf16 %v5198_v2, %v4652_v49  ;;  %v6810_v55 = vshll.u32 %v6634_v56, 16  ;;  %v990_v49 = vld [vmem:[#allocation2 + $0x78] sm:$0xf] }
 0x2e9   : > { %v5920_v52 = vadd.bf16 %v5904_v51, %v5868_v47  ;;  %v6801_v27 = vrot.slane %v6799_v38, 5  ;;  %v6804_v57 = vrot.slane %v6802_v4, 6  ;;  %v7138_v35 = vmul.bf16 %v10167_v17, %v10156_v20  ;;  %v989_v47 = vld [vmem:[#allocation2 + $0x70] sm:$0xf8] }
 0x2ea   : > { %v6379_v23 = vadd.bf16 %v6363_v44, %v6327_v19  ;;  %v6809_v39 = vrot.slane %v6807_v9, 5  ;;  %v6812_v6 = vrot.slane %v6810_v55, 6  ;;  %v7190_v51 = vmul.bf16 %v10171_v30, %v10159_v53  ;;  %v1516_v55 = vld [vmem:[#allocation2 + $0x70] sm:$0xf0] }
 0x2eb   : > { %v5972_v14 = vadd.bf16 %v5956_v7, %v5920_v52  ;;  %v6805_v3 = vor.u32 %v6804_v57, %v6801_v27  ;;  %v14187_v44 = vmul.bf16 %v10163_v60, %v10153_v15  ;;  %v7242_v7 = vmul.bf16 %v10193_v42, %v10177_v46  ;;  %v1517_v57 = vld [vmem:[#allocation2 + $0x78] sm:$0xf] }
 0x2ec   : > { %v6431_v28 = vadd.bf16 %v6415_v36, %v6379_v23  ;;  %v6813_v2 = vor.u32 %v6812_v6, %v6809_v39  ;;  %v7294_v9 = vmul.bf16 %v10197_v29, %v10204_v24  ;;  %v7346_v23 = vmul.bf16 %v10201_v34, %v10420_v62  ;;  %v14249_v34 = vld [vmem:[#allocation130_spill] sm:$0xff] }
 0x2ed   : > { %v6024_v54 = vadd.bf16 %v6008_v8, %v5972_v14  ;;  %v7154_v45 = vadd.bf16 %v7138_v35, %v14187_v44  ;;  %v1102_v8 = vshrl.u32 %v989_v47, 16  ;;  %v1105_v27 = vshll.u32 %v989_v47, 16  ;;  %v14189_v47 = vld [vmem:[#allocation23_spill] sm:$0xff] }
 0x2ee   : > { %v6483_v56 = vadd.bf16 %v6467_v58, %v6431_v28  ;;  %v10611_v15 = vsel %vm6661_vm6, %v6805_v3, %v6813_v2  ;;  %v1110_v38 = vshrl.u32 %v990_v49, 16  ;;  %v1113_v4 = vshll.u32 %v990_v49, 16 }
 0x2ef   : > { %v6040_v36 = vadd.bf16 %v6024_v54, %v5214_v11  ;;  %v7206_v19 = vadd.bf16 %v7190_v51, %v7154_v45  ;;  %14188 = vst [vmem:[#allocation216_spill] sm:$0xff] %v10611_v15  ;;  %v7401_v58 = vmul.bf16 %v10213_v25, %v10611_v15  ;;  %v1104_v39 = vrot.slane %v1102_v8, 3  ;;  %v14191_v8 = vld [vmem:[#allocation19_spill] sm:$0xff] }
 0x2f0   : > { %v6535_v52 = vadd.bf16 %v6519_v33, %v6483_v56  ;;  %v1107_v6 = vrot.slane %v1105_v27, 4  ;;  %v1112_v28 = vrot.slane %v1110_v38, 3  ;;  %v1115_v54 = vrot.slane %v1113_v4, 4  ;;  %v1835_v33 = vld [vmem:[#allocation2 + $0x70] sm:$0xf0]  ;;  %v14192_v38 = vld [vmem:[#allocation61_spill] sm:$0xff] }
 0x2f1   : > { %v7258_v14 = vadd.bf16 %v7242_v7, %v7206_v19  ;;  %v1384_v11 = vmul.bf16 %v8981_v10, %v10238_v32  ;;  %v1424_v44 = vmul.bf16 %v14189_v47, %v10438_v21  ;;  %v1594_v45 = vrot.slane %v1516_v55, 4  ;;  %v1836_v7 = vld [vmem:[#allocation2 + $0x78] sm:$0x1f]  ;;  %v14190_v19 = vld [vmem:[#allocation37_spill] sm:$0xff]  ;;  %v14193_v4 = vld [vmem:[#allocation20_spill] sm:$0xff] }
 0x2f2   : > { %v6587_v35 = vadd.bf16 %v6571_v43, %v6535_v52  ;;  %v1108_v3 = vor.u32 %v1107_v6, %v1104_v39  ;;  %v1116_v56 = vor.u32 %v1115_v54, %v1112_v28  ;;  %v1595_v2 = vrot.slane %v1517_v57, 4  ;;  %v14196_v6 = vld [vmem:[#allocation24_spill] sm:$0xff]  ;;  %v14205_v47 = vld [vmem:[#allocation86_spill] sm:$0xff]  ;;  %v14247_v21 = vld [vmem:[#allocation95_spill] sm:$0xff] }
 0x2f3   : > { %v7310_v51 = vadd.bf16 %v7294_v9, %v7258_v14  ;;  %v1692_v27 = vmul.bf16 %v14191_v8, %v14190_v19  ;;  %v1440_v52 = vadd.bf16 %v1424_v44, %v1384_v11  ;;  %v1728_v25 = vmul.bf16 %v14193_v4, %v14192_v38  ;;  %v14198_v4 = vld [vmem:[#allocation57_spill] sm:$0xff] }
 0x2f4   : > { %v6603_v49 = vadd.bf16 %v6587_v35, %v6040_v36  ;;  %v1948_v32 = vshrl.u32 %v1835_v33, 16  ;;  %v10624_v9 = vsel %vm1015_vm0, %v1108_v3, %v1116_v56  ;;  %v10627_v14 = vsel %vm1578_vm1, %v1594_v45, %v1595_v2  ;;  %v14199_v45 = vld [vmem:[#allocation25_spill] sm:$0xff] }
 0x2f5   : > { %v7362_v43 = vadd.bf16 %v7346_v23, %v7310_v51  ;;  %14194 = vst [vmem:[#allocation60_spill] sm:$0xff] %v10624_v9  ;;  %14195 = vst [vmem:[#allocation64_spill] sm:$0xff] %v10627_v14  ;;  %v1951_v55 = vshll.u32 %v1835_v33, 16  ;;  %v1956_v39 = vshrl.u32 %v1836_v7, 16  ;;  %v1477_v57 = vmul.bf16 %v14196_v6, %v10624_v9  ;;  %v14197_v23 = vld [vmem:[#allocation21_spill] sm:$0xff]  ;;  %v14202_v6 = vld [vmem:[#allocation88_spill] sm:$0xff] }
 0x2f6   : > { %v1744_v35 = vadd.bf16 %v1728_v25, %v1692_v27  ;;  %v1780_v28 = vmul.bf16 %v14197_v23, %v10627_v14  ;;  %v1950_v54 = vrot.slane %v1948_v32, 4  ;;  %v1959_v44 = vshll.u32 %v1836_v7, 16  ;;  %v14203_v25 = vld [vmem:[#allocation87_spill] sm:$0xff]  ;;  %v14206_v23 = vld [vmem:[#allocation85_spill] sm:$0xff]  ;;  %v14209_v7 = vld [vmem:[#allocation252_spill] sm:$0xff] }
 0x2f7   : > { %v7417_v36 = vadd.bf16 %v7401_v58, %v7362_v43  ;;  %v1953_v11 = vrot.slane %v1951_v55, 5  ;;  %v1958_v51 = vrot.slane %v1956_v39, 4  ;;  %v1493_v3 = vadd.bf16 %v1477_v57, %v1440_v52  ;;  %v14200_v58 = vld [vmem:[#allocation65_spill] sm:$0xff]  ;;  %v14201_v43 = vld [vmem:[#allocation26_spill] sm:$0xff]  ;;  %v14210_v39 = vld [vmem:[#allocation192_spill] sm:$0xff] }
 0x2f8   : > { %v1796_v56 = vadd.bf16 %v1780_v28, %v1744_v35  ;;  %v2227_v2 = vmul.bf16 %v14199_v45, %v14198_v4  ;;  %v1961_v8 = vrot.slane %v1959_v44, 5  ;;  %v2263_v38 = vmul.bf16 %v14201_v43, %v14200_v58  ;;  %v14212_v57 = vld [vmem:[#allocation193_spill] sm:$0xff]  ;;  %v14213_v35 = vld [vmem:[#allocation196_spill] sm:$0xff]  ;;  %v14214_v44 = vld [vmem:[#allocation195_spill] sm:$0xff] }
 0x2f9   : > { %v7433_v19 = vadd.bf16 %v7417_v36, %v6603_v49  ;;  %v1954_v33 = vor.u32 %v1953_v11, %v1950_v54  ;;  %v14204_v27 = vor.u32 %v14202_v6, %v14203_v25  ;;  %v14207_v32 = vor.u32 %v14205_v47, %v14206_v23  ;;  %v14211_v36 = vld [vmem:[#allocation31_spill] sm:$0xff]  ;;  %v14215_v43 = vld [vmem:[#allocation33_spill] sm:$0xff]  ;;  %v14216_v25 = vld [vmem:[#allocation68_spill] sm:$0xff] }
 0x2fa   : > { %v1812_v52 = vadd.bf16 %v1796_v56, %v1493_v3  ;;  %v2915_v4 = vmul.bf16 %v14211_v36, %v14210_v39  ;;  %v2954_v28 = vmul.bf16 %v14213_v35, %v14212_v57  ;;  %v1962_v54 = vor.u32 %v1961_v8, %v1958_v51  ;;  %v14217_v45 = vld [vmem:[#allocation197_spill] sm:$0xff]  ;;  %v14219_v58 = vld [vmem:[#allocation134_spill] sm:$0xff]  ;;  %v14221_v56 = vld [vmem:[#allocation63_spill] sm:$0xff] }
 0x2fb   : > { %v10644_v55 = vsel %vm2470_vm3, %v14207_v32, %v14204_v27  ;;  %v7456_v49 = vadd.bf16 %v14209_v7, %v7433_v19  ;;  %v2279_v11 = vadd.bf16 %v2263_v38, %v2227_v2  ;;  %v3009_v6 = vmul.bf16 %v14215_v43, %v14214_v44  ;;  %v14220_v19 = vld [vmem:[#allocation36_spill] sm:$0xff]  ;;  %v14222_v7 = vld [vmem:[#allocation198_spill] sm:$0xff]  ;;  %v14224_v8 = vld [vmem:[#allocation83_spill] sm:$0xff] }
 0x2fc   : > { %14208 = vst [vmem:[#allocation226_spill] sm:$0xff] %v10644_v55  ;;  %v3066_v47 = vmul.bf16 %v14217_v45, %v14216_v25  ;;  %v14218_v23 = vmov 0   ;;  %v2970_v32 = vadd.bf16 %v2954_v28, %v2915_v4  ;;  %v3122_v3 = vmul.bf16 %v14220_v19, %v14219_v58  ;;  %v14225_v51 = vld [vmem:[#allocation84_spill] sm:$0xff]  ;;  %v14227_v43 = vld [vmem:[#allocation82_spill] sm:$0xff]  ;;  %v14241_v9 = vld [vmem:[#allocation209_spill] sm:$0xff] }
 0x2fd   : > { %v7472_v27 = vmax.bf16 %v14218_v23, %v7456_v49  ;;  %v3179_v39 = vmul.bf16 %v14222_v7, %v14221_v56  ;;  %v10661_v36 = vsel %vm1861_vm2, %v1954_v33, %v1962_v54  ;;  %v3235_v38 = vmul.bf16 %v14224_v8, %v10644_v55  ;;  %v14230_v49 = vld [vmem:[#allocation201_spill] sm:$0xff]  ;;  %v14231_v4 = vld [vmem:[#allocation204_spill] sm:$0xff]  ;;  %v14232_v7 = vld [vmem:[#allocation27_spill] sm:$0xff] }
 0x2fe   : > { %14223 = vst [vmem:[#allocation228_spill] sm:$0xff] %v10661_v36  ;;  %v14226_v2 = vrot.slane %v14225_v51, 3  ;;  %v14228_v35 = vrot.slane %v14227_v43, 3  ;;  %v3486_v28 = vmul.bf16 %v14231_v4, %v14230_v49  ;;  %v2318_v56 = vmul.bf16 %v14232_v7, %v10661_v36  ;;  %v14233_v54 = vld [vmem:[#allocation203_spill] sm:$0xff]  ;;  %v14234_v58 = vld [vmem:[#allocation98_spill] sm:$0xff]  ;;  %v14235_v8 = vld [vmem:[#allocation205_spill] sm:$0xff] }
 0x2ff   : > { %v7488_v19 = vmin.bf16 %v14114_v50, %v7472_v27  ;;  %v3025_v33 = vadd.bf16 %v3009_v6, %v2970_v32  ;;  %v3522_v25 = vmul.bf16 %v14234_v58, %v14233_v54  ;;  %v14236_v55 = vld [vmem:[#allocation206_spill] sm:$0xff]  ;;  %v14242_v49 = vld [vmem:[#allocation163_spill] sm:$0xff]  ;;  %v14243_v32 = vld [vmem:[#allocation208_spill] sm:$0xff] }
 0x300   : > { %v10670_v45 = vsel %vm3352_vm4, %v14228_v35, %v14226_v2  ;;  %v3577_v51 = vmul.bf16 %v14236_v55, %v14235_v8  ;;  %v14237_v44 = vld [vmem:[#allocation202_spill] sm:$0xff]  ;;  %v14239_v35 = vld [vmem:[#allocation56_spill] sm:$0xff]  ;;  %v14240_v2 = vld [vmem:[#allocation207_spill] sm:$0xff]  ;;  %v3740_v4 = vmul.bf16 %v14242_v49, %v14241_v9  ;;  %v2334_v10 = vadd.bf16 %v2318_v56, %v2279_v11 }
 0x301   : > { %14229 = vst [vmem:[#allocation229_spill] sm:$0xff] %v10670_v45  ;;  %v14238_v43 = vld [vmem:[#allocation114_spill] sm:$0xff]  ;;  %v3686_v14 = vmul.bf16 %v14240_v2, %v14239_v35  ;;  %v7504_v27 = vadd.bf16 %v7488_v19, %v10540_v31  ;;  %v3082_v7 = vadd.bf16 %v3066_v47, %v3025_v33  ;;  %v3538_v6 = vadd.bf16 %v3522_v25, %v3486_v28  ;;  %v14244_v54 = vld [vmem:[#allocation91_spill] sm:$0xff]  ;;  %v14245_v36 = vld [vmem:[#allocation92_spill] sm:$0xff] }
 0x302   : > { %v3631_v57 = vmul.bf16 %v14238_v43, %v14237_v44  ;;  %v3795_v58 = vmul.bf16 %v14243_v32, %v10670_v45  ;;  %v4044_v55 = vor.u32 %v14245_v36, %v14244_v54  ;;  %v14246_v8 = vld [vmem:[#allocation94_spill] sm:$0xff]  ;;  %v14248_v44 = vld [vmem:[#allocation211_spill] sm:$0xff]  ;;  %v2350_v35 = vadd.bf16 %v2334_v10, %v1812_v52  ;;  %v14253_v19 = vld [vmem:[#allocation212_spill] sm:$0xff] }
 0x303   : > { %v4052_v43 = vor.u32 %v14247_v21, %v14246_v8  ;;  %v4325_v2 = vmul.bf16 %v14249_v34, %v14248_v44  ;;  %8245 = vmatprep.mubr.bf16.mxu1 %v7504_v27  ;;  %v3138_v49 = vadd.bf16 %v3122_v3, %v3082_v7  ;;  %v3593_v9 = vadd.bf16 %v3577_v51, %v3538_v6  ;;  %v14250_v31 = vld [vmem:[#allocation34_spill] sm:$0xff]  ;;  %v14251_v11 = vld [vmem:[#allocation35_spill] sm:$0xff]  ;;  %v14256_v33 = vld [vmem:[#allocation213_spill] sm:$0xff] }
 0x304   : > { %v4361_v47 = vmul.bf16 %v14251_v11, %v14250_v31  ;;  %v14254_v56 = vld [vmem:[#allocation131_spill] sm:$0xff]  ;;  %v14255_v36 = vld [vmem:[#allocation214_spill] sm:$0xff]  ;;  %v14258_v8 = vld [vmem:[#allocation132_spill] sm:$0xff] }
 0x305   : > { %v10699_v25 = vsel %vm1015_vm0, %v4044_v55, %v4052_v43  ;;  %v4413_v28 = vmul.bf16 %v14254_v56, %v14253_v19  ;;  %v4465_v54 = vmul.bf16 %v14256_v33, %v14255_v36  ;;  %v14257_v21 = vld [vmem:[#allocation55_spill] sm:$0xff]  ;;  %v14259_v44 = vld [vmem:[#allocation28_spill] sm:$0xff]  ;;  %v3195_v10 = vadd.bf16 %v3179_v39, %v3138_v49  ;;  %v14260_v3 = vld [vmem:[#allocation194_spill] sm:$0xff] }
 0x306   : > { %14252 = vst [vmem:[#allocation231_spill] sm:$0xff] %v10699_v25  ;;  %v4517_v32 = vmul.bf16 %v14258_v8, %v14257_v21  ;;  %v2373_v27 = vadd.bf16 %v14259_v44, %v2350_v35  ;;  %v3647_v7 = vadd.bf16 %v3631_v57, %v3593_v9  ;;  %v4377_v52 = vadd.bf16 %v4361_v47, %v4325_v2  ;;  %v14261_v51 = vld [vmem:[#allocation215_spill] sm:$0xff]  ;;  %v14262_v55 = vld [vmem:[#allocation170_spill] sm:$0xff]  ;;  %v14265_v56 = vld [vmem:[#allocation89_spill] sm:$0xff] }
 0x307   : > { %v4569_v6 = vmul.bf16 %v14261_v51, %v14260_v3  ;;  %v4621_v43 = vmul.bf16 %v14262_v55, %v10699_v25  ;;  %v14263_v11 = vld [vmem:[#allocation90_spill] sm:$0xff]  ;;  %v14266_v19 = vrot.slane %v14265_v56, 4  ;;  %v14269_v8 = vld [vmem:[#allocation221_spill] sm:$0xff]  ;;  %v3251_v9 = vadd.bf16 %v3235_v38, %v3195_v10  ;;  %v14270_v2 = vld [vmem:[#allocation219_spill] sm:$0xff] }
 0x308   : > { %v14264_v34 = vrot.slane %v14263_v11, 4  ;;  %v14268_v36 = vld [vmem:[#allocation218_spill] sm:$0xff]  ;;  %v2389_v39 = vmax.bf16 %v14218_v23, %v2373_v27  ;;  %v3702_v57 = vadd.bf16 %v3686_v14, %v3647_v7  ;;  %v4429_v35 = vadd.bf16 %v4413_v28, %v4377_v52  ;;  %v14271_v49 = vld [vmem:[#allocation171_spill] sm:$0xff]  ;;  %v14272_v51 = vld [vmem:[#allocation220_spill] sm:$0xff] }
 0x309   : > { %v4887_v21 = vmul.bf16 %v14269_v8, %v14268_v36  ;;  %v4923_v47 = vmul.bf16 %v14271_v49, %v14270_v2  ;;  %v14273_v55 = vld [vmem:[#allocation223_spill] sm:$0xff]  ;;  %v14274_v11 = vld [vmem:[#allocation174_spill] sm:$0xff]  ;;  %v5131_v14 = vmul.bf16 %v14163_v1, %v10533_v12  ;;  %v14276_v28 = vld [vmem:[#allocation225_spill] sm:$0xff] }
 0x30a   : > { %v10717_v33 = vsel %vm1578_vm1, %v14266_v19, %v14264_v34  ;;  %v4975_v25 = vmul.bf16 %v14273_v55, %v14272_v51  ;;  %v5027_v56 = vmul.bf16 %v14274_v11, %v14160_v5  ;;  %v14275_v34 = vld [vmem:[#allocation224_spill] sm:$0xff]  ;;  %v10731_v44 = vmin.bf16 %v14114_v50, %v2389_v39  ;;  %v14277_v7 = vld [vmem:[#allocation93_spill] sm:$0xff] }
 0x30b   : > { %14267 = vst [vmem:[#allocation43_spill] sm:$0xff] %v10717_v33  ;;  %v5079_v19 = vmul.bf16 %v14275_v34, %v14162_v41  ;;  %v3756_v36 = vadd.bf16 %v3740_v4, %v3702_v57  ;;  %v4481_v27 = vadd.bf16 %v4465_v54, %v4429_v35  ;;  %v4939_v38 = vadd.bf16 %v4923_v47, %v4887_v21  ;;  %v14280_v41 = vld [vmem:[#allocation96_spill] sm:$0xff]  ;;  %v14283_v47 = vld [vmem:[#allocation230_spill] sm:$0xff] }
 0x30c   : > { %v5183_v10 = vmul.bf16 %v14276_v28, %v10717_v33  ;;  %v14278_v52 = vshrl.u32 %v14277_v7, 16  ;;  %v14279_v11 = vshll.u32 %v14277_v7, 16  ;;  %v14281_v39 = vshrl.u32 %v14280_v41, 16 }
 0x30d   : > { %v3811_v49 = vadd.bf16 %v3795_v58, %v3756_v36  ;;  %v4533_v34 = vadd.bf16 %v4517_v32, %v4481_v27  ;;  %v14282_v4 = vshll.u32 %v14280_v41, 16  ;;  %v4991_v57 = vadd.bf16 %v4975_v25, %v4939_v38  ;;  %v6073_v32 = vld [vmem:[#allocation2 + $0x98] sm:$0x1f]  ;;  %v14284_v41 = vld [vmem:[#allocation232_spill] sm:$0xff]  ;;  %v14287_v38 = vld [vmem:[#allocation69_spill] sm:$0xff] }
 0x30e   : > { %v5428_v55 = vrot.slane %v14278_v52, 4  ;;  %v5431_v5 = vrot.slane %v14279_v11, 5  ;;  %v5436_v51 = vrot.slane %v14281_v39, 4  ;;  %v5713_v21 = vmul.bf16 %v14171_v16, %v14047_v0  ;;  %v6072_v52 = vld [vmem:[#allocation2 + $0x90] sm:$0xe0] }
 0x30f   : > { %v5439_v54 = vrot.slane %v14282_v4, 5  ;;  %v5749_v28 = vmul.bf16 %v14283_v47, %v14049_v59  ;;  %v3827_v1 = vadd.bf16 %v3811_v49, %v3251_v9  ;;  %v4585_v7 = vadd.bf16 %v4569_v6, %v4533_v34  ;;  %v14286_v9 = vld [vmem:[#allocation233_spill] sm:$0xff]  ;;  %v14288_v4 = vld [vmem:[#allocation235_spill] sm:$0xff] }
 0x310   : > { %v5432_v35 = vor.u32 %v5431_v5, %v5428_v55  ;;  %v5801_v58 = vmul.bf16 %v14048_v48, %v14051_v63  ;;  %v5043_v36 = vadd.bf16 %v5027_v56, %v4991_v57  ;;  %v5853_v25 = vmul.bf16 %v14284_v41, %v10057_v26  ;;  %v14289_v57 = vld [vmem:[#allocation236_spill] sm:$0xff] }
 0x311   : > { %v5440_v11 = vor.u32 %v5439_v54, %v5436_v51  ;;  %v5765_v27 = vadd.bf16 %v5749_v28, %v5713_v21  ;;  %v5905_v5 = vmul.bf16 %v14052_v61, %v10382_v18  ;;  %v4637_v0 = vadd.bf16 %v4621_v43, %v4585_v7  ;;  %v14290_v21 = vld [vmem:[#allocation30_spill] sm:$0xff] }
 0x312   : > { %v5957_v6 = vmul.bf16 %v14286_v9, %v10575_v40  ;;  %v6170_v51 = vrot.slane %v6072_v52, 5  ;;  %v5095_v49 = vadd.bf16 %v5079_v19, %v5043_v36  ;;  %v6171_v28 = vrot.slane %v6073_v32, 5  ;;  %v14291_v7 = vld [vmem:[#allocation238_spill] sm:$0xff]  ;;  %v14294_v52 = vld [vmem:[#allocation240_spill] sm:$0xff] }
 0x313   : > { %v10756_v55 = vsel %vm1861_vm2, %v5432_v35, %v5440_v11  ;;  %v5817_v34 = vadd.bf16 %v5801_v58, %v5765_v27  ;;  %v4653_v39 = vadd.bf16 %v4637_v0, %v3827_v1  ;;  %v6276_v54 = vmul.bf16 %v14180_v37, %v14288_v4  ;;  %v14292_v35 = vld [vmem:[#allocation239_spill] sm:$0xff]  ;;  %v6635_v61 = vld [vmem:[#allocation2 + $0x90] sm:$0xe0]  ;;  %v14295_v58 = vld [vmem:[#allocation32_spill] sm:$0xff] }
 0x314   : > { %14285 = vst [vmem:[#allocation42_spill] sm:$0xff] %v10756_v55  ;;  %v6009_v56 = vmul.bf16 %v14287_v38, %v10756_v55  ;;  %v6312_v43 = vmul.bf16 %v14290_v21, %v14289_v57  ;;  %v6364_v11 = vmul.bf16 %v14292_v35, %v14291_v7  ;;  %v5147_v41 = vadd.bf16 %v5131_v14, %v5095_v49  ;;  %v6636_v32 = vld [vmem:[#allocation2 + $0x98] sm:$0x3f]  ;;  %v14296_v27 = vld [vmem:[#allocation241_spill] sm:$0xff] }
 0x315   : > { %v5869_v9 = vadd.bf16 %v5853_v25, %v5817_v34  ;;  %v10769_v19 = vsel %vm6142_vm5, %v6170_v51, %v6171_v28  ;;  %v6416_v36 = vmul.bf16 %v14295_v58, %v14294_v52  ;;  %v6468_v0 = vmul.bf16 %v14296_v27, %v10393_v13  ;;  %v14297_v4 = vld [vmem:[#allocation242_spill] sm:$0xff]  ;;  %v14298_v37 = vld [vmem:[#allocation243_spill] sm:$0xff] }
 0x316   : > { %14293 = vst [vmem:[#allocation41_spill] sm:$0xff] %v10769_v19  ;;  %v6328_v1 = vadd.bf16 %v6312_v43, %v6276_v54  ;;  %v6520_v21 = vmul.bf16 %v14297_v4, %v10584_v22  ;;  %v6572_v35 = vmul.bf16 %v14298_v37, %v10769_v19  ;;  %v5199_v7 = vadd.bf16 %v5183_v10, %v5147_v41  ;;  %v991_v10 = vld [vmem:[#allocation2 + $0x80] sm:$0xf8] }
 0x317   : > { %v5921_v14 = vadd.bf16 %v5905_v5, %v5869_v9  ;;  %v6816_v25 = vshrl.u32 %v6635_v61, 16  ;;  %v6819_v49 = vshll.u32 %v6635_v61, 16  ;;  %v6824_v34 = vshrl.u32 %v6636_v32, 16 }
 0x318   : > { %v6380_v51 = vadd.bf16 %v6364_v11, %v6328_v1  ;;  %v6827_v28 = vshll.u32 %v6636_v32, 16  ;;  %v7103_v58 = vmul.bf16 %v10163_v60, %v10156_v20  ;;  %v5215_v54 = vadd.bf16 %v5199_v7, %v4653_v39  ;;  %v992_v20 = vld [vmem:[#allocation2 + $0x88] sm:$0xf]  ;;  %v14299_v32 = vld [vmem:[#allocation249_spill] sm:$0xff] }
 0x319   : > { %v5973_v43 = vadd.bf16 %v5957_v6, %v5921_v14  ;;  %v6818_v52 = vrot.slane %v6816_v25, 5  ;;  %v6821_v27 = vrot.slane %v6819_v49, 6  ;;  %v6826_v57 = vrot.slane %v6824_v34, 5 }
 0x31a   : > { %v6432_v13 = vadd.bf16 %v6416_v36, %v6380_v51  ;;  %v6829_v4 = vrot.slane %v6827_v28, 6  ;;  %v7139_v37 = vmul.bf16 %v10167_v17, %v10159_v53  ;;  %v7191_v61 = vmul.bf16 %v10171_v30, %v10177_v46  ;;  %v1518_v51 = vld [vmem:[#allocation2 + $0x80] sm:$0xf0] }
 0x31b   : > { %v6025_v41 = vadd.bf16 %v6009_v56, %v5973_v43  ;;  %v6822_v5 = vor.u32 %v6821_v27, %v6818_v52  ;;  %v7243_v9 = vmul.bf16 %v10193_v42, %v10204_v24  ;;  %v7295_v11 = vmul.bf16 %v10197_v29, %v10420_v62  ;;  %v14302_v43 = vld [vmem:[#allocation62_spill] sm:$0xff]  ;;  %v1838_v29 = vld [vmem:[#allocation2 + $0x88] sm:$0x1f] }
 0x31c   : > { %v6484_v39 = vadd.bf16 %v6468_v0, %v6432_v13  ;;  %v6830_v6 = vor.u32 %v6829_v4, %v6826_v57  ;;  %v7155_v7 = vadd.bf16 %v7139_v37, %v7103_v58  ;;  %v7347_v1 = vmul.bf16 %v14299_v32, %v10611_v15  ;;  %v14301_v13 = vld [vmem:[#allocation251_spill] sm:$0xff]  ;;  %v1519_v4 = vld [vmem:[#allocation2 + $0x88] sm:$0xf] }
 0x31d   : > { %v6041_v36 = vadd.bf16 %v6025_v41, %v5215_v54  ;;  %v1119_v14 = vshrl.u32 %v991_v10, 16  ;;  %v1122_v56 = vshll.u32 %v991_v10, 16  ;;  %v1127_v49 = vshrl.u32 %v992_v20, 16  ;;  %v14303_v41 = vld [vmem:[#allocation22_spill] sm:$0xff] }
 0x31e   : > { %v6536_v52 = vadd.bf16 %v6520_v21, %v6484_v39  ;;  %v10792_v27 = vsel %vm6661_vm6, %v6822_v5, %v6830_v6  ;;  %v7207_v25 = vadd.bf16 %v7191_v61, %v7155_v7  ;;  %v1130_v0 = vshll.u32 %v992_v20, 16  ;;  %v1837_v21 = vld [vmem:[#allocation2 + $0x80] sm:$0xf0]  ;;  %v14305_v61 = vld [vmem:[#allocation23_spill] sm:$0xff] }
 0x31f   : > { %14300 = vst [vmem:[#allocation40_spill] sm:$0xff] %v10792_v27  ;;  %v7402_v57 = vmul.bf16 %v14301_v13, %v10792_v27  ;;  %v1121_v37 = vrot.slane %v1119_v14, 3  ;;  %v1124_v58 = vrot.slane %v1122_v56, 4  ;;  %v1129_v54 = vrot.slane %v1127_v49, 3  ;;  %v14304_v6 = vld [vmem:[#allocation60_spill] sm:$0xff]  ;;  %v14306_v56 = vld [vmem:[#allocation61_spill] sm:$0xff] }
 0x320   : > { %v6588_v34 = vadd.bf16 %v6572_v35, %v6536_v52  ;;  %v7259_v28 = vadd.bf16 %v7243_v9, %v7207_v25  ;;  %v1385_v10 = vmul.bf16 %v14303_v41, %v14302_v43  ;;  %v1132_v5 = vrot.slane %v1130_v0, 4  ;;  %v14307_v20 = vld [vmem:[#allocation19_spill] sm:$0xff]  ;;  %v14308_v52 = vld [vmem:[#allocation64_spill] sm:$0xff] }
 0x321   : > { %v1125_v39 = vor.u32 %v1124_v58, %v1121_v37  ;;  %v1425_v7 = vmul.bf16 %v14305_v61, %v14304_v6  ;;  %v1597_v32 = vrot.slane %v1518_v51, 4  ;;  %v1598_v14 = vrot.slane %v1519_v4, 4  ;;  %v14309_v25 = vld [vmem:[#allocation20_spill] sm:$0xff] }
 0x322   : > { %v6604_v15 = vadd.bf16 %v6588_v34, %v6041_v36  ;;  %v7311_v13 = vadd.bf16 %v7295_v11, %v7259_v28  ;;  %v1693_v27 = vmul.bf16 %v14307_v20, %v14306_v56  ;;  %v1133_v35 = vor.u32 %v1132_v5, %v1129_v54  ;;  %v14312_v36 = vld [vmem:[#allocation21_spill] sm:$0xff]  ;;  %v14313_v54 = vld [vmem:[#allocation24_spill] sm:$0xff] }
 0x323   : > { %v1441_v9 = vadd.bf16 %v1425_v7, %v1385_v10  ;;  %v1729_v49 = vmul.bf16 %v14309_v25, %v14308_v52  ;;  %v1965_v43 = vshrl.u32 %v1837_v21, 16  ;;  %v10805_v37 = vsel %vm1578_vm1, %v1597_v32, %v1598_v14  ;;  %v14314_v32 = vld [vmem:[#allocation65_spill] sm:$0xff]  ;;  %v14316_v56 = vld [vmem:[#allocation228_spill] sm:$0xff]  ;;  %v14317_v25 = vld [vmem:[#allocation26_spill] sm:$0xff] }
 0x324   : > { %v7363_v41 = vadd.bf16 %v7347_v1, %v7311_v13  ;;  %14310 = vst [vmem:[#allocation190_spill] sm:$0xff] %v10805_v37  ;;  %v1968_v58 = vshll.u32 %v1837_v21, 16  ;;  %v1973_v0 = vshrl.u32 %v1838_v29, 16  ;;  %v10808_v51 = vsel %vm1015_vm0, %v1125_v39, %v1133_v35  ;;  %v14315_v14 = vld [vmem:[#allocation25_spill] sm:$0xff]  ;;  %v14361_v61 = vld [vmem:[#allocation80_spill] sm:$0xff] }
 0x325   : > { %14311 = vst [vmem:[#allocation191_spill] sm:$0xff] %v10808_v51  ;;  %v1745_v11 = vadd.bf16 %v1729_v49, %v1693_v27  ;;  %v1781_v4 = vmul.bf16 %v14312_v36, %v10805_v37  ;;  %v1967_v34 = vrot.slane %v1965_v43, 4  ;;  %v1478_v10 = vmul.bf16 %v14313_v54, %v10808_v51  ;;  %v14318_v20 = vld [vmem:[#allocation73_spill] sm:$0xff]  ;;  %v14319_v36 = vld [vmem:[#allocation72_spill] sm:$0xff] }
 0x326   : > { %v7418_v28 = vadd.bf16 %v7402_v57, %v7363_v41  ;;  %v1970_v5 = vrot.slane %v1968_v58, 5  ;;  %v1975_v7 = vrot.slane %v1973_v0, 4  ;;  %v1976_v13 = vshll.u32 %v1838_v29, 16  ;;  %v14321_v57 = vld [vmem:[#allocation71_spill] sm:$0xff]  ;;  %v14322_v41 = vld [vmem:[#allocation70_spill] sm:$0xff]  ;;  %v14328_v54 = vld [vmem:[#allocation196_spill] sm:$0xff] }
 0x327   : > { %v1797_v1 = vadd.bf16 %v1781_v4, %v1745_v11  ;;  %v2228_v21 = vmul.bf16 %v14315_v14, %v14314_v32  ;;  %v2264_v39 = vmul.bf16 %v14317_v25, %v14316_v56  ;;  %v1494_v27 = vadd.bf16 %v1478_v10, %v1441_v9  ;;  %v14325_v11 = vld [vmem:[#allocation193_spill] sm:$0xff]  ;;  %v14326_v4 = vld [vmem:[#allocation31_spill] sm:$0xff]  ;;  %v14337_v56 = vld [vmem:[#allocation198_spill] sm:$0xff] }
 0x328   : > { %v7434_v35 = vadd.bf16 %v7418_v28, %v6604_v15  ;;  %v1971_v49 = vor.u32 %v1970_v5, %v1967_v34  ;;  %v14320_v43 = vor.u32 %v14318_v20, %v14319_v36  ;;  %v14323_v37 = vor.u32 %v14321_v57, %v14322_v41  ;;  %v14327_v14 = vld [vmem:[#allocation195_spill] sm:$0xff]  ;;  %v14329_v15 = vld [vmem:[#allocation252_spill] sm:$0xff]  ;;  %v14331_v10 = vld [vmem:[#allocation33_spill] sm:$0xff] }
 0x329   : > { %v1978_v0 = vrot.slane %v1976_v13, 5  ;;  %v2280_v29 = vadd.bf16 %v2264_v39, %v2228_v21  ;;  %v2916_v32 = vmul.bf16 %v14326_v4, %v14325_v11  ;;  %v2955_v25 = vmul.bf16 %v14328_v54, %v14327_v14  ;;  %v14330_v28 = vld [vmem:[#allocation68_spill] sm:$0xff]  ;;  %v14332_v36 = vld [vmem:[#allocation134_spill] sm:$0xff]  ;;  %v14333_v5 = vld [vmem:[#allocation197_spill] sm:$0xff] }
 0x32a   : > { %v10825_v58 = vsel %vm2470_vm3, %v14323_v37, %v14320_v43  ;;  %v7457_v9 = vadd.bf16 %v14329_v15, %v7434_v35  ;;  %v1813_v34 = vadd.bf16 %v1797_v1, %v1494_v27  ;;  %v3010_v20 = vmul.bf16 %v14331_v10, %v14330_v28  ;;  %v14334_v43 = vld [vmem:[#allocation63_spill] sm:$0xff]  ;;  %v14335_v13 = vld [vmem:[#allocation36_spill] sm:$0xff]  ;;  %v14336_v39 = vld [vmem:[#allocation226_spill] sm:$0xff] }
 0x32b   : > { %14324 = vst [vmem:[#allocation39_spill] sm:$0xff] %v10825_v58  ;;  %v3067_v57 = vmul.bf16 %v14333_v5, %v14332_v36  ;;  %v1979_v41 = vor.u32 %v1978_v0, %v1975_v7  ;;  %v2971_v37 = vadd.bf16 %v2955_v25, %v2916_v32  ;;  %v3123_v21 = vmul.bf16 %v14335_v13, %v14334_v43  ;;  %v14338_v54 = vld [vmem:[#allocation83_spill] sm:$0xff]  ;;  %v14341_v15 = vld [vmem:[#allocation66_spill] sm:$0xff]  ;;  %v14345_v25 = vld [vmem:[#allocation204_spill] sm:$0xff] }
 0x32c   : > { %v3180_v11 = vmul.bf16 %v14337_v56, %v14336_v39  ;;  %v7473_v4 = vmax.bf16 %v14218_v23, %v7457_v9  ;;  %v3236_v35 = vmul.bf16 %v14338_v54, %v10825_v58  ;;  %v14339_v1 = vld [vmem:[#allocation67_spill] sm:$0xff]  ;;  %v14342_v10 = vrot.slane %v14341_v15, 3  ;;  %v14347_v56 = vld [vmem:[#allocation205_spill] sm:$0xff]  ;;  %v14348_v39 = vld [vmem:[#allocation98_spill] sm:$0xff] }
 0x32d   : > { %v14340_v27 = vrot.slane %v14339_v1, 3  ;;  %v14344_v7 = vld [vmem:[#allocation203_spill] sm:$0xff]  ;;  %v10853_v32 = vsel %vm1861_vm2, %v1971_v49, %v1979_v41  ;;  %v3026_v13 = vadd.bf16 %v3010_v20, %v2971_v37  ;;  %v3523_v9 = vmul.bf16 %v14348_v39, %v14347_v56  ;;  %v14349_v5 = vld [vmem:[#allocation202_spill] sm:$0xff]  ;;  %v14354_v14 = vld [vmem:[#allocation209_spill] sm:$0xff] }
 0x32e   : > { %v3487_v0 = vmul.bf16 %v14345_v25, %v14344_v7  ;;  %14346 = vst [vmem:[#allocation200_spill] sm:$0xff] %v10853_v32  ;;  %v14350_v43 = vld [vmem:[#allocation206_spill] sm:$0xff]  ;;  %v7489_v1 = vmin.bf16 %v14114_v50, %v7473_v4  ;;  %v14351_v15 = vld [vmem:[#allocation27_spill] sm:$0xff]  ;;  %v14357_v39 = vld [vmem:[#allocation208_spill] sm:$0xff] }
 0x32f   : > { %v10848_v28 = vsel %vm3352_vm4, %v14342_v10, %v14340_v27  ;;  %v3578_v54 = vmul.bf16 %v14350_v43, %v14349_v5  ;;  %v2319_v58 = vmul.bf16 %v14351_v15, %v10853_v32  ;;  %v14352_v10 = vld [vmem:[#allocation56_spill] sm:$0xff]  ;;  %v14353_v27 = vld [vmem:[#allocation114_spill] sm:$0xff]  ;;  %v14355_v7 = vld [vmem:[#allocation207_spill] sm:$0xff]  ;;  %v3083_v49 = vadd.bf16 %v3067_v57, %v3026_v13 }
 0x330   : > { %14343 = vst [vmem:[#allocation38_spill] sm:$0xff] %v10848_v28  ;;  %v3632_v36 = vmul.bf16 %v14353_v27, %v14352_v10  ;;  %v3687_v25 = vmul.bf16 %v14355_v7, %v14354_v14  ;;  %v3539_v41 = vadd.bf16 %v3523_v9, %v3487_v0  ;;  %v14356_v20 = vld [vmem:[#allocation163_spill] sm:$0xff]  ;;  %v3796_v56 = vmul.bf16 %v14357_v39, %v10848_v28  ;;  %v14358_v5 = vld [vmem:[#allocation76_spill] sm:$0xff]  ;;  %v14359_v52 = vld [vmem:[#allocation77_spill] sm:$0xff] }
 0x331   : > { %v3741_v37 = vmul.bf16 %v14356_v20, %v10670_v45  ;;  %v7505_v43 = vadd.bf16 %v7489_v1, %v10731_v44  ;;  %v2335_v4 = vadd.bf16 %v2319_v58, %v2280_v29  ;;  %v4061_v15 = vor.u32 %v14359_v52, %v14358_v5  ;;  %v14360_v32 = vld [vmem:[#allocation79_spill] sm:$0xff]  ;;  %v14362_v57 = vld [vmem:[#allocation130_spill] sm:$0xff]  ;;  %v14363_v0 = vld [vmem:[#allocation212_spill] sm:$0xff] }
 0x332   : > { %v4069_v27 = vor.u32 %v14361_v61, %v14360_v32  ;;  %v3139_v10 = vadd.bf16 %v3123_v21, %v3083_v49  ;;  %v3594_v51 = vadd.bf16 %v3578_v54, %v3539_v41  ;;  %v4326_v13 = vmul.bf16 %v14362_v57, %v14250_v31  ;;  %v14364_v9 = vld [vmem:[#allocation35_spill] sm:$0xff]  ;;  %v14366_v44 = vld [vmem:[#allocation214_spill] sm:$0xff]  ;;  %v14369_v5 = vld [vmem:[#allocation213_spill] sm:$0xff] }
 0x333   : > { %v4362_v20 = vmul.bf16 %v14364_v9, %v14363_v0  ;;  %8246 = vmatmul.mubr.bf16.gmra.mrb[4].mxu1 %v7505_v43  ;;  %v2351_v7 = vadd.bf16 %v2335_v4, %v1813_v34  ;;  %v14367_v58 = vld [vmem:[#allocation131_spill] sm:$0xff]  ;;  %v14370_v32 = vld [vmem:[#allocation132_spill] sm:$0xff] }
 0x334   : > { %v10880_v39 = vsel %vm1015_vm0, %v4061_v15, %v4069_v27  ;;  %v4414_v29 = vmul.bf16 %v14367_v58, %v14366_v44  ;;  %v14368_v52 = vld [vmem:[#allocation55_spill] sm:$0xff]  ;;  %v3196_v61 = vadd.bf16 %v3180_v11, %v3139_v10  ;;  %v3648_v21 = vadd.bf16 %v3632_v36, %v3594_v51  ;;  %v14371_v49 = vld [vmem:[#allocation28_spill] sm:$0xff]  ;;  %v14374_v15 = vld [vmem:[#allocation170_spill] sm:$0xff] }
 0x335   : > { %14365 = vst [vmem:[#allocation53_spill] sm:$0xff] %v10880_v39  ;;  %v4466_v1 = vmul.bf16 %v14369_v5, %v14368_v52  ;;  %v4378_v54 = vadd.bf16 %v4362_v20, %v4326_v13  ;;  %v4518_v31 = vmul.bf16 %v14370_v32, %v14260_v3  ;;  %v2374_v41 = vadd.bf16 %v14371_v49, %v2351_v7  ;;  %v14372_v9 = vld [vmem:[#allocation231_spill] sm:$0xff]  ;;  %v14377_v58 = vld [vmem:[#allocation74_spill] sm:$0xff]  ;;  %v14380_v20 = vld [vmem:[#allocation220_spill] sm:$0xff] }
 0x336   : > { %v14373_v43 = vld [vmem:[#allocation215_spill] sm:$0xff]  ;;  %v4622_v27 = vmul.bf16 %v14374_v15, %v10880_v39  ;;  %v14378_v44 = vrot.slane %v14377_v58, 4  ;;  %v3252_v51 = vadd.bf16 %v3236_v35, %v3196_v61  ;;  %v3703_v36 = vadd.bf16 %v3687_v25, %v3648_v21  ;;  %v14382_v49 = vld [vmem:[#allocation222_spill] sm:$0xff]  ;;  %v14386_v35 = vld [vmem:[#allocation224_spill] sm:$0xff] }
 0x337   : > { %v4570_v34 = vmul.bf16 %v14373_v43, %v14372_v9  ;;  %v14375_v4 = vld [vmem:[#allocation75_spill] sm:$0xff]  ;;  %v4430_v11 = vadd.bf16 %v4414_v29, %v4378_v54  ;;  %v4888_v10 = vmul.bf16 %v14269_v8, %v14270_v2  ;;  %v2390_v7 = vmax.bf16 %v14218_v23, %v2374_v41  ;;  %v14385_v32 = vld [vmem:[#allocation174_spill] sm:$0xff]  ;;  %v14388_v21 = vld [vmem:[#allocation225_spill] sm:$0xff] }
 0x338   : > { %v14376_v57 = vrot.slane %v14375_v4, 4  ;;  %v14381_v13 = vld [vmem:[#allocation171_spill] sm:$0xff]  ;;  %v14384_v4 = vld [vmem:[#allocation54_spill] sm:$0xff]  ;;  %v3757_v9 = vadd.bf16 %v3741_v37, %v3703_v36  ;;  %v5080_v25 = vmul.bf16 %v14386_v35, %v10533_v12  ;;  %v14392_v36 = vld [vmem:[#allocation81_spill] sm:$0xff] }
 0x339   : > { %v4924_v43 = vmul.bf16 %v14381_v13, %v14380_v20  ;;  %v14383_v15 = vld [vmem:[#allocation223_spill] sm:$0xff]  ;;  %v5028_v58 = vmul.bf16 %v14385_v32, %v14384_v4  ;;  %v10914_v2 = vmin.bf16 %v14114_v50, %v2390_v7  ;;  %v14389_v41 = vld [vmem:[#allocation78_spill] sm:$0xff] }
 0x33a   : > { %v10898_v5 = vsel %vm1578_vm1, %v14378_v44, %v14376_v57  ;;  %v4976_v39 = vmul.bf16 %v14383_v15, %v14382_v49  ;;  %v4482_v57 = vadd.bf16 %v4466_v1, %v4430_v11  ;;  %v14387_v44 = vld [vmem:[#allocation175_spill] sm:$0xff]  ;;  %v14390_v15 = vshrl.u32 %v14389_v41, 16 }
 0x33b   : > { %14379 = vst [vmem:[#allocation48_spill] sm:$0xff] %v10898_v5  ;;  %v5132_v29 = vmul.bf16 %v14387_v44, %v10717_v33  ;;  %v4940_v61 = vadd.bf16 %v4924_v43, %v4888_v10  ;;  %v5184_v54 = vmul.bf16 %v14388_v21, %v10898_v5  ;;  %v3812_v49 = vadd.bf16 %v3796_v56, %v3757_v9  ;;  %v6074_v21 = vld [vmem:[#allocation2 + $0xa0] sm:$0xe0] }
 0x33c   : > { %v5445_v13 = vrot.slane %v14390_v15, 4  ;;  %v4534_v32 = vadd.bf16 %v4518_v31, %v4482_v57  ;;  %v14391_v37 = vshll.u32 %v14389_v41, 16  ;;  %v14393_v11 = vshrl.u32 %v14392_v36, 16  ;;  %v6075_v57 = vld [vmem:[#allocation2 + $0xa8] sm:$0x1f] }
 0x33d   : > { %v4992_v12 = vadd.bf16 %v4976_v39, %v4940_v61  ;;  %v14394_v44 = vshll.u32 %v14392_v36, 16  ;;  %v5714_v43 = vmul.bf16 %v14171_v16, %v14049_v59  ;;  %v5750_v10 = vmul.bf16 %v14283_v47, %v14051_v63  ;;  %v14395_v61 = vld [vmem:[#allocation232_spill] sm:$0xff]  ;;  %v14396_v59 = vld [vmem:[#allocation129_spill] sm:$0xff] }
 0x33e   : > { %v5448_v1 = vrot.slane %v14391_v37, 5  ;;  %v5453_v35 = vrot.slane %v14393_v11, 4  ;;  %v3828_v15 = vadd.bf16 %v3812_v49, %v3252_v51  ;;  %v4586_v56 = vadd.bf16 %v4570_v34, %v4534_v32  ;;  %v14397_v47 = vld [vmem:[#allocation233_spill] sm:$0xff] }
 0x33f   : > { %v5456_v7 = vrot.slane %v14394_v44, 5  ;;  %v5802_v31 = vmul.bf16 %v14048_v48, %v10057_v26  ;;  %v5044_v41 = vadd.bf16 %v5028_v58, %v4992_v12  ;;  %v5766_v39 = vadd.bf16 %v5750_v10, %v5714_v43  ;;  %v14402_v43 = vld [vmem:[#allocation30_spill] sm:$0xff] }
 0x340   : > { %v5449_v9 = vor.u32 %v5448_v1, %v5445_v13  ;;  %v5854_v44 = vmul.bf16 %v14395_v61, %v10382_v18  ;;  %v4638_v36 = vadd.bf16 %v4622_v27, %v4586_v56  ;;  %v5906_v11 = vmul.bf16 %v14396_v59, %v10575_v40  ;;  %v14400_v1 = vld [vmem:[#allocation237_spill] sm:$0xff]  ;;  %v6637_v56 = vld [vmem:[#allocation2 + $0xa0] sm:$0xe0] }
 0x341   : > { %v5457_v37 = vor.u32 %v5456_v7, %v5453_v35  ;;  %v5958_v16 = vmul.bf16 %v14397_v47, %v10756_v55  ;;  %v6173_v49 = vrot.slane %v6074_v21, 5  ;;  %v5096_v32 = vadd.bf16 %v5080_v25, %v5044_v41  ;;  %v14399_v35 = vld [vmem:[#allocation236_spill] sm:$0xff]  ;;  %v14401_v7 = vld [vmem:[#allocation238_spill] sm:$0xff] }
 0x342   : > { %v5818_v51 = vadd.bf16 %v5802_v31, %v5766_v39  ;;  %v6174_v13 = vrot.slane %v6075_v57, 5  ;;  %v4654_v12 = vadd.bf16 %v4638_v36, %v3828_v15  ;;  %v6277_v27 = vmul.bf16 %v14400_v1, %v14399_v35  ;;  %v14404_v21 = vld [vmem:[#allocation240_spill] sm:$0xff]  ;;  %v14408_v36 = vld [vmem:[#allocation241_spill] sm:$0xff]  ;;  %v14409_v1 = vld [vmem:[#allocation242_spill] sm:$0xff] }
 0x343   : > { %v10939_v34 = vsel %vm1861_vm2, %v5449_v9, %v5457_v37  ;;  %v6313_v10 = vmul.bf16 %v14402_v43, %v14401_v7  ;;  %v5148_v59 = vadd.bf16 %v5132_v29, %v5096_v32  ;;  %v14405_v9 = vld [vmem:[#allocation239_spill] sm:$0xff]  ;;  %v6638_v57 = vld [vmem:[#allocation2 + $0xa8] sm:$0x3f]  ;;  %v6469_v35 = vmul.bf16 %v14408_v36, %v10584_v22 }
 0x344   : > { %14398 = vst [vmem:[#allocation49_spill] sm:$0xff] %v10939_v34  ;;  %v6010_v58 = vmul.bf16 %v14287_v38, %v10939_v34  ;;  %v5870_v47 = vadd.bf16 %v5854_v44, %v5818_v51  ;;  %v10948_v25 = vsel %vm6142_vm5, %v6173_v49, %v6174_v13  ;;  %v6365_v31 = vmul.bf16 %v14405_v9, %v14404_v21  ;;  %v14406_v41 = vld [vmem:[#allocation52_spill] sm:$0xff]  ;;  %v14410_v44 = vld [vmem:[#allocation243_spill] sm:$0xff] }
 0x345   : > { %14403 = vst [vmem:[#allocation50_spill] sm:$0xff] %v10948_v25  ;;  %v6329_v15 = vadd.bf16 %v6313_v10, %v6277_v27  ;;  %v14407_v37 = vld [vmem:[#allocation32_spill] sm:$0xff]  ;;  %v6521_v43 = vmul.bf16 %v14409_v1, %v10769_v19  ;;  %v5200_v7 = vadd.bf16 %v5184_v54, %v5148_v59  ;;  %v6573_v49 = vmul.bf16 %v14410_v44, %v10948_v25  ;;  %v993_v54 = vld [vmem:[#allocation2 + $0x90] sm:$0xf8] }
 0x346   : > { %v6417_v39 = vmul.bf16 %v14407_v37, %v14406_v41  ;;  %v5922_v29 = vadd.bf16 %v5906_v11, %v5870_v47  ;;  %v6833_v32 = vshrl.u32 %v6637_v56, 16  ;;  %v6836_v13 = vshll.u32 %v6637_v56, 16 }
 0x347   : > { %v6381_v51 = vadd.bf16 %v6365_v31, %v6329_v15  ;;  %v6841_v9 = vshrl.u32 %v6638_v57, 16  ;;  %v6844_v21 = vshll.u32 %v6638_v57, 16  ;;  %v5216_v27 = vadd.bf16 %v5200_v7, %v4654_v12  ;;  %v14412_v57 = vld [vmem:[#allocation248_spill] sm:$0xff] }
 0x348   : > { %v5974_v10 = vadd.bf16 %v5958_v16, %v5922_v29  ;;  %v6835_v38 = vrot.slane %v6833_v32, 5  ;;  %v7104_v37 = vmul.bf16 %v10163_v60, %v10159_v53  ;;  %v6838_v22 = vrot.slane %v6836_v13, 6  ;;  %v994_v16 = vld [vmem:[#allocation2 + $0x98] sm:$0xf]  ;;  %v14411_v53 = vld [vmem:[#allocation216_spill] sm:$0xff] }
 0x349   : > { %v6433_v36 = vadd.bf16 %v6417_v39, %v6381_v51  ;;  %v6843_v41 = vrot.slane %v6841_v9, 5  ;;  %v6846_v1 = vrot.slane %v6844_v21, 6  ;;  %v7140_v59 = vmul.bf16 %v10167_v17, %v10177_v46  ;;  %v14413_v39 = vld [vmem:[#allocation40_spill] sm:$0xff] }
 0x34a   : > { %v6026_v47 = vadd.bf16 %v6010_v58, %v5974_v10  ;;  %v7192_v11 = vmul.bf16 %v10171_v30, %v10204_v24  ;;  %v7244_v12 = vmul.bf16 %v10193_v42, %v10420_v62  ;;  %v6839_v56 = vor.u32 %v6838_v22, %v6835_v38  ;;  %v14414_v58 = vld [vmem:[#allocation249_spill] sm:$0xff]  ;;  %v1520_v42 = vld [vmem:[#allocation2 + $0x90] sm:$0xf0]  ;;  %v14416_v22 = vld [vmem:[#allocation251_spill] sm:$0xff] }
 0x34b   : > { %v6485_v7 = vadd.bf16 %v6469_v35, %v6433_v36  ;;  %v6847_v31 = vor.u32 %v6846_v1, %v6843_v41  ;;  %v7296_v15 = vmul.bf16 %v14412_v57, %v14411_v53  ;;  %v7156_v21 = vadd.bf16 %v7140_v59, %v7104_v37  ;;  %v1521_v36 = vld [vmem:[#allocation2 + $0x98] sm:$0xf]  ;;  %v1839_v57 = vld [vmem:[#allocation2 + $0x90] sm:$0xf0]  ;;  %v14423_v53 = vld [vmem:[#allocation20_spill] sm:$0xff] }
 0x34c   : > { %v6042_v9 = vadd.bf16 %v6026_v47, %v5216_v27  ;;  %v7348_v29 = vmul.bf16 %v14414_v58, %v14413_v39  ;;  %v1136_v32 = vshrl.u32 %v993_v54, 16  ;;  %v1139_v10 = vshll.u32 %v993_v54, 16  ;;  %v14417_v47 = vld [vmem:[#allocation22_spill] sm:$0xff] }
 0x34d   : > { %v6537_v51 = vadd.bf16 %v6521_v43, %v6485_v7  ;;  %v10973_v13 = vsel %vm6661_vm6, %v6839_v56, %v6847_v31  ;;  %v1144_v30 = vshrl.u32 %v994_v16, 16  ;;  %v7208_v62 = vadd.bf16 %v7192_v11, %v7156_v21  ;;  %v14418_v56 = vld [vmem:[#allocation191_spill] sm:$0xff] }
 0x34e   : > { %14415 = vst [vmem:[#allocation51_spill] sm:$0xff] %v10973_v13  ;;  %v7403_v38 = vmul.bf16 %v14416_v22, %v10973_v13  ;;  %v1138_v1 = vrot.slane %v1136_v32, 3  ;;  %v1147_v41 = vshll.u32 %v994_v16, 16  ;;  %v1141_v37 = vrot.slane %v1139_v10, 4  ;;  %v14419_v31 = vld [vmem:[#allocation23_spill] sm:$0xff]  ;;  %v14420_v32 = vld [vmem:[#allocation64_spill] sm:$0xff] }
 0x34f   : > { %v6589_v35 = vadd.bf16 %v6573_v49, %v6537_v51  ;;  %v1146_v27 = vrot.slane %v1144_v30, 3  ;;  %v1386_v59 = vmul.bf16 %v14417_v47, %v14304_v6  ;;  %v7260_v43 = vadd.bf16 %v7244_v12, %v7208_v62  ;;  %v1840_v11 = vld [vmem:[#allocation2 + $0x98] sm:$0x1f] }
 0x350   : > { %v1149_v7 = vrot.slane %v1147_v41, 4  ;;  %v1426_v54 = vmul.bf16 %v14419_v31, %v14418_v56  ;;  %v1600_v58 = vrot.slane %v1520_v42, 4  ;;  %v1142_v39 = vor.u32 %v1141_v37, %v1138_v1  ;;  %v14421_v16 = vld [vmem:[#allocation19_spill] sm:$0xff]  ;;  %v14422_v10 = vld [vmem:[#allocation190_spill] sm:$0xff] }
 0x351   : > { %v6605_v21 = vadd.bf16 %v6589_v35, %v6042_v9  ;;  %v1601_v22 = vrot.slane %v1521_v36, 4  ;;  %v1694_v13 = vmul.bf16 %v14421_v16, %v14420_v32  ;;  %v7312_v49 = vadd.bf16 %v7296_v15, %v7260_v43  ;;  %v14425_v36 = vld [vmem:[#allocation21_spill] sm:$0xff]  ;;  %v14426_v15 = vld [vmem:[#allocation24_spill] sm:$0xff] }
 0x352   : > { %v1150_v51 = vor.u32 %v1149_v7, %v1146_v27  ;;  %v1442_v30 = vadd.bf16 %v1426_v54, %v1386_v59  ;;  %v1730_v6 = vmul.bf16 %v14423_v53, %v14422_v10  ;;  %v1982_v12 = vshrl.u32 %v1839_v57, 16  ;;  %v14427_v54 = vld [vmem:[#allocation228_spill] sm:$0xff]  ;;  %v14432_v53 = vld [vmem:[#allocation118_spill] sm:$0xff] }
 0x353   : > { %v10986_v62 = vsel %vm1578_vm1, %v1600_v58, %v1601_v22  ;;  %v1985_v41 = vshll.u32 %v1839_v57, 16  ;;  %v1990_v42 = vshrl.u32 %v1840_v11, 16  ;;  %v7364_v31 = vadd.bf16 %v7348_v29, %v7312_v49  ;;  %v14428_v57 = vld [vmem:[#allocation25_spill] sm:$0xff]  ;;  %v14435_v16 = vld [vmem:[#allocation116_spill] sm:$0xff] }
 0x354   : > { %14424 = vst [vmem:[#allocation210_spill] sm:$0xff] %v10986_v62  ;;  %v10989_v9 = vsel %vm1015_vm0, %v1142_v39, %v1150_v51  ;;  %v1746_v1 = vadd.bf16 %v1730_v6, %v1694_v13  ;;  %v1782_v35 = vmul.bf16 %v14425_v36, %v10986_v62  ;;  %v1984_v27 = vrot.slane %v1982_v12, 4  ;;  %v14429_v39 = vld [vmem:[#allocation200_spill] sm:$0xff]  ;;  %v14430_v51 = vld [vmem:[#allocation26_spill] sm:$0xff]  ;;  %v14431_v6 = vld [vmem:[#allocation119_spill] sm:$0xff] }
 0x355   : > { %v1479_v37 = vmul.bf16 %v14426_v15, %v10989_v9  ;;  %v1987_v59 = vrot.slane %v1985_v41, 5  ;;  %v1992_v43 = vrot.slane %v1990_v42, 4  ;;  %v7419_v7 = vadd.bf16 %v7403_v38, %v7364_v31  ;;  %v14434_v62 = vld [vmem:[#allocation117_spill] sm:$0xff]  ;;  %v14439_v41 = vld [vmem:[#allocation31_spill] sm:$0xff] }
 0x356   : > { %v1798_v58 = vadd.bf16 %v1782_v35, %v1746_v1  ;;  %v1993_v22 = vshll.u32 %v1840_v11, 16  ;;  %v2229_v32 = vmul.bf16 %v14428_v57, %v14427_v54  ;;  %v2265_v13 = vmul.bf16 %v14430_v51, %v14429_v39  ;;  %v14438_v11 = vld [vmem:[#allocation195_spill] sm:$0xff]  ;;  %v14440_v1 = vld [vmem:[#allocation68_spill] sm:$0xff]  ;;  %v14443_v54 = vld [vmem:[#allocation33_spill] sm:$0xff] }
 0x357   : > { %v1495_v29 = vadd.bf16 %v1479_v37, %v1442_v30  ;;  %v1988_v49 = vor.u32 %v1987_v59, %v1984_v27  ;;  %v14433_v36 = vor.u32 %v14431_v6, %v14432_v53  ;;  %v14436_v15 = vor.u32 %v14434_v62, %v14435_v16  ;;  %v14441_v30 = vld [vmem:[#allocation196_spill] sm:$0xff]  ;;  %v14442_v59 = vld [vmem:[#allocation134_spill] sm:$0xff]  ;;  %v14444_v53 = vld [vmem:[#allocation63_spill] sm:$0xff] }
 0x358   : > { %v7435_v38 = vadd.bf16 %v7419_v7, %v6605_v21  ;;  %v1995_v31 = vrot.slane %v1993_v22, 5  ;;  %v2917_v42 = vmul.bf16 %v14439_v41, %v14438_v11  ;;  %v2956_v35 = vmul.bf16 %v14441_v30, %v14440_v1  ;;  %v14445_v6 = vld [vmem:[#allocation197_spill] sm:$0xff]  ;;  %v14446_v16 = vld [vmem:[#allocation252_spill] sm:$0xff]  ;;  %v14447_v21 = vld [vmem:[#allocation226_spill] sm:$0xff] }
 0x359   : > { %v11006_v12 = vsel %vm2470_vm3, %v14436_v15, %v14433_v36  ;;  %v1814_v37 = vadd.bf16 %v1798_v58, %v1495_v29  ;;  %v2281_v27 = vadd.bf16 %v2265_v13, %v2229_v32  ;;  %v3011_v51 = vmul.bf16 %v14443_v54, %v14442_v59  ;;  %v14448_v7 = vld [vmem:[#allocation36_spill] sm:$0xff]  ;;  %v14449_v39 = vld [vmem:[#allocation39_spill] sm:$0xff]  ;;  %v14450_v11 = vld [vmem:[#allocation198_spill] sm:$0xff] }
 0x35a   : > { %14437 = vst [vmem:[#allocation45_spill] sm:$0xff] %v11006_v12  ;;  %v3068_v57 = vmul.bf16 %v14445_v6, %v14444_v53  ;;  %v7458_v62 = vadd.bf16 %v14446_v16, %v7435_v38  ;;  %v1996_v36 = vor.u32 %v1995_v31, %v1992_v43  ;;  %v2972_v15 = vadd.bf16 %v2956_v35, %v2917_v42  ;;  %v14451_v30 = vld [vmem:[#allocation83_spill] sm:$0xff]  ;;  %v14454_v13 = vld [vmem:[#allocation113_spill] sm:$0xff]  ;;  %v14458_v38 = vld [vmem:[#allocation204_spill] sm:$0xff] }
 0x35b   : > { %v3124_v22 = vmul.bf16 %v14448_v7, %v14447_v21  ;;  %v3181_v41 = vmul.bf16 %v14450_v11, %v14449_v39  ;;  %v3237_v58 = vmul.bf16 %v14451_v30, %v11006_v12  ;;  %v14452_v32 = vld [vmem:[#allocation115_spill] sm:$0xff]  ;;  %v14455_v54 = vrot.slane %v14454_v13, 3  ;;  %v14457_v6 = vld [vmem:[#allocation205_spill] sm:$0xff]  ;;  %v14459_v11 = vld [vmem:[#allocation202_spill] sm:$0xff] }
 0x35c   : > { %v14453_v29 = vrot.slane %v14452_v32, 3  ;;  %v3488_v43 = vmul.bf16 %v14458_v38, %v14457_v6  ;;  %v7474_v31 = vmax.bf16 %v14218_v23, %v7458_v62  ;;  %v11034_v42 = vsel %vm1861_vm2, %v1988_v49, %v1996_v36  ;;  %v14460_v7 = vld [vmem:[#allocation98_spill] sm:$0xff]  ;;  %v14461_v30 = vld [vmem:[#allocation27_spill] sm:$0xff]  ;;  %v14462_v12 = vld [vmem:[#allocation56_spill] sm:$0xff] }
 0x35d   : > { %v3027_v35 = vadd.bf16 %v3011_v51, %v2972_v15  ;;  %v3524_v39 = vmul.bf16 %v14460_v7, %v14459_v11  ;;  %v2320_v32 = vmul.bf16 %v14461_v30, %v11034_v42  ;;  %v14463_v13 = vld [vmem:[#allocation206_spill] sm:$0xff]  ;;  %v14465_v6 = vld [vmem:[#allocation207_spill] sm:$0xff]  ;;  %v14467_v11 = vld [vmem:[#allocation208_spill] sm:$0xff] }
 0x35e   : > { %v11028_v59 = vsel %vm3352_vm4, %v14455_v54, %v14453_v29  ;;  %v3579_v21 = vmul.bf16 %v14463_v13, %v14462_v12  ;;  %v14464_v54 = vld [vmem:[#allocation114_spill] sm:$0xff]  ;;  %v3688_v38 = vmul.bf16 %v14465_v6, %v10670_v45  ;;  %v7490_v62 = vmin.bf16 %v14114_v50, %v7474_v31  ;;  %v14466_v51 = vld [vmem:[#allocation163_spill] sm:$0xff]  ;;  %v14470_v12 = vld [vmem:[#allocation125_spill] sm:$0xff] }
 0x35f   : > { %14456 = vst [vmem:[#allocation44_spill] sm:$0xff] %v11028_v59  ;;  %v3633_v29 = vmul.bf16 %v14464_v54, %v14354_v14  ;;  %v3084_v49 = vadd.bf16 %v3068_v57, %v3027_v35  ;;  %v3540_v36 = vadd.bf16 %v3524_v39, %v3488_v43  ;;  %v3742_v15 = vmul.bf16 %v14466_v51, %v10848_v28  ;;  %v14468_v16 = vld [vmem:[#allocation122_spill] sm:$0xff]  ;;  %v14469_v53 = vld [vmem:[#allocation123_spill] sm:$0xff] }
 0x360   : > { %v2336_v7 = vadd.bf16 %v2320_v32, %v2281_v27  ;;  %v3797_v30 = vmul.bf16 %v14467_v11, %v11028_v59  ;;  %v4078_v13 = vor.u32 %v14469_v53, %v14468_v16  ;;  %v14471_v1 = vld [vmem:[#allocation126_spill] sm:$0xff]  ;;  %v7506_v14 = vadd.bf16 %v7490_v62, %v10914_v2  ;;  %v14475_v35 = vld [vmem:[#allocation35_spill] sm:$0xff]  ;;  %v14477_v2 = vld [vmem:[#allocation213_spill] sm:$0xff] }
 0x361   : > { %v4086_v54 = vor.u32 %v14471_v1, %v14470_v12  ;;  %v3140_v6 = vadd.bf16 %v3124_v22, %v3084_v49  ;;  %v3595_v45 = vadd.bf16 %v3579_v21, %v3540_v36  ;;  %v14472_v57 = vld [vmem:[#allocation130_spill] sm:$0xff]  ;;  %v14476_v11 = vld [vmem:[#allocation131_spill] sm:$0xff]  ;;  %v4467_v1 = vmul.bf16 %v14477_v2, %v14260_v3  ;;  %v14479_v22 = vld [vmem:[#allocation132_spill] sm:$0xff] }
 0x362   : > { %v4327_v39 = vmul.bf16 %v14472_v57, %v14363_v0  ;;  %v2352_v43 = vadd.bf16 %v2336_v7, %v1814_v37  ;;  %v14474_v27 = vld [vmem:[#allocation214_spill] sm:$0xff]  ;;  %v4415_v53 = vmul.bf16 %v14476_v11, %v14368_v52  ;;  %8249 = vmatprep.mubr.bf16.mxu1 %v7506_v14  ;;  %v14478_v21 = vld [vmem:[#allocation231_spill] sm:$0xff]  ;;  %v14480_v0 = vld [vmem:[#allocation28_spill] sm:$0xff] }
 0x363   : > { %v11059_v31 = vsel %vm1015_vm0, %v4078_v13, %v4086_v54  ;;  %v4363_v32 = vmul.bf16 %v14475_v35, %v14474_v27  ;;  %v3197_v16 = vadd.bf16 %v3181_v41, %v3140_v6  ;;  %v3649_v12 = vadd.bf16 %v3633_v29, %v3595_v45  ;;  %v14481_v13 = vld [vmem:[#allocation53_spill] sm:$0xff]  ;;  %v14482_v54 = vld [vmem:[#allocation215_spill] sm:$0xff]  ;;  %v14483_v36 = vld [vmem:[#allocation170_spill] sm:$0xff] }
 0x364   : > { %14473 = vst [vmem:[#allocation217_spill] sm:$0xff] %v11059_v31  ;;  %v4519_v62 = vmul.bf16 %v14479_v22, %v14478_v21  ;;  %v2375_v37 = vadd.bf16 %v14480_v0, %v2352_v43  ;;  %v4571_v49 = vmul.bf16 %v14482_v54, %v14481_v13  ;;  %v4623_v35 = vmul.bf16 %v14483_v36, %v11059_v31  ;;  %v14484_v14 = vld [vmem:[#allocation121_spill] sm:$0xff]  ;;  %v14486_v45 = vld [vmem:[#allocation120_spill] sm:$0xff]  ;;  %v14490_v54 = vld [vmem:[#allocation171_spill] sm:$0xff] }
 0x365   : > { %v4379_v7 = vadd.bf16 %v4363_v32, %v4327_v39  ;;  %v3253_v57 = vadd.bf16 %v3237_v58, %v3197_v16  ;;  %v3704_v11 = vadd.bf16 %v3688_v38, %v3649_v12  ;;  %v14485_v41 = vrot.slane %v14484_v14, 4  ;;  %v14489_v32 = vld [vmem:[#allocation222_spill] sm:$0xff]  ;;  %v14491_v36 = vld [vmem:[#allocation223_spill] sm:$0xff] }
 0x366   : > { %v14487_v29 = vrot.slane %v14486_v45, 4  ;;  %v4889_v22 = vmul.bf16 %v14269_v8, %v14380_v20  ;;  %v2391_v39 = vmax.bf16 %v14218_v23, %v2375_v37  ;;  %v4925_v0 = vmul.bf16 %v14490_v54, %v14489_v32  ;;  %v14492_v16 = vld [vmem:[#allocation59_spill] sm:$0xff]  ;;  %v14493_v12 = vld [vmem:[#allocation174_spill] sm:$0xff]  ;;  %v14494_v45 = vld [vmem:[#allocation224_spill] sm:$0xff] }
 0x367   : > { %v4431_v43 = vadd.bf16 %v4415_v53, %v4379_v7  ;;  %v4977_v58 = vmul.bf16 %v14491_v36, %v14384_v4  ;;  %v3758_v38 = vadd.bf16 %v3742_v15, %v3704_v11  ;;  %v5029_v14 = vmul.bf16 %v14493_v12, %v14492_v16  ;;  %v14496_v7 = vld [vmem:[#allocation225_spill] sm:$0xff]  ;;  %v14497_v36 = vld [vmem:[#allocation124_spill] sm:$0xff]  ;;  %v14500_v4 = vld [vmem:[#allocation127_spill] sm:$0xff] }
 0x368   : > { %v11079_v6 = vsel %vm1578_vm1, %v14487_v29, %v14485_v41  ;;  %v5081_v41 = vmul.bf16 %v14494_v45, %v10717_v33  ;;  %v14495_v29 = vld [vmem:[#allocation175_spill] sm:$0xff]  ;;  %v11095_v20 = vmin.bf16 %v14114_v50, %v2391_v39  ;;  %v4941_v37 = vadd.bf16 %v4925_v0, %v4889_v22  ;;  %v6076_v0 = vld [vmem:[#allocation2 + $0xb0] sm:$0xe0] }
 0x369   : > { %14488 = vst [vmem:[#allocation46_spill] sm:$0xff] %v11079_v6  ;;  %v5133_v31 = vmul.bf16 %v14495_v29, %v10898_v5  ;;  %v4483_v53 = vadd.bf16 %v4467_v1, %v4431_v43  ;;  %v5185_v54 = vmul.bf16 %v14496_v7, %v11079_v6  ;;  %v3813_v8 = vadd.bf16 %v3797_v30, %v3758_v38  ;;  %v14503_v1 = vld [vmem:[#allocation29_spill] sm:$0xff]  ;;  %v14504_v38 = vld [vmem:[#allocation230_spill] sm:$0xff] }
 0x36a   : > { %v14498_v11 = vshrl.u32 %v14497_v36, 16  ;;  %v14499_v12 = vshll.u32 %v14497_v36, 16  ;;  %v14501_v45 = vshrl.u32 %v14500_v4, 16  ;;  %v4993_v29 = vadd.bf16 %v4977_v58, %v4941_v37 }
 0x36b   : > { %v4535_v32 = vadd.bf16 %v4519_v62, %v4483_v53  ;;  %v14502_v39 = vshll.u32 %v14500_v4, 16  ;;  %v5715_v22 = vmul.bf16 %v14503_v1, %v14051_v63  ;;  %v3829_v43 = vadd.bf16 %v3813_v8, %v3253_v57  ;;  %v14505_v53 = vld [vmem:[#allocation129_spill] sm:$0xff] }
 0x36c   : > { %v5462_v15 = vrot.slane %v14498_v11, 4  ;;  %v5465_v16 = vrot.slane %v14499_v12, 5  ;;  %v5470_v33 = vrot.slane %v14501_v45, 4  ;;  %v5751_v11 = vmul.bf16 %v14504_v38, %v10057_v26  ;;  %v6077_v12 = vld [vmem:[#allocation2 + $0xb8] sm:$0x1f]  ;;  %v14506_v8 = vld [vmem:[#allocation233_spill] sm:$0xff] }
 0x36d   : > { %v5473_v5 = vrot.slane %v14502_v39, 5  ;;  %v5803_v36 = vmul.bf16 %v14048_v48, %v10382_v18  ;;  %v4587_v7 = vadd.bf16 %v4571_v49, %v4535_v32  ;;  %v5045_v45 = vadd.bf16 %v5029_v14, %v4993_v29  ;;  %v14509_v32 = vld [vmem:[#allocation238_spill] sm:$0xff]  ;;  %v14510_v14 = vld [vmem:[#allocation237_spill] sm:$0xff] }
 0x36e   : > { %v5466_v30 = vor.u32 %v5465_v16, %v5462_v15  ;;  %v5855_v4 = vmul.bf16 %v14395_v61, %v10575_v40  ;;  %v5767_v58 = vadd.bf16 %v5751_v11, %v5715_v22  ;;  %v5907_v63 = vmul.bf16 %v14505_v53, %v10756_v55  ;;  %v14511_v22 = vld [vmem:[#allocation240_spill] sm:$0xff]  ;;  %v14512_v11 = vld [vmem:[#allocation30_spill] sm:$0xff] }
 0x36f   : > { %v5474_v62 = vor.u32 %v5473_v5, %v5470_v33  ;;  %v5959_v57 = vmul.bf16 %v14506_v8, %v10939_v34  ;;  %v6176_v16 = vrot.slane %v6076_v0, 5  ;;  %v4639_v37 = vadd.bf16 %v4623_v35, %v4587_v7  ;;  %v14508_v33 = vld [vmem:[#allocation69_spill] sm:$0xff]  ;;  %v6639_v61 = vld [vmem:[#allocation2 + $0xb0] sm:$0xe0]  ;;  %v14515_v7 = vld [vmem:[#allocation239_spill] sm:$0xff] }
 0x370   : > { %v5097_v15 = vadd.bf16 %v5081_v41, %v5045_v45  ;;  %v6177_v48 = vrot.slane %v6077_v12, 5  ;;  %v5819_v49 = vadd.bf16 %v5803_v36, %v5767_v58  ;;  %v6278_v29 = vmul.bf16 %v14510_v14, %v14509_v32  ;;  %v14514_v41 = vld [vmem:[#allocation52_spill] sm:$0xff]  ;;  %v14516_v45 = vld [vmem:[#allocation58_spill] sm:$0xff]  ;;  %v14518_v32 = vld [vmem:[#allocation241_spill] sm:$0xff] }
 0x371   : > { %v11120_v39 = vsel %vm1861_vm2, %v5466_v30, %v5474_v62  ;;  %v6314_v53 = vmul.bf16 %v14512_v11, %v14511_v22  ;;  %v4655_v55 = vadd.bf16 %v4639_v37, %v3829_v43  ;;  %v6366_v0 = vmul.bf16 %v14515_v7, %v14514_v41  ;;  %v6640_v30 = vld [vmem:[#allocation2 + $0xb8] sm:$0x3f]  ;;  %v14517_v62 = vld [vmem:[#allocation32_spill] sm:$0xff] }
 0x372   : > { %14507 = vst [vmem:[#allocation47_spill] sm:$0xff] %v11120_v39  ;;  %v6011_v5 = vmul.bf16 %v14508_v33, %v11120_v39  ;;  %v5149_v8 = vadd.bf16 %v5133_v31, %v5097_v15  ;;  %v11129_v35 = vsel %vm6142_vm5, %v6176_v16, %v6177_v48  ;;  %v5871_v36 = vadd.bf16 %v5855_v4, %v5819_v49  ;;  %v14519_v11 = vld [vmem:[#allocation242_spill] sm:$0xff] }
 0x373   : > { %14513 = vst [vmem:[#allocation227_spill] sm:$0xff] %v11129_v35  ;;  %v6330_v12 = vadd.bf16 %v6314_v53, %v6278_v29  ;;  %v6418_v58 = vmul.bf16 %v14517_v62, %v14516_v45  ;;  %v6470_v14 = vmul.bf16 %v14518_v32, %v10769_v19  ;;  %v6522_v43 = vmul.bf16 %v14519_v11, %v10948_v25  ;;  %v995_v19 = vld [vmem:[#allocation2 + $0xa0] sm:$0xf8] }
 0x374   : > { %v5201_v33 = vadd.bf16 %v5185_v54, %v5149_v8  ;;  %v6574_v48 = vmul.bf16 %v14410_v44, %v11129_v35  ;;  %v6850_v31 = vshrl.u32 %v6639_v61, 16  ;;  %v5923_v16 = vadd.bf16 %v5907_v63, %v5871_v36  ;;  %v14520_v35 = vld [vmem:[#allocation199_spill] sm:$0xff]  ;;  %v14521_v63 = vld [vmem:[#allocation246_spill] sm:$0xff] }
 0x375   : > { %v6382_v37 = vadd.bf16 %v6366_v0, %v6330_v12  ;;  %v6853_v15 = vshll.u32 %v6639_v61, 16  ;;  %v6858_v7 = vshrl.u32 %v6640_v30, 16  ;;  %v6861_v49 = vshll.u32 %v6640_v30, 16  ;;  %v14522_v61 = vld [vmem:[#allocation216_spill] sm:$0xff]  ;;  %v14523_v36 = vld [vmem:[#allocation247_spill] sm:$0xff] }
 0x376   : > { %v5217_v4 = vadd.bf16 %v5201_v33, %v4655_v55  ;;  %v6852_v53 = vrot.slane %v6850_v31, 5  ;;  %v7105_v29 = vmul.bf16 %v10163_v60, %v10177_v46  ;;  %v5975_v62 = vadd.bf16 %v5959_v57, %v5923_v16  ;;  %v996_v33 = vld [vmem:[#allocation2 + $0xa8] sm:$0xf] }
 0x377   : > { %v6434_v32 = vadd.bf16 %v6418_v58, %v6382_v37  ;;  %v6855_v54 = vrot.slane %v6853_v15, 6  ;;  %v6860_v8 = vrot.slane %v6858_v7, 5  ;;  %v6863_v11 = vrot.slane %v6861_v49, 6  ;;  %v14524_v46 = vld [vmem:[#allocation40_spill] sm:$0xff]  ;;  %v14526_v37 = vld [vmem:[#allocation51_spill] sm:$0xff]  ;;  %v14527_v15 = vld [vmem:[#allocation249_spill] sm:$0xff] }
 0x378   : > { %v7141_v44 = vmul.bf16 %v10167_v17, %v10204_v24  ;;  %v7193_v0 = vmul.bf16 %v14521_v63, %v14520_v35  ;;  %v7245_v55 = vmul.bf16 %v14523_v36, %v14522_v61  ;;  %v6027_v30 = vadd.bf16 %v6011_v5, %v5975_v62  ;;  %v14525_v57 = vld [vmem:[#allocation248_spill] sm:$0xff] }
 0x379   : > { %v6486_v12 = vadd.bf16 %v6470_v14, %v6434_v32  ;;  %v6856_v31 = vor.u32 %v6855_v54, %v6852_v53  ;;  %v7297_v58 = vmul.bf16 %v14525_v57, %v14524_v46  ;;  %v6864_v16 = vor.u32 %v6863_v11, %v6860_v8  ;;  %v1522_v62 = vld [vmem:[#allocation2 + $0xa0] sm:$0xf0]  ;;  %v1523_v32 = vld [vmem:[#allocation2 + $0xa8] sm:$0xf]  ;;  %v14528_v11 = vld [vmem:[#allocation251_spill] sm:$0xff] }
 0x37a   : > { %v7157_v7 = vadd.bf16 %v7141_v44, %v7105_v29  ;;  %v7349_v49 = vmul.bf16 %v14527_v15, %v14526_v37  ;;  %v1153_v60 = vshrl.u32 %v995_v19, 16  ;;  %v6043_v17 = vadd.bf16 %v6027_v30, %v5217_v4  ;;  %v1841_v30 = vld [vmem:[#allocation2 + $0xa0] sm:$0xf0] }
 0x37b   : > { %v6538_v24 = vadd.bf16 %v6522_v43, %v6486_v12  ;;  %v1156_v25 = vshll.u32 %v995_v19, 16  ;;  %v1161_v63 = vshrl.u32 %v996_v33, 16  ;;  %v11154_v35 = vsel %vm6661_vm6, %v6856_v31, %v6864_v16  ;;  %v14529_v43 = vld [vmem:[#allocation23_spill] sm:$0xff]  ;;  %v1842_v31 = vld [vmem:[#allocation2 + $0xa8] sm:$0x1f] }
 0x37c   : > { %v7209_v36 = vadd.bf16 %v7193_v0, %v7157_v7  ;;  %v1155_v5 = vrot.slane %v1153_v60, 3  ;;  %v1164_v14 = vshll.u32 %v996_v33, 16  ;;  %v7404_v44 = vmul.bf16 %v14528_v11, %v11154_v35 }
 0x37d   : > { %v6590_v53 = vadd.bf16 %v6574_v48, %v6538_v24  ;;  %v1158_v29 = vrot.slane %v1156_v25, 4  ;;  %v1163_v54 = vrot.slane %v1161_v63, 3  ;;  %v1387_v19 = vmul.bf16 %v14417_v47, %v14418_v56  ;;  %v14530_v25 = vld [vmem:[#allocation19_spill] sm:$0xff]  ;;  %v14533_v56 = vld [vmem:[#allocation20_spill] sm:$0xff] }
 0x37e   : > { %v7261_v8 = vadd.bf16 %v7245_v55, %v7209_v36  ;;  %v1166_v15 = vrot.slane %v1164_v14, 4  ;;  %v1427_v4 = vmul.bf16 %v14529_v43, %v10989_v9  ;;  %v1603_v33 = vrot.slane %v1522_v62, 4  ;;  %v14532_v55 = vld [vmem:[#allocation210_spill] sm:$0xff]  ;;  %v14535_v62 = vld [vmem:[#allocation24_spill] sm:$0xff] }
 0x37f   : > { %v6606_v0 = vadd.bf16 %v6590_v53, %v6043_v17  ;;  %v1159_v60 = vor.u32 %v1158_v29, %v1155_v5  ;;  %v1604_v12 = vrot.slane %v1523_v32, 4  ;;  %v1695_v63 = vmul.bf16 %v14530_v25, %v14422_v10  ;;  %v14534_v5 = vld [vmem:[#allocation21_spill] sm:$0xff]  ;;  %v14540_v25 = vld [vmem:[#allocation102_spill] sm:$0xff] }
 0x380   : > { %v7313_v24 = vadd.bf16 %v7297_v58, %v7261_v8  ;;  %v1167_v48 = vor.u32 %v1166_v15, %v1163_v54  ;;  %v1443_v16 = vadd.bf16 %v1427_v4, %v1387_v19  ;;  %v1731_v7 = vmul.bf16 %v14533_v56, %v14532_v55  ;;  %v14536_v4 = vld [vmem:[#allocation200_spill] sm:$0xff] }
 0x381   : > { %v11165_v36 = vsel %vm1578_vm1, %v1603_v33, %v1604_v12  ;;  %v1999_v14 = vshrl.u32 %v1841_v30, 16  ;;  %v2002_v43 = vshll.u32 %v1841_v30, 16  ;;  %v2007_v15 = vshrl.u32 %v1842_v31, 16  ;;  %v14537_v33 = vld [vmem:[#allocation25_spill] sm:$0xff] }
 0x382   : > { %14531 = vst [vmem:[#allocation234_spill] sm:$0xff] %v11165_v36  ;;  %v7365_v47 = vadd.bf16 %v7349_v49, %v7313_v24  ;;  %v11170_v17 = vsel %vm1015_vm0, %v1159_v60, %v1167_v48  ;;  %v1783_v58 = vmul.bf16 %v14534_v5, %v11165_v36  ;;  %v1747_v10 = vadd.bf16 %v1731_v7, %v1695_v63  ;;  %v14538_v24 = vld [vmem:[#allocation26_spill] sm:$0xff]  ;;  %v14539_v36 = vld [vmem:[#allocation103_spill] sm:$0xff]  ;;  %v14542_v63 = vld [vmem:[#allocation101_spill] sm:$0xff] }
 0x383   : > { %v1480_v32 = vmul.bf16 %v14535_v62, %v11170_v17  ;;  %v2001_v53 = vrot.slane %v1999_v14, 4  ;;  %v2004_v29 = vrot.slane %v2002_v43, 5  ;;  %v2009_v8 = vrot.slane %v2007_v15, 4  ;;  %v14543_v7 = vld [vmem:[#allocation100_spill] sm:$0xff]  ;;  %v14548_v15 = vld [vmem:[#allocation134_spill] sm:$0xff] }
 0x384   : > { %v7420_v54 = vadd.bf16 %v7404_v44, %v7365_v47  ;;  %v2010_v19 = vshll.u32 %v1842_v31, 16  ;;  %v2230_v30 = vmul.bf16 %v14537_v33, %v14536_v4  ;;  %v1799_v12 = vadd.bf16 %v1783_v58, %v1747_v10  ;;  %v14546_v44 = vld [vmem:[#allocation68_spill] sm:$0xff]  ;;  %v14547_v31 = vld [vmem:[#allocation31_spill] sm:$0xff]  ;;  %v14554_v4 = vld [vmem:[#allocation197_spill] sm:$0xff] }
 0x385   : > { %v1496_v49 = vadd.bf16 %v1480_v32, %v1443_v16  ;;  %v2005_v60 = vor.u32 %v2004_v29, %v2001_v53  ;;  %v2266_v48 = vmul.bf16 %v14538_v24, %v11034_v42  ;;  %v14541_v62 = vor.u32 %v14539_v36, %v14540_v25  ;;  %v14549_v32 = vld [vmem:[#allocation196_spill] sm:$0xff]  ;;  %v14550_v53 = vld [vmem:[#allocation63_spill] sm:$0xff]  ;;  %v14553_v36 = vld [vmem:[#allocation226_spill] sm:$0xff] }
 0x386   : > { %v7436_v5 = vadd.bf16 %v7420_v54, %v6606_v0  ;;  %v2012_v56 = vrot.slane %v2010_v19, 5  ;;  %v14544_v43 = vor.u32 %v14542_v63, %v14543_v7  ;;  %v2918_v14 = vmul.bf16 %v14547_v31, %v14546_v44  ;;  %v14551_v0 = vld [vmem:[#allocation33_spill] sm:$0xff]  ;;  %v14552_v54 = vld [vmem:[#allocation252_spill] sm:$0xff]  ;;  %v14555_v7 = vld [vmem:[#allocation39_spill] sm:$0xff] }
 0x387   : > { %v1815_v16 = vadd.bf16 %v1799_v12, %v1496_v49  ;;  %v2282_v58 = vadd.bf16 %v2266_v48, %v2230_v30  ;;  %v2957_v10 = vmul.bf16 %v14549_v32, %v14548_v15  ;;  %v3012_v29 = vmul.bf16 %v14551_v0, %v14550_v53  ;;  %v14557_v33 = vld [vmem:[#allocation45_spill] sm:$0xff]  ;;  %v14558_v44 = vld [vmem:[#allocation198_spill] sm:$0xff]  ;;  %v14559_v30 = vld [vmem:[#allocation83_spill] sm:$0xff] }
 0x388   : > { %v11187_v47 = vsel %vm2470_vm3, %v14544_v43, %v14541_v62  ;;  %v7459_v19 = vadd.bf16 %v14552_v54, %v7436_v5  ;;  %v2013_v25 = vor.u32 %v2012_v56, %v2009_v8  ;;  %v3069_v63 = vmul.bf16 %v14554_v4, %v14553_v36  ;;  %v14556_v62 = vld [vmem:[#allocation36_spill] sm:$0xff]  ;;  %v14560_v48 = vld [vmem:[#allocation99_spill] sm:$0xff]  ;;  %v14562_v31 = vld [vmem:[#allocation97_spill] sm:$0xff] }
 0x389   : > { %14545 = vst [vmem:[#allocation37_spill] sm:$0xff] %v11187_v47  ;;  %v3125_v43 = vmul.bf16 %v14556_v62, %v14555_v7  ;;  %v2973_v24 = vadd.bf16 %v2957_v10, %v2918_v14  ;;  %v3182_v49 = vmul.bf16 %v14558_v44, %v14557_v33  ;;  %v3238_v12 = vmul.bf16 %v14559_v30, %v11187_v47  ;;  %v14565_v62 = vld [vmem:[#allocation202_spill] sm:$0xff]  ;;  %v14566_v14 = vld [vmem:[#allocation204_spill] sm:$0xff]  ;;  %v14569_v30 = vld [vmem:[#allocation27_spill] sm:$0xff] }
 0x38a   : > { %v14561_v32 = vrot.slane %v14560_v48, 3  ;;  %v14563_v0 = vrot.slane %v14562_v31, 3  ;;  %v7475_v56 = vmax.bf16 %v14218_v23, %v7459_v19  ;;  %v11213_v8 = vsel %vm1861_vm2, %v2005_v60, %v2013_v25  ;;  %v14567_v4 = vld [vmem:[#allocation56_spill] sm:$0xff]  ;;  %v14568_v44 = vld [vmem:[#allocation98_spill] sm:$0xff]  ;;  %v14570_v7 = vld [vmem:[#allocation209_spill] sm:$0xff] }
 0x38b   : > { %v3489_v10 = vmul.bf16 %v14566_v14, %v14565_v62  ;;  %v3525_v33 = vmul.bf16 %v14568_v44, %v14567_v4  ;;  %v2321_v47 = vmul.bf16 %v14569_v30, %v11213_v8  ;;  %v3028_v48 = vadd.bf16 %v3012_v29, %v2973_v24  ;;  %v14571_v31 = vld [vmem:[#allocation206_spill] sm:$0xff]  ;;  %v14574_v25 = vld [vmem:[#allocation207_spill] sm:$0xff]  ;;  %v14575_v30 = vld [vmem:[#allocation208_spill] sm:$0xff] }
 0x38c   : > { %v11209_v5 = vsel %vm3352_vm4, %v14563_v0, %v14561_v32  ;;  %v3580_v36 = vmul.bf16 %v14571_v31, %v14570_v7  ;;  %v14572_v32 = vld [vmem:[#allocation229_spill] sm:$0xff]  ;;  %v14573_v0 = vld [vmem:[#allocation114_spill] sm:$0xff]  ;;  %v7491_v19 = vmin.bf16 %v14114_v50, %v7475_v56  ;;  %v3689_v53 = vmul.bf16 %v14574_v25, %v10848_v28  ;;  %v14576_v29 = vld [vmem:[#allocation107_spill] sm:$0xff] }
 0x38d   : > { %14564 = vst [vmem:[#allocation57_spill] sm:$0xff] %v11209_v5  ;;  %v3634_v54 = vmul.bf16 %v14573_v0, %v14572_v32  ;;  %v3541_v60 = vadd.bf16 %v3525_v33, %v3489_v10  ;;  %v3743_v62 = vmul.bf16 %v14466_v51, %v11028_v59  ;;  %v2337_v44 = vadd.bf16 %v2321_v47, %v2282_v58  ;;  %v14577_v4 = vld [vmem:[#allocation108_spill] sm:$0xff]  ;;  %v14578_v32 = vld [vmem:[#allocation110_spill] sm:$0xff]  ;;  %v14579_v56 = vld [vmem:[#allocation111_spill] sm:$0xff] }
 0x38e   : > { %v3085_v14 = vadd.bf16 %v3069_v63, %v3028_v48  ;;  %v3798_v24 = vmul.bf16 %v14575_v30, %v11209_v5  ;;  %v4095_v31 = vor.u32 %v14577_v4, %v14576_v29  ;;  %v7507_v7 = vadd.bf16 %v7491_v19, %v11095_v20  ;;  %v14580_v10 = vld [vmem:[#allocation130_spill] sm:$0xff]  ;;  %v14581_v47 = vld [vmem:[#allocation35_spill] sm:$0xff] }
 0x38f   : > { %v3596_v0 = vadd.bf16 %v3580_v36, %v3541_v60  ;;  %v4103_v33 = vor.u32 %v14579_v56, %v14578_v32  ;;  %v4328_v25 = vmul.bf16 %v14580_v10, %v14474_v27  ;;  %v2353_v28 = vadd.bf16 %v2337_v44, %v1815_v16  ;;  %v14582_v63 = vld [vmem:[#allocation131_spill] sm:$0xff]  ;;  %v14584_v36 = vld [vmem:[#allocation132_spill] sm:$0xff] }
 0x390   : > { %v3141_v15 = vadd.bf16 %v3125_v43, %v3085_v14  ;;  %v4364_v58 = vmul.bf16 %v14581_v47, %v14368_v52  ;;  %v4416_v48 = vmul.bf16 %v14582_v63, %v14260_v3  ;;  %8250 = vmatmul.mubr.bf16.gmra.mrb[8].mxu1 %v7507_v7  ;;  %v4468_v20 = vmul.bf16 %v14477_v2, %v14478_v21  ;;  %v14585_v27 = vld [vmem:[#allocation28_spill] sm:$0xff]  ;;  %v14586_v14 = vld [vmem:[#allocation217_spill] sm:$0xff]  ;;  %v14587_v19 = vld [vmem:[#allocation215_spill] sm:$0xff] }
 0x391   : > { %v3650_v30 = vadd.bf16 %v3634_v54, %v3596_v0  ;;  %v11244_v4 = vsel %vm1015_vm0, %v4095_v31, %v4103_v33  ;;  %v4520_v32 = vmul.bf16 %v14584_v36, %v14481_v13  ;;  %v2376_v16 = vadd.bf16 %v14585_v27, %v2353_v28  ;;  %v14588_v7 = vld [vmem:[#allocation170_spill] sm:$0xff]  ;;  %v14589_v0 = vld [vmem:[#allocation105_spill] sm:$0xff]  ;;  %v14591_v56 = vld [vmem:[#allocation104_spill] sm:$0xff] }
 0x392   : > { %14583 = vst [vmem:[#allocation88_spill] sm:$0xff] %v11244_v4  ;;  %v3198_v43 = vadd.bf16 %v3182_v49, %v3141_v15  ;;  %v4380_v44 = vadd.bf16 %v4364_v58, %v4328_v25  ;;  %v4572_v60 = vmul.bf16 %v14587_v19, %v14586_v14  ;;  %v4624_v54 = vmul.bf16 %v14588_v7, %v11244_v4  ;;  %v14594_v63 = vld [vmem:[#allocation222_spill] sm:$0xff]  ;;  %v14595_v36 = vld [vmem:[#allocation221_spill] sm:$0xff]  ;;  %v14597_v58 = vld [vmem:[#allocation171_spill] sm:$0xff] }
 0x393   : > { %v3705_v29 = vadd.bf16 %v3689_v53, %v3650_v30  ;;  %v14590_v31 = vrot.slane %v14589_v0, 4  ;;  %v14592_v33 = vrot.slane %v14591_v56, 4  ;;  %v4890_v13 = vmul.bf16 %v14595_v36, %v14594_v63  ;;  %v14596_v25 = vld [vmem:[#allocation54_spill] sm:$0xff]  ;;  %v14598_v19 = vld [vmem:[#allocation59_spill] sm:$0xff]  ;;  %v14602_v14 = vld [vmem:[#allocation48_spill] sm:$0xff] }
 0x394   : > { %v2392_v28 = vmax.bf16 %v14218_v23, %v2376_v16  ;;  %v3254_v15 = vadd.bf16 %v3238_v12, %v3198_v43  ;;  %v4432_v49 = vadd.bf16 %v4416_v48, %v4380_v44  ;;  %v4926_v53 = vmul.bf16 %v14597_v58, %v14596_v25  ;;  %v14599_v7 = vld [vmem:[#allocation223_spill] sm:$0xff]  ;;  %v14601_v27 = vld [vmem:[#allocation174_spill] sm:$0xff] }
 0x395   : > { %v11260_v2 = vsel %vm1578_vm1, %v14592_v33, %v14590_v31  ;;  %v3759_v30 = vadd.bf16 %v3743_v62, %v3705_v29  ;;  %v4978_v4 = vmul.bf16 %v14599_v7, %v14598_v19  ;;  %v14600_v0 = vld [vmem:[#allocation43_spill] sm:$0xff]  ;;  %v14603_v31 = vld [vmem:[#allocation224_spill] sm:$0xff]  ;;  %v14605_v62 = vld [vmem:[#allocation225_spill] sm:$0xff] }
 0x396   : > { %14593 = vst [vmem:[#allocation87_spill] sm:$0xff] %v11260_v2  ;;  %v5030_v56 = vmul.bf16 %v14601_v27, %v14600_v0  ;;  %v5082_v33 = vmul.bf16 %v14603_v31, %v14602_v14  ;;  %v11274_v21 = vmin.bf16 %v14114_v50, %v2392_v28  ;;  %v4484_v63 = vadd.bf16 %v4468_v20, %v4432_v49  ;;  %v14604_v12 = vld [vmem:[#allocation175_spill] sm:$0xff]  ;;  %v14606_v29 = vld [vmem:[#allocation109_spill] sm:$0xff]  ;;  %v14609_v14 = vld [vmem:[#allocation112_spill] sm:$0xff] }
 0x397   : > { %v4942_v16 = vadd.bf16 %v4926_v53, %v4890_v13  ;;  %v5134_v48 = vmul.bf16 %v14604_v12, %v11079_v6  ;;  %v3814_v43 = vadd.bf16 %v3798_v24, %v3759_v30  ;;  %v5186_v44 = vmul.bf16 %v14605_v62, %v11260_v2 }
 0x398   : > { %v14607_v7 = vshrl.u32 %v14606_v29, 16  ;;  %v14608_v27 = vshll.u32 %v14606_v29, 16  ;;  %v4536_v19 = vadd.bf16 %v4520_v32, %v4484_v63  ;;  %v14610_v28 = vshrl.u32 %v14609_v14, 16  ;;  %v6079_v63 = vld [vmem:[#allocation2 + $0xc8] sm:$0x1f] }
 0x399   : > { %v4994_v31 = vadd.bf16 %v4978_v4, %v4942_v16  ;;  %v14611_v13 = vshll.u32 %v14609_v14, 16  ;;  %v3830_v49 = vadd.bf16 %v3814_v43, %v3254_v15  ;;  %v5716_v24 = vmul.bf16 %v14503_v1, %v10057_v26  ;;  %v14612_v4 = vld [vmem:[#allocation106_spill] sm:$0xff]  ;;  %v14614_v14 = vld [vmem:[#allocation232_spill] sm:$0xff]  ;;  %v14615_v15 = vld [vmem:[#allocation129_spill] sm:$0xff] }
 0x39a   : > { %v5479_v58 = vrot.slane %v14607_v7, 4  ;;  %v5482_v0 = vrot.slane %v14608_v27, 5  ;;  %v5487_v36 = vrot.slane %v14610_v28, 4  ;;  %v5752_v30 = vmul.bf16 %v14504_v38, %v10382_v18  ;;  %v6078_v7 = vld [vmem:[#allocation2 + $0xc0] sm:$0xe0]  ;;  %v14613_v28 = vld [vmem:[#allocation42_spill] sm:$0xff] }
 0x39b   : > { %v5490_v20 = vrot.slane %v14611_v13, 5  ;;  %v4588_v62 = vadd.bf16 %v4572_v60, %v4536_v19  ;;  %v5046_v29 = vadd.bf16 %v5030_v56, %v4994_v31  ;;  %v5804_v32 = vmul.bf16 %v14612_v4, %v10575_v40  ;;  %v14616_v26 = vld [vmem:[#allocation233_spill] sm:$0xff] }
 0x39c   : > { %v5483_v53 = vor.u32 %v5482_v0, %v5479_v58  ;;  %v5768_v16 = vadd.bf16 %v5752_v30, %v5716_v24  ;;  %v5856_v13 = vmul.bf16 %v14614_v14, %v14613_v28  ;;  %v5908_v58 = vmul.bf16 %v14615_v15, %v10939_v34  ;;  %v14618_v56 = vld [vmem:[#allocation69_spill] sm:$0xff]  ;;  %v14620_v15 = vld [vmem:[#allocation30_spill] sm:$0xff] }
 0x39d   : > { %v5491_v27 = vor.u32 %v5490_v20, %v5487_v36  ;;  %v5960_v0 = vmul.bf16 %v14616_v26, %v11120_v39  ;;  %v4640_v43 = vadd.bf16 %v4624_v54, %v4588_v62  ;;  %v5098_v38 = vadd.bf16 %v5082_v33, %v5046_v29  ;;  %v14619_v24 = vld [vmem:[#allocation237_spill] sm:$0xff]  ;;  %v14621_v54 = vld [vmem:[#allocation239_spill] sm:$0xff]  ;;  %v6641_v62 = vld [vmem:[#allocation2 + $0xc0] sm:$0xe0] }
 0x39e   : > { %v6179_v36 = vrot.slane %v6078_v7, 5  ;;  %v5820_v60 = vadd.bf16 %v5804_v32, %v5768_v16  ;;  %v6180_v20 = vrot.slane %v6079_v63, 5  ;;  %v6279_v30 = vmul.bf16 %v14619_v24, %v14511_v22  ;;  %v14624_v32 = vld [vmem:[#allocation32_spill] sm:$0xff]  ;;  %v14625_v16 = vld [vmem:[#allocation50_spill] sm:$0xff]  ;;  %v14629_v24 = vld [vmem:[#allocation243_spill] sm:$0xff] }
 0x39f   : > { %v11301_v19 = vsel %vm1861_vm2, %v5483_v53, %v5491_v27  ;;  %v4656_v14 = vadd.bf16 %v4640_v43, %v3830_v49  ;;  %v5150_v4 = vadd.bf16 %v5134_v48, %v5098_v38  ;;  %v6315_v34 = vmul.bf16 %v14620_v15, %v14514_v41  ;;  %v6642_v53 = vld [vmem:[#allocation2 + $0xc8] sm:$0x3f]  ;;  %v14627_v48 = vld [vmem:[#allocation227_spill] sm:$0xff]  ;;  %v14628_v43 = vld [vmem:[#allocation242_spill] sm:$0xff] }
 0x3a0   : > { %14617 = vst [vmem:[#allocation86_spill] sm:$0xff] %v11301_v19  ;;  %v6012_v31 = vmul.bf16 %v14618_v56, %v11301_v19  ;;  %v6367_v33 = vmul.bf16 %v14621_v54, %v14516_v45  ;;  %v5872_v29 = vadd.bf16 %v5856_v13, %v5820_v60  ;;  %v11312_v7 = vsel %vm6142_vm5, %v6179_v36, %v6180_v20  ;;  %v14623_v27 = vld [vmem:[#allocation41_spill] sm:$0xff]  ;;  %v14630_v19 = vld [vmem:[#allocation250_spill] sm:$0xff] }
 0x3a1   : > { %14622 = vst [vmem:[#allocation85_spill] sm:$0xff] %v11312_v7  ;;  %v6419_v63 = vmul.bf16 %v14624_v32, %v14623_v27  ;;  %v14626_v56 = vld [vmem:[#allocation241_spill] sm:$0xff]  ;;  %v5202_v49 = vadd.bf16 %v5186_v44, %v5150_v4  ;;  %v6331_v38 = vadd.bf16 %v6315_v34, %v6279_v30  ;;  %v6523_v15 = vmul.bf16 %v14628_v43, %v14627_v48  ;;  %v14631_v32 = vld [vmem:[#allocation244_spill] sm:$0xff]  ;;  %v14632_v43 = vld [vmem:[#allocation199_spill] sm:$0xff] }
 0x3a2   : > { %v6471_v22 = vmul.bf16 %v14626_v56, %v14625_v16  ;;  %v6575_v54 = vmul.bf16 %v14629_v24, %v11312_v7  ;;  %v5924_v45 = vadd.bf16 %v5908_v58, %v5872_v29  ;;  %v6867_v41 = vshrl.u32 %v6641_v62, 16  ;;  %v14633_v48 = vld [vmem:[#allocation245_spill] sm:$0xff]  ;;  %v14634_v58 = vld [vmem:[#allocation246_spill] sm:$0xff] }
 0x3a3   : > { %v6870_v13 = vshll.u32 %v6641_v62, 16  ;;  %v6875_v60 = vshrl.u32 %v6642_v53, 16  ;;  %v5218_v36 = vadd.bf16 %v5202_v49, %v4656_v14  ;;  %v6383_v20 = vadd.bf16 %v6367_v33, %v6331_v38  ;;  %v997_v62 = vld [vmem:[#allocation2 + $0xb0] sm:$0xf8]  ;;  %v998_v24 = vld [vmem:[#allocation2 + $0xb8] sm:$0xf] }
 0x3a4   : > { %v6878_v26 = vshll.u32 %v6642_v53, 16  ;;  %v7106_v27 = vmul.bf16 %v14631_v32, %v14630_v19  ;;  %v5976_v39 = vadd.bf16 %v5960_v0, %v5924_v45  ;;  %v6869_v56 = vrot.slane %v6867_v41, 5  ;;  %v14635_v53 = vld [vmem:[#allocation247_spill] sm:$0xff] }
 0x3a5   : > { %v6872_v44 = vrot.slane %v6870_v13, 6  ;;  %v6877_v34 = vrot.slane %v6875_v60, 5  ;;  %v6435_v4 = vadd.bf16 %v6419_v63, %v6383_v20  ;;  %v7142_v16 = vmul.bf16 %v14633_v48, %v14632_v43 }
 0x3a6   : > { %v6880_v30 = vrot.slane %v6878_v26, 6  ;;  %v7194_v29 = vmul.bf16 %v14634_v58, %v14522_v61  ;;  %v6028_v14 = vadd.bf16 %v6012_v31, %v5976_v39  ;;  %v7246_v49 = vmul.bf16 %v14635_v53, %v14524_v46  ;;  %v14636_v26 = vld [vmem:[#allocation249_spill] sm:$0xff]  ;;  %v1525_v53 = vld [vmem:[#allocation2 + $0xb8] sm:$0xf] }
 0x3a7   : > { %v6873_v33 = vor.u32 %v6872_v44, %v6869_v56  ;;  %v7298_v41 = vmul.bf16 %v14525_v57, %v14526_v37  ;;  %v6487_v45 = vadd.bf16 %v6471_v22, %v6435_v4  ;;  %v7158_v19 = vadd.bf16 %v7142_v16, %v7106_v27  ;;  %v1524_v44 = vld [vmem:[#allocation2 + $0xb0] sm:$0xf0] }
 0x3a8   : > { %v6881_v0 = vor.u32 %v6880_v30, %v6877_v34  ;;  %v7350_v63 = vmul.bf16 %v14636_v26, %v11154_v35  ;;  %v6044_v38 = vadd.bf16 %v6028_v14, %v5218_v36  ;;  %v1170_v13 = vshrl.u32 %v997_v62, 16 }
 0x3a9   : > { %v1173_v60 = vshll.u32 %v997_v62, 16  ;;  %v1178_v20 = vshrl.u32 %v998_v24, 16  ;;  %v6539_v58 = vadd.bf16 %v6523_v15, %v6487_v45  ;;  %v7210_v56 = vadd.bf16 %v7194_v29, %v7158_v19  ;;  %v14637_v62 = vld [vmem:[#allocation22_spill] sm:$0xff] }
 0x3aa   : > { %v11335_v39 = vsel %vm6661_vm6, %v6873_v33, %v6881_v0  ;;  %v1181_v31 = vshll.u32 %v998_v24, 16  ;;  %v1172_v34 = vrot.slane %v1170_v13, 3  ;;  %v1388_v14 = vmul.bf16 %v14637_v62, %v10989_v9  ;;  %v1843_v15 = vld [vmem:[#allocation2 + $0xb0] sm:$0xf0]  ;;  %v14638_v33 = vld [vmem:[#allocation23_spill] sm:$0xff]  ;;  %v14642_v9 = vld [vmem:[#allocation20_spill] sm:$0xff] }
 0x3ab   : > { %v7405_v22 = vmul.bf16 %v14528_v11, %v11335_v39  ;;  %v1175_v27 = vrot.slane %v1173_v60, 4  ;;  %v1180_v16 = vrot.slane %v1178_v20, 3  ;;  %v6591_v4 = vadd.bf16 %v6575_v54, %v6539_v58  ;;  %v14639_v13 = vld [vmem:[#allocation19_spill] sm:$0xff] }
 0x3ac   : > { %v7262_v30 = vadd.bf16 %v7246_v49, %v7210_v56  ;;  %v1183_v36 = vrot.slane %v1181_v31, 4  ;;  %v1428_v29 = vmul.bf16 %v14638_v33, %v11170_v17  ;;  %v1606_v24 = vrot.slane %v1524_v44, 4  ;;  %v1844_v20 = vld [vmem:[#allocation2 + $0xb8] sm:$0x1f]  ;;  %v14644_v44 = vld [vmem:[#allocation24_spill] sm:$0xff] }
 0x3ad   : > { %v1176_v45 = vor.u32 %v1175_v27, %v1172_v34  ;;  %v1607_v0 = vrot.slane %v1525_v53, 4  ;;  %v6607_v19 = vadd.bf16 %v6591_v4, %v6044_v38  ;;  %v1696_v60 = vmul.bf16 %v14639_v13, %v14532_v55  ;;  %v14641_v49 = vld [vmem:[#allocation234_spill] sm:$0xff]  ;;  %v14643_v53 = vld [vmem:[#allocation21_spill] sm:$0xff]  ;;  %v14647_v13 = vld [vmem:[#allocation152_spill] sm:$0xff] }
 0x3ae   : > { %v7314_v26 = vadd.bf16 %v7298_v41, %v7262_v30  ;;  %v1184_v57 = vor.u32 %v1183_v36, %v1180_v16  ;;  %v1444_v54 = vadd.bf16 %v1428_v29, %v1388_v14  ;;  %v1732_v56 = vmul.bf16 %v14642_v9, %v14641_v49 }
 0x3af   : > { %v11346_v58 = vsel %vm1578_vm1, %v1606_v24, %v1607_v0  ;;  %v2016_v31 = vshrl.u32 %v1843_v15, 16  ;;  %v2019_v38 = vshll.u32 %v1843_v15, 16  ;;  %v2024_v30 = vshrl.u32 %v1844_v20, 16  ;;  %v14645_v24 = vld [vmem:[#allocation25_spill] sm:$0xff] }
 0x3b0   : > { %14640 = vst [vmem:[#allocation192_spill] sm:$0xff] %v11346_v58  ;;  %v7366_v34 = vadd.bf16 %v7350_v63, %v7314_v26  ;;  %v11351_v27 = vsel %vm1015_vm0, %v1176_v45, %v1184_v57  ;;  %v1784_v41 = vmul.bf16 %v14643_v53, %v11346_v58  ;;  %v1748_v16 = vadd.bf16 %v1732_v56, %v1696_v60  ;;  %v14646_v45 = vld [vmem:[#allocation26_spill] sm:$0xff] }
 0x3b1   : > { %v1481_v55 = vmul.bf16 %v14644_v44, %v11351_v27  ;;  %v2018_v4 = vrot.slane %v2016_v31, 4  ;;  %v2021_v14 = vrot.slane %v2019_v38, 5  ;;  %v2027_v29 = vshll.u32 %v1844_v20, 16  ;;  %v14648_v44 = vld [vmem:[#allocation151_spill] sm:$0xff]  ;;  %v14650_v56 = vld [vmem:[#allocation150_spill] sm:$0xff]  ;;  %v14651_v31 = vld [vmem:[#allocation149_spill] sm:$0xff] }
 0x3b2   : > { %v7421_v36 = vadd.bf16 %v7405_v22, %v7366_v34  ;;  %v2231_v0 = vmul.bf16 %v14645_v24, %v11034_v42  ;;  %v1800_v63 = vadd.bf16 %v1784_v41, %v1748_v16  ;;  %v2026_v57 = vrot.slane %v2024_v30, 4  ;;  %v14655_v41 = vld [vmem:[#allocation31_spill] sm:$0xff]  ;;  %v14657_v16 = vld [vmem:[#allocation196_spill] sm:$0xff] }
 0x3b3   : > { %v1497_v26 = vadd.bf16 %v1481_v55, %v1444_v54  ;;  %v2267_v9 = vmul.bf16 %v14646_v45, %v11213_v8  ;;  %v2022_v15 = vor.u32 %v2021_v14, %v2018_v4  ;;  %v2029_v58 = vrot.slane %v2027_v29, 5  ;;  %v14654_v54 = vld [vmem:[#allocation134_spill] sm:$0xff]  ;;  %v14656_v55 = vld [vmem:[#allocation63_spill] sm:$0xff]  ;;  %v14660_v29 = vld [vmem:[#allocation33_spill] sm:$0xff] }
 0x3b4   : > { %v7437_v53 = vadd.bf16 %v7421_v36, %v6607_v19  ;;  %v14649_v60 = vor.u32 %v14647_v13, %v14648_v44  ;;  %v14652_v22 = vor.u32 %v14650_v56, %v14651_v31  ;;  %v2919_v38 = vmul.bf16 %v14655_v41, %v14654_v54  ;;  %v14658_v19 = vld [vmem:[#allocation252_spill] sm:$0xff]  ;;  %v14659_v14 = vld [vmem:[#allocation226_spill] sm:$0xff]  ;;  %v14661_v44 = vld [vmem:[#allocation39_spill] sm:$0xff] }
 0x3b5   : > { %v1816_v34 = vadd.bf16 %v1800_v63, %v1497_v26  ;;  %v2283_v42 = vadd.bf16 %v2267_v9, %v2231_v0  ;;  %v2958_v30 = vmul.bf16 %v14657_v16, %v14656_v55  ;;  %v2030_v36 = vor.u32 %v2029_v58, %v2026_v57  ;;  %v14662_v45 = vld [vmem:[#allocation197_spill] sm:$0xff]  ;;  %v14666_v0 = vld [vmem:[#allocation198_spill] sm:$0xff]  ;;  %v14667_v54 = vld [vmem:[#allocation83_spill] sm:$0xff] }
 0x3b6   : > { %v11368_v20 = vsel %vm2470_vm3, %v14652_v22, %v14649_v60  ;;  %v7460_v4 = vadd.bf16 %v14658_v19, %v7437_v53  ;;  %v3013_v13 = vmul.bf16 %v14660_v29, %v14659_v14  ;;  %v3070_v56 = vmul.bf16 %v14662_v45, %v14661_v44  ;;  %v14663_v60 = vld [vmem:[#allocation45_spill] sm:$0xff]  ;;  %v14664_v22 = vld [vmem:[#allocation36_spill] sm:$0xff]  ;;  %v14671_v29 = vld [vmem:[#allocation147_spill] sm:$0xff] }
 0x3b7   : > { %14653 = vst [vmem:[#allocation84_spill] sm:$0xff] %v11368_v20  ;;  %v2974_v31 = vadd.bf16 %v2958_v30, %v2919_v38  ;;  %v3126_v26 = vmul.bf16 %v14664_v22, %v14663_v60  ;;  %v14665_v9 = vld [vmem:[#allocation37_spill] sm:$0xff]  ;;  %v3239_v41 = vmul.bf16 %v14667_v54, %v11368_v20  ;;  %v11387_v58 = vsel %vm1861_vm2, %v2022_v15, %v2030_v36  ;;  %v14669_v53 = vld [vmem:[#allocation148_spill] sm:$0xff]  ;;  %v14678_v20 = vld [vmem:[#allocation98_spill] sm:$0xff] }
 0x3b8   : > { %v3183_v63 = vmul.bf16 %v14666_v0, %v14665_v9  ;;  %v7476_v16 = vmax.bf16 %v14218_v23, %v7460_v4  ;;  %14668 = vst [vmem:[#allocation82_spill] sm:$0xff] %v11387_v58  ;;  %v14670_v57 = vrot.slane %v14669_v53, 3  ;;  %v14672_v19 = vrot.slane %v14671_v29, 3  ;;  %v14674_v30 = vld [vmem:[#allocation56_spill] sm:$0xff]  ;;  %v14676_v0 = vld [vmem:[#allocation27_spill] sm:$0xff]  ;;  %v14677_v54 = vld [vmem:[#allocation209_spill] sm:$0xff] }
 0x3b9   : > { %v14675_v22 = vld [vmem:[#allocation204_spill] sm:$0xff]  ;;  %v2322_v9 = vmul.bf16 %v14676_v0, %v11387_v58  ;;  %v3029_v60 = vadd.bf16 %v3013_v13, %v2974_v31  ;;  %v3526_v4 = vmul.bf16 %v14678_v20, %v14677_v54  ;;  %v14679_v44 = vld [vmem:[#allocation229_spill] sm:$0xff]  ;;  %v14680_v15 = vld [vmem:[#allocation206_spill] sm:$0xff] }
 0x3ba   : > { %v11394_v38 = vsel %vm3352_vm4, %v14672_v19, %v14670_v57  ;;  %v3490_v45 = vmul.bf16 %v14675_v22, %v14674_v30  ;;  %v3581_v36 = vmul.bf16 %v14680_v15, %v14679_v44  ;;  %v7492_v53 = vmin.bf16 %v14114_v50, %v7476_v16  ;;  %v14681_v14 = vld [vmem:[#allocation38_spill] sm:$0xff]  ;;  %v14683_v19 = vld [vmem:[#allocation207_spill] sm:$0xff]  ;;  %v14684_v31 = vld [vmem:[#allocation208_spill] sm:$0xff] }
 0x3bb   : > { %14673 = vst [vmem:[#allocation201_spill] sm:$0xff] %v11394_v38  ;;  %v14682_v29 = vld [vmem:[#allocation114_spill] sm:$0xff]  ;;  %v3690_v57 = vmul.bf16 %v14683_v19, %v11028_v59  ;;  %v3744_v30 = vmul.bf16 %v14466_v51, %v11209_v5  ;;  %v2338_v22 = vadd.bf16 %v2322_v9, %v2283_v42  ;;  %v3086_v0 = vadd.bf16 %v3070_v56, %v3029_v60  ;;  %v14685_v15 = vld [vmem:[#allocation156_spill] sm:$0xff]  ;;  %v14686_v44 = vld [vmem:[#allocation157_spill] sm:$0xff] }
 0x3bc   : > { %v3635_v55 = vmul.bf16 %v14682_v29, %v14681_v14  ;;  %v3542_v13 = vadd.bf16 %v3526_v4, %v3490_v45  ;;  %v3799_v20 = vmul.bf16 %v14684_v31, %v11394_v38  ;;  %v7508_v54 = vadd.bf16 %v7492_v53, %v11274_v21  ;;  %v14687_v58 = vld [vmem:[#allocation158_spill] sm:$0xff]  ;;  %v14688_v24 = vld [vmem:[#allocation160_spill] sm:$0xff]  ;;  %v14690_v21 = vld [vmem:[#allocation231_spill] sm:$0xff] }
 0x3bd   : > { %v4112_v16 = vor.u32 %v14686_v44, %v14685_v15  ;;  %v4120_v29 = vor.u32 %v14688_v24, %v14687_v58  ;;  %v4329_v19 = vmul.bf16 %v14580_v10, %v14368_v52  ;;  %v2354_v59 = vadd.bf16 %v2338_v22, %v1816_v34  ;;  %v14691_v56 = vld [vmem:[#allocation131_spill] sm:$0xff]  ;;  %v14692_v44 = vld [vmem:[#allocation53_spill] sm:$0xff]  ;;  %v14695_v58 = vld [vmem:[#allocation132_spill] sm:$0xff] }
 0x3be   : > { %v3142_v14 = vadd.bf16 %v3126_v26, %v3086_v0  ;;  %v3597_v51 = vadd.bf16 %v3581_v36, %v3542_v13  ;;  %v4365_v45 = vmul.bf16 %v14581_v47, %v14260_v3  ;;  %8253 = vmatprep.mubr.bf16.mxu1 %v7508_v54  ;;  %v4417_v60 = vmul.bf16 %v14691_v56, %v14690_v21  ;;  %v14693_v9 = vld [vmem:[#allocation213_spill] sm:$0xff]  ;;  %v14696_v52 = vld [vmem:[#allocation28_spill] sm:$0xff]  ;;  %v14698_v53 = vld [vmem:[#allocation215_spill] sm:$0xff] }
 0x3bf   : > { %v11423_v42 = vsel %vm1015_vm0, %v4112_v16, %v4120_v29  ;;  %v4469_v4 = vmul.bf16 %v14693_v9, %v14692_v44  ;;  %v14694_v24 = vld [vmem:[#allocation217_spill] sm:$0xff]  ;;  %v2377_v34 = vadd.bf16 %v14696_v52, %v2354_v59  ;;  %v14697_v36 = vld [vmem:[#allocation88_spill] sm:$0xff]  ;;  %v14699_v29 = vld [vmem:[#allocation170_spill] sm:$0xff] }
 0x3c0   : > { %14689 = vst [vmem:[#allocation91_spill] sm:$0xff] %v11423_v42  ;;  %v4521_v15 = vmul.bf16 %v14695_v58, %v14694_v24  ;;  %v3199_v22 = vadd.bf16 %v3183_v63, %v3142_v14  ;;  %v3651_v26 = vadd.bf16 %v3635_v55, %v3597_v51  ;;  %v4381_v0 = vadd.bf16 %v4365_v45, %v4329_v19  ;;  %v14700_v16 = vld [vmem:[#allocation154_spill] sm:$0xff]  ;;  %v14702_v56 = vld [vmem:[#allocation153_spill] sm:$0xff]  ;;  %v14706_v63 = vld [vmem:[#allocation59_spill] sm:$0xff] }
 0x3c1   : > { %v4573_v54 = vmul.bf16 %v14698_v53, %v14697_v36  ;;  %v4625_v13 = vmul.bf16 %v14699_v29, %v11423_v42  ;;  %v14701_v47 = vrot.slane %v14700_v16, 4  ;;  %v14703_v21 = vrot.slane %v14702_v56, 4  ;;  %v14705_v58 = vld [vmem:[#allocation221_spill] sm:$0xff]  ;;  %v14707_v19 = vld [vmem:[#allocation171_spill] sm:$0xff]  ;;  %v14710_v16 = vld [vmem:[#allocation48_spill] sm:$0xff] }
 0x3c2   : > { %v4891_v24 = vmul.bf16 %v14705_v58, %v14596_v25  ;;  %v2393_v59 = vmax.bf16 %v14218_v23, %v2377_v34  ;;  %v3255_v51 = vadd.bf16 %v3239_v41, %v3199_v22  ;;  %v3706_v55 = vadd.bf16 %v3690_v57, %v3651_v26  ;;  %v14708_v53 = vld [vmem:[#allocation43_spill] sm:$0xff]  ;;  %v14711_v52 = vld [vmem:[#allocation174_spill] sm:$0xff] }
 0x3c3   : > { %v11441_v9 = vsel %vm1578_vm1, %v14703_v21, %v14701_v47  ;;  %v4433_v14 = vadd.bf16 %v4417_v60, %v4381_v0  ;;  %v4927_v45 = vmul.bf16 %v14707_v19, %v14706_v63  ;;  %v14709_v29 = vld [vmem:[#allocation223_spill] sm:$0xff]  ;;  %v5031_v56 = vmul.bf16 %v14711_v52, %v14710_v16  ;;  %v14712_v47 = vld [vmem:[#allocation224_spill] sm:$0xff]  ;;  %v14713_v60 = vld [vmem:[#allocation225_spill] sm:$0xff] }
 0x3c4   : > { %14704 = vst [vmem:[#allocation92_spill] sm:$0xff] %v11441_v9  ;;  %v4979_v42 = vmul.bf16 %v14709_v29, %v14708_v53  ;;  %v5083_v21 = vmul.bf16 %v14712_v47, %v11079_v6  ;;  %v11455_v36 = vmin.bf16 %v14114_v50, %v2393_v59  ;;  %v3760_v25 = vadd.bf16 %v3744_v30, %v3706_v55  ;;  %v14714_v26 = vld [vmem:[#allocation155_spill] sm:$0xff] }
 0x3c5   : > { %v4485_v34 = vadd.bf16 %v4469_v4, %v4433_v14  ;;  %v5135_v41 = vmul.bf16 %v14604_v12, %v11260_v2  ;;  %v4943_v57 = vadd.bf16 %v4927_v45, %v4891_v24  ;;  %v5187_v22 = vmul.bf16 %v14713_v60, %v11441_v9  ;;  %v14717_v6 = vld [vmem:[#allocation159_spill] sm:$0xff]  ;;  %v14720_v45 = vld [vmem:[#allocation230_spill] sm:$0xff] }
 0x3c6   : > { %v14715_v0 = vshrl.u32 %v14714_v26, 16  ;;  %v14716_v52 = vshll.u32 %v14714_v26, 16  ;;  %v3815_v19 = vadd.bf16 %v3799_v20, %v3760_v25  ;;  %v14718_v59 = vshrl.u32 %v14717_v6, 16  ;;  %v14721_v20 = vld [vmem:[#allocation106_spill] sm:$0xff] }
 0x3c7   : > { %v4537_v47 = vadd.bf16 %v4521_v15, %v4485_v34  ;;  %v14719_v30 = vshll.u32 %v14717_v6, 16  ;;  %v4995_v55 = vadd.bf16 %v4979_v42, %v4943_v57  ;;  %v5717_v24 = vmul.bf16 %v14503_v1, %v10382_v18  ;;  %v6081_v25 = vld [vmem:[#allocation2 + $0xd8] sm:$0x1f]  ;;  %v14722_v6 = vld [vmem:[#allocation49_spill] sm:$0xff] }
 0x3c8   : > { %v5496_v29 = vrot.slane %v14715_v0, 4  ;;  %v5499_v16 = vrot.slane %v14716_v52, 5  ;;  %v5504_v53 = vrot.slane %v14718_v59, 4  ;;  %v5753_v60 = vmul.bf16 %v14720_v45, %v10575_v40  ;;  %v6080_v0 = vld [vmem:[#allocation2 + $0xd0] sm:$0xe0] }
 0x3c9   : > { %v5507_v4 = vrot.slane %v14719_v30, 5  ;;  %v3831_v12 = vadd.bf16 %v3815_v19, %v3255_v51  ;;  %v4589_v26 = vadd.bf16 %v4573_v54, %v4537_v47  ;;  %v5805_v15 = vmul.bf16 %v14721_v20, %v14613_v28  ;;  %v14723_v30 = vld [vmem:[#allocation232_spill] sm:$0xff]  ;;  %v14727_v45 = vld [vmem:[#allocation86_spill] sm:$0xff]  ;;  %v14728_v51 = vld [vmem:[#allocation233_spill] sm:$0xff] }
 0x3ca   : > { %v5500_v14 = vor.u32 %v5499_v16, %v5496_v29  ;;  %v5047_v34 = vadd.bf16 %v5031_v56, %v4995_v55  ;;  %v5769_v59 = vadd.bf16 %v5753_v60, %v5717_v24  ;;  %v5857_v42 = vmul.bf16 %v14723_v30, %v14722_v6  ;;  %v14724_v29 = vld [vmem:[#allocation47_spill] sm:$0xff]  ;;  %v14725_v16 = vld [vmem:[#allocation129_spill] sm:$0xff]  ;;  %v14730_v24 = vld [vmem:[#allocation52_spill] sm:$0xff] }
 0x3cb   : > { %v5508_v52 = vor.u32 %v5507_v4, %v5504_v53  ;;  %v5909_v57 = vmul.bf16 %v14725_v16, %v14724_v29  ;;  %v4641_v18 = vadd.bf16 %v4625_v13, %v4589_v26  ;;  %v5961_v54 = vmul.bf16 %v14728_v51, %v14727_v45  ;;  %v14729_v4 = vld [vmem:[#allocation69_spill] sm:$0xff]  ;;  %v14732_v6 = vld [vmem:[#allocation58_spill] sm:$0xff] }
 0x3cc   : > { %v6182_v53 = vrot.slane %v6080_v0, 5  ;;  %v5099_v19 = vadd.bf16 %v5083_v21, %v5047_v34  ;;  %v5821_v47 = vadd.bf16 %v5805_v15, %v5769_v59  ;;  %v6183_v60 = vrot.slane %v6081_v25, 5  ;;  %v14731_v30 = vld [vmem:[#allocation237_spill] sm:$0xff]  ;;  %v14733_v16 = vld [vmem:[#allocation30_spill] sm:$0xff]  ;;  %v14738_v15 = vld [vmem:[#allocation32_spill] sm:$0xff] }
 0x3cd   : > { %v11480_v1 = vsel %vm1861_vm2, %v5500_v14, %v5508_v52  ;;  %v4657_v55 = vadd.bf16 %v4641_v18, %v3831_v12  ;;  %v6280_v20 = vmul.bf16 %v14731_v30, %v14730_v24  ;;  %v6316_v13 = vmul.bf16 %v14733_v16, %v14732_v6  ;;  %v14734_v26 = vld [vmem:[#allocation41_spill] sm:$0xff]  ;;  %v14735_v14 = vld [vmem:[#allocation239_spill] sm:$0xff]  ;;  %v6643_v29 = vld [vmem:[#allocation2 + $0xd0] sm:$0xe0] }
 0x3ce   : > { %14726 = vst [vmem:[#allocation94_spill] sm:$0xff] %v11480_v1  ;;  %v6013_v56 = vmul.bf16 %v14729_v4, %v11480_v1  ;;  %v6368_v52 = vmul.bf16 %v14735_v14, %v14734_v26  ;;  %v5151_v28 = vadd.bf16 %v5135_v41, %v5099_v19  ;;  %v5873_v51 = vadd.bf16 %v5857_v42, %v5821_v47  ;;  %v14737_v0 = vld [vmem:[#allocation50_spill] sm:$0xff]  ;;  %v14739_v59 = vld [vmem:[#allocation227_spill] sm:$0xff]  ;;  %v14740_v18 = vld [vmem:[#allocation241_spill] sm:$0xff] }
 0x3cf   : > { %v11493_v21 = vsel %vm6142_vm5, %v6182_v53, %v6183_v60  ;;  %v6420_v34 = vmul.bf16 %v14738_v15, %v14737_v0  ;;  %v6644_v25 = vld [vmem:[#allocation2 + $0xd8] sm:$0x3f]  ;;  %v6332_v12 = vadd.bf16 %v6316_v13, %v6280_v20  ;;  %v6472_v24 = vmul.bf16 %v14740_v18, %v14739_v59 }
 0x3d0   : > { %14736 = vst [vmem:[#allocation95_spill] sm:$0xff] %v11493_v21  ;;  %v14741_v30 = vld [vmem:[#allocation242_spill] sm:$0xff]  ;;  %v14742_v6 = vld [vmem:[#allocation243_spill] sm:$0xff]  ;;  %v5203_v26 = vadd.bf16 %v5187_v22, %v5151_v28  ;;  %v5925_v41 = vadd.bf16 %v5909_v57, %v5873_v51  ;;  %v6884_v42 = vshrl.u32 %v6643_v29, 16  ;;  %v6887_v19 = vshll.u32 %v6643_v29, 16 }
 0x3d1   : > { %v6524_v16 = vmul.bf16 %v14741_v30, %v11312_v7  ;;  %v6576_v14 = vmul.bf16 %v14742_v6, %v11493_v21  ;;  %v6384_v53 = vadd.bf16 %v6368_v52, %v6332_v12  ;;  %v6892_v47 = vshrl.u32 %v6644_v25, 16  ;;  %v999_v28 = vld [vmem:[#allocation2 + $0xc0] sm:$0xf8]  ;;  %v14743_v29 = vld [vmem:[#allocation246_spill] sm:$0xff] }
 0x3d2   : > { %v6895_v60 = vshll.u32 %v6644_v25, 16  ;;  %v7107_v15 = vmul.bf16 %v14631_v32, %v14632_v43  ;;  %v5219_v20 = vadd.bf16 %v5203_v26, %v4657_v55  ;;  %v5977_v13 = vadd.bf16 %v5961_v54, %v5925_v41  ;;  %v14744_v52 = vld [vmem:[#allocation247_spill] sm:$0xff]  ;;  %v1000_v43 = vld [vmem:[#allocation2 + $0xc8] sm:$0xf] }
 0x3d3   : > { %v6886_v0 = vrot.slane %v6884_v42, 5  ;;  %v6889_v18 = vrot.slane %v6887_v19, 6  ;;  %v6436_v59 = vadd.bf16 %v6420_v34, %v6384_v53  ;;  %v6894_v4 = vrot.slane %v6892_v47, 5  ;;  %v14745_v34 = vld [vmem:[#allocation248_spill] sm:$0xff]  ;;  %v14746_v42 = vld [vmem:[#allocation249_spill] sm:$0xff] }
 0x3d4   : > { %v6897_v30 = vrot.slane %v6895_v60, 6  ;;  %v7143_v6 = vmul.bf16 %v14633_v48, %v14522_v61  ;;  %v6029_v22 = vadd.bf16 %v6013_v56, %v5977_v13  ;;  %v7195_v51 = vmul.bf16 %v14743_v29, %v14524_v46  ;;  %v1526_v13 = vld [vmem:[#allocation2 + $0xc0] sm:$0xf0] }
 0x3d5   : > { %v6890_v57 = vor.u32 %v6889_v18, %v6886_v0  ;;  %v7247_v25 = vmul.bf16 %v14744_v52, %v14526_v37  ;;  %v6488_v55 = vadd.bf16 %v6472_v24, %v6436_v59  ;;  %v7299_v12 = vmul.bf16 %v14745_v34, %v11154_v35  ;;  %v1527_v59 = vld [vmem:[#allocation2 + $0xc8] sm:$0xf] }
 0x3d6   : > { %v6898_v54 = vor.u32 %v6897_v30, %v6894_v4  ;;  %v7159_v26 = vadd.bf16 %v7143_v6, %v7107_v15  ;;  %v6045_v41 = vadd.bf16 %v6029_v22, %v5219_v20  ;;  %v7351_v19 = vmul.bf16 %v14746_v42, %v11335_v39 }
 0x3d7   : > { %v1187_v53 = vshrl.u32 %v999_v28, 16  ;;  %v1190_v56 = vshll.u32 %v999_v28, 16  ;;  %v6540_v0 = vadd.bf16 %v6524_v16, %v6488_v55  ;;  %v1195_v60 = vshrl.u32 %v1000_v43, 16  ;;  %v1845_v16 = vld [vmem:[#allocation2 + $0xc0] sm:$0xf0] }
 0x3d8   : > { %v11516_v18 = vsel %vm6661_vm6, %v6890_v57, %v6898_v54  ;;  %v7211_v47 = vadd.bf16 %v7195_v51, %v7159_v26  ;;  %v1198_v15 = vshll.u32 %v1000_v43, 16  ;;  %v1389_v28 = vmul.bf16 %v14637_v62, %v11170_v17  ;;  %v1846_v26 = vld [vmem:[#allocation2 + $0xc8] sm:$0x1f]  ;;  %v14747_v43 = vld [vmem:[#allocation19_spill] sm:$0xff] }
 0x3d9   : > { %v7406_v30 = vmul.bf16 %v14528_v11, %v11516_v18  ;;  %v1189_v6 = vrot.slane %v1187_v53, 3  ;;  %v1192_v4 = vrot.slane %v1190_v56, 4  ;;  %v6592_v24 = vadd.bf16 %v6576_v14, %v6540_v0  ;;  %v14748_v0 = vld [vmem:[#allocation192_spill] sm:$0xff] }
 0x3da   : > { %v7263_v20 = vadd.bf16 %v7247_v25, %v7211_v47  ;;  %v1197_v22 = vrot.slane %v1195_v60, 3  ;;  %v1200_v57 = vrot.slane %v1198_v15, 4  ;;  %v1429_v51 = vmul.bf16 %v14638_v33, %v11351_v27  ;;  %v14749_v47 = vld [vmem:[#allocation20_spill] sm:$0xff] }
 0x3db   : > { %v1193_v55 = vor.u32 %v1192_v4, %v1189_v6  ;;  %v1609_v54 = vrot.slane %v1526_v13, 4  ;;  %v6608_v42 = vadd.bf16 %v6592_v24, %v6045_v41  ;;  %v1610_v53 = vrot.slane %v1527_v59, 4  ;;  %v14751_v41 = vld [vmem:[#allocation21_spill] sm:$0xff] }
 0x3dc   : > { %v7315_v11 = vadd.bf16 %v7299_v12, %v7263_v20  ;;  %v1697_v56 = vmul.bf16 %v14747_v43, %v14641_v49  ;;  %v1201_v14 = vor.u32 %v1200_v57, %v1197_v22  ;;  %v1445_v25 = vadd.bf16 %v1429_v51, %v1389_v28  ;;  %v14752_v20 = vld [vmem:[#allocation24_spill] sm:$0xff]  ;;  %v14753_v51 = vld [vmem:[#allocation25_spill] sm:$0xff] }
 0x3dd   : > { %v1733_v60 = vmul.bf16 %v14749_v47, %v14748_v0  ;;  %v2033_v17 = vshrl.u32 %v1845_v16, 16  ;;  %v11529_v6 = vsel %vm1578_vm1, %v1609_v54, %v1610_v53  ;;  %v2036_v4 = vshll.u32 %v1845_v16, 16  ;;  %v14754_v54 = vld [vmem:[#allocation82_spill] sm:$0xff] }
 0x3de   : > { %v7367_v62 = vadd.bf16 %v7351_v19, %v7315_v11  ;;  %14750 = vst [vmem:[#allocation211_spill] sm:$0xff] %v11529_v6  ;;  %v2041_v15 = vshrl.u32 %v1846_v26, 16  ;;  %v11532_v13 = vsel %vm1015_vm0, %v1193_v55, %v1201_v14  ;;  %v1785_v59 = vmul.bf16 %v14751_v41, %v11529_v6  ;;  %v14755_v53 = vld [vmem:[#allocation26_spill] sm:$0xff]  ;;  %v14757_v41 = vld [vmem:[#allocation137_spill] sm:$0xff] }
 0x3df   : > { %v1749_v12 = vadd.bf16 %v1733_v60, %v1697_v56  ;;  %v2035_v49 = vrot.slane %v2033_v17, 4  ;;  %v1482_v22 = vmul.bf16 %v14752_v20, %v11532_v13  ;;  %v2038_v28 = vrot.slane %v2036_v4, 5  ;;  %v14756_v47 = vld [vmem:[#allocation138_spill] sm:$0xff]  ;;  %v14766_v20 = vld [vmem:[#allocation196_spill] sm:$0xff] }
 0x3e0   : > { %v7422_v24 = vadd.bf16 %v7406_v30, %v7367_v62  ;;  %v2043_v57 = vrot.slane %v2041_v15, 4  ;;  %v2044_v19 = vshll.u32 %v1846_v26, 16  ;;  %v2232_v16 = vmul.bf16 %v14753_v51, %v11213_v8  ;;  %v14759_v62 = vld [vmem:[#allocation136_spill] sm:$0xff]  ;;  %v14760_v30 = vld [vmem:[#allocation135_spill] sm:$0xff]  ;;  %v14765_v51 = vld [vmem:[#allocation226_spill] sm:$0xff] }
 0x3e1   : > { %v1801_v11 = vadd.bf16 %v1785_v59, %v1749_v12  ;;  %v2268_v55 = vmul.bf16 %v14755_v53, %v14754_v54  ;;  %v1498_v56 = vadd.bf16 %v1482_v22, %v1445_v25  ;;  %v2039_v60 = vor.u32 %v2038_v28, %v2035_v49  ;;  %v14763_v12 = vld [vmem:[#allocation63_spill] sm:$0xff]  ;;  %v14769_v22 = vld [vmem:[#allocation33_spill] sm:$0xff]  ;;  %v14775_v54 = vld [vmem:[#allocation198_spill] sm:$0xff] }
 0x3e2   : > { %v7438_v14 = vadd.bf16 %v7422_v24, %v6608_v42  ;;  %v14758_v17 = vor.u32 %v14756_v47, %v14757_v41  ;;  %v14761_v6 = vor.u32 %v14759_v62, %v14760_v30  ;;  %v2046_v15 = vrot.slane %v2044_v19, 5  ;;  %v14764_v59 = vld [vmem:[#allocation31_spill] sm:$0xff]  ;;  %v14767_v42 = vld [vmem:[#allocation252_spill] sm:$0xff]  ;;  %v14770_v41 = vld [vmem:[#allocation45_spill] sm:$0xff] }
 0x3e3   : > { %v2284_v26 = vadd.bf16 %v2268_v55, %v2232_v16  ;;  %v2920_v8 = vmul.bf16 %v14764_v59, %v14763_v12  ;;  %v2959_v53 = vmul.bf16 %v14766_v20, %v14765_v51  ;;  %v1817_v49 = vadd.bf16 %v1801_v11, %v1498_v56  ;;  %v14768_v24 = vld [vmem:[#allocation39_spill] sm:$0xff]  ;;  %v14771_v28 = vld [vmem:[#allocation197_spill] sm:$0xff]  ;;  %v14773_v19 = vld [vmem:[#allocation36_spill] sm:$0xff] }
 0x3e4   : > { %v11549_v4 = vsel %vm2470_vm3, %v14761_v6, %v14758_v17  ;;  %v7461_v25 = vadd.bf16 %v14767_v42, %v7438_v14  ;;  %v3014_v47 = vmul.bf16 %v14769_v22, %v14768_v24  ;;  %v3071_v62 = vmul.bf16 %v14771_v28, %v14770_v41  ;;  %v14772_v17 = vld [vmem:[#allocation37_spill] sm:$0xff]  ;;  %v14774_v55 = vld [vmem:[#allocation84_spill] sm:$0xff]  ;;  %v14776_v20 = vld [vmem:[#allocation83_spill] sm:$0xff] }
 0x3e5   : > { %14762 = vst [vmem:[#allocation34_spill] sm:$0xff] %v11549_v4  ;;  %v2047_v30 = vor.u32 %v2046_v15, %v2043_v57  ;;  %v2975_v6 = vadd.bf16 %v2959_v53, %v2920_v8  ;;  %v3127_v16 = vmul.bf16 %v14773_v19, %v14772_v17  ;;  %v3184_v12 = vmul.bf16 %v14775_v54, %v14774_v55  ;;  %v14777_v11 = vld [vmem:[#allocation133_spill] sm:$0xff]  ;;  %v14779_v42 = vld [vmem:[#allocation128_spill] sm:$0xff]  ;;  %v14786_v55 = vld [vmem:[#allocation98_spill] sm:$0xff] }
 0x3e6   : > { %v7477_v59 = vmax.bf16 %v14218_v23, %v7461_v25  ;;  %v3240_v14 = vmul.bf16 %v14776_v20, %v11549_v4  ;;  %v14778_v56 = vrot.slane %v14777_v11, 3  ;;  %v14780_v22 = vrot.slane %v14779_v42, 3  ;;  %v14782_v57 = vld [vmem:[#allocation209_spill] sm:$0xff]  ;;  %v14783_v53 = vld [vmem:[#allocation204_spill] sm:$0xff]  ;;  %v14787_v28 = vld [vmem:[#allocation38_spill] sm:$0xff] }
 0x3e7   : > { %v3491_v15 = vmul.bf16 %v14783_v53, %v14782_v57  ;;  %v11577_v8 = vsel %vm1861_vm2, %v2039_v60, %v2047_v30  ;;  %v3030_v19 = vadd.bf16 %v3014_v47, %v2975_v6  ;;  %v14785_v54 = vld [vmem:[#allocation229_spill] sm:$0xff]  ;;  %v14788_v17 = vld [vmem:[#allocation206_spill] sm:$0xff]  ;;  %v14789_v42 = vld [vmem:[#allocation27_spill] sm:$0xff] }
 0x3e8   : > { %v11572_v24 = vsel %vm3352_vm4, %v14780_v22, %v14778_v56  ;;  %14784 = vst [vmem:[#allocation90_spill] sm:$0xff] %v11577_v8  ;;  %v3527_v25 = vmul.bf16 %v14786_v55, %v14785_v54  ;;  %v3582_v20 = vmul.bf16 %v14788_v17, %v14787_v28  ;;  %v7493_v11 = vmin.bf16 %v14114_v50, %v7477_v59  ;;  %v14790_v22 = vld [vmem:[#allocation44_spill] sm:$0xff]  ;;  %v14791_v56 = vld [vmem:[#allocation114_spill] sm:$0xff]  ;;  %v14792_v57 = vld [vmem:[#allocation207_spill] sm:$0xff] }
 0x3e9   : > { %14781 = vst [vmem:[#allocation194_spill] sm:$0xff] %v11572_v24  ;;  %v2323_v4 = vmul.bf16 %v14789_v42, %v11577_v8  ;;  %v3636_v41 = vmul.bf16 %v14791_v56, %v14790_v22  ;;  %v3691_v53 = vmul.bf16 %v14792_v57, %v11209_v5  ;;  %v3087_v60 = vadd.bf16 %v3071_v62, %v3030_v19  ;;  %v14793_v47 = vld [vmem:[#allocation163_spill] sm:$0xff]  ;;  %v14795_v54 = vld [vmem:[#allocation144_spill] sm:$0xff]  ;;  %v14796_v51 = vld [vmem:[#allocation145_spill] sm:$0xff] }
 0x3ea   : > { %v3543_v30 = vadd.bf16 %v3527_v25, %v3491_v15  ;;  %v3745_v6 = vmul.bf16 %v14793_v47, %v11394_v38  ;;  %v3800_v55 = vmul.bf16 %v14684_v31, %v11572_v24  ;;  %v7509_v17 = vadd.bf16 %v7493_v11, %v11455_v36  ;;  %v14794_v28 = vld [vmem:[#allocation143_spill] sm:$0xff]  ;;  %v14797_v8 = vld [vmem:[#allocation146_spill] sm:$0xff]  ;;  %v14805_v11 = vld [vmem:[#allocation132_spill] sm:$0xff] }
 0x3eb   : > { %v2339_v59 = vadd.bf16 %v2323_v4, %v2284_v26  ;;  %v4129_v42 = vor.u32 %v14795_v54, %v14794_v28  ;;  %v4137_v56 = vor.u32 %v14797_v8, %v14796_v51  ;;  %v3143_v22 = vadd.bf16 %v3127_v16, %v3087_v60  ;;  %v14798_v19 = vld [vmem:[#allocation231_spill] sm:$0xff]  ;;  %v14802_v54 = vld [vmem:[#allocation217_spill] sm:$0xff]  ;;  %v14804_v8 = vld [vmem:[#allocation88_spill] sm:$0xff] }
 0x3ec   : > { %v3598_v43 = vadd.bf16 %v3582_v20, %v3543_v30  ;;  %v4330_v62 = vmul.bf16 %v14580_v10, %v14260_v3  ;;  %v14799_v15 = vld [vmem:[#allocation35_spill] sm:$0xff]  ;;  %8254 = vmatmul.mubr.bf16.gmra.mrb[12].mxu1 %v7509_v17  ;;  %v14803_v26 = vld [vmem:[#allocation213_spill] sm:$0xff]  ;;  %v4522_v3 = vmul.bf16 %v14805_v11, %v14804_v8  ;;  %v14806_v60 = vld [vmem:[#allocation28_spill] sm:$0xff] }
 0x3ed   : > { %v4366_v25 = vmul.bf16 %v14799_v15, %v14798_v19  ;;  %v2355_v47 = vadd.bf16 %v2339_v59, %v1817_v49  ;;  %v11604_v31 = vsel %vm1015_vm0, %v4129_v42, %v4137_v56  ;;  %v14801_v36 = vld [vmem:[#allocation131_spill] sm:$0xff]  ;;  %v4470_v28 = vmul.bf16 %v14803_v26, %v14802_v54  ;;  %v14809_v42 = vld [vmem:[#allocation170_spill] sm:$0xff]  ;;  %v14810_v59 = vld [vmem:[#allocation140_spill] sm:$0xff] }
 0x3ee   : > { %14800 = vst [vmem:[#allocation89_spill] sm:$0xff] %v11604_v31  ;;  %v4418_v4 = vmul.bf16 %v14801_v36, %v14692_v44  ;;  %v3200_v51 = vadd.bf16 %v3184_v12, %v3143_v22  ;;  %v3652_v16 = vadd.bf16 %v3636_v41, %v3598_v43  ;;  %v14807_v15 = vld [vmem:[#allocation91_spill] sm:$0xff]  ;;  %v4626_v56 = vmul.bf16 %v14809_v42, %v11604_v31  ;;  %v14820_v11 = vld [vmem:[#allocation174_spill] sm:$0xff] }
 0x3ef   : > { %v4382_v20 = vadd.bf16 %v4366_v25, %v4330_v62  ;;  %v2378_v30 = vadd.bf16 %v14806_v60, %v2355_v47  ;;  %v14808_v17 = vld [vmem:[#allocation215_spill] sm:$0xff]  ;;  %v14811_v10 = vrot.slane %v14810_v59, 4  ;;  %v4892_v22 = vmul.bf16 %v14705_v58, %v14706_v63  ;;  %v14817_v60 = vld [vmem:[#allocation48_spill] sm:$0xff]  ;;  %v14819_v59 = vld [vmem:[#allocation46_spill] sm:$0xff] }
 0x3f0   : > { %v4574_v49 = vmul.bf16 %v14808_v17, %v14807_v15  ;;  %v14812_v36 = vld [vmem:[#allocation139_spill] sm:$0xff]  ;;  %v3256_v43 = vadd.bf16 %v3240_v14, %v3200_v51  ;;  %v3707_v41 = vadd.bf16 %v3691_v53, %v3652_v16  ;;  %v14823_v16 = vld [vmem:[#allocation225_spill] sm:$0xff] }
 0x3f1   : > { %v14813_v44 = vrot.slane %v14812_v36, 4  ;;  %v4434_v12 = vadd.bf16 %v4418_v4, %v4382_v20  ;;  %v2394_v47 = vmax.bf16 %v14218_v23, %v2378_v30  ;;  %v14815_v62 = vld [vmem:[#allocation43_spill] sm:$0xff]  ;;  %v5032_v36 = vmul.bf16 %v14820_v11, %v14819_v59  ;;  %v14824_v30 = vld [vmem:[#allocation141_spill] sm:$0xff]  ;;  %v6082_v59 = vld [vmem:[#allocation2 + $0xe0] sm:$0xe0] }
 0x3f2   : > { %v14816_v25 = vld [vmem:[#allocation171_spill] sm:$0xff]  ;;  %v3761_v15 = vadd.bf16 %v3745_v6, %v3707_v41  ;;  %v14826_v6 = vshll.u32 %v14824_v30, 16  ;;  %v14827_v41 = vld [vmem:[#allocation142_spill] sm:$0xff] }
 0x3f3   : > { %v11622_v26 = vsel %vm1578_vm1, %v14813_v44, %v14811_v10  ;;  %v4928_v17 = vmul.bf16 %v14816_v25, %v14815_v62  ;;  %v14818_v42 = vld [vmem:[#allocation223_spill] sm:$0xff]  ;;  %v4486_v10 = vadd.bf16 %v4470_v28, %v4434_v12  ;;  %v14821_v44 = vld [vmem:[#allocation224_spill] sm:$0xff]  ;;  %v11638_v63 = vmin.bf16 %v14114_v50, %v2394_v47 }
 0x3f4   : > { %14814 = vst [vmem:[#allocation218_spill] sm:$0xff] %v11622_v26  ;;  %v4980_v31 = vmul.bf16 %v14818_v42, %v14817_v60  ;;  %v5084_v14 = vmul.bf16 %v14821_v44, %v11260_v2  ;;  %v14822_v53 = vld [vmem:[#allocation175_spill] sm:$0xff]  ;;  %v5188_v20 = vmul.bf16 %v14823_v16, %v11622_v26  ;;  %v14825_v42 = vshrl.u32 %v14824_v30, 16  ;;  %v14832_v16 = vld [vmem:[#allocation230_spill] sm:$0xff] }
 0x3f5   : > { %v5136_v4 = vmul.bf16 %v14822_v53, %v11441_v9  ;;  %v4944_v51 = vadd.bf16 %v4928_v17, %v4892_v22  ;;  %v3816_v60 = vadd.bf16 %v3800_v55, %v3761_v15  ;;  %v4538_v11 = vadd.bf16 %v4522_v3, %v4486_v10  ;;  %v14830_v17 = vld [vmem:[#allocation29_spill] sm:$0xff]  ;;  %v14831_v9 = vld [vmem:[#allocation42_spill] sm:$0xff] }
 0x3f6   : > { %v5513_v25 = vrot.slane %v14825_v42, 4  ;;  %v5516_v28 = vrot.slane %v14826_v6, 5  ;;  %v14828_v12 = vshrl.u32 %v14827_v41, 16  ;;  %v14829_v53 = vshll.u32 %v14827_v41, 16  ;;  %v14833_v3 = vld [vmem:[#allocation49_spill] sm:$0xff]  ;;  %v14834_v10 = vld [vmem:[#allocation106_spill] sm:$0xff] }
 0x3f7   : > { %v4996_v2 = vadd.bf16 %v4980_v31, %v4944_v51  ;;  %v5718_v22 = vmul.bf16 %v14830_v17, %v10575_v40  ;;  %v5754_v26 = vmul.bf16 %v14832_v16, %v14831_v9  ;;  %v3832_v42 = vadd.bf16 %v3816_v60, %v3256_v43  ;;  %v6083_v6 = vld [vmem:[#allocation2 + $0xe8] sm:$0x1f]  ;;  %v14835_v51 = vld [vmem:[#allocation47_spill] sm:$0xff] }
 0x3f8   : > { %v5521_v44 = vrot.slane %v14828_v12, 4  ;;  %v5524_v47 = vrot.slane %v14829_v53, 5  ;;  %v4590_v55 = vadd.bf16 %v4574_v49, %v4538_v11  ;;  %v5517_v15 = vor.u32 %v5516_v28, %v5513_v25  ;;  %v14836_v41 = vld [vmem:[#allocation232_spill] sm:$0xff]  ;;  %v14837_v40 = vld [vmem:[#allocation129_spill] sm:$0xff] }
 0x3f9   : > { %v5806_v30 = vmul.bf16 %v14834_v10, %v14833_v3  ;;  %v5048_v58 = vadd.bf16 %v5032_v36, %v4996_v2  ;;  %v5770_v31 = vadd.bf16 %v5754_v26, %v5718_v22  ;;  %v5858_v53 = vmul.bf16 %v14836_v41, %v14835_v51  ;;  %v14838_v16 = vld [vmem:[#allocation233_spill] sm:$0xff]  ;;  %v14843_v22 = vld [vmem:[#allocation30_spill] sm:$0xff] }
 0x3fa   : > { %v5525_v12 = vor.u32 %v5524_v47, %v5521_v44  ;;  %v4642_v62 = vadd.bf16 %v4626_v56, %v4590_v55  ;;  %v5910_v17 = vmul.bf16 %v14837_v40, %v14727_v45  ;;  %v5962_v9 = vmul.bf16 %v14838_v16, %v11480_v1  ;;  %v14839_v26 = vld [vmem:[#allocation69_spill] sm:$0xff]  ;;  %v14840_v44 = vld [vmem:[#allocation58_spill] sm:$0xff]  ;;  %v6645_v40 = vld [vmem:[#allocation2 + $0xe0] sm:$0xe0] }
 0x3fb   : > { %v6185_v60 = vrot.slane %v6082_v59, 5  ;;  %v5100_v11 = vadd.bf16 %v5084_v14, %v5048_v58  ;;  %v5822_v43 = vadd.bf16 %v5806_v30, %v5770_v31  ;;  %v6186_v25 = vrot.slane %v6083_v6, 5  ;;  %v14841_v28 = vld [vmem:[#allocation237_spill] sm:$0xff]  ;;  %v14845_v59 = vld [vmem:[#allocation50_spill] sm:$0xff]  ;;  %v14846_v14 = vld [vmem:[#allocation239_spill] sm:$0xff] }
 0x3fc   : > { %v11663_v49 = vsel %vm1861_vm2, %v5517_v15, %v5525_v12  ;;  %v4658_v2 = vadd.bf16 %v4642_v62, %v3832_v42  ;;  %v6281_v56 = vmul.bf16 %v14841_v28, %v14840_v44  ;;  %v14842_v47 = vld [vmem:[#allocation41_spill] sm:$0xff]  ;;  %v6369_v15 = vmul.bf16 %v14846_v14, %v14845_v59  ;;  %v14847_v42 = vld [vmem:[#allocation227_spill] sm:$0xff]  ;;  %v14848_v6 = vld [vmem:[#allocation32_spill] sm:$0xff] }
 0x3fd   : > { %v6014_v36 = vmul.bf16 %v14839_v26, %v11663_v49  ;;  %v6317_v55 = vmul.bf16 %v14843_v22, %v14842_v47  ;;  %v5152_v41 = vadd.bf16 %v5136_v4, %v5100_v11  ;;  %v5874_v16 = vadd.bf16 %v5858_v53, %v5822_v43  ;;  %v6646_v30 = vld [vmem:[#allocation2 + $0xe8] sm:$0x3f]  ;;  %v14850_v28 = vld [vmem:[#allocation242_spill] sm:$0xff]  ;;  %v14851_v53 = vld [vmem:[#allocation243_spill] sm:$0xff] }
 0x3fe   : > { %v11672_v58 = vsel %vm6142_vm5, %v6185_v60, %v6186_v25  ;;  %v6421_v12 = vmul.bf16 %v14848_v6, %v14847_v42  ;;  %v14849_v31 = vld [vmem:[#allocation241_spill] sm:$0xff]  ;;  %v6525_v22 = vmul.bf16 %v14850_v28, %v11493_v21  ;;  %v6901_v11 = vshrl.u32 %v6645_v40, 16 }
 0x3ff   : > { %14844 = vst [vmem:[#allocation219_spill] sm:$0xff] %v11672_v58  ;;  %v6333_v62 = vadd.bf16 %v6317_v55, %v6281_v56  ;;  %v6473_v44 = vmul.bf16 %v14849_v31, %v11312_v7  ;;  %v5204_v47 = vadd.bf16 %v5188_v20, %v5152_v41  ;;  %v5926_v4 = vadd.bf16 %v5910_v17, %v5874_v16  ;;  %v1001_v20 = vld [vmem:[#allocation2 + $0xd0] sm:$0xf8] }
 0x400   : > { %v6577_v60 = vmul.bf16 %v14851_v53, %v11672_v58  ;;  %v6904_v25 = vshll.u32 %v6645_v40, 16  ;;  %v6909_v14 = vshrl.u32 %v6646_v30, 16  ;;  %v6912_v59 = vshll.u32 %v6646_v30, 16 }
 0x401   : > { %v6385_v43 = vadd.bf16 %v6369_v15, %v6333_v62  ;;  %v5220_v56 = vadd.bf16 %v5204_v47, %v4658_v2  ;;  %v5978_v55 = vadd.bf16 %v5962_v9, %v5926_v4  ;;  %v6903_v26 = vrot.slane %v6901_v11, 5  ;;  %v1002_v9 = vld [vmem:[#allocation2 + $0xd8] sm:$0xf] }
 0x402   : > { %v7108_v6 = vmul.bf16 %v14631_v32, %v14522_v61  ;;  %v6906_v7 = vrot.slane %v6904_v25, 6  ;;  %v6911_v42 = vrot.slane %v6909_v14, 5  ;;  %v6914_v28 = vrot.slane %v6912_v59, 6  ;;  %v1528_v25 = vld [vmem:[#allocation2 + $0xd0] sm:$0xf0] }
 0x403   : > { %v6437_v31 = vadd.bf16 %v6421_v12, %v6385_v43  ;;  %v6030_v16 = vadd.bf16 %v6014_v36, %v5978_v55  ;;  %v7144_v17 = vmul.bf16 %v14633_v48, %v14524_v46  ;;  %v7196_v41 = vmul.bf16 %v14743_v29, %v14526_v37  ;;  %v14852_v36 = vld [vmem:[#allocation249_spill] sm:$0xff] }
 0x404   : > { %v7248_v40 = vmul.bf16 %v14744_v52, %v11154_v35  ;;  %v6907_v47 = vor.u32 %v6906_v7, %v6903_v26  ;;  %v6915_v15 = vor.u32 %v6914_v28, %v6911_v42  ;;  %v7300_v61 = vmul.bf16 %v14745_v34, %v11335_v39  ;;  %v14854_v7 = vld [vmem:[#allocation251_spill] sm:$0xff] }
 0x405   : > { %v6489_v2 = vadd.bf16 %v6473_v44, %v6437_v31  ;;  %v6046_v14 = vadd.bf16 %v6030_v16, %v5220_v56  ;;  %v7160_v59 = vadd.bf16 %v7144_v17, %v7108_v6  ;;  %v7352_v30 = vmul.bf16 %v14852_v36, %v11516_v18  ;;  %v1529_v31 = vld [vmem:[#allocation2 + $0xd8] sm:$0xf] }
 0x406   : > { %v1204_v62 = vshrl.u32 %v1001_v20, 16  ;;  %v11697_v4 = vsel %vm6661_vm6, %v6907_v47, %v6915_v15  ;;  %v1207_v11 = vshll.u32 %v1001_v20, 16  ;;  %v1212_v43 = vshrl.u32 %v1002_v9, 16  ;;  %v14855_v16 = vld [vmem:[#allocation22_spill] sm:$0xff] }
 0x407   : > { %v6541_v12 = vadd.bf16 %v6525_v22, %v6489_v2  ;;  %14853 = vst [vmem:[#allocation93_spill] sm:$0xff] %v11697_v4  ;;  %v7212_v55 = vadd.bf16 %v7196_v41, %v7160_v59  ;;  %v7407_v26 = vmul.bf16 %v14854_v7, %v11697_v4  ;;  %v1215_v42 = vshll.u32 %v1002_v9, 16  ;;  %v1847_v15 = vld [vmem:[#allocation2 + $0xd0] sm:$0xf0]  ;;  %v1848_v41 = vld [vmem:[#allocation2 + $0xd8] sm:$0x1f] }
 0x408   : > { %v1206_v28 = vrot.slane %v1204_v62, 3  ;;  %v1209_v6 = vrot.slane %v1207_v11, 4  ;;  %v1214_v56 = vrot.slane %v1212_v43, 3  ;;  %v1390_v17 = vmul.bf16 %v14855_v16, %v11351_v27  ;;  %v14856_v9 = vld [vmem:[#allocation19_spill] sm:$0xff]  ;;  %v14858_v4 = vld [vmem:[#allocation20_spill] sm:$0xff] }
 0x409   : > { %v6593_v44 = vadd.bf16 %v6577_v60, %v6541_v12  ;;  %v7264_v22 = vadd.bf16 %v7248_v40, %v7212_v55  ;;  %v1217_v2 = vrot.slane %v1215_v42, 4  ;;  %v1430_v20 = vmul.bf16 %v14638_v33, %v11532_v13  ;;  %v14857_v43 = vld [vmem:[#allocation211_spill] sm:$0xff] }
 0x40a   : > { %v1612_v47 = vrot.slane %v1528_v25, 4  ;;  %v1210_v36 = vor.u32 %v1209_v6, %v1206_v28  ;;  %v1613_v7 = vrot.slane %v1529_v31, 4  ;;  %v1698_v62 = vmul.bf16 %v14856_v9, %v14748_v0  ;;  %v14860_v31 = vld [vmem:[#allocation21_spill] sm:$0xff]  ;;  %v14870_v9 = vld [vmem:[#allocation176_spill] sm:$0xff] }
 0x40b   : > { %v6609_v59 = vadd.bf16 %v6593_v44, %v6046_v14  ;;  %v7316_v60 = vadd.bf16 %v7300_v61, %v7264_v22  ;;  %v1218_v12 = vor.u32 %v1217_v2, %v1214_v56  ;;  %v1446_v11 = vadd.bf16 %v1430_v20, %v1390_v17  ;;  %v14861_v61 = vld [vmem:[#allocation24_spill] sm:$0xff]  ;;  %v14862_v20 = vld [vmem:[#allocation82_spill] sm:$0xff] }
 0x40c   : > { %v1734_v27 = vmul.bf16 %v14858_v4, %v14857_v43  ;;  %v11710_v40 = vsel %vm1578_vm1, %v1612_v47, %v1613_v7  ;;  %v2050_v55 = vshrl.u32 %v1847_v15, 16  ;;  %v2053_v42 = vshll.u32 %v1847_v15, 16  ;;  %v14863_v47 = vld [vmem:[#allocation25_spill] sm:$0xff]  ;;  %v14867_v4 = vld [vmem:[#allocation178_spill] sm:$0xff] }
 0x40d   : > { %14859 = vst [vmem:[#allocation96_spill] sm:$0xff] %v11710_v40  ;;  %v2058_v25 = vshrl.u32 %v1848_v41, 16  ;;  %v7368_v33 = vadd.bf16 %v7352_v30, %v7316_v60  ;;  %v11713_v14 = vsel %vm1015_vm0, %v1210_v36, %v1218_v12  ;;  %v1786_v0 = vmul.bf16 %v14860_v31, %v11710_v40  ;;  %v14864_v36 = vld [vmem:[#allocation90_spill] sm:$0xff]  ;;  %v14869_v40 = vld [vmem:[#allocation177_spill] sm:$0xff] }
 0x40e   : > { %v1750_v28 = vadd.bf16 %v1734_v27, %v1698_v62  ;;  %v1483_v44 = vmul.bf16 %v14861_v61, %v11713_v14  ;;  %v2052_v6 = vrot.slane %v2050_v55, 4  ;;  %v2055_v56 = vrot.slane %v2053_v42, 5  ;;  %v14865_v12 = vld [vmem:[#allocation26_spill] sm:$0xff]  ;;  %v14866_v27 = vld [vmem:[#allocation179_spill] sm:$0xff] }
 0x40f   : > { %v2060_v17 = vrot.slane %v2058_v25, 4  ;;  %v7423_v22 = vadd.bf16 %v7407_v26, %v7368_v33  ;;  %v2061_v2 = vshll.u32 %v1848_v41, 16  ;;  %v2233_v15 = vmul.bf16 %v14863_v47, %v14862_v20  ;;  %v14873_v41 = vld [vmem:[#allocation226_spill] sm:$0xff]  ;;  %v14874_v42 = vld [vmem:[#allocation31_spill] sm:$0xff]  ;;  %v14878_v20 = vld [vmem:[#allocation33_spill] sm:$0xff] }
 0x410   : > { %v1802_v7 = vadd.bf16 %v1786_v0, %v1750_v28  ;;  %v1499_v30 = vadd.bf16 %v1483_v44, %v1446_v11  ;;  %v2056_v60 = vor.u32 %v2055_v56, %v2052_v6  ;;  %v2269_v62 = vmul.bf16 %v14865_v12, %v14864_v36  ;;  %v14875_v28 = vld [vmem:[#allocation39_spill] sm:$0xff]  ;;  %v14876_v11 = vld [vmem:[#allocation196_spill] sm:$0xff]  ;;  %v14877_v56 = vld [vmem:[#allocation45_spill] sm:$0xff] }
 0x411   : > { %v14868_v31 = vor.u32 %v14866_v27, %v14867_v4  ;;  %v14871_v61 = vor.u32 %v14869_v40, %v14870_v9  ;;  %v7439_v33 = vadd.bf16 %v7423_v22, %v6609_v59  ;;  %v2063_v26 = vrot.slane %v2061_v2, 5  ;;  %v14879_v4 = vld [vmem:[#allocation37_spill] sm:$0xff]  ;;  %v14881_v9 = vld [vmem:[#allocation252_spill] sm:$0xff]  ;;  %v14884_v36 = vld [vmem:[#allocation34_spill] sm:$0xff] }
 0x412   : > { %v2921_v25 = vmul.bf16 %v14874_v42, %v14873_v41  ;;  %v2960_v0 = vmul.bf16 %v14876_v11, %v14875_v28  ;;  %v1818_v44 = vadd.bf16 %v1802_v7, %v1499_v30  ;;  %v2285_v6 = vadd.bf16 %v2269_v62, %v2233_v15  ;;  %v14880_v27 = vld [vmem:[#allocation197_spill] sm:$0xff]  ;;  %v14882_v59 = vld [vmem:[#allocation84_spill] sm:$0xff]  ;;  %v14885_v41 = vld [vmem:[#allocation198_spill] sm:$0xff] }
 0x413   : > { %v11730_v55 = vsel %vm2470_vm3, %v14871_v61, %v14868_v31  ;;  %v3015_v12 = vmul.bf16 %v14878_v20, %v14877_v56  ;;  %v3072_v47 = vmul.bf16 %v14880_v27, %v14879_v4  ;;  %v7462_v40 = vadd.bf16 %v14881_v9, %v7439_v33  ;;  %v14883_v22 = vld [vmem:[#allocation36_spill] sm:$0xff]  ;;  %v14886_v11 = vld [vmem:[#allocation83_spill] sm:$0xff]  ;;  %v14887_v15 = vld [vmem:[#allocation173_spill] sm:$0xff] }
 0x414   : > { %14872 = vst [vmem:[#allocation235_spill] sm:$0xff] %v11730_v55  ;;  %v2064_v31 = vor.u32 %v2063_v26, %v2060_v17  ;;  %v2976_v61 = vadd.bf16 %v2960_v0, %v2921_v25  ;;  %v3128_v2 = vmul.bf16 %v14883_v22, %v14882_v59  ;;  %v3185_v42 = vmul.bf16 %v14885_v41, %v14884_v36  ;;  %v14889_v62 = vld [vmem:[#allocation172_spill] sm:$0xff]  ;;  %v14892_v27 = vld [vmem:[#allocation229_spill] sm:$0xff]  ;;  %v14894_v41 = vld [vmem:[#allocation38_spill] sm:$0xff] }
 0x415   : > { %v3241_v7 = vmul.bf16 %v14886_v11, %v11730_v55  ;;  %v14888_v30 = vrot.slane %v14887_v15, 3  ;;  %v14890_v20 = vrot.slane %v14889_v62, 3  ;;  %v14893_v33 = vld [vmem:[#allocation204_spill] sm:$0xff]  ;;  %v7478_v26 = vmax.bf16 %v14218_v23, %v7462_v40  ;;  %v14895_v22 = vld [vmem:[#allocation98_spill] sm:$0xff]  ;;  %v14896_v11 = vld [vmem:[#allocation27_spill] sm:$0xff] }
 0x416   : > { %v3492_v17 = vmul.bf16 %v14893_v33, %v14892_v27  ;;  %v11758_v25 = vsel %vm1861_vm2, %v2056_v60, %v2064_v31  ;;  %v3031_v0 = vadd.bf16 %v3015_v12, %v2976_v61  ;;  %v3528_v36 = vmul.bf16 %v14895_v22, %v14894_v41  ;;  %v14897_v55 = vld [vmem:[#allocation44_spill] sm:$0xff]  ;;  %v14898_v62 = vld [vmem:[#allocation206_spill] sm:$0xff]  ;;  %v14900_v12 = vld [vmem:[#allocation163_spill] sm:$0xff] }
 0x417   : > { %v11752_v56 = vsel %vm3352_vm4, %v14890_v20, %v14888_v30  ;;  %v2324_v15 = vmul.bf16 %v14896_v11, %v11758_v25  ;;  %v3583_v59 = vmul.bf16 %v14898_v62, %v14897_v55  ;;  %v14899_v20 = vld [vmem:[#allocation114_spill] sm:$0xff]  ;;  %v3692_v27 = vmul.bf16 %v14792_v57, %v11394_v38  ;;  %v14901_v33 = vld [vmem:[#allocation208_spill] sm:$0xff]  ;;  %v14902_v11 = vld [vmem:[#allocation183_spill] sm:$0xff] }
 0x418   : > { %14891 = vst [vmem:[#allocation62_spill] sm:$0xff] %v11752_v56  ;;  %v3637_v30 = vmul.bf16 %v14899_v20, %v11209_v5  ;;  %v7494_v40 = vmin.bf16 %v14114_v50, %v7478_v26  ;;  %v3088_v60 = vadd.bf16 %v3072_v47, %v3031_v0  ;;  %v3544_v31 = vadd.bf16 %v3528_v36, %v3492_v17  ;;  %v14903_v4 = vld [vmem:[#allocation184_spill] sm:$0xff]  ;;  %v14904_v55 = vld [vmem:[#allocation185_spill] sm:$0xff]  ;;  %v14905_v9 = vld [vmem:[#allocation187_spill] sm:$0xff] }
 0x419   : > { %v3746_v61 = vmul.bf16 %v14900_v12, %v11572_v24  ;;  %v2340_v22 = vadd.bf16 %v2324_v15, %v2285_v6  ;;  %v3801_v41 = vmul.bf16 %v14901_v33, %v11752_v56  ;;  %v4146_v62 = vor.u32 %v14903_v4, %v14902_v11  ;;  %v14906_v47 = vld [vmem:[#allocation130_spill] sm:$0xff]  ;;  %v14908_v6 = vld [vmem:[#allocation53_spill] sm:$0xff]  ;;  %v14909_v0 = vld [vmem:[#allocation35_spill] sm:$0xff] }
 0x41a   : > { %v4154_v20 = vor.u32 %v14905_v9, %v14904_v55  ;;  %v7510_v5 = vadd.bf16 %v7494_v40, %v11638_v63  ;;  %v3144_v57 = vadd.bf16 %v3128_v2, %v3088_v60  ;;  %v3599_v38 = vadd.bf16 %v3583_v59, %v3544_v31  ;;  %v14910_v33 = vld [vmem:[#allocation131_spill] sm:$0xff]  ;;  %v14911_v63 = vld [vmem:[#allocation213_spill] sm:$0xff]  ;;  %v14913_v2 = vld [vmem:[#allocation132_spill] sm:$0xff] }
 0x41b   : > { %v4331_v36 = vmul.bf16 %v14906_v47, %v14798_v19  ;;  %v2356_v17 = vadd.bf16 %v2340_v22, %v1818_v44  ;;  %v4367_v15 = vmul.bf16 %v14909_v0, %v14908_v6  ;;  %v4419_v11 = vmul.bf16 %v14910_v33, %v14802_v54  ;;  %v14912_v59 = vld [vmem:[#allocation91_spill] sm:$0xff]  ;;  %v14914_v19 = vld [vmem:[#allocation28_spill] sm:$0xff]  ;;  %v14917_v31 = vld [vmem:[#allocation170_spill] sm:$0xff] }
 0x41c   : > { %v11783_v26 = vsel %vm1015_vm0, %v4146_v62, %v4154_v20  ;;  %8257 = vmatprep.mubr.bf16.mxu1 %v7510_v5  ;;  %v3201_v4 = vadd.bf16 %v3185_v42, %v3144_v57  ;;  %v3653_v55 = vadd.bf16 %v3637_v30, %v3599_v38  ;;  %v4471_v9 = vmul.bf16 %v14911_v63, %v14804_v8  ;;  %v14915_v62 = vld [vmem:[#allocation89_spill] sm:$0xff]  ;;  %v14916_v20 = vld [vmem:[#allocation215_spill] sm:$0xff]  ;;  %v14920_v38 = vld [vmem:[#allocation180_spill] sm:$0xff] }
 0x41d   : > { %14907 = vst [vmem:[#allocation60_spill] sm:$0xff] %v11783_v26  ;;  %v4523_v40 = vmul.bf16 %v14913_v2, %v14912_v59  ;;  %v2379_v44 = vadd.bf16 %v14914_v19, %v2356_v17  ;;  %v4383_v22 = vadd.bf16 %v4367_v15, %v4331_v36  ;;  %v4575_v60 = vmul.bf16 %v14916_v20, %v14915_v62  ;;  %v14918_v5 = vld [vmem:[#allocation181_spill] sm:$0xff]  ;;  %v14923_v63 = vld [vmem:[#allocation43_spill] sm:$0xff]  ;;  %v14925_v15 = vld [vmem:[#allocation48_spill] sm:$0xff] }
 0x41e   : > { %v4627_v0 = vmul.bf16 %v14917_v31, %v11783_v26  ;;  %v3257_v47 = vadd.bf16 %v3241_v7, %v3201_v4  ;;  %v3708_v33 = vadd.bf16 %v3692_v27, %v3653_v55  ;;  %v14919_v57 = vrot.slane %v14918_v5, 4  ;;  %v14924_v2 = vld [vmem:[#allocation221_spill] sm:$0xff]  ;;  %v14926_v20 = vld [vmem:[#allocation171_spill] sm:$0xff]  ;;  %v14927_v8 = vld [vmem:[#allocation46_spill] sm:$0xff] }
 0x41f   : > { %v14921_v42 = vrot.slane %v14920_v38, 4  ;;  %v4893_v59 = vmul.bf16 %v14924_v2, %v14923_v63  ;;  %v2395_v36 = vmax.bf16 %v14218_v23, %v2379_v44  ;;  %v4435_v17 = vadd.bf16 %v4419_v11, %v4383_v22  ;;  %v14928_v31 = vld [vmem:[#allocation223_spill] sm:$0xff]  ;;  %v14930_v55 = vld [vmem:[#allocation174_spill] sm:$0xff]  ;;  %v14931_v38 = vld [vmem:[#allocation92_spill] sm:$0xff] }
 0x420   : > { %v4929_v62 = vmul.bf16 %v14926_v20, %v14925_v15  ;;  %v4981_v7 = vmul.bf16 %v14928_v31, %v14927_v8  ;;  %v3762_v27 = vadd.bf16 %v3746_v61, %v3708_v33  ;;  %v14929_v4 = vld [vmem:[#allocation87_spill] sm:$0xff]  ;;  %v14932_v26 = vld [vmem:[#allocation224_spill] sm:$0xff]  ;;  %v14935_v22 = vld [vmem:[#allocation225_spill] sm:$0xff] }
 0x421   : > { %v11803_v30 = vsel %vm1578_vm1, %v14921_v42, %v14919_v57  ;;  %v5033_v5 = vmul.bf16 %v14930_v55, %v14929_v4  ;;  %v5085_v57 = vmul.bf16 %v14932_v26, %v14931_v38  ;;  %v14933_v42 = vld [vmem:[#allocation218_spill] sm:$0xff]  ;;  %v14934_v19 = vld [vmem:[#allocation175_spill] sm:$0xff]  ;;  %v11819_v63 = vmin.bf16 %v14114_v50, %v2395_v36 }
 0x422   : > { %14922 = vst [vmem:[#allocation61_spill] sm:$0xff] %v11803_v30  ;;  %v5137_v54 = vmul.bf16 %v14934_v19, %v14933_v42  ;;  %v4487_v11 = vadd.bf16 %v4471_v9, %v4435_v17  ;;  %v4945_v44 = vadd.bf16 %v4929_v62, %v4893_v59  ;;  %v5189_v20 = vmul.bf16 %v14935_v22, %v11803_v30  ;;  %v14936_v31 = vld [vmem:[#allocation182_spill] sm:$0xff]  ;;  %v14943_v59 = vld [vmem:[#allocation29_spill] sm:$0xff] }
 0x423   : > { %v3817_v2 = vadd.bf16 %v3801_v41, %v3762_v27  ;;  %v14937_v33 = vshrl.u32 %v14936_v31, 16  ;;  %v14938_v55 = vshll.u32 %v14936_v31, 16  ;;  %v14939_v8 = vld [vmem:[#allocation186_spill] sm:$0xff]  ;;  %v5807_v31 = vmul.bf16 %v14834_v10, %v14835_v51 }
 0x424   : > { %v14940_v26 = vshrl.u32 %v14939_v8, 16  ;;  %v4539_v15 = vadd.bf16 %v4523_v40, %v4487_v11  ;;  %v4997_v19 = vadd.bf16 %v4981_v7, %v4945_v44  ;;  %v14941_v36 = vshll.u32 %v14939_v8, 16  ;;  %v14942_v9 = vld [vmem:[#allocation42_spill] sm:$0xff]  ;;  %v14945_v7 = vld [vmem:[#allocation232_spill] sm:$0xff]  ;;  %v14946_v44 = vld [vmem:[#allocation129_spill] sm:$0xff] }
 0x425   : > { %v5530_v61 = vrot.slane %v14937_v33, 4  ;;  %v5533_v4 = vrot.slane %v14938_v55, 5  ;;  %v5719_v62 = vmul.bf16 %v14943_v59, %v14942_v9  ;;  %v6084_v17 = vld [vmem:[#allocation2 + $0xf0] sm:$0xe0]  ;;  %v3833_v22 = vadd.bf16 %v3817_v2, %v3257_v47  ;;  %v6085_v55 = vld [vmem:[#allocation2 + $0xf8] sm:$0x1f] }
 0x426   : > { %v5538_v38 = vrot.slane %v14940_v26, 4  ;;  %v5541_v42 = vrot.slane %v14941_v36, 5  ;;  %v14944_v27 = vld [vmem:[#allocation230_spill] sm:$0xff]  ;;  %v4591_v30 = vadd.bf16 %v4575_v60, %v4539_v15  ;;  %v5049_v26 = vadd.bf16 %v5033_v5, %v4997_v19  ;;  %v14947_v47 = vld [vmem:[#allocation233_spill] sm:$0xff] }
 0x427   : > { %v5534_v41 = vor.u32 %v5533_v4, %v5530_v61  ;;  %v5755_v33 = vmul.bf16 %v14944_v27, %v14833_v3  ;;  %v5859_v8 = vmul.bf16 %v14945_v7, %v14727_v45  ;;  %v5911_v36 = vmul.bf16 %v14946_v44, %v11480_v1  ;;  %v14948_v19 = vld [vmem:[#allocation69_spill] sm:$0xff]  ;;  %v6647_v7 = vld [vmem:[#allocation2 + $0xf0] sm:$0xe0] }
 0x428   : > { %v5542_v40 = vor.u32 %v5541_v42, %v5538_v38  ;;  %v5963_v2 = vmul.bf16 %v14947_v47, %v11663_v49  ;;  %v6188_v4 = vrot.slane %v6084_v17, 5  ;;  %v4643_v61 = vadd.bf16 %v4627_v0, %v4591_v30  ;;  %v14949_v5 = vld [vmem:[#allocation41_spill] sm:$0xff]  ;;  %v14954_v30 = vld [vmem:[#allocation227_spill] sm:$0xff] }
 0x429   : > { %v5771_v11 = vadd.bf16 %v5755_v33, %v5719_v62  ;;  %v5101_v9 = vadd.bf16 %v5085_v57, %v5049_v26  ;;  %v6189_v10 = vrot.slane %v6085_v55, 5  ;;  %v14950_v38 = vld [vmem:[#allocation237_spill] sm:$0xff]  ;;  %v14951_v62 = vld [vmem:[#allocation50_spill] sm:$0xff]  ;;  %v14955_v57 = vld [vmem:[#allocation239_spill] sm:$0xff] }
 0x42a   : > { %v11844_v27 = vsel %vm1861_vm2, %v5534_v41, %v5542_v40  ;;  %v6282_v42 = vmul.bf16 %v14950_v38, %v14949_v5  ;;  %v14952_v33 = vld [vmem:[#allocation30_spill] sm:$0xff]  ;;  %v4659_v1 = vadd.bf16 %v4643_v61, %v3833_v22  ;;  %v6370_v17 = vmul.bf16 %v14955_v57, %v14954_v30  ;;  %v14956_v26 = vld [vmem:[#allocation85_spill] sm:$0xff]  ;;  %v14957_v40 = vld [vmem:[#allocation32_spill] sm:$0xff] }
 0x42b   : > { %v5823_v60 = vadd.bf16 %v5807_v31, %v5771_v11  ;;  %v6015_v15 = vmul.bf16 %v14948_v19, %v11844_v27  ;;  %v6318_v44 = vmul.bf16 %v14952_v33, %v14951_v62  ;;  %v5153_v47 = vadd.bf16 %v5137_v54, %v5101_v9  ;;  %v6648_v41 = vld [vmem:[#allocation2 + $0xf8] sm:$0x3f]  ;;  %v14958_v5 = vld [vmem:[#allocation241_spill] sm:$0xff] }
 0x42c   : > { %v11853_v0 = vsel %vm6142_vm5, %v6188_v4, %v6189_v10  ;;  %v6422_v11 = vmul.bf16 %v14957_v40, %v14956_v26  ;;  %v6474_v19 = vmul.bf16 %v14958_v5, %v11493_v21  ;;  %v14959_v33 = vld [vmem:[#allocation242_spill] sm:$0xff]  ;;  %v6918_v10 = vshrl.u32 %v6647_v7, 16  ;;  %v1003_v21 = vld [vmem:[#allocation2 + $0xe0] sm:$0xf8] }
 0x42d   : > { %14953 = vst [vmem:[#allocation65_spill] sm:$0xff] %v11853_v0  ;;  %v5875_v31 = vadd.bf16 %v5859_v8, %v5823_v60  ;;  %v6334_v55 = vadd.bf16 %v6318_v44, %v6282_v42  ;;  %v5205_v38 = vadd.bf16 %v5189_v20, %v5153_v47  ;;  %v6526_v22 = vmul.bf16 %v14959_v33, %v11672_v58 }
 0x42e   : > { %v6578_v54 = vmul.bf16 %v14851_v53, %v11853_v0  ;;  %v6921_v9 = vshll.u32 %v6647_v7, 16  ;;  %v6926_v57 = vshrl.u32 %v6648_v41, 16  ;;  %v6920_v44 = vrot.slane %v6918_v10, 5  ;;  %v1004_v7 = vld [vmem:[#allocation2 + $0xe8] sm:$0xf] }
 0x42f   : > { %v5927_v4 = vadd.bf16 %v5911_v36, %v5875_v31  ;;  %v6386_v61 = vadd.bf16 %v6370_v17, %v6334_v55  ;;  %v5221_v8 = vadd.bf16 %v5205_v38, %v4659_v1  ;;  %v6929_v60 = vshll.u32 %v6648_v41, 16  ;;  %v14960_v31 = vld [vmem:[#allocation93_spill] sm:$0xff] }
 0x430   : > { %v7109_v42 = vmul.bf16 %v14631_v32, %v14524_v46  ;;  %v6923_v20 = vrot.slane %v6921_v9, 6  ;;  %v6928_v47 = vrot.slane %v6926_v57, 5  ;;  %v7145_v53 = vmul.bf16 %v14633_v48, %v14526_v37  ;;  %v14961_v55 = vld [vmem:[#allocation249_spill] sm:$0xff] }
 0x431   : > { %v5979_v40 = vadd.bf16 %v5963_v2, %v5927_v4  ;;  %v6438_v5 = vadd.bf16 %v6422_v11, %v6386_v61  ;;  %v6931_v33 = vrot.slane %v6929_v60, 6  ;;  %v7197_v36 = vmul.bf16 %v14743_v29, %v11154_v35 }
 0x432   : > { %v7249_v1 = vmul.bf16 %v14744_v52, %v11335_v39  ;;  %v6924_v41 = vor.u32 %v6923_v20, %v6920_v44  ;;  %v7301_v46 = vmul.bf16 %v14745_v34, %v11516_v18  ;;  %v7161_v57 = vadd.bf16 %v7145_v53, %v7109_v42 }
 0x433   : > { %v6031_v38 = vadd.bf16 %v6015_v15, %v5979_v40  ;;  %v6490_v17 = vadd.bf16 %v6474_v19, %v6438_v5  ;;  %v6932_v2 = vor.u32 %v6931_v33, %v6928_v47  ;;  %v7353_v11 = vmul.bf16 %v14961_v55, %v14960_v31  ;;  %v1530_v40 = vld [vmem:[#allocation2 + $0xe0] sm:$0xf0]  ;;  %v1531_v5 = vld [vmem:[#allocation2 + $0xe8] sm:$0xf]  ;;  %v14963_v33 = vld [vmem:[#allocation251_spill] sm:$0xff] }
 0x434   : > { %v1221_v10 = vshrl.u32 %v1003_v21, 16  ;;  %v1224_v9 = vshll.u32 %v1003_v21, 16  ;;  %v1229_v60 = vshrl.u32 %v1004_v7, 16  ;;  %v7213_v52 = vadd.bf16 %v7197_v36, %v7161_v57 }
 0x435   : > { %v6047_v4 = vadd.bf16 %v6031_v38, %v5221_v8  ;;  %v6542_v61 = vadd.bf16 %v6526_v22, %v6490_v17  ;;  %v11878_v29 = vsel %vm6661_vm6, %v6924_v41, %v6932_v2  ;;  %v1232_v19 = vshll.u32 %v1004_v7, 16  ;;  %v14964_v22 = vld [vmem:[#allocation23_spill] sm:$0xff]  ;;  %v1849_v38 = vld [vmem:[#allocation2 + $0xe0] sm:$0xf0]  ;;  %v1850_v2 = vld [vmem:[#allocation2 + $0xe8] sm:$0x1f] }
 0x436   : > { %14962 = vst [vmem:[#allocation73_spill] sm:$0xff] %v11878_v29  ;;  %v1223_v15 = vrot.slane %v1221_v10, 3  ;;  %v7408_v53 = vmul.bf16 %v14963_v33, %v11878_v29  ;;  %v1226_v42 = vrot.slane %v1224_v9, 4  ;;  %v1231_v20 = vrot.slane %v1229_v60, 3 }
 0x437   : > { %v6594_v44 = vadd.bf16 %v6578_v54, %v6542_v61  ;;  %v7265_v47 = vadd.bf16 %v7249_v1, %v7213_v52  ;;  %v1234_v55 = vrot.slane %v1232_v19, 4  ;;  %v1391_v21 = vmul.bf16 %v14855_v16, %v11532_v13  ;;  %v14965_v61 = vld [vmem:[#allocation19_spill] sm:$0xff]  ;;  %v14967_v1 = vld [vmem:[#allocation96_spill] sm:$0xff] }
 0x438   : > { %v1431_v8 = vmul.bf16 %v14964_v22, %v11713_v14  ;;  %v1227_v17 = vor.u32 %v1226_v42, %v1223_v15  ;;  %v1615_v7 = vrot.slane %v1530_v40, 4  ;;  %v1616_v41 = vrot.slane %v1531_v5, 4  ;;  %v14968_v13 = vld [vmem:[#allocation20_spill] sm:$0xff]  ;;  %v14969_v15 = vld [vmem:[#allocation21_spill] sm:$0xff] }
 0x439   : > { %v6610_v36 = vadd.bf16 %v6594_v44, %v6047_v4  ;;  %v7317_v54 = vadd.bf16 %v7301_v46, %v7265_v47  ;;  %v1235_v57 = vor.u32 %v1234_v55, %v1231_v20  ;;  %v1699_v9 = vmul.bf16 %v14965_v61, %v14857_v43  ;;  %v14970_v40 = vld [vmem:[#allocation24_spill] sm:$0xff]  ;;  %v14975_v61 = vld [vmem:[#allocation165_spill] sm:$0xff] }
 0x43a   : > { %v1447_v10 = vadd.bf16 %v1431_v8, %v1391_v21  ;;  %v11889_v52 = vsel %vm1578_vm1, %v1615_v7, %v1616_v41  ;;  %v1735_v60 = vmul.bf16 %v14968_v13, %v14967_v1  ;;  %v2067_v19 = vshrl.u32 %v1849_v38, 16  ;;  %v14971_v8 = vld [vmem:[#allocation90_spill] sm:$0xff]  ;;  %v14972_v7 = vld [vmem:[#allocation25_spill] sm:$0xff] }
 0x43b   : > { %14966 = vst [vmem:[#allocation72_spill] sm:$0xff] %v11889_v52  ;;  %v2070_v22 = vshll.u32 %v1849_v38, 16  ;;  %v7369_v16 = vadd.bf16 %v7353_v11, %v7317_v54  ;;  %v11894_v4 = vsel %vm1015_vm0, %v1227_v17, %v1235_v57  ;;  %v1787_v46 = vmul.bf16 %v14969_v15, %v11889_v52  ;;  %v14973_v54 = vld [vmem:[#allocation26_spill] sm:$0xff]  ;;  %v14974_v52 = vld [vmem:[#allocation164_spill] sm:$0xff] }
 0x43c   : > { %v2075_v55 = vshrl.u32 %v1850_v2, 16  ;;  %v1484_v5 = vmul.bf16 %v14970_v40, %v11894_v4  ;;  %v1751_v43 = vadd.bf16 %v1735_v60, %v1699_v9  ;;  %v2069_v44 = vrot.slane %v2067_v19, 4  ;;  %v14976_v9 = vld [vmem:[#allocation167_spill] sm:$0xff]  ;;  %v14977_v60 = vld [vmem:[#allocation168_spill] sm:$0xff] }
 0x43d   : > { %v2072_v42 = vrot.slane %v2070_v22, 5  ;;  %v7424_v20 = vadd.bf16 %v7408_v53, %v7369_v16  ;;  %v2078_v21 = vshll.u32 %v1850_v2, 16  ;;  %v2234_v38 = vmul.bf16 %v14972_v7, %v14971_v8  ;;  %v14978_v2 = vld [vmem:[#allocation31_spill] sm:$0xff]  ;;  %v14986_v8 = vld [vmem:[#allocation197_spill] sm:$0xff] }
 0x43e   : > { %v2077_v47 = vrot.slane %v2075_v55, 4  ;;  %v1500_v11 = vadd.bf16 %v1484_v5, %v1447_v10  ;;  %v1803_v41 = vadd.bf16 %v1787_v46, %v1751_v43  ;;  %v2270_v57 = vmul.bf16 %v14973_v54, %v11758_v25  ;;  %v14979_v55 = vld [vmem:[#allocation45_spill] sm:$0xff]  ;;  %v14980_v10 = vld [vmem:[#allocation196_spill] sm:$0xff] }
 0x43f   : > { %v2073_v17 = vor.u32 %v2072_v42, %v2069_v44  ;;  %v7440_v15 = vadd.bf16 %v7424_v20, %v6610_v36  ;;  %v2080_v13 = vrot.slane %v2078_v21, 5  ;;  %v2750_v40 = vor.u32 %v14975_v61, %v14974_v52  ;;  %v14981_v5 = vld [vmem:[#allocation252_spill] sm:$0xff]  ;;  %v14983_v42 = vld [vmem:[#allocation37_spill] sm:$0xff] }
 0x440   : > { %v2758_v22 = vor.u32 %v14977_v60, %v14976_v9  ;;  %v1819_v16 = vadd.bf16 %v1803_v41, %v1500_v11  ;;  %v2286_v53 = vadd.bf16 %v2270_v57, %v2234_v38  ;;  %v2922_v19 = vmul.bf16 %v14978_v2, %v14875_v28  ;;  %v14984_v20 = vld [vmem:[#allocation33_spill] sm:$0xff]  ;;  %v14985_v21 = vld [vmem:[#allocation84_spill] sm:$0xff]  ;;  %v14987_v38 = vld [vmem:[#allocation34_spill] sm:$0xff] }
 0x441   : > { %v2961_v46 = vmul.bf16 %v14980_v10, %v14979_v55  ;;  %v7463_v43 = vadd.bf16 %v14981_v5, %v7440_v15  ;;  %v2081_v44 = vor.u32 %v2080_v13, %v2077_v47  ;;  %v3016_v61 = vmul.bf16 %v14984_v20, %v14983_v42  ;;  %v14988_v41 = vld [vmem:[#allocation36_spill] sm:$0xff]  ;;  %v14989_v28 = vld [vmem:[#allocation235_spill] sm:$0xff]  ;;  %v14990_v9 = vld [vmem:[#allocation198_spill] sm:$0xff] }
 0x442   : > { %v11914_v36 = vsel %vm2470_vm3, %v2750_v40, %v2758_v22  ;;  %v3073_v11 = vmul.bf16 %v14986_v8, %v14985_v21  ;;  %v3129_v57 = vmul.bf16 %v14988_v41, %v14987_v38  ;;  %v3186_v60 = vmul.bf16 %v14990_v9, %v14989_v28  ;;  %v14992_v15 = vld [vmem:[#allocation83_spill] sm:$0xff]  ;;  %v14993_v47 = vld [vmem:[#allocation162_spill] sm:$0xff]  ;;  %v15000_v28 = vld [vmem:[#allocation204_spill] sm:$0xff] }
 0x443   : > { %14982 = vst [vmem:[#allocation71_spill] sm:$0xff] %v11914_v36  ;;  %v2977_v52 = vadd.bf16 %v2961_v46, %v2922_v19  ;;  %v7479_v10 = vmax.bf16 %v14218_v23, %v7463_v43  ;;  %v11926_v13 = vsel %vm1861_vm2, %v2073_v17, %v2081_v44  ;;  %v3242_v40 = vmul.bf16 %v14992_v15, %v11914_v36  ;;  %v14995_v19 = vld [vmem:[#allocation161_spill] sm:$0xff]  ;;  %v14998_v41 = vld [vmem:[#allocation27_spill] sm:$0xff]  ;;  %v14999_v9 = vld [vmem:[#allocation38_spill] sm:$0xff] }
 0x444   : > { %14991 = vst [vmem:[#allocation70_spill] sm:$0xff] %v11926_v13  ;;  %v14994_v22 = vrot.slane %v14993_v47, 3  ;;  %v14996_v46 = vrot.slane %v14995_v19, 3  ;;  %v2325_v38 = vmul.bf16 %v14998_v41, %v11926_v13  ;;  %v3493_v43 = vmul.bf16 %v15000_v28, %v14999_v9  ;;  %v15001_v21 = vld [vmem:[#allocation44_spill] sm:$0xff]  ;;  %v15002_v17 = vld [vmem:[#allocation98_spill] sm:$0xff]  ;;  %v15003_v15 = vld [vmem:[#allocation57_spill] sm:$0xff] }
 0x445   : > { %v3032_v20 = vadd.bf16 %v3016_v61, %v2977_v52  ;;  %v3529_v44 = vmul.bf16 %v15002_v17, %v15001_v21  ;;  %v7495_v42 = vmin.bf16 %v14114_v50, %v7479_v10  ;;  %v15004_v36 = vld [vmem:[#allocation206_spill] sm:$0xff]  ;;  %v15005_v2 = vld [vmem:[#allocation201_spill] sm:$0xff]  ;;  %v3747_v52 = vmul.bf16 %v14900_v12, %v11752_v56  ;;  %v15008_v17 = vld [vmem:[#allocation208_spill] sm:$0xff] }
 0x446   : > { %v11935_v8 = vsel %vm3352_vm4, %v14996_v46, %v14994_v22  ;;  %v3584_v47 = vmul.bf16 %v15004_v36, %v15003_v15  ;;  %v15006_v19 = vld [vmem:[#allocation114_spill] sm:$0xff]  ;;  %v15007_v22 = vld [vmem:[#allocation207_spill] sm:$0xff]  ;;  %v2341_v5 = vadd.bf16 %v2325_v38, %v2286_v53  ;;  %v15012_v53 = vld [vmem:[#allocation169_spill] sm:$0xff] }
 0x447   : > { %14997 = vst [vmem:[#allocation193_spill] sm:$0xff] %v11935_v8  ;;  %v3638_v55 = vmul.bf16 %v15006_v19, %v15005_v2  ;;  %v3693_v46 = vmul.bf16 %v15007_v22, %v11572_v24  ;;  %v3089_v41 = vadd.bf16 %v3073_v11, %v3032_v20  ;;  %v3545_v61 = vadd.bf16 %v3529_v44, %v3493_v43  ;;  %v15009_v28 = vld [vmem:[#allocation166_spill] sm:$0xff]  ;;  %v15017_v12 = vld [vmem:[#allocation35_spill] sm:$0xff]  ;;  %v15024_v56 = vld [vmem:[#allocation132_spill] sm:$0xff] }
 0x448   : > { %v7511_v9 = vadd.bf16 %v7495_v42, %v11819_v63  ;;  %v3802_v10 = vmul.bf16 %v15008_v17, %v11935_v8  ;;  %v15010_v21 = vshrl.u32 %v15009_v28, 16  ;;  %v15011_v15 = vshll.u32 %v15009_v28, 16  ;;  %v15015_v42 = vld [vmem:[#allocation130_spill] sm:$0xff]  ;;  %v15016_v17 = vld [vmem:[#allocation217_spill] sm:$0xff]  ;;  %v15018_v8 = vld [vmem:[#allocation28_spill] sm:$0xff] }
 0x449   : > { %v2357_v2 = vadd.bf16 %v2341_v5, %v1819_v16  ;;  %v3145_v54 = vadd.bf16 %v3129_v57, %v3089_v41  ;;  %v3600_v22 = vadd.bf16 %v3584_v47, %v3545_v61  ;;  %v15013_v20 = vshrl.u32 %v15012_v53, 16  ;;  %v15019_v5 = vld [vmem:[#allocation88_spill] sm:$0xff]  ;;  %v15020_v41 = vld [vmem:[#allocation131_spill] sm:$0xff] }
 0x44a   : > { %v4159_v36 = vrot.slane %v15010_v21, 3  ;;  %v4162_v19 = vrot.slane %v15011_v15, 4  ;;  %8258 = vmatmul.mubr.bf16.gmra.mrb[16].mxu1 %v7511_v9  ;;  %v15014_v43 = vshll.u32 %v15012_v53, 16  ;;  %v4332_v44 = vmul.bf16 %v15015_v42, %v14908_v6  ;;  %v4698_v47 = vld [vmem:[#allocation2 + $0x100] sm:$0xf0]  ;;  %v15022_v53 = vld [vmem:[#allocation213_spill] sm:$0xff] }
 0x44b   : > { %v4167_v11 = vrot.slane %v15013_v20, 3  ;;  %v4368_v21 = vmul.bf16 %v15017_v12, %v15016_v17  ;;  %v2380_v28 = vadd.bf16 %v15018_v8, %v2357_v2  ;;  %v3202_v15 = vadd.bf16 %v3186_v60, %v3145_v54  ;;  %v4699_v61 = vld [vmem:[#allocation2 + $0x108] sm:$0xf]  ;;  %v15026_v54 = vld [vmem:[#allocation215_spill] sm:$0xff] }
 0x44c   : > { %v4163_v38 = vor.u32 %v4162_v19, %v4159_v36  ;;  %v4170_v63 = vrot.slane %v15014_v43, 4  ;;  %v3654_v16 = vadd.bf16 %v3638_v55, %v3600_v22  ;;  %v4420_v57 = vmul.bf16 %v15020_v41, %v15019_v5  ;;  %v15021_v19 = vld [vmem:[#allocation91_spill] sm:$0xff]  ;;  %v15023_v43 = vld [vmem:[#allocation89_spill] sm:$0xff]  ;;  %v15025_v2 = vld [vmem:[#allocation60_spill] sm:$0xff] }
 0x44d   : > { %v4384_v36 = vadd.bf16 %v4368_v21, %v4332_v44  ;;  %v4472_v20 = vmul.bf16 %v15022_v53, %v15021_v19  ;;  %v4524_v6 = vmul.bf16 %v15024_v56, %v15023_v43  ;;  %v2396_v42 = vmax.bf16 %v14218_v23, %v2380_v28  ;;  %v15028_v21 = vld [vmem:[#allocation170_spill] sm:$0xff]  ;;  %v15029_v53 = vld [vmem:[#allocation48_spill] sm:$0xff]  ;;  %v15030_v28 = vld [vmem:[#allocation221_spill] sm:$0xff] }
 0x44e   : > { %v4171_v9 = vor.u32 %v4170_v63, %v4167_v11  ;;  %v3258_v12 = vadd.bf16 %v3242_v40, %v3202_v15  ;;  %v3709_v17 = vadd.bf16 %v3693_v46, %v3654_v16  ;;  %v4576_v55 = vmul.bf16 %v15026_v54, %v15025_v2  ;;  %v5260_v46 = vld [vmem:[#allocation2 + $0x100] sm:$0xf0] }
 0x44f   : > { %v4436_v22 = vadd.bf16 %v4420_v57, %v4384_v36  ;;  %v4802_v41 = vrot.slane %v4698_v47, 4  ;;  %v4803_v11 = vrot.slane %v4699_v61, 4  ;;  %v11981_v63 = vmin.bf16 %v14114_v50, %v2396_v42  ;;  %v15034_v47 = vld [vmem:[#allocation87_spill] sm:$0xff]  ;;  %v5261_v42 = vld [vmem:[#allocation2 + $0x108] sm:$0x1f] }
 0x450   : > { %v11978_v60 = vsel %vm1015_vm0, %v4163_v38, %v4171_v9  ;;  %v3763_v44 = vadd.bf16 %v3747_v52, %v3709_v17  ;;  %v4894_v40 = vmul.bf16 %v15030_v28, %v15029_v53  ;;  %v15032_v38 = vld [vmem:[#allocation46_spill] sm:$0xff]  ;;  %v15033_v9 = vld [vmem:[#allocation171_spill] sm:$0xff]  ;;  %v15036_v17 = vld [vmem:[#allocation92_spill] sm:$0xff]  ;;  %v5548_v5 = vshll.u32 %v5260_v46, 16 }
 0x451   : > { %15027 = vst [vmem:[#allocation67_spill] sm:$0xff] %v11978_v60  ;;  %v4628_v56 = vmul.bf16 %v15028_v21, %v11978_v60  ;;  %v4488_v15 = vadd.bf16 %v4472_v20, %v4436_v22  ;;  %v11988_v16 = vsel %vm1578_vm1, %v4802_v41, %v4803_v11  ;;  %v4930_v57 = vmul.bf16 %v15033_v9, %v15032_v38  ;;  %v15035_v61 = vld [vmem:[#allocation223_spill] sm:$0xff]  ;;  %v15037_v52 = vld [vmem:[#allocation174_spill] sm:$0xff]  ;;  %v15039_v60 = vld [vmem:[#allocation224_spill] sm:$0xff] }
 0x452   : > { %15031 = vst [vmem:[#allocation66_spill] sm:$0xff] %v11988_v16  ;;  %v4982_v36 = vmul.bf16 %v15035_v61, %v15034_v47  ;;  %v3818_v54 = vadd.bf16 %v3802_v10, %v3763_v44  ;;  %v5034_v2 = vmul.bf16 %v15037_v52, %v15036_v17  ;;  %v15038_v21 = vld [vmem:[#allocation218_spill] sm:$0xff]  ;;  %v15040_v53 = vld [vmem:[#allocation61_spill] sm:$0xff]  ;;  %v15041_v28 = vld [vmem:[#allocation175_spill] sm:$0xff]  ;;  %v5545_v9 = vshrl.u32 %v5260_v46, 16 }
 0x453   : > { %v5086_v43 = vmul.bf16 %v15039_v60, %v15038_v21  ;;  %v5138_v20 = vmul.bf16 %v15041_v28, %v15040_v53  ;;  %v4540_v22 = vadd.bf16 %v4524_v6, %v4488_v15  ;;  %v4946_v41 = vadd.bf16 %v4930_v57, %v4894_v40  ;;  %v15042_v11 = vld [vmem:[#allocation225_spill] sm:$0xff]  ;;  %v15043_v6 = vld [vmem:[#allocation230_spill] sm:$0xff]  ;;  %v6086_v15 = vld [vmem:[#allocation2 + $0x100] sm:$0xe0] }
 0x454   : > { %v5190_v19 = vmul.bf16 %v15042_v11, %v11988_v16  ;;  %v3834_v38 = vadd.bf16 %v3818_v54, %v3258_v12  ;;  %v5553_v61 = vshrl.u32 %v5261_v42, 16  ;;  %v5556_v47 = vshll.u32 %v5261_v42, 16  ;;  %v15044_v12 = vld [vmem:[#allocation106_spill] sm:$0xff]  ;;  %v15046_v42 = vld [vmem:[#allocation232_spill] sm:$0xff] }
 0x455   : > { %v4592_v10 = vadd.bf16 %v4576_v55, %v4540_v22  ;;  %v4998_v44 = vadd.bf16 %v4982_v36, %v4946_v41  ;;  %v5547_v8 = vrot.slane %v5545_v9, 4  ;;  %v5720_v52 = vmul.bf16 %v14943_v59, %v14833_v3  ;;  %v15045_v46 = vld [vmem:[#allocation94_spill] sm:$0xff]  ;;  %v6087_v36 = vld [vmem:[#allocation2 + $0x108] sm:$0x1f] }
 0x456   : > { %v5550_v60 = vrot.slane %v5548_v5, 5  ;;  %v5555_v21 = vrot.slane %v5553_v61, 4  ;;  %v5558_v17 = vrot.slane %v5556_v47, 5  ;;  %v5756_v40 = vmul.bf16 %v15043_v6, %v14835_v51  ;;  %v15047_v3 = vld [vmem:[#allocation129_spill] sm:$0xff] }
 0x457   : > { %v4644_v57 = vadd.bf16 %v4628_v56, %v4592_v10  ;;  %v5050_v11 = vadd.bf16 %v5034_v2, %v4998_v44  ;;  %v5808_v54 = vmul.bf16 %v15044_v12, %v14727_v45  ;;  %v5860_v55 = vmul.bf16 %v15046_v42, %v15045_v46  ;;  %v15048_v6 = vld [vmem:[#allocation233_spill] sm:$0xff] }
 0x458   : > { %v5551_v9 = vor.u32 %v5550_v60, %v5547_v8  ;;  %v5559_v22 = vor.u32 %v5558_v17, %v5555_v21  ;;  %v5772_v41 = vadd.bf16 %v5756_v40, %v5720_v52  ;;  %v5912_v5 = vmul.bf16 %v15047_v3, %v11663_v49  ;;  %v15049_v42 = vld [vmem:[#allocation237_spill] sm:$0xff]  ;;  %v15051_v17 = vld [vmem:[#allocation30_spill] sm:$0xff] }
 0x459   : > { %v4660_v47 = vadd.bf16 %v4644_v57, %v3834_v38  ;;  %v5102_v61 = vadd.bf16 %v5086_v43, %v5050_v11  ;;  %v5964_v59 = vmul.bf16 %v15048_v6, %v11844_v27  ;;  %v6191_v56 = vrot.slane %v6086_v15, 5  ;;  %v15050_v60 = vld [vmem:[#allocation69_spill] sm:$0xff]  ;;  %v15052_v43 = vld [vmem:[#allocation239_spill] sm:$0xff]  ;;  %v6649_v11 = vld [vmem:[#allocation2 + $0x100] sm:$0xe0] }
 0x45a   : > { %v12015_v2 = vsel %vm1861_vm2, %v5551_v9, %v5559_v22  ;;  %v5824_v10 = vadd.bf16 %v5808_v54, %v5772_v41  ;;  %v6192_v44 = vrot.slane %v6087_v36, 5  ;;  %v6283_v12 = vmul.bf16 %v15049_v42, %v14951_v62  ;;  %v6650_v40 = vld [vmem:[#allocation2 + $0x108] sm:$0x3f]  ;;  %v15054_v54 = vld [vmem:[#allocation95_spill] sm:$0xff] }
 0x45b   : > { %v5154_v8 = vadd.bf16 %v5138_v20, %v5102_v61  ;;  %v6016_v21 = vmul.bf16 %v15050_v60, %v12015_v2  ;;  %v6319_v38 = vmul.bf16 %v15051_v17, %v14954_v30  ;;  %v6371_v52 = vmul.bf16 %v15052_v43, %v14956_v26  ;;  %v15055_v36 = vld [vmem:[#allocation32_spill] sm:$0xff]  ;;  %v15056_v62 = vld [vmem:[#allocation241_spill] sm:$0xff]  ;;  %v15057_v61 = vld [vmem:[#allocation242_spill] sm:$0xff] }
 0x45c   : > { %v5876_v15 = vadd.bf16 %v5860_v55, %v5824_v10  ;;  %v12026_v57 = vsel %vm6142_vm5, %v6191_v56, %v6192_v44  ;;  %v6423_v9 = vmul.bf16 %v15055_v36, %v15054_v54  ;;  %v6475_v20 = vmul.bf16 %v15056_v62, %v11672_v58  ;;  %v15058_v60 = vld [vmem:[#allocation243_spill] sm:$0xff] }
 0x45d   : > { %15053 = vst [vmem:[#allocation203_spill] sm:$0xff] %v12026_v57  ;;  %v5206_v22 = vadd.bf16 %v5190_v19, %v5154_v8  ;;  %v6335_v41 = vadd.bf16 %v6319_v38, %v6283_v12  ;;  %v6527_v17 = vmul.bf16 %v15057_v61, %v11853_v0  ;;  %v6579_v43 = vmul.bf16 %v15058_v60, %v12026_v57  ;;  %v1006_v60 = vld [vmem:[#allocation2 + $0xf8] sm:$0xf] }
 0x45e   : > { %v5928_v26 = vadd.bf16 %v5912_v5, %v5876_v15  ;;  %v6935_v42 = vshrl.u32 %v6649_v11, 16  ;;  %v6938_v55 = vshll.u32 %v6649_v11, 16  ;;  %v6943_v10 = vshrl.u32 %v6650_v40, 16  ;;  %v15059_v5 = vld [vmem:[#allocation246_spill] sm:$0xff] }
 0x45f   : > { %v5222_v56 = vadd.bf16 %v5206_v22, %v4660_v47  ;;  %v6387_v44 = vadd.bf16 %v6371_v52, %v6335_v41  ;;  %v6946_v30 = vshll.u32 %v6650_v40, 16  ;;  %v7110_v36 = vmul.bf16 %v14631_v32, %v14526_v37  ;;  %v1005_v11 = vld [vmem:[#allocation2 + $0xf0] sm:$0xf8]  ;;  %v15060_v40 = vld [vmem:[#allocation247_spill] sm:$0xff] }
 0x460   : > { %v5980_v54 = vadd.bf16 %v5964_v59, %v5928_v26  ;;  %v6937_v62 = vrot.slane %v6935_v42, 5  ;;  %v6940_v19 = vrot.slane %v6938_v55, 6  ;;  %v6945_v12 = vrot.slane %v6943_v10, 5 }
 0x461   : > { %v6439_v8 = vadd.bf16 %v6423_v9, %v6387_v44  ;;  %v6948_v38 = vrot.slane %v6946_v30, 6  ;;  %v7146_v61 = vmul.bf16 %v14633_v48, %v11154_v35  ;;  %v7198_v15 = vmul.bf16 %v15059_v5, %v11335_v39  ;;  %v15061_v30 = vld [vmem:[#allocation249_spill] sm:$0xff] }
 0x462   : > { %v6032_v47 = vadd.bf16 %v6016_v21, %v5980_v54  ;;  %v6941_v52 = vor.u32 %v6940_v19, %v6937_v62  ;;  %v7250_v22 = vmul.bf16 %v15060_v40, %v11516_v18  ;;  %v7302_v37 = vmul.bf16 %v14745_v34, %v14960_v31  ;;  %v1532_v19 = vld [vmem:[#allocation2 + $0xf0] sm:$0xf0]  ;;  %v1533_v40 = vld [vmem:[#allocation2 + $0xf8] sm:$0xf] }
 0x463   : > { %v6491_v59 = vadd.bf16 %v6475_v20, %v6439_v8  ;;  %v6949_v26 = vor.u32 %v6948_v38, %v6945_v12  ;;  %v7162_v42 = vadd.bf16 %v7146_v61, %v7110_v36  ;;  %v7354_v9 = vmul.bf16 %v15061_v30, %v11878_v29 }
 0x464   : > { %v6048_v41 = vadd.bf16 %v6032_v47, %v5222_v56  ;;  %v1238_v55 = vshrl.u32 %v1005_v11, 16  ;;  %v1241_v10 = vshll.u32 %v1005_v11, 16  ;;  %v1246_v44 = vshrl.u32 %v1006_v60, 16  ;;  %v15063_v11 = vld [vmem:[#allocation22_spill] sm:$0xff] }
 0x465   : > { %v6543_v5 = vadd.bf16 %v6527_v17, %v6491_v59  ;;  %v12049_v21 = vsel %vm6661_vm6, %v6941_v52, %v6949_v26  ;;  %v7214_v54 = vadd.bf16 %v7198_v15, %v7162_v42  ;;  %v1249_v62 = vshll.u32 %v1006_v60, 16  ;;  %v1851_v17 = vld [vmem:[#allocation2 + $0xf0] sm:$0xf0]  ;;  %v15064_v52 = vld [vmem:[#allocation23_spill] sm:$0xff] }
 0x466   : > { %15062 = vst [vmem:[#allocation76_spill] sm:$0xff] %v12049_v21  ;;  %v7409_v20 = vmul.bf16 %v14963_v33, %v12049_v21  ;;  %v1240_v12 = vrot.slane %v1238_v55, 3  ;;  %v1243_v36 = vrot.slane %v1241_v10, 4  ;;  %v1248_v61 = vrot.slane %v1246_v44, 3  ;;  %v15065_v55 = vld [vmem:[#allocation19_spill] sm:$0xff] }
 0x467   : > { %v6595_v8 = vadd.bf16 %v6579_v43, %v6543_v5  ;;  %v7266_v38 = vadd.bf16 %v7250_v22, %v7214_v54  ;;  %v1251_v56 = vrot.slane %v1249_v62, 4  ;;  %v1392_v47 = vmul.bf16 %v15063_v11, %v11713_v14  ;;  %v1852_v44 = vld [vmem:[#allocation2 + $0xf8] sm:$0x1f]  ;;  %v15067_v22 = vld [vmem:[#allocation72_spill] sm:$0xff] }
 0x468   : > { %v1244_v59 = vor.u32 %v1243_v36, %v1240_v12  ;;  %v1432_v15 = vmul.bf16 %v15064_v52, %v11894_v4  ;;  %v1618_v60 = vrot.slane %v1532_v19, 4  ;;  %v1619_v26 = vrot.slane %v1533_v40, 4  ;;  %v15068_v14 = vld [vmem:[#allocation20_spill] sm:$0xff]  ;;  %v15069_v40 = vld [vmem:[#allocation21_spill] sm:$0xff] }
 0x469   : > { %v6611_v42 = vadd.bf16 %v6595_v8, %v6048_v41  ;;  %v7318_v30 = vadd.bf16 %v7302_v37, %v7266_v38  ;;  %v1252_v34 = vor.u32 %v1251_v56, %v1248_v61  ;;  %v1700_v10 = vmul.bf16 %v15065_v55, %v14967_v1  ;;  %v15070_v19 = vld [vmem:[#allocation24_spill] sm:$0xff] }
 0x46a   : > { %v1448_v43 = vadd.bf16 %v1432_v15, %v1392_v47  ;;  %v12060_v5 = vsel %vm1578_vm1, %v1618_v60, %v1619_v26  ;;  %v1736_v54 = vmul.bf16 %v15068_v14, %v15067_v22  ;;  %v2084_v62 = vshrl.u32 %v1851_v17, 16 }
 0x46b   : > { %15066 = vst [vmem:[#allocation77_spill] sm:$0xff] %v12060_v5  ;;  %v7370_v12 = vadd.bf16 %v7354_v9, %v7318_v30  ;;  %v12065_v36 = vsel %vm1015_vm0, %v1244_v59, %v1252_v34  ;;  %v1788_v37 = vmul.bf16 %v15069_v40, %v12060_v5  ;;  %v2087_v41 = vshll.u32 %v1851_v17, 16  ;;  %v15071_v59 = vld [vmem:[#allocation26_spill] sm:$0xff]  ;;  %v15072_v5 = vld [vmem:[#allocation188_spill] sm:$0xff] }
 0x46c   : > { %v1485_v1 = vmul.bf16 %v15070_v19, %v12065_v36  ;;  %v1752_v61 = vadd.bf16 %v1736_v54, %v1700_v10  ;;  %v2086_v8 = vrot.slane %v2084_v62, 4  ;;  %v2092_v38 = vshrl.u32 %v1852_v44, 16 }
 0x46d   : > { %v7425_v56 = vadd.bf16 %v7409_v20, %v7370_v12  ;;  %v2089_v47 = vrot.slane %v2087_v41, 5  ;;  %v2095_v15 = vshll.u32 %v1852_v44, 16  ;;  %v2235_v60 = vmul.bf16 %v14972_v7, %v11758_v25  ;;  %v15075_v12 = vld [vmem:[#allocation189_spill] sm:$0xff]  ;;  %v3299_v7 = vld [vmem:[#allocation2 + $0x118] sm:$0x7] }
 0x46e   : > { %v1501_v30 = vadd.bf16 %v1485_v1, %v1448_v43  ;;  %v1804_v9 = vadd.bf16 %v1788_v37, %v1752_v61  ;;  %v2094_v34 = vrot.slane %v2092_v38, 4  ;;  %v2271_v26 = vmul.bf16 %v15071_v59, %v11926_v13  ;;  %v15077_v43 = vld [vmem:[#allocation252_spill] sm:$0xff]  ;;  %v15086_v59 = vld [vmem:[#allocation197_spill] sm:$0xff] }
 0x46f   : > { %v7441_v40 = vadd.bf16 %v7425_v56, %v6611_v42  ;;  %v2090_v17 = vor.u32 %v2089_v47, %v2086_v8  ;;  %v2097_v14 = vrot.slane %v2095_v15, 5  ;;  %v15073_v19 = vshrl.u32 %v15072_v5, 16  ;;  %v15079_v42 = vld [vmem:[#allocation45_spill] sm:$0xff]  ;;  %v15080_v8 = vld [vmem:[#allocation31_spill] sm:$0xff]  ;;  %v15108_v13 = vld [vmem:[#allocation28_spill] sm:$0xff] }
 0x470   : > { %v1820_v54 = vadd.bf16 %v1804_v9, %v1501_v30  ;;  %v2287_v62 = vadd.bf16 %v2271_v26, %v2235_v60  ;;  %v15074_v20 = vshll.u32 %v15072_v5, 16  ;;  %v15076_v41 = vshrl.u32 %v15075_v12, 16  ;;  %v3298_v47 = vld [vmem:[#allocation2 + $0x110] sm:$0xf8]  ;;  %v15082_v30 = vld [vmem:[#allocation196_spill] sm:$0xff] }
 0x471   : > { %v2763_v10 = vrot.slane %v15073_v19, 2  ;;  %v7464_v37 = vadd.bf16 %v15077_v43, %v7441_v40  ;;  %v2098_v1 = vor.u32 %v2097_v14, %v2094_v34  ;;  %v15078_v61 = vshll.u32 %v15075_v12, 16  ;;  %v15081_v19 = vld [vmem:[#allocation37_spill] sm:$0xff]  ;;  %v15083_v9 = vld [vmem:[#allocation84_spill] sm:$0xff]  ;;  %v15088_v12 = vld [vmem:[#allocation235_spill] sm:$0xff] }
 0x472   : > { %v2766_v44 = vrot.slane %v15074_v20, 3  ;;  %v2771_v25 = vrot.slane %v15076_v41, 2  ;;  %v2923_v56 = vmul.bf16 %v15080_v8, %v15079_v42  ;;  %v2962_v60 = vmul.bf16 %v15082_v30, %v15081_v19  ;;  %v15084_v5 = vld [vmem:[#allocation33_spill] sm:$0xff]  ;;  %v15085_v20 = vld [vmem:[#allocation34_spill] sm:$0xff]  ;;  %v15091_v8 = vld [vmem:[#allocation71_spill] sm:$0xff] }
 0x473   : > { %v2774_v38 = vrot.slane %v15078_v61, 3  ;;  %v3017_v26 = vmul.bf16 %v15084_v5, %v15083_v9  ;;  %v3074_v41 = vmul.bf16 %v15086_v59, %v15085_v20  ;;  %v7480_v14 = vmax.bf16 %v14218_v23, %v7464_v37  ;;  %v15089_v61 = vld [vmem:[#allocation36_spill] sm:$0xff]  ;;  %v15092_v19 = vld [vmem:[#allocation198_spill] sm:$0xff] }
 0x474   : > { %v2767_v15 = vor.u32 %v2766_v44, %v2763_v10  ;;  %v12094_v40 = vsel %vm1861_vm2, %v2090_v17, %v2098_v1  ;;  %v3130_v42 = vmul.bf16 %v15089_v61, %v15088_v12  ;;  %v15090_v10 = vld [vmem:[#allocation27_spill] sm:$0xff]  ;;  %v2978_v30 = vadd.bf16 %v2962_v60, %v2923_v56  ;;  %v15094_v17 = vld [vmem:[#allocation44_spill] sm:$0xff]  ;;  %v15097_v56 = vld [vmem:[#allocation57_spill] sm:$0xff] }
 0x475   : > { %15087 = vst [vmem:[#allocation79_spill] sm:$0xff] %v12094_v40  ;;  %v2775_v34 = vor.u32 %v2774_v38, %v2771_v25  ;;  %v2326_v44 = vmul.bf16 %v15090_v10, %v12094_v40  ;;  %v3187_v5 = vmul.bf16 %v15092_v19, %v15091_v8  ;;  %v3404_v9 = vrot.slane %v3298_v47, 3  ;;  %v15095_v1 = vld [vmem:[#allocation204_spill] sm:$0xff]  ;;  %v3874_v38 = vld [vmem:[#allocation2 + $0x110] sm:$0xf8]  ;;  %v15096_v12 = vld [vmem:[#allocation83_spill] sm:$0xff] }
 0x476   : > { %v7496_v59 = vmin.bf16 %v14114_v50, %v7480_v14  ;;  %v3405_v37 = vrot.slane %v3299_v7, 3  ;;  %v3494_v25 = vmul.bf16 %v15095_v1, %v15094_v17  ;;  %v3033_v61 = vadd.bf16 %v3017_v26, %v2978_v30  ;;  %v15098_v60 = vld [vmem:[#allocation98_spill] sm:$0xff] }
 0x477   : > { %v12104_v20 = vsel %vm2470_vm3, %v2767_v15, %v2775_v34  ;;  %v2342_v43 = vadd.bf16 %v2326_v44, %v2287_v62  ;;  %v3530_v40 = vmul.bf16 %v15098_v60, %v15097_v56  ;;  %v3875_v19 = vld [vmem:[#allocation2 + $0x118] sm:$0xf]  ;;  %v15100_v15 = vld [vmem:[#allocation201_spill] sm:$0xff]  ;;  %v15106_v56 = vld [vmem:[#allocation163_spill] sm:$0xff] }
 0x478   : > { %15093 = vst [vmem:[#allocation80_spill] sm:$0xff] %v12104_v20  ;;  %v3243_v10 = vmul.bf16 %v15096_v12, %v12104_v20  ;;  %v7512_v47 = vadd.bf16 %v7496_v59, %v11981_v63  ;;  %v12114_v14 = vsel %vm3352_vm4, %v3404_v9, %v3405_v37  ;;  %v15101_v7 = vld [vmem:[#allocation206_spill] sm:$0xff]  ;;  %v3090_v30 = vadd.bf16 %v3074_v41, %v3033_v61  ;;  %v15104_v12 = vld [vmem:[#allocation207_spill] sm:$0xff]  ;;  %v15105_v60 = vld [vmem:[#allocation193_spill] sm:$0xff] }
 0x479   : > { %15099 = vst [vmem:[#allocation212_spill] sm:$0xff] %v12114_v14  ;;  %v3585_v34 = vmul.bf16 %v15101_v7, %v15100_v15  ;;  %v15102_v17 = vld [vmem:[#allocation114_spill] sm:$0xff]  ;;  %v2358_v62 = vadd.bf16 %v2342_v43, %v1820_v54  ;;  %v3546_v26 = vadd.bf16 %v3530_v40, %v3494_v25  ;;  %v3748_v8 = vmul.bf16 %v15106_v56, %v15105_v60  ;;  %v15107_v63 = vld [vmem:[#allocation208_spill] sm:$0xff]  ;;  %v15109_v40 = vld [vmem:[#allocation217_spill] sm:$0xff] }
 0x47a   : > { %v3639_v1 = vmul.bf16 %v15102_v17, %v11572_v24  ;;  %v15103_v44 = vld [vmem:[#allocation62_spill] sm:$0xff]  ;;  %8261 = vmatprep.mubr.bf16.mxu1 %v7512_v47  ;;  %v3803_v59 = vmul.bf16 %v15107_v63, %v12114_v14  ;;  %v4174_v9 = vshrl.u32 %v3874_v38, 16  ;;  %v4177_v37 = vshll.u32 %v3874_v38, 16  ;;  %v15111_v14 = vld [vmem:[#allocation88_spill] sm:$0xff]  ;;  %v15112_v38 = vld [vmem:[#allocation35_spill] sm:$0xff] }
 0x47b   : > { %v3694_v20 = vmul.bf16 %v15104_v12, %v15103_v44  ;;  %v2381_v7 = vadd.bf16 %v15108_v13, %v2358_v62  ;;  %v3146_v15 = vadd.bf16 %v3130_v42, %v3090_v30  ;;  %v3601_v55 = vadd.bf16 %v3585_v34, %v3546_v26  ;;  %v15110_v61 = vld [vmem:[#allocation130_spill] sm:$0xff]  ;;  %v15113_v62 = vld [vmem:[#allocation91_spill] sm:$0xff]  ;;  %v15122_v13 = vld [vmem:[#allocation221_spill] sm:$0xff] }
 0x47c   : > { %v4182_v17 = vshrl.u32 %v3875_v19, 16  ;;  %v4176_v54 = vrot.slane %v4174_v9, 3  ;;  %v4179_v43 = vrot.slane %v4177_v37, 4  ;;  %v4185_v41 = vshll.u32 %v3875_v19, 16  ;;  %v15114_v42 = vld [vmem:[#allocation131_spill] sm:$0xff] }
 0x47d   : > { %v4333_v25 = vmul.bf16 %v15110_v61, %v15109_v40  ;;  %v2397_v47 = vmax.bf16 %v14218_v23, %v2381_v7  ;;  %v3203_v12 = vadd.bf16 %v3187_v5, %v3146_v15  ;;  %v3655_v56 = vadd.bf16 %v3639_v1, %v3601_v55  ;;  %v4700_v30 = vld [vmem:[#allocation2 + $0x110] sm:$0xf0]  ;;  %v4701_v26 = vld [vmem:[#allocation2 + $0x118] sm:$0xf]  ;;  %v15115_v40 = vld [vmem:[#allocation89_spill] sm:$0xff] }
 0x47e   : > { %v4184_v60 = vrot.slane %v4182_v17, 3  ;;  %v4180_v44 = vor.u32 %v4179_v43, %v4176_v54  ;;  %v4187_v63 = vrot.slane %v4185_v41, 4  ;;  %v4369_v24 = vmul.bf16 %v15112_v38, %v15111_v14  ;;  %v15116_v7 = vld [vmem:[#allocation213_spill] sm:$0xff]  ;;  %v15117_v15 = vld [vmem:[#allocation60_spill] sm:$0xff]  ;;  %v15119_v43 = vld [vmem:[#allocation67_spill] sm:$0xff] }
 0x47f   : > { %v4421_v34 = vmul.bf16 %v15114_v42, %v15113_v62  ;;  %v12135_v19 = vmin.bf16 %v14114_v50, %v2397_v47  ;;  %v3259_v9 = vadd.bf16 %v3243_v10, %v3203_v12  ;;  %v3710_v37 = vadd.bf16 %v3694_v20, %v3655_v56  ;;  %v15118_v17 = vld [vmem:[#allocation132_spill] sm:$0xff]  ;;  %v15120_v41 = vld [vmem:[#allocation215_spill] sm:$0xff]  ;;  %v15121_v14 = vld [vmem:[#allocation46_spill] sm:$0xff] }
 0x480   : > { %v4473_v5 = vmul.bf16 %v15116_v7, %v15115_v40  ;;  %v4188_v55 = vor.u32 %v4187_v63, %v4184_v60  ;;  %v4385_v1 = vadd.bf16 %v4369_v24, %v4333_v25  ;;  %v4525_v54 = vmul.bf16 %v15118_v17, %v15117_v15  ;;  %v15124_v10 = vld [vmem:[#allocation87_spill] sm:$0xff]  ;;  %v15126_v24 = vld [vmem:[#allocation92_spill] sm:$0xff]  ;;  %v5262_v17 = vld [vmem:[#allocation2 + $0x110] sm:$0xf0] }
 0x481   : > { %v4577_v38 = vmul.bf16 %v15120_v41, %v15119_v43  ;;  %v3764_v61 = vadd.bf16 %v3748_v8, %v3710_v37  ;;  %v4805_v42 = vrot.slane %v4700_v30, 4  ;;  %v4806_v62 = vrot.slane %v4701_v26, 4  ;;  %v15125_v56 = vld [vmem:[#allocation171_spill] sm:$0xff]  ;;  %v15128_v41 = vld [vmem:[#allocation170_spill] sm:$0xff] }
 0x482   : > { %v4895_v47 = vmul.bf16 %v15122_v13, %v15121_v14  ;;  %v12146_v12 = vsel %vm1015_vm0, %v4180_v44, %v4188_v55  ;;  %v4437_v20 = vadd.bf16 %v4421_v34, %v4385_v1  ;;  %v4931_v60 = vmul.bf16 %v15125_v56, %v15124_v10  ;;  %v15127_v63 = vld [vmem:[#allocation223_spill] sm:$0xff]  ;;  %v15130_v26 = vld [vmem:[#allocation218_spill] sm:$0xff]  ;;  %v15132_v1 = vld [vmem:[#allocation224_spill] sm:$0xff] }
 0x483   : > { %15123 = vst [vmem:[#allocation55_spill] sm:$0xff] %v12146_v12  ;;  %v4983_v25 = vmul.bf16 %v15127_v63, %v15126_v24  ;;  %v3819_v7 = vadd.bf16 %v3803_v59, %v3764_v61  ;;  %v4629_v8 = vmul.bf16 %v15128_v41, %v12146_v12  ;;  %v12155_v30 = vsel %vm1578_vm1, %v4805_v42, %v4806_v62  ;;  %v15131_v14 = vld [vmem:[#allocation174_spill] sm:$0xff]  ;;  %v15133_v59 = vld [vmem:[#allocation225_spill] sm:$0xff] }
 0x484   : > { %15129 = vst [vmem:[#allocation75_spill] sm:$0xff] %v12155_v30  ;;  %v5035_v37 = vmul.bf16 %v15131_v14, %v15130_v26  ;;  %v5263_v44 = vld [vmem:[#allocation2 + $0x118] sm:$0x1f]  ;;  %v4489_v55 = vadd.bf16 %v4473_v5, %v4437_v20  ;;  %v4947_v34 = vadd.bf16 %v4931_v60, %v4895_v47  ;;  %v5087_v56 = vmul.bf16 %v15132_v1, %v15040_v53  ;;  %v15134_v5 = vld [vmem:[#allocation29_spill] sm:$0xff] }
 0x485   : > { %v5139_v63 = vmul.bf16 %v15041_v28, %v11988_v16  ;;  %v3835_v24 = vadd.bf16 %v3819_v7, %v3259_v9  ;;  %v5191_v61 = vmul.bf16 %v15133_v59, %v12155_v30  ;;  %v5562_v41 = vshrl.u32 %v5262_v17, 16  ;;  %v15135_v20 = vld [vmem:[#allocation230_spill] sm:$0xff] }
 0x486   : > { %v5565_v13 = vshll.u32 %v5262_v17, 16  ;;  %v4541_v62 = vadd.bf16 %v4525_v54, %v4489_v55  ;;  %v4999_v42 = vadd.bf16 %v4983_v25, %v4947_v34  ;;  %v5570_v10 = vshrl.u32 %v5263_v44, 16  ;;  %v6088_v16 = vld [vmem:[#allocation2 + $0x110] sm:$0xe0]  ;;  %v6089_v59 = vld [vmem:[#allocation2 + $0x118] sm:$0x1f] }
 0x487   : > { %v5573_v12 = vshll.u32 %v5263_v44, 16  ;;  %v5564_v14 = vrot.slane %v5562_v41, 4  ;;  %v5721_v47 = vmul.bf16 %v15134_v5, %v14835_v51  ;;  %v5757_v60 = vmul.bf16 %v15135_v20, %v14727_v45  ;;  %v15136_v54 = vld [vmem:[#allocation106_spill] sm:$0xff]  ;;  %v15137_v41 = vld [vmem:[#allocation232_spill] sm:$0xff] }
 0x488   : > { %v5567_v26 = vrot.slane %v5565_v13, 5  ;;  %v4593_v1 = vadd.bf16 %v4577_v38, %v4541_v62  ;;  %v5051_v28 = vadd.bf16 %v5035_v37, %v4999_v42  ;;  %v5572_v9 = vrot.slane %v5570_v10, 4  ;;  %v15138_v42 = vld [vmem:[#allocation227_spill] sm:$0xff] }
 0x489   : > { %v5575_v7 = vrot.slane %v5573_v12, 5  ;;  %v5773_v17 = vadd.bf16 %v5757_v60, %v5721_v47  ;;  %v5809_v25 = vmul.bf16 %v15136_v54, %v15045_v46  ;;  %v5861_v13 = vmul.bf16 %v15137_v41, %v11663_v49  ;;  %v15139_v47 = vld [vmem:[#allocation237_spill] sm:$0xff] }
 0x48a   : > { %v5568_v30 = vor.u32 %v5567_v26, %v5564_v14  ;;  %v4645_v44 = vadd.bf16 %v4629_v8, %v4593_v1  ;;  %v5103_v55 = vadd.bf16 %v5087_v56, %v5051_v28  ;;  %v5913_v34 = vmul.bf16 %v15047_v3, %v11844_v27  ;;  %v15140_v28 = vld [vmem:[#allocation69_spill] sm:$0xff] }
 0x48b   : > { %v5576_v51 = vor.u32 %v5575_v7, %v5572_v9  ;;  %v5825_v38 = vadd.bf16 %v5809_v25, %v5773_v17  ;;  %v5965_v12 = vmul.bf16 %v15048_v6, %v12015_v2  ;;  %v6194_v10 = vrot.slane %v6088_v16, 5  ;;  %v15142_v9 = vld [vmem:[#allocation85_spill] sm:$0xff]  ;;  %v15143_v7 = vld [vmem:[#allocation30_spill] sm:$0xff]  ;;  %v15145_v25 = vld [vmem:[#allocation239_spill] sm:$0xff] }
 0x48c   : > { %v6195_v37 = vrot.slane %v6089_v59, 5  ;;  %v4661_v26 = vadd.bf16 %v4645_v44, %v3835_v24  ;;  %v5155_v14 = vadd.bf16 %v5139_v63, %v5103_v55  ;;  %v6284_v60 = vmul.bf16 %v15139_v47, %v15138_v42  ;;  %v6651_v16 = vld [vmem:[#allocation2 + $0x110] sm:$0xe0]  ;;  %v6652_v59 = vld [vmem:[#allocation2 + $0x118] sm:$0x3f]  ;;  %v15146_v44 = vld [vmem:[#allocation32_spill] sm:$0xff] }
 0x48d   : > { %v12178_v62 = vsel %vm1861_vm2, %v5568_v30, %v5576_v51  ;;  %v5877_v8 = vadd.bf16 %v5861_v13, %v5825_v38  ;;  %v6320_v17 = vmul.bf16 %v15143_v7, %v15142_v9  ;;  %v15144_v63 = vld [vmem:[#allocation95_spill] sm:$0xff]  ;;  %v6424_v55 = vmul.bf16 %v15146_v44, %v11672_v58  ;;  %v15147_v13 = vld [vmem:[#allocation241_spill] sm:$0xff] }
 0x48e   : > { %v6017_v56 = vmul.bf16 %v15140_v28, %v12178_v62  ;;  %v12185_v1 = vsel %vm6142_vm5, %v6194_v10, %v6195_v37  ;;  %v5207_v24 = vadd.bf16 %v5191_v61, %v5155_v14  ;;  %v6372_v30 = vmul.bf16 %v15145_v25, %v15144_v63  ;;  %v15148_v10 = vld [vmem:[#allocation242_spill] sm:$0xff]  ;;  %v15149_v28 = vld [vmem:[#allocation243_spill] sm:$0xff] }
 0x48f   : > { %15141 = vst [vmem:[#allocation74_spill] sm:$0xff] %v12185_v1  ;;  %v6476_v51 = vmul.bf16 %v15147_v13, %v11853_v0  ;;  %v5929_v38 = vadd.bf16 %v5913_v34, %v5877_v8  ;;  %v6336_v42 = vadd.bf16 %v6320_v17, %v6284_v60  ;;  %v6528_v37 = vmul.bf16 %v15148_v10, %v12026_v57 }
 0x490   : > { %v6580_v7 = vmul.bf16 %v15149_v28, %v12185_v1  ;;  %v5223_v47 = vadd.bf16 %v5207_v24, %v4661_v26  ;;  %v6952_v9 = vshrl.u32 %v6651_v16, 16  ;;  %v6955_v61 = vshll.u32 %v6651_v16, 16  ;;  %v15150_v26 = vld [vmem:[#allocation246_spill] sm:$0xff]  ;;  %v1007_v16 = vld [vmem:[#allocation2 + $0x100] sm:$0xf8] }
 0x491   : > { %v6960_v14 = vshrl.u32 %v6652_v59, 16  ;;  %v5981_v6 = vadd.bf16 %v5965_v12, %v5929_v38  ;;  %v6388_v25 = vadd.bf16 %v6372_v30, %v6336_v42  ;;  %v6963_v63 = vshll.u32 %v6652_v59, 16  ;;  %v1008_v28 = vld [vmem:[#allocation2 + $0x108] sm:$0xf]  ;;  %v15151_v59 = vld [vmem:[#allocation247_spill] sm:$0xff] }
 0x492   : > { %v7111_v44 = vmul.bf16 %v14631_v32, %v11154_v35  ;;  %v6954_v58 = vrot.slane %v6952_v9, 5  ;;  %v6957_v13 = vrot.slane %v6955_v61, 6  ;;  %v7147_v60 = vmul.bf16 %v14633_v48, %v11335_v39  ;;  %v15152_v35 = vld [vmem:[#allocation248_spill] sm:$0xff] }
 0x493   : > { %v6962_v34 = vrot.slane %v6960_v14, 5  ;;  %v6033_v8 = vadd.bf16 %v6017_v56, %v5981_v6  ;;  %v6440_v17 = vadd.bf16 %v6424_v55, %v6388_v25  ;;  %v6965_v10 = vrot.slane %v6963_v63, 6  ;;  %v15153_v6 = vld [vmem:[#allocation249_spill] sm:$0xff] }
 0x494   : > { %v7199_v24 = vmul.bf16 %v15150_v26, %v11516_v18  ;;  %v6958_v12 = vor.u32 %v6957_v13, %v6954_v58  ;;  %v7163_v30 = vadd.bf16 %v7147_v60, %v7111_v44  ;;  %v7251_v38 = vmul.bf16 %v15151_v59, %v14960_v31  ;;  %v1534_v60 = vld [vmem:[#allocation2 + $0x100] sm:$0xf0] }
 0x495   : > { %v7303_v9 = vmul.bf16 %v15152_v35, %v11878_v29  ;;  %v6049_v42 = vadd.bf16 %v6033_v8, %v5223_v47  ;;  %v6492_v61 = vadd.bf16 %v6476_v51, %v6440_v17  ;;  %v6966_v14 = vor.u32 %v6965_v10, %v6962_v34  ;;  %v1535_v35 = vld [vmem:[#allocation2 + $0x108] sm:$0xf] }
 0x496   : > { %v7355_v56 = vmul.bf16 %v15153_v6, %v12049_v21  ;;  %v7215_v63 = vadd.bf16 %v7199_v24, %v7163_v30  ;;  %v1255_v25 = vshrl.u32 %v1007_v16, 16  ;;  %v1258_v55 = vshll.u32 %v1007_v16, 16  ;;  %v1853_v16 = vld [vmem:[#allocation2 + $0x100] sm:$0xf0] }
 0x497   : > { %v1263_v26 = vshrl.u32 %v1008_v28, 16  ;;  %v6544_v48 = vadd.bf16 %v6528_v37, %v6492_v61  ;;  %v12212_v58 = vsel %vm6661_vm6, %v6958_v12, %v6966_v14  ;;  %v1266_v44 = vshll.u32 %v1008_v28, 16 }
 0x498   : > { %15154 = vst [vmem:[#allocation220_spill] sm:$0xff] %v12212_v58  ;;  %v1393_v13 = vmul.bf16 %v15063_v11, %v11894_v4  ;;  %v7267_v47 = vadd.bf16 %v7251_v38, %v7215_v63  ;;  %v7410_v51 = vmul.bf16 %v14963_v33, %v12212_v58  ;;  %v1257_v10 = vrot.slane %v1255_v25, 3  ;;  %v1854_v4 = vld [vmem:[#allocation2 + $0x108] sm:$0x1f]  ;;  %v15155_v63 = vld [vmem:[#allocation19_spill] sm:$0xff] }
 0x499   : > { %v1260_v34 = vrot.slane %v1258_v55, 4  ;;  %v6596_v8 = vadd.bf16 %v6580_v7, %v6544_v48  ;;  %v1265_v17 = vrot.slane %v1263_v26, 3  ;;  %v1268_v24 = vrot.slane %v1266_v44, 4  ;;  %v15157_v7 = vld [vmem:[#allocation77_spill] sm:$0xff]  ;;  %v15158_v26 = vld [vmem:[#allocation20_spill] sm:$0xff] }
 0x49a   : > { %v1433_v37 = vmul.bf16 %v15064_v52, %v12065_v36  ;;  %v7319_v12 = vadd.bf16 %v7303_v9, %v7267_v47  ;;  %v1621_v30 = vrot.slane %v1534_v60, 4  ;;  %v1622_v61 = vrot.slane %v1535_v35, 4  ;;  %v15160_v35 = vld [vmem:[#allocation21_spill] sm:$0xff] }
 0x49b   : > { %v1261_v28 = vor.u32 %v1260_v34, %v1257_v10  ;;  %v6612_v14 = vadd.bf16 %v6596_v8, %v6049_v42  ;;  %v1269_v11 = vor.u32 %v1268_v24, %v1265_v17  ;;  %v1701_v33 = vmul.bf16 %v15155_v63, %v15067_v22  ;;  %v15161_v10 = vld [vmem:[#allocation24_spill] sm:$0xff] }
 0x49c   : > { %v1449_v38 = vadd.bf16 %v1433_v37, %v1393_v13  ;;  %v7371_v25 = vadd.bf16 %v7355_v56, %v7319_v12  ;;  %v12223_v48 = vsel %vm1578_vm1, %v1621_v30, %v1622_v61  ;;  %v1737_v55 = vmul.bf16 %v15158_v26, %v15157_v7  ;;  %v2462_v8 = vld [vmem:[#allocation2 + $0x120] sm:$0xfc]  ;;  %v15162_v12 = vld [vmem:[#allocation70_spill] sm:$0xff]  ;;  %v15163_v30 = vld [vmem:[#allocation25_spill] sm:$0xff] }
 0x49d   : > { %15156 = vst [vmem:[#allocation78_spill] sm:$0xff] %v12223_v48  ;;  %v2101_v44 = vshrl.u32 %v1853_v16, 16  ;;  %v12228_v9 = vsel %vm1015_vm0, %v1261_v28, %v1269_v11  ;;  %v1789_v60 = vmul.bf16 %v15160_v35, %v12223_v48  ;;  %v2104_v42 = vshll.u32 %v1853_v16, 16  ;;  %v2463_v11 = vld [vmem:[#allocation2 + $0x128] sm:$0x7]  ;;  %v15164_v35 = vld [vmem:[#allocation79_spill] sm:$0xff] }
 0x49e   : > { %15159 = vst [vmem:[#allocation81_spill] sm:$0xff] %v12228_v9  ;;  %v2109_v47 = vshrl.u32 %v1854_v4, 16  ;;  %v7426_v13 = vadd.bf16 %v7410_v51, %v7371_v25  ;;  %v1486_v22 = vmul.bf16 %v15161_v10, %v12228_v9  ;;  %v1753_v56 = vadd.bf16 %v1737_v55, %v1701_v33  ;;  %v15165_v16 = vld [vmem:[#allocation26_spill] sm:$0xff]  ;;  %v15166_v33 = vld [vmem:[#allocation252_spill] sm:$0xff] }
 0x49f   : > { %v2103_v34 = vrot.slane %v2101_v44, 4  ;;  %v2106_v17 = vrot.slane %v2104_v42, 5  ;;  %v2112_v37 = vshll.u32 %v1854_v4, 16  ;;  %v2236_v61 = vmul.bf16 %v15163_v30, %v15162_v12 }
 0x4a0   : > { %v2111_v24 = vrot.slane %v2109_v47, 4  ;;  %v7442_v28 = vadd.bf16 %v7426_v13, %v6612_v14  ;;  %v1502_v26 = vadd.bf16 %v1486_v22, %v1449_v38  ;;  %v1805_v63 = vadd.bf16 %v1789_v60, %v1753_v56  ;;  %v15167_v60 = vld [vmem:[#allocation37_spill] sm:$0xff]  ;;  %v15168_v13 = vld [vmem:[#allocation31_spill] sm:$0xff]  ;;  %v15169_v56 = vld [vmem:[#allocation84_spill] sm:$0xff] }
 0x4a1   : > { %v2272_v48 = vmul.bf16 %v15165_v16, %v15164_v35  ;;  %v2107_v51 = vor.u32 %v2106_v17, %v2103_v34  ;;  %v2114_v25 = vrot.slane %v2112_v37, 5  ;;  %v2778_v7 = vshrl.u32 %v2462_v8, 16  ;;  %v15170_v34 = vld [vmem:[#allocation196_spill] sm:$0xff] }
 0x4a2   : > { %v2781_v10 = vshll.u32 %v2462_v8, 16  ;;  %v7465_v55 = vadd.bf16 %v15166_v33, %v7442_v28  ;;  %v1821_v44 = vadd.bf16 %v1805_v63, %v1502_v26  ;;  %v2786_v47 = vshrl.u32 %v2463_v11, 16  ;;  %v3300_v37 = vld [vmem:[#allocation2 + $0x120] sm:$0xf8]  ;;  %v15172_v26 = vld [vmem:[#allocation34_spill] sm:$0xff] }
 0x4a3   : > { %v2288_v42 = vadd.bf16 %v2272_v48, %v2236_v61  ;;  %v2115_v4 = vor.u32 %v2114_v25, %v2111_v24  ;;  %v2780_v52 = vrot.slane %v2778_v7, 2  ;;  %v2789_v12 = vshll.u32 %v2463_v11, 16  ;;  %v15173_v24 = vld [vmem:[#allocation33_spill] sm:$0xff]  ;;  %v15174_v11 = vld [vmem:[#allocation27_spill] sm:$0xff] }
 0x4a4   : > { %v2783_v9 = vrot.slane %v2781_v10, 3  ;;  %v7481_v14 = vmax.bf16 %v14218_v23, %v7465_v55  ;;  %v2788_v38 = vrot.slane %v2786_v47, 2  ;;  %v2924_v22 = vmul.bf16 %v15168_v13, %v15167_v60  ;;  %v3301_v10 = vld [vmem:[#allocation2 + $0x128] sm:$0x7]  ;;  %v15175_v55 = vld [vmem:[#allocation235_spill] sm:$0xff]  ;;  %v15176_v47 = vld [vmem:[#allocation197_spill] sm:$0xff] }
 0x4a5   : > { %v2963_v17 = vmul.bf16 %v15170_v34, %v15169_v56  ;;  %v12245_v8 = vsel %vm1861_vm2, %v2107_v51, %v2115_v4  ;;  %v2791_v48 = vrot.slane %v2789_v12, 3  ;;  %v3018_v7 = vmul.bf16 %v15173_v24, %v15172_v26  ;;  %v15177_v13 = vld [vmem:[#allocation71_spill] sm:$0xff]  ;;  %v15178_v56 = vld [vmem:[#allocation36_spill] sm:$0xff] }
 0x4a6   : > { %15171 = vst [vmem:[#allocation236_spill] sm:$0xff] %v12245_v8  ;;  %v2784_v63 = vor.u32 %v2783_v9, %v2780_v52  ;;  %v7497_v61 = vmin.bf16 %v14114_v50, %v7481_v14  ;;  %v2327_v28 = vmul.bf16 %v15174_v11, %v12245_v8  ;;  %v3075_v60 = vmul.bf16 %v15176_v47, %v15175_v55  ;;  %v15179_v4 = vld [vmem:[#allocation80_spill] sm:$0xff]  ;;  %v15180_v52 = vld [vmem:[#allocation198_spill] sm:$0xff]  ;;  %v15184_v47 = vld [vmem:[#allocation201_spill] sm:$0xff] }
 0x4a7   : > { %v2979_v25 = vadd.bf16 %v2963_v17, %v2924_v22  ;;  %v2792_v34 = vor.u32 %v2791_v48, %v2788_v38  ;;  %v3131_v51 = vmul.bf16 %v15178_v56, %v15177_v13  ;;  %v3188_v9 = vmul.bf16 %v15180_v52, %v15179_v4  ;;  %v15182_v22 = vld [vmem:[#allocation57_spill] sm:$0xff]  ;;  %v15183_v17 = vld [vmem:[#allocation204_spill] sm:$0xff]  ;;  %v15185_v38 = vld [vmem:[#allocation98_spill] sm:$0xff] }
 0x4a8   : > { %v3407_v12 = vrot.slane %v3300_v37, 3  ;;  %v7513_v24 = vadd.bf16 %v7497_v61, %v12135_v19  ;;  %v2343_v26 = vadd.bf16 %v2327_v28, %v2288_v42  ;;  %v3408_v14 = vrot.slane %v3301_v10, 3  ;;  %v15186_v55 = vld [vmem:[#allocation194_spill] sm:$0xff]  ;;  %v3876_v8 = vld [vmem:[#allocation2 + $0x120] sm:$0xf8] }
 0x4a9   : > { %v3034_v33 = vadd.bf16 %v3018_v7, %v2979_v25  ;;  %v12260_v16 = vsel %vm2470_vm3, %v2784_v63, %v2792_v34  ;;  %v3495_v11 = vmul.bf16 %v15183_v17, %v15182_v22  ;;  %v3531_v48 = vmul.bf16 %v15185_v38, %v15184_v47  ;;  %v15187_v56 = vld [vmem:[#allocation206_spill] sm:$0xff]  ;;  %v15188_v19 = vld [vmem:[#allocation83_spill] sm:$0xff]  ;;  %v3877_v34 = vld [vmem:[#allocation2 + $0x128] sm:$0xf] }
 0x4aa   : > { %15181 = vst [vmem:[#allocation191_spill] sm:$0xff] %v12260_v16  ;;  %v3586_v13 = vmul.bf16 %v15187_v56, %v15186_v55  ;;  %8262 = vmatmul.mubr.bf16.gmra.mrb[20].mxu1 %v7513_v24  ;;  %v2359_v37 = vadd.bf16 %v2343_v26, %v1821_v44  ;;  %v3244_v42 = vmul.bf16 %v15188_v19, %v12260_v16  ;;  %v15190_v10 = vld [vmem:[#allocation62_spill] sm:$0xff]  ;;  %v15192_v25 = vld [vmem:[#allocation193_spill] sm:$0xff]  ;;  %v15193_v22 = vld [vmem:[#allocation207_spill] sm:$0xff]  ;;  %v4191_v47 = vshrl.u32 %v3876_v8, 16 }
 0x4ab   : > { %v3091_v52 = vadd.bf16 %v3075_v60, %v3034_v33  ;;  %v12271_v7 = vsel %vm3352_vm4, %v3407_v12, %v3408_v14  ;;  %v3547_v63 = vadd.bf16 %v3531_v48, %v3495_v11  ;;  %v15191_v61 = vld [vmem:[#allocation114_spill] sm:$0xff]  ;;  %v3695_v38 = vmul.bf16 %v15193_v22, %v15192_v25  ;;  %v15194_v17 = vld [vmem:[#allocation212_spill] sm:$0xff]  ;;  %v15195_v56 = vld [vmem:[#allocation163_spill] sm:$0xff] }
 0x4ac   : > { %15189 = vst [vmem:[#allocation64_spill] sm:$0xff] %v12271_v7  ;;  %v3640_v28 = vmul.bf16 %v15191_v61, %v15190_v10  ;;  %v3749_v55 = vmul.bf16 %v15195_v56, %v15194_v17  ;;  %v15196_v24 = vld [vmem:[#allocation28_spill] sm:$0xff]  ;;  %v4194_v14 = vshll.u32 %v3876_v8, 16  ;;  %v4199_v19 = vshrl.u32 %v3877_v34, 16  ;;  %v15199_v22 = vld [vmem:[#allocation130_spill] sm:$0xff]  ;;  %v15201_v8 = vld [vmem:[#allocation35_spill] sm:$0xff] }
 0x4ad   : > { %v2382_v44 = vadd.bf16 %v15196_v24, %v2359_v37  ;;  %v3147_v33 = vadd.bf16 %v3131_v51, %v3091_v52  ;;  %v15197_v26 = vld [vmem:[#allocation208_spill] sm:$0xff]  ;;  %v3602_v12 = vadd.bf16 %v3586_v13, %v3547_v63  ;;  %v4202_v11 = vshll.u32 %v3877_v34, 16  ;;  %v15200_v13 = vld [vmem:[#allocation91_spill] sm:$0xff] }
 0x4ae   : > { %v3804_v60 = vmul.bf16 %v15197_v26, %v12271_v7  ;;  %v4193_v10 = vrot.slane %v4191_v47, 3  ;;  %v15198_v16 = vld [vmem:[#allocation88_spill] sm:$0xff]  ;;  %v4196_v56 = vrot.slane %v4194_v14, 4  ;;  %v4201_v17 = vrot.slane %v4199_v19, 3  ;;  %v15202_v34 = vld [vmem:[#allocation131_spill] sm:$0xff] }
 0x4af   : > { %v2398_v48 = vmax.bf16 %v14218_v23, %v2382_v44  ;;  %v3204_v61 = vadd.bf16 %v3188_v9, %v3147_v33  ;;  %v4334_v25 = vmul.bf16 %v15199_v22, %v15198_v16  ;;  %v3656_v4 = vadd.bf16 %v3640_v28, %v3602_v12  ;;  %v4702_v51 = vld [vmem:[#allocation2 + $0x120] sm:$0xf0]  ;;  %v4703_v9 = vld [vmem:[#allocation2 + $0x128] sm:$0xf]  ;;  %v15203_v16 = vld [vmem:[#allocation213_spill] sm:$0xff] }
 0x4b0   : > { %v4204_v37 = vrot.slane %v4202_v11, 4  ;;  %v4370_v63 = vmul.bf16 %v15201_v8, %v15200_v13  ;;  %v4422_v44 = vmul.bf16 %v15202_v34, %v15115_v40  ;;  %v4197_v33 = vor.u32 %v4196_v56, %v4193_v10  ;;  %v15204_v12 = vld [vmem:[#allocation132_spill] sm:$0xff]  ;;  %v15205_v11 = vld [vmem:[#allocation55_spill] sm:$0xff] }
 0x4b1   : > { %v12286_v52 = vmin.bf16 %v14114_v50, %v2398_v48  ;;  %v3260_v24 = vadd.bf16 %v3244_v42, %v3204_v61  ;;  %v3711_v47 = vadd.bf16 %v3695_v38, %v3656_v4  ;;  %v4474_v28 = vmul.bf16 %v15203_v16, %v15117_v15  ;;  %v15206_v48 = vld [vmem:[#allocation215_spill] sm:$0xff]  ;;  %v15209_v4 = vld [vmem:[#allocation221_spill] sm:$0xff]  ;;  %v15210_v38 = vld [vmem:[#allocation170_spill] sm:$0xff] }
 0x4b2   : > { %v4205_v26 = vor.u32 %v4204_v37, %v4201_v17  ;;  %v4386_v19 = vadd.bf16 %v4370_v63, %v4334_v25  ;;  %v4526_v14 = vmul.bf16 %v15204_v12, %v15119_v43  ;;  %v4578_v42 = vmul.bf16 %v15206_v48, %v15205_v11  ;;  %v15208_v40 = vld [vmem:[#allocation87_spill] sm:$0xff]  ;;  %v15211_v25 = vld [vmem:[#allocation92_spill] sm:$0xff]  ;;  %v15213_v12 = vld [vmem:[#allocation218_spill] sm:$0xff] }
 0x4b3   : > { %v4808_v61 = vrot.slane %v4702_v51, 4  ;;  %v3765_v22 = vadd.bf16 %v3749_v55, %v3711_v47  ;;  %v4809_v34 = vrot.slane %v4703_v9, 4  ;;  %v4896_v56 = vmul.bf16 %v15209_v4, %v15208_v40  ;;  %v15212_v37 = vld [vmem:[#allocation171_spill] sm:$0xff]  ;;  %v5264_v48 = vld [vmem:[#allocation2 + $0x120] sm:$0xf0]  ;;  %v15216_v9 = vld [vmem:[#allocation174_spill] sm:$0xff] }
 0x4b4   : > { %v12299_v8 = vsel %vm1015_vm0, %v4197_v33, %v4205_v26  ;;  %v4438_v17 = vadd.bf16 %v4422_v44, %v4386_v19  ;;  %v4932_v63 = vmul.bf16 %v15212_v37, %v15211_v25  ;;  %v15214_v16 = vld [vmem:[#allocation223_spill] sm:$0xff]  ;;  %v5265_v51 = vld [vmem:[#allocation2 + $0x128] sm:$0x1f]  ;;  %v5036_v47 = vmul.bf16 %v15216_v9, %v15040_v53  ;;  %v15217_v40 = vld [vmem:[#allocation66_spill] sm:$0xff] }
 0x4b5   : > { %15207 = vst [vmem:[#allocation190_spill] sm:$0xff] %v12299_v8  ;;  %v4630_v10 = vmul.bf16 %v15210_v38, %v12299_v8  ;;  %v4984_v43 = vmul.bf16 %v15214_v16, %v15213_v12  ;;  %v3820_v55 = vadd.bf16 %v3804_v60, %v3765_v22  ;;  %v12310_v26 = vsel %vm1578_vm1, %v4808_v61, %v4809_v34  ;;  %v15218_v44 = vld [vmem:[#allocation224_spill] sm:$0xff]  ;;  %v15219_v4 = vld [vmem:[#allocation75_spill] sm:$0xff]  ;;  %v15221_v25 = vld [vmem:[#allocation225_spill] sm:$0xff] }
 0x4b6   : > { %15215 = vst [vmem:[#allocation228_spill] sm:$0xff] %v12310_v26  ;;  %v5088_v33 = vmul.bf16 %v15218_v44, %v15217_v40  ;;  %v4490_v19 = vadd.bf16 %v4474_v28, %v4438_v17  ;;  %v4948_v38 = vadd.bf16 %v4932_v63, %v4896_v56  ;;  %v15220_v8 = vld [vmem:[#allocation175_spill] sm:$0xff]  ;;  %v5192_v16 = vmul.bf16 %v15221_v25, %v12310_v26 }
 0x4b7   : > { %v5140_v37 = vmul.bf16 %v15220_v8, %v15219_v4  ;;  %v3836_v12 = vadd.bf16 %v3820_v55, %v3260_v24  ;;  %v5579_v11 = vshrl.u32 %v5264_v48, 16  ;;  %v5582_v22 = vshll.u32 %v5264_v48, 16  ;;  %v6090_v48 = vld [vmem:[#allocation2 + $0x120] sm:$0xe0]  ;;  %v6091_v55 = vld [vmem:[#allocation2 + $0x128] sm:$0x1f] }
 0x4b8   : > { %v5587_v60 = vshrl.u32 %v5265_v51, 16  ;;  %v4542_v34 = vadd.bf16 %v4526_v14, %v4490_v19  ;;  %v5000_v61 = vadd.bf16 %v4984_v43, %v4948_v38  ;;  %v5590_v15 = vshll.u32 %v5265_v51, 16 }
 0x4b9   : > { %v5722_v9 = vmul.bf16 %v15134_v5, %v14727_v45  ;;  %v5581_v53 = vrot.slane %v5579_v11, 4  ;;  %v5584_v44 = vrot.slane %v5582_v22, 5  ;;  %v5758_v56 = vmul.bf16 %v15135_v20, %v15045_v46 }
 0x4ba   : > { %v5589_v28 = vrot.slane %v5587_v60, 4  ;;  %v4594_v17 = vadd.bf16 %v4578_v42, %v4542_v34  ;;  %v5052_v63 = vadd.bf16 %v5036_v47, %v5000_v61  ;;  %v5592_v8 = vrot.slane %v5590_v15, 5  ;;  %v15222_v42 = vld [vmem:[#allocation233_spill] sm:$0xff] }
 0x4bb   : > { %v5810_v24 = vmul.bf16 %v15136_v54, %v11663_v49  ;;  %v5585_v14 = vor.u32 %v5584_v44, %v5581_v53  ;;  %v5774_v43 = vadd.bf16 %v5758_v56, %v5722_v9  ;;  %v5862_v38 = vmul.bf16 %v15137_v41, %v11844_v27  ;;  %v15223_v34 = vld [vmem:[#allocation85_spill] sm:$0xff]  ;;  %v15225_v56 = vld [vmem:[#allocation95_spill] sm:$0xff]  ;;  %v15226_v41 = vld [vmem:[#allocation30_spill] sm:$0xff] }
 0x4bc   : > { %v5914_v45 = vmul.bf16 %v15047_v3, %v12015_v2  ;;  %v4646_v11 = vadd.bf16 %v4630_v10, %v4594_v17  ;;  %v5104_v51 = vadd.bf16 %v5088_v33, %v5052_v63  ;;  %v5593_v19 = vor.u32 %v5592_v8, %v5589_v28  ;;  %v15224_v61 = vld [vmem:[#allocation237_spill] sm:$0xff]  ;;  %v6653_v10 = vld [vmem:[#allocation2 + $0x120] sm:$0xe0]  ;;  %v15229_v63 = vld [vmem:[#allocation219_spill] sm:$0xff] }
 0x4bd   : > { %v5966_v47 = vmul.bf16 %v15222_v42, %v12178_v62  ;;  %v5826_v15 = vadd.bf16 %v5810_v24, %v5774_v43  ;;  %v6197_v22 = vrot.slane %v6090_v48, 5  ;;  %v6198_v60 = vrot.slane %v6091_v55, 5  ;;  %v15227_v8 = vld [vmem:[#allocation69_spill] sm:$0xff]  ;;  %v15230_v24 = vld [vmem:[#allocation239_spill] sm:$0xff] }
 0x4be   : > { %v6285_v54 = vmul.bf16 %v15224_v61, %v15223_v34  ;;  %v4662_v53 = vadd.bf16 %v4646_v11, %v3836_v12  ;;  %v5156_v9 = vadd.bf16 %v5140_v37, %v5104_v51  ;;  %v12335_v44 = vsel %vm1861_vm2, %v5585_v14, %v5593_v19  ;;  %v6654_v55 = vld [vmem:[#allocation2 + $0x128] sm:$0x3f]  ;;  %v15234_v34 = vld [vmem:[#allocation243_spill] sm:$0xff] }
 0x4bf   : > { %v6321_v3 = vmul.bf16 %v15226_v41, %v15225_v56  ;;  %v5878_v33 = vadd.bf16 %v5862_v38, %v5826_v15  ;;  %v6018_v28 = vmul.bf16 %v15227_v8, %v12335_v44  ;;  %v12342_v17 = vsel %vm6142_vm5, %v6197_v22, %v6198_v60  ;;  %v15231_v14 = vld [vmem:[#allocation32_spill] sm:$0xff]  ;;  %v15232_v11 = vld [vmem:[#allocation241_spill] sm:$0xff]  ;;  %v15233_v38 = vld [vmem:[#allocation242_spill] sm:$0xff] }
 0x4c0   : > { %15228 = vst [vmem:[#allocation119_spill] sm:$0xff] %v12342_v17  ;;  %v6373_v48 = vmul.bf16 %v15230_v24, %v15229_v63  ;;  %v5208_v12 = vadd.bf16 %v5192_v16, %v5156_v9  ;;  %v6425_v43 = vmul.bf16 %v15231_v14, %v11853_v0  ;;  %v6477_v51 = vmul.bf16 %v15232_v11, %v12026_v57 }
 0x4c1   : > { %v6337_v37 = vadd.bf16 %v6321_v3, %v6285_v54  ;;  %v5930_v19 = vadd.bf16 %v5914_v45, %v5878_v33  ;;  %v6529_v15 = vmul.bf16 %v15233_v38, %v12185_v1  ;;  %v6581_v22 = vmul.bf16 %v15234_v34, %v12342_v17  ;;  %v15235_v33 = vld [vmem:[#allocation245_spill] sm:$0xff] }
 0x4c2   : > { %v6969_v60 = vshrl.u32 %v6653_v10, 16  ;;  %v5224_v8 = vadd.bf16 %v5208_v12, %v4662_v53  ;;  %v6972_v24 = vshll.u32 %v6653_v10, 16  ;;  %v6977_v63 = vshrl.u32 %v6654_v55, 16  ;;  %v1009_v1 = vld [vmem:[#allocation2 + $0x110] sm:$0xf8] }
 0x4c3   : > { %v6389_v41 = vadd.bf16 %v6373_v48, %v6337_v37  ;;  %v5982_v16 = vadd.bf16 %v5966_v47, %v5930_v19  ;;  %v6980_v54 = vshll.u32 %v6654_v55, 16  ;;  %v7112_v9 = vmul.bf16 %v14631_v32, %v11335_v39  ;;  %v15236_v53 = vld [vmem:[#allocation246_spill] sm:$0xff]  ;;  %v15237_v39 = vld [vmem:[#allocation248_spill] sm:$0xff] }
 0x4c4   : > { %v6971_v3 = vrot.slane %v6969_v60, 5  ;;  %v6974_v11 = vrot.slane %v6972_v24, 6  ;;  %v6979_v45 = vrot.slane %v6977_v63, 5  ;;  %v7148_v38 = vmul.bf16 %v15235_v33, %v11516_v18  ;;  %v1010_v10 = vld [vmem:[#allocation2 + $0x118] sm:$0xf] }
 0x4c5   : > { %v6441_v14 = vadd.bf16 %v6425_v43, %v6389_v41  ;;  %v6034_v57 = vadd.bf16 %v6018_v28, %v5982_v16  ;;  %v6982_v34 = vrot.slane %v6980_v54, 6  ;;  %v7200_v48 = vmul.bf16 %v15236_v53, %v14960_v31  ;;  %v1536_v53 = vld [vmem:[#allocation2 + $0x110] sm:$0xf0] }
 0x4c6   : > { %v7252_v47 = vmul.bf16 %v15151_v59, %v11878_v29  ;;  %v6975_v12 = vor.u32 %v6974_v11, %v6971_v3  ;;  %v7164_v37 = vadd.bf16 %v7148_v38, %v7112_v9  ;;  %v7304_v41 = vmul.bf16 %v15237_v39, %v12049_v21  ;;  %v1537_v3 = vld [vmem:[#allocation2 + $0x118] sm:$0xf] }
 0x4c7   : > { %v6493_v55 = vadd.bf16 %v6477_v51, %v6441_v14  ;;  %v6050_v63 = vadd.bf16 %v6034_v57, %v5224_v8  ;;  %v6983_v24 = vor.u32 %v6982_v34, %v6979_v45  ;;  %v7356_v43 = vmul.bf16 %v15153_v6, %v12212_v58  ;;  %v15239_v51 = vld [vmem:[#allocation22_spill] sm:$0xff]  ;;  %v15240_v34 = vld [vmem:[#allocation251_spill] sm:$0xff] }
 0x4c8   : > { %v1272_v28 = vshrl.u32 %v1009_v1, 16  ;;  %v7216_v60 = vadd.bf16 %v7200_v48, %v7164_v37  ;;  %v1275_v16 = vshll.u32 %v1009_v1, 16  ;;  %v1280_v54 = vshrl.u32 %v1010_v10, 16  ;;  %v15241_v1 = vld [vmem:[#allocation81_spill] sm:$0xff]  ;;  %v1856_v58 = vld [vmem:[#allocation2 + $0x118] sm:$0x1f] }
 0x4c9   : > { %v6545_v19 = vadd.bf16 %v6529_v15, %v6493_v55  ;;  %v12367_v59 = vsel %vm6661_vm6, %v6975_v12, %v6983_v24  ;;  %v1283_v11 = vshll.u32 %v1010_v10, 16  ;;  %v1394_v38 = vmul.bf16 %v15239_v51, %v12065_v36  ;;  %v15242_v55 = vld [vmem:[#allocation23_spill] sm:$0xff]  ;;  %v1855_v12 = vld [vmem:[#allocation2 + $0x110] sm:$0xf0] }
 0x4ca   : > { %15238 = vst [vmem:[#allocation118_spill] sm:$0xff] %v12367_v59  ;;  %v1274_v14 = vrot.slane %v1272_v28, 3  ;;  %v7268_v8 = vadd.bf16 %v7252_v47, %v7216_v60  ;;  %v7411_v9 = vmul.bf16 %v15240_v34, %v12367_v59  ;;  %v1277_v45 = vrot.slane %v1275_v16, 4  ;;  %v15244_v47 = vld [vmem:[#allocation19_spill] sm:$0xff]  ;;  %v15245_v60 = vld [vmem:[#allocation78_spill] sm:$0xff]  ;;  %v15246_v34 = vld [vmem:[#allocation20_spill] sm:$0xff] }
 0x4cb   : > { %v6597_v57 = vadd.bf16 %v6581_v22, %v6545_v19  ;;  %v1282_v15 = vrot.slane %v1280_v54, 3  ;;  %v1285_v48 = vrot.slane %v1283_v11, 4  ;;  %v1434_v37 = vmul.bf16 %v15242_v55, %v15241_v1  ;;  %v15243_v22 = vld [vmem:[#allocation77_spill] sm:$0xff] }
 0x4cc   : > { %v1624_v6 = vrot.slane %v1536_v53, 4  ;;  %v7320_v28 = vadd.bf16 %v7304_v41, %v7268_v8  ;;  %v1278_v10 = vor.u32 %v1277_v45, %v1274_v14  ;;  %v1625_v39 = vrot.slane %v1537_v3, 4  ;;  %v15248_v14 = vld [vmem:[#allocation21_spill] sm:$0xff]  ;;  %v15249_v8 = vld [vmem:[#allocation24_spill] sm:$0xff] }
 0x4cd   : > { %v6613_v24 = vadd.bf16 %v6597_v57, %v6050_v63  ;;  %v1286_v36 = vor.u32 %v1285_v48, %v1282_v15  ;;  %v1450_v51 = vadd.bf16 %v1434_v37, %v1394_v38  ;;  %v1702_v19 = vmul.bf16 %v15244_v47, %v15243_v22  ;;  %v2465_v37 = vld [vmem:[#allocation2 + $0x138] sm:$0x7] }
 0x4ce   : > { %v1738_v16 = vmul.bf16 %v15246_v34, %v15245_v60  ;;  %v7372_v54 = vadd.bf16 %v7356_v43, %v7320_v28  ;;  %v12380_v11 = vsel %vm1578_vm1, %v1624_v6, %v1625_v39  ;;  %v2118_v55 = vshrl.u32 %v1855_v12, 16  ;;  %v2464_v43 = vld [vmem:[#allocation2 + $0x130] sm:$0xfc] }
 0x4cf   : > { %15247 = vst [vmem:[#allocation117_spill] sm:$0xff] %v12380_v11  ;;  %v2121_v53 = vshll.u32 %v1855_v12, 16  ;;  %v12383_v63 = vsel %vm1015_vm0, %v1278_v10, %v1286_v36  ;;  %v1790_v3 = vmul.bf16 %v15248_v14, %v12380_v11  ;;  %v2126_v38 = vshrl.u32 %v1856_v58, 16 }
 0x4d0   : > { %v1754_v41 = vadd.bf16 %v1738_v16, %v1702_v19  ;;  %v7427_v57 = vadd.bf16 %v7411_v9, %v7372_v54  ;;  %v1487_v45 = vmul.bf16 %v15249_v8, %v12383_v63  ;;  %v2120_v15 = vrot.slane %v2118_v55, 4  ;;  %v15250_v19 = vld [vmem:[#allocation236_spill] sm:$0xff]  ;;  %v15251_v16 = vld [vmem:[#allocation26_spill] sm:$0xff] }
 0x4d1   : > { %v2123_v48 = vrot.slane %v2121_v53, 5  ;;  %v2128_v39 = vrot.slane %v2126_v38, 4  ;;  %v2129_v28 = vshll.u32 %v1856_v58, 16  ;;  %v2237_v12 = vmul.bf16 %v15163_v30, %v15164_v35  ;;  %v15252_v55 = vld [vmem:[#allocation252_spill] sm:$0xff] }
 0x4d2   : > { %v1806_v6 = vadd.bf16 %v1790_v3, %v1754_v41  ;;  %v7443_v10 = vadd.bf16 %v7427_v57, %v6613_v24  ;;  %v1503_v36 = vadd.bf16 %v1487_v45, %v1450_v51  ;;  %v2273_v14 = vmul.bf16 %v15251_v16, %v15250_v19  ;;  %v15253_v24 = vld [vmem:[#allocation84_spill] sm:$0xff]  ;;  %v15254_v57 = vld [vmem:[#allocation31_spill] sm:$0xff]  ;;  %v3303_v16 = vld [vmem:[#allocation2 + $0x138] sm:$0x7] }
 0x4d3   : > { %v2124_v22 = vor.u32 %v2123_v48, %v2120_v15  ;;  %v2131_v9 = vrot.slane %v2129_v28, 5  ;;  %v2795_v54 = vshrl.u32 %v2464_v43, 16  ;;  %v2798_v34 = vshll.u32 %v2464_v43, 16  ;;  %v15255_v15 = vld [vmem:[#allocation34_spill] sm:$0xff]  ;;  %v15256_v48 = vld [vmem:[#allocation196_spill] sm:$0xff] }
 0x4d4   : > { %v2803_v8 = vshrl.u32 %v2465_v37, 16  ;;  %v7466_v53 = vadd.bf16 %v15252_v55, %v7443_v10  ;;  %v1822_v11 = vadd.bf16 %v1806_v6, %v1503_v36  ;;  %v2289_v47 = vadd.bf16 %v2273_v14, %v2237_v12  ;;  %v3302_v43 = vld [vmem:[#allocation2 + $0x130] sm:$0xf8] }
 0x4d5   : > { %v2806_v41 = vshll.u32 %v2465_v37, 16  ;;  %v2132_v3 = vor.u32 %v2131_v9, %v2128_v39  ;;  %v2797_v58 = vrot.slane %v2795_v54, 2  ;;  %v2800_v38 = vrot.slane %v2798_v34, 3  ;;  %v15258_v37 = vld [vmem:[#allocation235_spill] sm:$0xff]  ;;  %v15259_v6 = vld [vmem:[#allocation33_spill] sm:$0xff] }
 0x4d6   : > { %v2805_v60 = vrot.slane %v2803_v8, 2  ;;  %v7482_v35 = vmax.bf16 %v14218_v23, %v7466_v53  ;;  %v2925_v45 = vmul.bf16 %v15254_v57, %v15253_v24  ;;  %v2964_v28 = vmul.bf16 %v15256_v48, %v15255_v15  ;;  %v15260_v34 = vld [vmem:[#allocation71_spill] sm:$0xff]  ;;  %v15261_v8 = vld [vmem:[#allocation197_spill] sm:$0xff]  ;;  %v15263_v24 = vld [vmem:[#allocation80_spill] sm:$0xff] }
 0x4d7   : > { %v2808_v51 = vrot.slane %v2806_v41, 3  ;;  %v12400_v10 = vsel %vm1861_vm2, %v2124_v22, %v2132_v3  ;;  %v2801_v14 = vor.u32 %v2800_v38, %v2797_v58  ;;  %v3019_v39 = vmul.bf16 %v15259_v6, %v15258_v37  ;;  %v15262_v9 = vld [vmem:[#allocation27_spill] sm:$0xff]  ;;  %v15264_v48 = vld [vmem:[#allocation36_spill] sm:$0xff]  ;;  %v15266_v22 = vld [vmem:[#allocation198_spill] sm:$0xff] }
 0x4d8   : > { %15257 = vst [vmem:[#allocation116_spill] sm:$0xff] %v12400_v10  ;;  %v3076_v12 = vmul.bf16 %v15261_v8, %v15260_v34  ;;  %v7498_v36 = vmin.bf16 %v14114_v50, %v7482_v35  ;;  %v2328_v54 = vmul.bf16 %v15262_v9, %v12400_v10  ;;  %v2980_v41 = vadd.bf16 %v2964_v28, %v2925_v45  ;;  %v15265_v15 = vld [vmem:[#allocation191_spill] sm:$0xff]  ;;  %v15271_v45 = vld [vmem:[#allocation204_spill] sm:$0xff] }
 0x4d9   : > { %v2809_v53 = vor.u32 %v2808_v51, %v2805_v60  ;;  %v3132_v57 = vmul.bf16 %v15264_v48, %v15263_v24  ;;  %v3189_v3 = vmul.bf16 %v15266_v22, %v15265_v15  ;;  %v3410_v58 = vrot.slane %v3302_v43, 3  ;;  %v15268_v34 = vld [vmem:[#allocation83_spill] sm:$0xff]  ;;  %v15270_v51 = vld [vmem:[#allocation201_spill] sm:$0xff]  ;;  %v15272_v48 = vld [vmem:[#allocation194_spill] sm:$0xff] }
 0x4da   : > { %v3411_v38 = vrot.slane %v3303_v16, 3  ;;  %v7514_v6 = vadd.bf16 %v7498_v36, %v12286_v52  ;;  %v2344_v37 = vadd.bf16 %v2328_v54, %v2289_v47  ;;  %v3035_v35 = vadd.bf16 %v3019_v39, %v2980_v41  ;;  %v15273_v22 = vld [vmem:[#allocation98_spill] sm:$0xff]  ;;  %v15276_v39 = vld [vmem:[#allocation193_spill] sm:$0xff] }
 0x4db   : > { %v12415_v8 = vsel %vm2470_vm3, %v2801_v14, %v2809_v53  ;;  %v3496_v28 = vmul.bf16 %v15271_v45, %v15270_v51  ;;  %v3532_v43 = vmul.bf16 %v15273_v22, %v15272_v48  ;;  %v3878_v16 = vld [vmem:[#allocation2 + $0x130] sm:$0xf8]  ;;  %v15280_v51 = vld [vmem:[#allocation163_spill] sm:$0xff]  ;;  %v15281_v22 = vld [vmem:[#allocation208_spill] sm:$0xff] }
 0x4dc   : > { %15267 = vst [vmem:[#allocation195_spill] sm:$0xff] %v12415_v8  ;;  %v3245_v9 = vmul.bf16 %v15268_v34, %v12415_v8  ;;  %v12420_v60 = vsel %vm3352_vm4, %v3410_v58, %v3411_v38  ;;  %8265 = vmatprep.mubr.bf16.mxu1 %v7514_v6  ;;  %v2360_v52 = vadd.bf16 %v2344_v37, %v1822_v11  ;;  %v15274_v36 = vld [vmem:[#allocation62_spill] sm:$0xff]  ;;  %v15278_v58 = vld [vmem:[#allocation212_spill] sm:$0xff]  ;;  %v15279_v38 = vld [vmem:[#allocation207_spill] sm:$0xff] }
 0x4dd   : > { %15269 = vst [vmem:[#allocation115_spill] sm:$0xff] %v12420_v60  ;;  %v3092_v47 = vadd.bf16 %v3076_v12, %v3035_v35  ;;  %v15275_v14 = vld [vmem:[#allocation206_spill] sm:$0xff]  ;;  %v3548_v8 = vadd.bf16 %v3532_v43, %v3496_v28  ;;  %v3696_v15 = vmul.bf16 %v15279_v38, %v15278_v58  ;;  %v3750_v45 = vmul.bf16 %v15280_v51, %v12271_v7  ;;  %v15282_v6 = vld [vmem:[#allocation28_spill] sm:$0xff] }
 0x4de   : > { %v3587_v54 = vmul.bf16 %v15275_v14, %v15274_v36  ;;  %v15277_v53 = vld [vmem:[#allocation114_spill] sm:$0xff]  ;;  %v3805_v48 = vmul.bf16 %v15281_v22, %v12420_v60  ;;  %v2383_v11 = vadd.bf16 %v15282_v6, %v2360_v52  ;;  %v4208_v12 = vshrl.u32 %v3878_v16, 16  ;;  %v15284_v22 = vld [vmem:[#allocation89_spill] sm:$0xff]  ;;  %v15285_v60 = vld [vmem:[#allocation35_spill] sm:$0xff] }
 0x4df   : > { %v3641_v41 = vmul.bf16 %v15277_v53, %v15276_v39  ;;  %v3879_v34 = vld [vmem:[#allocation2 + $0x138] sm:$0xf]  ;;  %v3148_v37 = vadd.bf16 %v3132_v57, %v3092_v47  ;;  %v4211_v35 = vshll.u32 %v3878_v16, 16  ;;  %v4371_v52 = vmul.bf16 %v15285_v60, %v15284_v22  ;;  %v4704_v57 = vld [vmem:[#allocation2 + $0x130] sm:$0xf0]  ;;  %v15294_v22 = vld [vmem:[#allocation215_spill] sm:$0xff] }
 0x4e0   : > { %v3603_v14 = vadd.bf16 %v3587_v54, %v3548_v8  ;;  %v4216_v36 = vshrl.u32 %v3879_v34, 16  ;;  %v4219_v24 = vshll.u32 %v3879_v34, 16  ;;  %v15283_v53 = vld [vmem:[#allocation130_spill] sm:$0xff]  ;;  %v2399_v43 = vmax.bf16 %v14218_v23, %v2383_v11  ;;  %v15287_v54 = vld [vmem:[#allocation60_spill] sm:$0xff] }
 0x4e1   : > { %v4335_v28 = vmul.bf16 %v15283_v53, %v15200_v13  ;;  %v3205_v38 = vadd.bf16 %v3189_v3, %v3148_v37  ;;  %v4210_v58 = vrot.slane %v4208_v12, 3  ;;  %v4213_v39 = vrot.slane %v4211_v35, 4  ;;  %v4705_v47 = vld [vmem:[#allocation2 + $0x138] sm:$0xf]  ;;  %v15288_v13 = vld [vmem:[#allocation131_spill] sm:$0xff] }
 0x4e2   : > { %v3657_v51 = vadd.bf16 %v3641_v41, %v3603_v14  ;;  %v4218_v7 = vrot.slane %v4216_v36, 3  ;;  %v4221_v55 = vrot.slane %v4219_v24, 4  ;;  %v12443_v8 = vmin.bf16 %v14114_v50, %v2399_v43  ;;  %v15289_v12 = vld [vmem:[#allocation67_spill] sm:$0xff]  ;;  %v15290_v14 = vld [vmem:[#allocation213_spill] sm:$0xff]  ;;  %v15292_v41 = vld [vmem:[#allocation132_spill] sm:$0xff] }
 0x4e3   : > { %v3261_v34 = vadd.bf16 %v3245_v9, %v3205_v38  ;;  %v4214_v16 = vor.u32 %v4213_v39, %v4210_v58  ;;  %v4423_v53 = vmul.bf16 %v15288_v13, %v15287_v54  ;;  %v4387_v37 = vadd.bf16 %v4371_v52, %v4335_v28  ;;  %v15291_v24 = vld [vmem:[#allocation55_spill] sm:$0xff]  ;;  %v15293_v60 = vld [vmem:[#allocation190_spill] sm:$0xff]  ;;  %v15296_v58 = vld [vmem:[#allocation92_spill] sm:$0xff] }
 0x4e4   : > { %15286 = vst [vmem:[#allocation113_spill] sm:$0xff] %v12443_v8  ;;  %v3712_v11 = vadd.bf16 %v3696_v15, %v3657_v51  ;;  %v4222_v3 = vor.u32 %v4221_v55, %v4218_v7  ;;  %v4475_v36 = vmul.bf16 %v15290_v14, %v15289_v12  ;;  %v4527_v35 = vmul.bf16 %v15292_v41, %v15291_v24  ;;  %v15297_v15 = vld [vmem:[#allocation221_spill] sm:$0xff]  ;;  %v5266_v55 = vld [vmem:[#allocation2 + $0x130] sm:$0xf0]  ;;  %v15300_v41 = vld [vmem:[#allocation171_spill] sm:$0xff] }
 0x4e5   : > { %v4579_v6 = vmul.bf16 %v15294_v22, %v15293_v60  ;;  %v4811_v23 = vrot.slane %v4704_v57, 4  ;;  %v4812_v43 = vrot.slane %v4705_v47, 4  ;;  %v4439_v39 = vadd.bf16 %v4423_v53, %v4387_v37  ;;  %v15298_v38 = vld [vmem:[#allocation170_spill] sm:$0xff]  ;;  %v15301_v57 = vld [vmem:[#allocation61_spill] sm:$0xff]  ;;  %v15302_v47 = vld [vmem:[#allocation223_spill] sm:$0xff] }
 0x4e6   : > { %v3766_v8 = vadd.bf16 %v3750_v45, %v3712_v11  ;;  %v12454_v9 = vsel %vm1015_vm0, %v4214_v16, %v4222_v3  ;;  %v4897_v7 = vmul.bf16 %v15297_v15, %v15296_v58  ;;  %v15299_v52 = vld [vmem:[#allocation218_spill] sm:$0xff]  ;;  %v4985_v45 = vmul.bf16 %v15302_v47, %v15301_v57  ;;  %v15304_v58 = vld [vmem:[#allocation224_spill] sm:$0xff] }
 0x4e7   : > { %15295 = vst [vmem:[#allocation205_spill] sm:$0xff] %v12454_v9  ;;  %v4631_v51 = vmul.bf16 %v15298_v38, %v12454_v9  ;;  %v12461_v28 = vsel %vm1578_vm1, %v4811_v23, %v4812_v43  ;;  %v4933_v22 = vmul.bf16 %v15300_v41, %v15299_v52  ;;  %v5267_v11 = vld [vmem:[#allocation2 + $0x138] sm:$0x1f]  ;;  %v4491_v3 = vadd.bf16 %v4475_v36, %v4439_v39 }
 0x4e8   : > { %v3821_v16 = vadd.bf16 %v3805_v48, %v3766_v8  ;;  %v15303_v53 = vld [vmem:[#allocation174_spill] sm:$0xff]  ;;  %v5089_v15 = vmul.bf16 %v15304_v58, %v15219_v4  ;;  %v15305_v38 = vld [vmem:[#allocation175_spill] sm:$0xff]  ;;  %v5193_v43 = vmul.bf16 %v15221_v25, %v12461_v28  ;;  %v5596_v41 = vshrl.u32 %v5266_v55, 16 }
 0x4e9   : > { %v5037_v37 = vmul.bf16 %v15303_v53, %v15217_v40  ;;  %v4949_v60 = vadd.bf16 %v4933_v22, %v4897_v7  ;;  %v5141_v23 = vmul.bf16 %v15305_v38, %v12310_v26  ;;  %v4543_v9 = vadd.bf16 %v4527_v35, %v4491_v3  ;;  %v6092_v38 = vld [vmem:[#allocation2 + $0x130] sm:$0xe0] }
 0x4ea   : > { %v3837_v52 = vadd.bf16 %v3821_v16, %v3261_v34  ;;  %v5599_v47 = vshll.u32 %v5266_v55, 16  ;;  %v5604_v57 = vshrl.u32 %v5267_v11, 16  ;;  %v5598_v8 = vrot.slane %v5596_v41, 4  ;;  %v15306_v34 = vld [vmem:[#allocation106_spill] sm:$0xff]  ;;  %v15307_v55 = vld [vmem:[#allocation232_spill] sm:$0xff] }
 0x4eb   : > { %v5001_v48 = vadd.bf16 %v4985_v45, %v4949_v60  ;;  %v5607_v36 = vshll.u32 %v5267_v11, 16  ;;  %v5723_v39 = vmul.bf16 %v15134_v5, %v15045_v46  ;;  %v4595_v53 = vadd.bf16 %v4579_v6, %v4543_v9  ;;  %v6093_v41 = vld [vmem:[#allocation2 + $0x138] sm:$0x1f]  ;;  %v15308_v46 = vld [vmem:[#allocation129_spill] sm:$0xff] }
 0x4ec   : > { %v5601_v58 = vrot.slane %v5599_v47, 5  ;;  %v5606_v22 = vrot.slane %v5604_v57, 4  ;;  %v5759_v7 = vmul.bf16 %v15135_v20, %v11663_v49  ;;  %v5811_v35 = vmul.bf16 %v15306_v34, %v11844_v27 }
 0x4ed   : > { %v5053_v26 = vadd.bf16 %v5037_v37, %v5001_v48  ;;  %v5609_v25 = vrot.slane %v5607_v36, 5  ;;  %v5863_v60 = vmul.bf16 %v15307_v55, %v12015_v2  ;;  %v4647_v45 = vadd.bf16 %v4631_v51, %v4595_v53  ;;  %v15309_v53 = vld [vmem:[#allocation219_spill] sm:$0xff] }
 0x4ee   : > { %v5602_v11 = vor.u32 %v5601_v58, %v5598_v8  ;;  %v5775_v16 = vadd.bf16 %v5759_v7, %v5723_v39  ;;  %v5915_v6 = vmul.bf16 %v15308_v46, %v12178_v62  ;;  %v5967_v47 = vmul.bf16 %v15222_v42, %v12335_v44  ;;  %v15310_v58 = vld [vmem:[#allocation30_spill] sm:$0xff]  ;;  %v15314_v7 = vld [vmem:[#allocation203_spill] sm:$0xff] }
 0x4ef   : > { %v5105_v9 = vadd.bf16 %v5089_v15, %v5053_v26  ;;  %v5610_v57 = vor.u32 %v5609_v25, %v5606_v22  ;;  %v6200_v3 = vrot.slane %v6092_v38, 5  ;;  %v4663_v37 = vadd.bf16 %v4647_v45, %v3837_v52  ;;  %v15311_v26 = vld [vmem:[#allocation239_spill] sm:$0xff]  ;;  %v6655_v15 = vld [vmem:[#allocation2 + $0x130] sm:$0xe0]  ;;  %v15312_v38 = vld [vmem:[#allocation69_spill] sm:$0xff] }
 0x4f0   : > { %v5827_v48 = vadd.bf16 %v5811_v35, %v5775_v16  ;;  %v6201_v36 = vrot.slane %v6093_v41, 5  ;;  %v6286_v34 = vmul.bf16 %v15224_v61, %v15225_v56  ;;  %v6322_v8 = vmul.bf16 %v15310_v58, %v15309_v53  ;;  %v15315_v56 = vld [vmem:[#allocation32_spill] sm:$0xff]  ;;  %v6656_v35 = vld [vmem:[#allocation2 + $0x138] sm:$0x3f]  ;;  %v12503_v41 = vpop.f32.mrb[0].mxu1 }
 0x4f1   : > { %v5157_v55 = vadd.bf16 %v5141_v23, %v5105_v9  ;;  %v12490_v51 = vsel %vm1861_vm2, %v5602_v11, %v5610_v57  ;;  %v6374_v25 = vmul.bf16 %v15311_v26, %v11853_v0  ;;  %v6426_v23 = vmul.bf16 %v15315_v56, %v15314_v7  ;;  %15316 = vst [vmem:[#allocation123_spill] sm:$0xff] %v12503_v41  ;;  %v15317_v16 = vld [vmem:[#allocation74_spill] sm:$0xff]  ;;  %v15318_v9 = vld [vmem:[#allocation241_spill] sm:$0xff] }
 0x4f2   : > { %v5879_v39 = vadd.bf16 %v5863_v60, %v5827_v48  ;;  %v6019_v52 = vmul.bf16 %v15312_v38, %v12490_v51  ;;  %v12499_v22 = vsel %vm6142_vm5, %v6200_v3, %v6201_v36  ;;  %v6338_v11 = vadd.bf16 %v6322_v8, %v6286_v34  ;;  %v15319_v26 = vld [vmem:[#allocation242_spill] sm:$0xff]  ;;  %v12509_v48 = vpop.f32.mrb[1].mxu1  ;;  %v15321_v3 = vld [vmem:[#allocation243_spill] sm:$0xff] }
 0x4f3   : > { %15313 = vst [vmem:[#allocation122_spill] sm:$0xff] %v12499_v22  ;;  %v5209_v45 = vadd.bf16 %v5193_v43, %v5157_v55  ;;  %v6478_v57 = vmul.bf16 %v15318_v9, %v15317_v16  ;;  %v6530_v60 = vmul.bf16 %v15319_v26, %v12342_v17  ;;  %15320 = vst [vmem:[#allocation125_spill] sm:$0xff] %v12509_v48  ;;  %v6986_v58 = vshrl.u32 %v6655_v15, 16  ;;  %v12513_v56 = vpop.f32.mrb[2].mxu1 }
 0x4f4   : > { %v5931_v38 = vadd.bf16 %v5915_v6, %v5879_v39  ;;  %v6582_v36 = vmul.bf16 %v15321_v3, %v12499_v22  ;;  %v6989_v0 = vshll.u32 %v6655_v15, 16  ;;  %15322 = vst [vmem:[#allocation126_spill] sm:$0xff] %v12513_v56  ;;  %v6390_v41 = vadd.bf16 %v6374_v25, %v6338_v11  ;;  %v12515_v55 = vpop.f32.mrb[3].mxu1 }
 0x4f5   : > { %v5225_v7 = vadd.bf16 %v5209_v45, %v4663_v37  ;;  %v6994_v43 = vshrl.u32 %v6656_v35, 16  ;;  %v6997_v34 = vshll.u32 %v6656_v35, 16  ;;  %15323 = vst [vmem:[#allocation214_spill] sm:$0xff] %v12515_v55  ;;  %v6988_v9 = vrot.slane %v6986_v58, 5  ;;  %v12519_v6 = vpop.f32.mrb[4].mxu1 }
 0x4f6   : > { %v5983_v8 = vadd.bf16 %v5967_v47, %v5931_v38  ;;  %v6991_v16 = vrot.slane %v6989_v0, 6  ;;  %v7113_v48 = vmul.bf16 %v14631_v32, %v11516_v18  ;;  %15324 = vst [vmem:[#allocation121_spill] sm:$0xff] %v12519_v6  ;;  %v6442_v39 = vadd.bf16 %v6426_v23, %v6390_v41  ;;  %v1011_v37 = vld [vmem:[#allocation2 + $0x120] sm:$0xf8]  ;;  %v12523_v25 = vpop.f32.mrb[5].mxu1  ;;  %v15326_v47 = vld [vmem:[#allocation246_spill] sm:$0xff] }
 0x4f7   : > { %v6996_v3 = vrot.slane %v6994_v43, 5  ;;  %v6999_v26 = vrot.slane %v6997_v34, 6  ;;  %v7149_v15 = vmul.bf16 %v15235_v33, %v14960_v31  ;;  %15325 = vst [vmem:[#allocation120_spill] sm:$0xff] %v12523_v25  ;;  %v7201_v58 = vmul.bf16 %v15326_v47, %v11878_v29  ;;  %v15327_v0 = vld [vmem:[#allocation247_spill] sm:$0xff]  ;;  %v1012_v18 = vld [vmem:[#allocation2 + $0x128] sm:$0xf] }
 0x4f8   : > { %v6035_v35 = vadd.bf16 %v6019_v52, %v5983_v8  ;;  %v6992_v45 = vor.u32 %v6991_v16, %v6988_v9  ;;  %v7253_v38 = vmul.bf16 %v15327_v0, %v12049_v21  ;;  %v12529_v11 = vpop.f32.mrb[6].mxu1  ;;  %v6494_v23 = vadd.bf16 %v6478_v57, %v6442_v39  ;;  %v15329_v34 = vld [vmem:[#allocation220_spill] sm:$0xff]  ;;  %v15332_v52 = vld [vmem:[#allocation249_spill] sm:$0xff]  ;;  %v15336_v39 = vld [vmem:[#allocation251_spill] sm:$0xff] }
 0x4f9   : > { %15328 = vst [vmem:[#allocation124_spill] sm:$0xff] %v12529_v11  ;;  %v7000_v41 = vor.u32 %v6999_v26, %v6996_v3  ;;  %v7165_v43 = vadd.bf16 %v7149_v15, %v7113_v48  ;;  %v15330_v6 = vld [vmem:[#allocation248_spill] sm:$0xff]  ;;  %v12533_v56 = vpop.f32.mrb[7].mxu1  ;;  %v7357_v16 = vmul.bf16 %v15332_v52, %v12367_v59  ;;  %v1289_v9 = vshrl.u32 %v1011_v37, 16 }
 0x4fa   : > { %v7305_v55 = vmul.bf16 %v15330_v6, %v15329_v34  ;;  %15331 = vst [vmem:[#allocation127_spill] sm:$0xff] %v12533_v56  ;;  %v6051_v25 = vadd.bf16 %v6035_v35, %v5225_v7  ;;  %v1292_v8 = vshll.u32 %v1011_v37, 16  ;;  %v12537_v47 = vpop.f32.mrb[8].mxu1  ;;  %v6546_v0 = vadd.bf16 %v6530_v60, %v6494_v23  ;;  %v1538_v48 = vld [vmem:[#allocation2 + $0x120] sm:$0xf0]  ;;  %v15340_v6 = vld [vmem:[#allocation23_spill] sm:$0xff] }
 0x4fb   : > { %15333 = vst [vmem:[#allocation238_spill] sm:$0xff] %v12537_v47  ;;  %v12540_v21 = vsel %vm6661_vm6, %v6992_v45, %v7000_v41  ;;  %v7217_v57 = vadd.bf16 %v7201_v58, %v7165_v43  ;;  %v1297_v26 = vshrl.u32 %v1012_v18, 16  ;;  %v12542_v3 = vpop.f32.mrb[9].mxu1  ;;  %v1291_v7 = vrot.slane %v1289_v9, 3  ;;  %v1539_v11 = vld [vmem:[#allocation2 + $0x128] sm:$0xf] }
 0x4fc   : > { %15334 = vst [vmem:[#allocation240_spill] sm:$0xff] %v12540_v21  ;;  %15335 = vst [vmem:[#allocation216_spill] sm:$0xff] %v12542_v3  ;;  %v7412_v15 = vmul.bf16 %v15336_v39, %v12540_v21  ;;  %v1294_v35 = vrot.slane %v1292_v8, 4  ;;  %v1300_v56 = vshll.u32 %v1012_v18, 16  ;;  %v12546_v52 = vpop.f32.mrb[10].mxu1  ;;  %v6598_v37 = vadd.bf16 %v6582_v36, %v6546_v0  ;;  %v15338_v45 = vld [vmem:[#allocation22_spill] sm:$0xff] }
 0x4fd   : > { %15337 = vst [vmem:[#allocation40_spill] sm:$0xff] %v12546_v52  ;;  %v7269_v47 = vadd.bf16 %v7253_v38, %v7217_v57  ;;  %v1299_v60 = vrot.slane %v1297_v26, 3  ;;  %v1395_v23 = vmul.bf16 %v15338_v45, %v15241_v1  ;;  %v1857_v58 = vld [vmem:[#allocation2 + $0x120] sm:$0xf0]  ;;  %v12550_v41 = vpop.f32.mrb[11].mxu1  ;;  %v1435_v39 = vmul.bf16 %v15340_v6, %v12383_v63  ;;  %v15342_v0 = vld [vmem:[#allocation78_spill] sm:$0xff] }
 0x4fe   : > { %15339 = vst [vmem:[#allocation51_spill] sm:$0xff] %v12550_v41  ;;  %v1295_v43 = vor.u32 %v1294_v35, %v1291_v7  ;;  %v1302_v3 = vrot.slane %v1300_v56, 4  ;;  %v1627_v9 = vrot.slane %v1538_v48, 4  ;;  %v1858_v8 = vld [vmem:[#allocation2 + $0x128] sm:$0x1f]  ;;  %v12554_v18 = vpop.f32.mrb[12].mxu1  ;;  %v6614_v21 = vadd.bf16 %v6598_v37, %v6051_v25 }
 0x4ff   : > { %15341 = vst [vmem:[#allocation210_spill] sm:$0xff] %v12554_v18  ;;  %v7321_v52 = vadd.bf16 %v7305_v55, %v7269_v47  ;;  %v1628_v36 = vrot.slane %v1539_v11, 4  ;;  %v15343_v38 = vld [vmem:[#allocation19_spill] sm:$0xff]  ;;  %v12558_v26 = vpop.f32.mrb[13].mxu1  ;;  %v1451_v45 = vadd.bf16 %v1435_v39, %v1395_v23  ;;  %v15345_v41 = vld [vmem:[#allocation117_spill] sm:$0xff]  ;;  %v15346_v7 = vld [vmem:[#allocation20_spill] sm:$0xff] }
 0x500   : > { %v1703_v57 = vmul.bf16 %v15343_v38, %v15342_v0  ;;  %15344 = vst [vmem:[#allocation200_spill] sm:$0xff] %v12558_v26  ;;  %v1303_v1 = vor.u32 %v1302_v3, %v1299_v60  ;;  %v1739_v56 = vmul.bf16 %v15346_v7, %v15345_v41  ;;  %v2135_v35 = vshrl.u32 %v1857_v58, 16  ;;  %v12562_v59 = vpop.f32.mrb[14].mxu1  ;;  %v15350_v3 = vld [vmem:[#allocation21_spill] sm:$0xff]  ;;  %v2466_v23 = vld [vmem:[#allocation2 + $0x140] sm:$0xfc] }
 0x501   : > { %15347 = vst [vmem:[#allocation103_spill] sm:$0xff] %v12562_v59  ;;  %v7373_v48 = vadd.bf16 %v7357_v16, %v7321_v52  ;;  %v12565_v6 = vsel %vm1578_vm1, %v1627_v9, %v1628_v36  ;;  %v2138_v25 = vshll.u32 %v1857_v58, 16  ;;  %v2143_v55 = vshrl.u32 %v1858_v8, 16  ;;  %v12567_v47 = vpop.f32.mrb[15].mxu1  ;;  %v15351_v59 = vld [vmem:[#allocation24_spill] sm:$0xff] }
 0x502   : > { %15348 = vst [vmem:[#allocation102_spill] sm:$0xff] %v12565_v6  ;;  %15349 = vst [vmem:[#allocation101_spill] sm:$0xff] %v12567_v47  ;;  %v12570_v11 = vsel %vm1015_vm0, %v1295_v43, %v1303_v1  ;;  %v1755_v37 = vadd.bf16 %v1739_v56, %v1703_v57  ;;  %v1791_v39 = vmul.bf16 %v15350_v3, %v12565_v6  ;;  %v2137_v60 = vrot.slane %v2135_v35, 4  ;;  %v2467_v36 = vld [vmem:[#allocation2 + $0x148] sm:$0x7]  ;;  %v15352_v43 = vld [vmem:[#allocation26_spill] sm:$0xff] }
 0x503   : > { %v7428_v0 = vadd.bf16 %v7412_v15, %v7373_v48  ;;  %v1488_v52 = vmul.bf16 %v15351_v59, %v12570_v11  ;;  %v2140_v16 = vrot.slane %v2138_v25, 5  ;;  %v2145_v9 = vrot.slane %v2143_v55, 4  ;;  %v15353_v59 = vld [vmem:[#allocation252_spill] sm:$0xff] }
 0x504   : > { %v1807_v58 = vadd.bf16 %v1791_v39, %v1755_v37  ;;  %v2146_v26 = vshll.u32 %v1858_v8, 16  ;;  %v2238_v47 = vmul.bf16 %v15163_v30, %v15250_v19  ;;  %v2274_v57 = vmul.bf16 %v15352_v43, %v12400_v10  ;;  %v15354_v19 = vld [vmem:[#allocation34_spill] sm:$0xff]  ;;  %v15355_v30 = vld [vmem:[#allocation31_spill] sm:$0xff] }
 0x505   : > { %v7444_v1 = vadd.bf16 %v7428_v0, %v6614_v21  ;;  %v1504_v56 = vadd.bf16 %v1488_v52, %v1451_v45  ;;  %v2141_v18 = vor.u32 %v2140_v16, %v2137_v60  ;;  %v2812_v35 = vshrl.u32 %v2466_v23, 16  ;;  %v15357_v60 = vld [vmem:[#allocation235_spill] sm:$0xff]  ;;  %v15358_v0 = vld [vmem:[#allocation196_spill] sm:$0xff] }
 0x506   : > { %v2148_v3 = vrot.slane %v2146_v26, 5  ;;  %v2290_v15 = vadd.bf16 %v2274_v57, %v2238_v47  ;;  %v2815_v48 = vshll.u32 %v2466_v23, 16  ;;  %v2820_v7 = vshrl.u32 %v2467_v36, 16  ;;  %v15359_v47 = vld [vmem:[#allocation71_spill] sm:$0xff]  ;;  %v15360_v23 = vld [vmem:[#allocation33_spill] sm:$0xff] }
 0x507   : > { %v7467_v25 = vadd.bf16 %v15353_v59, %v7444_v1  ;;  %v1823_v55 = vadd.bf16 %v1807_v58, %v1504_v56  ;;  %v2814_v6 = vrot.slane %v2812_v35, 2  ;;  %v2823_v37 = vshll.u32 %v2467_v36, 16  ;;  %v3304_v16 = vld [vmem:[#allocation2 + $0x140] sm:$0xf8]  ;;  %v3305_v57 = vld [vmem:[#allocation2 + $0x148] sm:$0x7] }
 0x508   : > { %v2149_v8 = vor.u32 %v2148_v3, %v2145_v9  ;;  %v2817_v39 = vrot.slane %v2815_v48, 3  ;;  %v2822_v38 = vrot.slane %v2820_v7, 2  ;;  %v2926_v41 = vmul.bf16 %v15355_v30, %v15354_v19  ;;  %v15362_v9 = vld [vmem:[#allocation80_spill] sm:$0xff]  ;;  %v15363_v7 = vld [vmem:[#allocation197_spill] sm:$0xff]  ;;  %v15364_v1 = vld [vmem:[#allocation191_spill] sm:$0xff] }
 0x509   : > { %v15356_v43 = vmov 0   ;;  %v2825_v45 = vrot.slane %v2823_v37, 3  ;;  %v2965_v26 = vmul.bf16 %v15358_v0, %v15357_v60  ;;  %v3020_v52 = vmul.bf16 %v15360_v23, %v15359_v47  ;;  %v15365_v56 = vld [vmem:[#allocation36_spill] sm:$0xff]  ;;  %v15367_v23 = vld [vmem:[#allocation195_spill] sm:$0xff]  ;;  %v15368_v47 = vld [vmem:[#allocation198_spill] sm:$0xff] }
 0x50a   : > { %v7483_v21 = vmax.bf16 %v15356_v43, %v7467_v25  ;;  %v12589_v58 = vsel %vm1861_vm2, %v2141_v18, %v2149_v8  ;;  %v2818_v3 = vor.u32 %v2817_v39, %v2814_v6  ;;  %v3077_v36 = vmul.bf16 %v15363_v7, %v15362_v9  ;;  %v15366_v25 = vld [vmem:[#allocation27_spill] sm:$0xff]  ;;  %v15369_v8 = vld [vmem:[#allocation194_spill] sm:$0xff]  ;;  %v15370_v6 = vld [vmem:[#allocation204_spill] sm:$0xff] }
 0x50b   : > { %15361 = vst [vmem:[#allocation100_spill] sm:$0xff] %v12589_v58  ;;  %v3133_v35 = vmul.bf16 %v15365_v56, %v15364_v1  ;;  %v2329_v37 = vmul.bf16 %v15366_v25, %v12589_v58  ;;  %v2826_v19 = vor.u32 %v2825_v45, %v2822_v38  ;;  %v2981_v0 = vadd.bf16 %v2965_v26, %v2926_v41  ;;  %v15371_v59 = vld [vmem:[#allocation113_spill] sm:$0xff]  ;;  %v3880_v1 = vld [vmem:[#allocation2 + $0x140] sm:$0xf8]  ;;  %v15375_v45 = vld [vmem:[#allocation62_spill] sm:$0xff] }
 0x50c   : > { %v7499_v48 = vmin.bf16 %v14114_v50, %v7483_v21  ;;  %v3190_v30 = vmul.bf16 %v15368_v47, %v15367_v23  ;;  %v3413_v60 = vrot.slane %v3304_v16, 3  ;;  %v3414_v18 = vrot.slane %v3305_v57, 3  ;;  %v15373_v25 = vld [vmem:[#allocation83_spill] sm:$0xff]  ;;  %v15376_v26 = vld [vmem:[#allocation98_spill] sm:$0xff]  ;;  %v15377_v57 = vld [vmem:[#allocation193_spill] sm:$0xff] }
 0x50d   : > { %v3497_v39 = vmul.bf16 %v15370_v6, %v15369_v8  ;;  %v2345_v9 = vadd.bf16 %v2329_v37, %v2290_v15  ;;  %v12604_v56 = vsel %vm2470_vm3, %v2818_v3, %v2826_v19  ;;  %v3036_v21 = vadd.bf16 %v3020_v52, %v2981_v0  ;;  %v15378_v47 = vld [vmem:[#allocation206_spill] sm:$0xff]  ;;  %v3881_v6 = vld [vmem:[#allocation2 + $0x148] sm:$0xf]  ;;  %v15382_v37 = vld [vmem:[#allocation207_spill] sm:$0xff] }
 0x50e   : > { %v7515_v7 = vadd.bf16 %v7499_v48, %v15371_v59  ;;  %15372 = vst [vmem:[#allocation68_spill] sm:$0xff] %v12604_v56  ;;  %v3246_v38 = vmul.bf16 %v15373_v25, %v12604_v56  ;;  %v12609_v41 = vsel %vm3352_vm4, %v3413_v60, %v3414_v18  ;;  %v3533_v16 = vmul.bf16 %v15376_v26, %v15375_v45  ;;  %v15379_v3 = vld [vmem:[#allocation212_spill] sm:$0xff]  ;;  %v15380_v48 = vld [vmem:[#allocation114_spill] sm:$0xff]  ;;  %v15383_v56 = vld [vmem:[#allocation115_spill] sm:$0xff] }
 0x50f   : > { %15374 = vst [vmem:[#allocation99_spill] sm:$0xff] %v12609_v41  ;;  %v3588_v8 = vmul.bf16 %v15378_v47, %v15377_v57  ;;  %v2361_v59 = vadd.bf16 %v2345_v9, %v1823_v55  ;;  %v3093_v15 = vadd.bf16 %v3077_v36, %v3036_v21  ;;  %v3642_v0 = vmul.bf16 %v15380_v48, %v15379_v3  ;;  %v15381_v52 = vld [vmem:[#allocation64_spill] sm:$0xff]  ;;  %v15384_v60 = vld [vmem:[#allocation163_spill] sm:$0xff]  ;;  %v15387_v48 = vld [vmem:[#allocation89_spill] sm:$0xff] }
 0x510   : > { %8266 = vmatmul.mubr.bf16.gmra.mrb[24].mxu1 %v7515_v7  ;;  %v3697_v19 = vmul.bf16 %v15382_v37, %v15381_v52  ;;  %v3549_v25 = vadd.bf16 %v3533_v16, %v3497_v39  ;;  %v3751_v18 = vmul.bf16 %v15384_v60, %v15383_v56  ;;  %v15385_v23 = vld [vmem:[#allocation208_spill] sm:$0xff]  ;;  %v4225_v45 = vshrl.u32 %v3880_v1, 16  ;;  %v15388_v3 = vld [vmem:[#allocation130_spill] sm:$0xff] }
 0x511   : > { %v3806_v26 = vmul.bf16 %v15385_v23, %v12609_v41  ;;  %v15386_v58 = vld [vmem:[#allocation28_spill] sm:$0xff]  ;;  %v3149_v57 = vadd.bf16 %v3133_v35, %v3093_v15  ;;  %v4228_v7 = vshll.u32 %v3880_v1, 16  ;;  %v4233_v55 = vshrl.u32 %v3881_v6, 16  ;;  %v15389_v23 = vld [vmem:[#allocation35_spill] sm:$0xff]  ;;  %v15390_v15 = vld [vmem:[#allocation190_spill] sm:$0xff] }
 0x512   : > { %v2384_v47 = vadd.bf16 %v15386_v58, %v2361_v59  ;;  %v3604_v9 = vadd.bf16 %v3588_v8, %v3549_v25  ;;  %v4227_v36 = vrot.slane %v4225_v45, 3  ;;  %v4236_v21 = vshll.u32 %v3881_v6, 16  ;;  %v4706_v35 = vld [vmem:[#allocation2 + $0x140] sm:$0xf0]  ;;  %v4707_v25 = vld [vmem:[#allocation2 + $0x148] sm:$0xf] }
 0x513   : > { %v4336_v10 = vmul.bf16 %v15388_v3, %v15387_v48  ;;  %v3206_v16 = vadd.bf16 %v3190_v30, %v3149_v57  ;;  %v4230_v37 = vrot.slane %v4228_v7, 4  ;;  %v4235_v60 = vrot.slane %v4233_v55, 3  ;;  %v15391_v48 = vld [vmem:[#allocation132_spill] sm:$0xff]  ;;  %v15392_v7 = vld [vmem:[#allocation205_spill] sm:$0xff]  ;;  %v15393_v55 = vld [vmem:[#allocation215_spill] sm:$0xff] }
 0x514   : > { %v2400_v39 = vmax.bf16 %v15356_v43, %v2384_v47  ;;  %v3658_v56 = vadd.bf16 %v3642_v0, %v3604_v9  ;;  %v4238_v52 = vrot.slane %v4236_v21, 4  ;;  %v4372_v41 = vmul.bf16 %v15389_v23, %v15287_v54  ;;  %v15394_v23 = vld [vmem:[#allocation218_spill] sm:$0xff] }
 0x515   : > { %v4424_v1 = vmul.bf16 %v15288_v13, %v15289_v12  ;;  %v3262_v45 = vadd.bf16 %v3246_v38, %v3206_v16  ;;  %v4231_v8 = vor.u32 %v4230_v37, %v4227_v36  ;;  %v4476_v30 = vmul.bf16 %v15290_v14, %v15291_v24  ;;  %v15395_v12 = vld [vmem:[#allocation221_spill] sm:$0xff]  ;;  %v15401_v16 = vld [vmem:[#allocation223_spill] sm:$0xff] }
 0x516   : > { %v12632_v6 = vmin.bf16 %v14114_v50, %v2400_v39  ;;  %v3713_v47 = vadd.bf16 %v3697_v19, %v3658_v56  ;;  %v4239_v57 = vor.u32 %v4238_v52, %v4235_v60  ;;  %v4388_v59 = vadd.bf16 %v4372_v41, %v4336_v10  ;;  %v15397_v36 = vld [vmem:[#allocation61_spill] sm:$0xff]  ;;  %v15398_v56 = vld [vmem:[#allocation171_spill] sm:$0xff]  ;;  %v5268_v10 = vld [vmem:[#allocation2 + $0x140] sm:$0xf0] }
 0x517   : > { %v4528_v0 = vmul.bf16 %v15391_v48, %v15390_v15  ;;  %v4580_v9 = vmul.bf16 %v15393_v55, %v15392_v7  ;;  %v4814_v21 = vrot.slane %v4706_v35, 4  ;;  %v4815_v13 = vrot.slane %v4707_v25, 4  ;;  %v15399_v41 = vld [vmem:[#allocation170_spill] sm:$0xff]  ;;  %v5269_v25 = vld [vmem:[#allocation2 + $0x148] sm:$0x1f] }
 0x518   : > { %v4898_v39 = vmul.bf16 %v15395_v12, %v15394_v23  ;;  %v3767_v3 = vadd.bf16 %v3751_v18, %v3713_v47  ;;  %v12643_v38 = vsel %vm1015_vm0, %v4231_v8, %v4239_v57  ;;  %v4440_v37 = vadd.bf16 %v4424_v1, %v4388_v59  ;;  %v15402_v23 = vld [vmem:[#allocation174_spill] sm:$0xff]  ;;  %v15403_v57 = vld [vmem:[#allocation228_spill] sm:$0xff]  ;;  %v15405_v12 = vld [vmem:[#allocation175_spill] sm:$0xff] }
 0x519   : > { %15396 = vst [vmem:[#allocation97_spill] sm:$0xff] %v12643_v38  ;;  %v4934_v52 = vmul.bf16 %v15398_v56, %v15397_v36  ;;  %v4632_v19 = vmul.bf16 %v15399_v41, %v12643_v38  ;;  %v12650_v60 = vsel %vm1578_vm1, %v4814_v21, %v4815_v13  ;;  %v4986_v35 = vmul.bf16 %v15401_v16, %v15217_v40  ;;  %v15404_v59 = vld [vmem:[#allocation224_spill] sm:$0xff]  ;;  %v15406_v41 = vld [vmem:[#allocation225_spill] sm:$0xff] }
 0x51a   : > { %15400 = vst [vmem:[#allocation202_spill] sm:$0xff] %v12650_v60  ;;  %v5038_v18 = vmul.bf16 %v15402_v23, %v15219_v4  ;;  %v3822_v8 = vadd.bf16 %v3806_v26, %v3767_v3  ;;  %v4492_v47 = vadd.bf16 %v4476_v30, %v4440_v37  ;;  %v5090_v56 = vmul.bf16 %v15404_v59, %v15403_v57 }
 0x51b   : > { %v4950_v1 = vadd.bf16 %v4934_v52, %v4898_v39  ;;  %v5142_v36 = vmul.bf16 %v15405_v12, %v12461_v28  ;;  %v5194_v13 = vmul.bf16 %v15406_v41, %v12650_v60  ;;  %v5613_v21 = vshrl.u32 %v5268_v10, 16  ;;  %v6094_v12 = vld [vmem:[#allocation2 + $0x140] sm:$0xe0]  ;;  %v6095_v41 = vld [vmem:[#allocation2 + $0x148] sm:$0x1f] }
 0x51c   : > { %v5616_v55 = vshll.u32 %v5268_v10, 16  ;;  %v3838_v38 = vadd.bf16 %v3822_v8, %v3262_v45  ;;  %v4544_v16 = vadd.bf16 %v4528_v0, %v4492_v47  ;;  %v5621_v48 = vshrl.u32 %v5269_v25, 16  ;;  %v15407_v45 = vld [vmem:[#allocation106_spill] sm:$0xff] }
 0x51d   : > { %v5002_v40 = vadd.bf16 %v4986_v35, %v4950_v1  ;;  %v5615_v23 = vrot.slane %v5613_v21, 4  ;;  %v5624_v26 = vshll.u32 %v5269_v25, 16  ;;  %v5724_v3 = vmul.bf16 %v15134_v5, %v11663_v49  ;;  %v15408_v35 = vld [vmem:[#allocation232_spill] sm:$0xff] }
 0x51e   : > { %v5618_v4 = vrot.slane %v5616_v55, 5  ;;  %v4596_v30 = vadd.bf16 %v4580_v9, %v4544_v16  ;;  %v5623_v37 = vrot.slane %v5621_v48, 4  ;;  %v5760_v52 = vmul.bf16 %v15135_v20, %v11844_v27 }
 0x51f   : > { %v5054_v39 = vadd.bf16 %v5038_v18, %v5002_v40  ;;  %v5626_v10 = vrot.slane %v5624_v26, 5  ;;  %v5812_v0 = vmul.bf16 %v15407_v45, %v12015_v2  ;;  %v5864_v55 = vmul.bf16 %v15408_v35, %v12178_v62  ;;  %v12672_v40 = vpop.f32.mrb[16].mxu1 }
 0x520   : > { %v5619_v60 = vor.u32 %v5618_v4, %v5615_v23  ;;  %v4648_v25 = vadd.bf16 %v4632_v19, %v4596_v30  ;;  %v5776_v47 = vadd.bf16 %v5760_v52, %v5724_v3  ;;  %v5916_v49 = vmul.bf16 %v15308_v46, %v12335_v44  ;;  %15409 = vst [vmem:[#allocation107_spill] sm:$0xff] %v12672_v40  ;;  %v12676_v23 = vpop.f32.mrb[17].mxu1  ;;  %v15412_v30 = vld [vmem:[#allocation65_spill] sm:$0xff] }
 0x521   : > { %v5106_v8 = vadd.bf16 %v5090_v56, %v5054_v39  ;;  %v5627_v48 = vor.u32 %v5626_v10, %v5623_v37  ;;  %v5968_v9 = vmul.bf16 %v15222_v42, %v12490_v51  ;;  %v6203_v4 = vrot.slane %v6094_v12, 5  ;;  %15410 = vst [vmem:[#allocation108_spill] sm:$0xff] %v12676_v23  ;;  %v12680_v19 = vpop.f32.mrb[18].mxu1  ;;  %v15413_v39 = vld [vmem:[#allocation30_spill] sm:$0xff]  ;;  %v15415_v37 = vld [vmem:[#allocation239_spill] sm:$0xff] }
 0x522   : > { %v6204_v16 = vrot.slane %v6095_v41, 5  ;;  %v4664_v18 = vadd.bf16 %v4648_v25, %v3838_v38  ;;  %v5828_v21 = vadd.bf16 %v5812_v0, %v5776_v47  ;;  %v6287_v56 = vmul.bf16 %v15224_v61, %v15309_v53  ;;  %15411 = vst [vmem:[#allocation110_spill] sm:$0xff] %v12680_v19  ;;  %v15414_v41 = vld [vmem:[#allocation203_spill] sm:$0xff]  ;;  %v6657_v38 = vld [vmem:[#allocation2 + $0x140] sm:$0xe0]  ;;  %v15417_v53 = vld [vmem:[#allocation69_spill] sm:$0xff] }
 0x523   : > { %v5158_v1 = vadd.bf16 %v5142_v36, %v5106_v8  ;;  %v12683_v26 = vsel %vm1861_vm2, %v5619_v60, %v5627_v48  ;;  %v6323_v12 = vmul.bf16 %v15413_v39, %v15412_v30  ;;  %v6375_v52 = vmul.bf16 %v15415_v37, %v15414_v41  ;;  %v12692_v36 = vpop.f32.mrb[19].mxu1  ;;  %v15418_v8 = vld [vmem:[#allocation74_spill] sm:$0xff]  ;;  %v15419_v60 = vld [vmem:[#allocation32_spill] sm:$0xff]  ;;  %v15422_v37 = vld [vmem:[#allocation243_spill] sm:$0xff] }
 0x524   : > { %v12686_v3 = vsel %vm6142_vm5, %v6203_v4, %v6204_v16  ;;  %15416 = vst [vmem:[#allocation111_spill] sm:$0xff] %v12692_v36  ;;  %v5880_v0 = vadd.bf16 %v5864_v55, %v5828_v21  ;;  %v6020_v25 = vmul.bf16 %v15417_v53, %v12683_v26  ;;  %v6427_v47 = vmul.bf16 %v15419_v60, %v15418_v8  ;;  %v6658_v48 = vld [vmem:[#allocation2 + $0x148] sm:$0x3f]  ;;  %v15421_v23 = vld [vmem:[#allocation242_spill] sm:$0xff] }
 0x525   : > { %v5210_v10 = vadd.bf16 %v5194_v13, %v5158_v1  ;;  %v6339_v4 = vadd.bf16 %v6323_v12, %v6287_v56  ;;  %v15420_v16 = vld [vmem:[#allocation241_spill] sm:$0xff]  ;;  %v6531_v40 = vmul.bf16 %v15421_v23, %v12499_v22  ;;  %v6583_v39 = vmul.bf16 %v15422_v37, %v12686_v3  ;;  %v15423_v37 = vld [vmem:[#allocation76_spill] sm:$0xff] }
 0x526   : > { %v6479_v19 = vmul.bf16 %v15420_v16, %v12342_v17  ;;  %v5932_v13 = vadd.bf16 %v5916_v49, %v5880_v0  ;;  %v7003_v55 = vshrl.u32 %v6657_v38, 16  ;;  %v7006_v1 = vshll.u32 %v6657_v38, 16 }
 0x527   : > { %v5226_v36 = vadd.bf16 %v5210_v10, %v4664_v18  ;;  %v6391_v21 = vadd.bf16 %v6375_v52, %v6339_v4  ;;  %v7011_v41 = vshrl.u32 %v6658_v48, 16  ;;  %v7014_v53 = vshll.u32 %v6658_v48, 16  ;;  %v15424_v18 = vld [vmem:[#allocation246_spill] sm:$0xff]  ;;  %v15425_v48 = vld [vmem:[#allocation247_spill] sm:$0xff] }
 0x528   : > { %v7114_v60 = vmul.bf16 %v14631_v32, %v14960_v31  ;;  %v5984_v56 = vadd.bf16 %v5968_v9, %v5932_v13  ;;  %v7005_v12 = vrot.slane %v7003_v55, 5  ;;  %v7008_v8 = vrot.slane %v7006_v1, 6  ;;  %v1013_v10 = vld [vmem:[#allocation2 + $0x130] sm:$0xf8]  ;;  %v1014_v31 = vld [vmem:[#allocation2 + $0x138] sm:$0xf] }
 0x529   : > { %v7150_v16 = vmul.bf16 %v15235_v33, %v11878_v29  ;;  %v6443_v23 = vadd.bf16 %v6427_v47, %v6391_v21  ;;  %v7013_v22 = vrot.slane %v7011_v41, 5  ;;  %v7016_v17 = vrot.slane %v7014_v53, 6  ;;  %v15426_v55 = vld [vmem:[#allocation118_spill] sm:$0xff]  ;;  %v15427_v1 = vld [vmem:[#allocation248_spill] sm:$0xff]  ;;  %v15429_v47 = vld [vmem:[#allocation249_spill] sm:$0xff] }
 0x52a   : > { %v7202_v49 = vmul.bf16 %v15424_v18, %v15423_v37  ;;  %v6036_v38 = vadd.bf16 %v6020_v25, %v5984_v56  ;;  %v7009_v52 = vor.u32 %v7008_v8, %v7005_v12  ;;  %v7254_v4 = vmul.bf16 %v15425_v48, %v15329_v34  ;;  %v15428_v33 = vld [vmem:[#allocation240_spill] sm:$0xff]  ;;  %v1541_v12 = vld [vmem:[#allocation2 + $0x138] sm:$0xf] }
 0x52b   : > { %v7166_v0 = vadd.bf16 %v7150_v16, %v7114_v60  ;;  %v6495_v9 = vadd.bf16 %v6479_v19, %v6443_v23  ;;  %v7017_v13 = vor.u32 %v7016_v17, %v7013_v22  ;;  %v7306_v32 = vmul.bf16 %v15427_v1, %v15426_v55  ;;  %v1540_v16 = vld [vmem:[#allocation2 + $0x130] sm:$0xf0]  ;;  %v15431_v17 = vld [vmem:[#allocation251_spill] sm:$0xff] }
 0x52c   : > { %v7358_v41 = vmul.bf16 %v15429_v47, %v15428_v33  ;;  %v6052_v53 = vadd.bf16 %v6036_v38, %v5226_v36  ;;  %v1306_v29 = vshrl.u32 %v1013_v10, 16  ;;  %v1309_v18 = vshll.u32 %v1013_v10, 16 }
 0x52d   : > { %v7218_v21 = vadd.bf16 %v7202_v49, %v7166_v0  ;;  %v6547_v37 = vadd.bf16 %v6531_v40, %v6495_v9  ;;  %v12717_v25 = vsel %vm6661_vm6, %v7009_v52, %v7017_v13  ;;  %v1314_v8 = vshrl.u32 %v1014_v31, 16  ;;  %v15432_v49 = vld [vmem:[#allocation22_spill] sm:$0xff]  ;;  %v15433_v0 = vld [vmem:[#allocation23_spill] sm:$0xff] }
 0x52e   : > { %15430 = vst [vmem:[#allocation105_spill] sm:$0xff] %v12717_v25  ;;  %v1317_v60 = vshll.u32 %v1014_v31, 16  ;;  %v7413_v22 = vmul.bf16 %v15431_v17, %v12717_v25  ;;  %v1308_v23 = vrot.slane %v1306_v29, 3  ;;  %v1311_v19 = vrot.slane %v1309_v18, 4  ;;  %v1859_v40 = vld [vmem:[#allocation2 + $0x130] sm:$0xf0] }
 0x52f   : > { %v7270_v56 = vadd.bf16 %v7254_v4, %v7218_v21  ;;  %v6599_v1 = vadd.bf16 %v6583_v39, %v6547_v37  ;;  %v1316_v47 = vrot.slane %v1314_v8, 3  ;;  %v1396_v10 = vmul.bf16 %v15432_v49, %v12383_v63  ;;  %v1860_v4 = vld [vmem:[#allocation2 + $0x138] sm:$0x1f]  ;;  %v15434_v29 = vld [vmem:[#allocation117_spill] sm:$0xff] }
 0x530   : > { %v1319_v36 = vrot.slane %v1317_v60, 4  ;;  %v1312_v52 = vor.u32 %v1311_v19, %v1308_v23  ;;  %v1436_v31 = vmul.bf16 %v15433_v0, %v12570_v11  ;;  %v1630_v9 = vrot.slane %v1540_v16, 4  ;;  %v15435_v18 = vld [vmem:[#allocation19_spill] sm:$0xff]  ;;  %v15436_v8 = vld [vmem:[#allocation102_spill] sm:$0xff]  ;;  %v15437_v60 = vld [vmem:[#allocation20_spill] sm:$0xff] }
 0x531   : > { %v7322_v38 = vadd.bf16 %v7306_v32, %v7270_v56  ;;  %v6615_v13 = vadd.bf16 %v6599_v1, %v6052_v53  ;;  %v1631_v17 = vrot.slane %v1541_v12, 4  ;;  %v1704_v25 = vmul.bf16 %v15435_v18, %v15434_v29  ;;  %v15438_v19 = vld [vmem:[#allocation24_spill] sm:$0xff]  ;;  %v15439_v53 = vld [vmem:[#allocation21_spill] sm:$0xff]  ;;  %v2469_v0 = vld [vmem:[#allocation2 + $0x158] sm:$0x7] }
 0x532   : > { %v1320_v21 = vor.u32 %v1319_v36, %v1316_v47  ;;  %v1452_v37 = vadd.bf16 %v1436_v31, %v1396_v10  ;;  %v1740_v33 = vmul.bf16 %v15437_v60, %v15436_v8  ;;  %v2152_v63 = vshrl.u32 %v1859_v40, 16  ;;  %v2468_v36 = vld [vmem:[#allocation2 + $0x150] sm:$0xfc] }
 0x533   : > { %v7374_v39 = vadd.bf16 %v7358_v41, %v7322_v38  ;;  %v1632_v56 = vsel %vm1578_vm1, %v1630_v9, %v1631_v17  ;;  %v2155_v23 = vshll.u32 %v1859_v40, 16  ;;  %v2160_v11 = vshrl.u32 %v1860_v4, 16 }
 0x534   : > { %v1321_v32 = vsel %vm1015_vm0, %v1312_v52, %v1320_v21  ;;  %v1756_v47 = vadd.bf16 %v1740_v33, %v1704_v25  ;;  %v1792_v12 = vmul.bf16 %v15439_v53, %v1632_v56  ;;  %v2154_v49 = vrot.slane %v2152_v63, 4  ;;  %v15440_v52 = vld [vmem:[#allocation116_spill] sm:$0xff]  ;;  %v15441_v21 = vld [vmem:[#allocation25_spill] sm:$0xff] }
 0x535   : > { %v7429_v16 = vadd.bf16 %v7413_v22, %v7374_v39  ;;  %v1489_v1 = vmul.bf16 %v15438_v19, %v1321_v32  ;;  %v2157_v41 = vrot.slane %v2155_v23, 5  ;;  %v2162_v10 = vrot.slane %v2160_v11, 4  ;;  %v15442_v22 = vld [vmem:[#allocation100_spill] sm:$0xff]  ;;  %v15443_v39 = vld [vmem:[#allocation26_spill] sm:$0xff] }
 0x536   : > { %v2163_v38 = vshll.u32 %v1860_v4, 16  ;;  %v1808_v18 = vadd.bf16 %v1792_v12, %v1756_v47  ;;  %v2239_v17 = vmul.bf16 %v15441_v21, %v15440_v52  ;;  %v2275_v8 = vmul.bf16 %v15443_v39, %v15442_v22  ;;  %v15444_v25 = vld [vmem:[#allocation252_spill] sm:$0xff]  ;;  %v15446_v47 = vld [vmem:[#allocation31_spill] sm:$0xff]  ;;  %v3307_v52 = vld [vmem:[#allocation2 + $0x158] sm:$0x7] }
 0x537   : > { %v7445_v31 = vadd.bf16 %v7429_v16, %v6615_v13  ;;  %v1505_v29 = vadd.bf16 %v1489_v1, %v1452_v37  ;;  %v2158_v40 = vor.u32 %v2157_v41, %v2154_v49  ;;  %v2829_v33 = vshrl.u32 %v2468_v36, 16  ;;  %v15445_v1 = vld [vmem:[#allocation235_spill] sm:$0xff]  ;;  %v15453_v39 = vld [vmem:[#allocation197_spill] sm:$0xff] }
 0x538   : > { %v2165_v9 = vrot.slane %v2163_v38, 5  ;;  %v2832_v63 = vshll.u32 %v2468_v36, 16  ;;  %v2837_v56 = vshrl.u32 %v2469_v0, 16  ;;  %v2291_v4 = vadd.bf16 %v2275_v8, %v2239_v17  ;;  %v15447_v41 = vld [vmem:[#allocation71_spill] sm:$0xff]  ;;  %v15448_v38 = vld [vmem:[#allocation196_spill] sm:$0xff]  ;;  %v15450_v36 = vld [vmem:[#allocation33_spill] sm:$0xff] }
 0x539   : > { %v7468_v60 = vadd.bf16 %v15444_v25, %v7445_v31  ;;  %v1824_v32 = vadd.bf16 %v1808_v18, %v1505_v29  ;;  %v2831_v11 = vrot.slane %v2829_v33, 2  ;;  %v2840_v13 = vshll.u32 %v2469_v0, 16  ;;  %v15449_v29 = vld [vmem:[#allocation80_spill] sm:$0xff]  ;;  %v15451_v21 = vld [vmem:[#allocation27_spill] sm:$0xff] }
 0x53a   : > { %v2166_v23 = vor.u32 %v2165_v9, %v2162_v10  ;;  %v2834_v16 = vrot.slane %v2832_v63, 3  ;;  %v2839_v19 = vrot.slane %v2837_v56, 2  ;;  %v2927_v53 = vmul.bf16 %v15446_v47, %v15445_v1  ;;  %v3306_v10 = vld [vmem:[#allocation2 + $0x150] sm:$0xf8]  ;;  %v15452_v22 = vld [vmem:[#allocation191_spill] sm:$0xff]  ;;  %v15455_v63 = vld [vmem:[#allocation36_spill] sm:$0xff] }
 0x53b   : > { %v7484_v37 = vmax.bf16 %v15356_v43, %v7468_v60  ;;  %v2842_v49 = vrot.slane %v2840_v13, 3  ;;  %v2966_v31 = vmul.bf16 %v15448_v38, %v15447_v41  ;;  %v3021_v18 = vmul.bf16 %v15450_v36, %v15449_v29  ;;  %v15457_v13 = vld [vmem:[#allocation198_spill] sm:$0xff] }
 0x53c   : > { %v2167_v12 = vsel %vm1861_vm2, %v2158_v40, %v2166_v23  ;;  %v2835_v9 = vor.u32 %v2834_v16, %v2831_v11  ;;  %v3078_v8 = vmul.bf16 %v15453_v39, %v15452_v22  ;;  %v15454_v40 = vld [vmem:[#allocation195_spill] sm:$0xff]  ;;  %v15456_v23 = vld [vmem:[#allocation68_spill] sm:$0xff]  ;;  %v3416_v38 = vrot.slane %v3306_v10, 3  ;;  %v15458_v11 = vld [vmem:[#allocation62_spill] sm:$0xff] }
 0x53d   : > { %v7500_v0 = vmin.bf16 %v14114_v50, %v7484_v37  ;;  %v2330_v17 = vmul.bf16 %v15451_v21, %v2167_v12  ;;  %v2843_v33 = vor.u32 %v2842_v49, %v2839_v19  ;;  %v2982_v60 = vadd.bf16 %v2966_v31, %v2927_v53  ;;  %v15459_v16 = vld [vmem:[#allocation204_spill] sm:$0xff]  ;;  %v15460_v21 = vld [vmem:[#allocation193_spill] sm:$0xff]  ;;  %v15461_v19 = vld [vmem:[#allocation98_spill] sm:$0xff] }
 0x53e   : > { %v3134_v56 = vmul.bf16 %v15455_v63, %v15454_v40  ;;  %v3191_v1 = vmul.bf16 %v15457_v13, %v15456_v23  ;;  %v3417_v29 = vrot.slane %v3307_v52, 3  ;;  %v3498_v36 = vmul.bf16 %v15459_v16, %v15458_v11  ;;  %v3882_v49 = vld [vmem:[#allocation2 + $0x150] sm:$0xf8]  ;;  %v15462_v22 = vld [vmem:[#allocation83_spill] sm:$0xff]  ;;  %v3883_v52 = vld [vmem:[#allocation2 + $0x158] sm:$0xf] }
 0x53f   : > { %v7516_v47 = vadd.bf16 %v7500_v0, %v12632_v6  ;;  %v2346_v41 = vadd.bf16 %v2330_v17, %v2291_v4  ;;  %v2844_v37 = vsel %vm2470_vm3, %v2835_v9, %v2843_v33  ;;  %v3037_v12 = vadd.bf16 %v3021_v18, %v2982_v60  ;;  %v15463_v6 = vld [vmem:[#allocation212_spill] sm:$0xff]  ;;  %v15464_v4 = vld [vmem:[#allocation206_spill] sm:$0xff]  ;;  %v15467_v60 = vld [vmem:[#allocation115_spill] sm:$0xff] }
 0x540   : > { %v3534_v53 = vmul.bf16 %v15461_v19, %v15460_v21  ;;  %v3247_v39 = vmul.bf16 %v15462_v22, %v2844_v37  ;;  %v3418_v40 = vsel %vm3352_vm4, %v3416_v38, %v3417_v29  ;;  %v3589_v10 = vmul.bf16 %v15464_v4, %v15463_v6  ;;  %v15465_v18 = vld [vmem:[#allocation64_spill] sm:$0xff]  ;;  %v15466_v9 = vld [vmem:[#allocation114_spill] sm:$0xff]  ;;  %v15468_v63 = vld [vmem:[#allocation207_spill] sm:$0xff] }
 0x541   : > { %8269 = vmatprep.mubr.bf16.mxu1 %v7516_v47  ;;  %v2362_v31 = vadd.bf16 %v2346_v41, %v1824_v32  ;;  %v3094_v0 = vadd.bf16 %v3078_v8, %v3037_v12  ;;  %v3643_v33 = vmul.bf16 %v15466_v9, %v15465_v18  ;;  %v3698_v23 = vmul.bf16 %v15468_v63, %v15467_v60  ;;  %v15469_v47 = vld [vmem:[#allocation99_spill] sm:$0xff]  ;;  %v15471_v37 = vld [vmem:[#allocation208_spill] sm:$0xff]  ;;  %v4709_v60 = vld [vmem:[#allocation2 + $0x158] sm:$0xf] }
 0x542   : > { %v3550_v17 = vadd.bf16 %v3534_v53, %v3498_v36  ;;  %v15470_v32 = vld [vmem:[#allocation163_spill] sm:$0xff]  ;;  %v3807_v11 = vmul.bf16 %v15471_v37, %v3418_v40  ;;  %v4242_v38 = vshrl.u32 %v3882_v49, 16  ;;  %v4245_v21 = vshll.u32 %v3882_v49, 16  ;;  %v15472_v53 = vld [vmem:[#allocation130_spill] sm:$0xff]  ;;  %v15477_v37 = vld [vmem:[#allocation97_spill] sm:$0xff] }
 0x543   : > { %v2385_v13 = vadd.bf16 %v15386_v58, %v2362_v31  ;;  %v3752_v41 = vmul.bf16 %v15470_v32, %v15469_v47  ;;  %v3150_v29 = vadd.bf16 %v3134_v56, %v3094_v0  ;;  %v4250_v19 = vshrl.u32 %v3883_v52, 16  ;;  %v15473_v9 = vld [vmem:[#allocation67_spill] sm:$0xff]  ;;  %v15476_v47 = vld [vmem:[#allocation132_spill] sm:$0xff] }
 0x544   : > { %v3605_v16 = vadd.bf16 %v3589_v10, %v3550_v17  ;;  %v4244_v12 = vrot.slane %v4242_v38, 3  ;;  %v4253_v36 = vshll.u32 %v3883_v52, 16  ;;  %v4337_v22 = vmul.bf16 %v15472_v53, %v15287_v54  ;;  %v15474_v56 = vld [vmem:[#allocation35_spill] sm:$0xff]  ;;  %v4708_v17 = vld [vmem:[#allocation2 + $0x150] sm:$0xf0] }
 0x545   : > { %v2401_v8 = vmax.bf16 %v15356_v43, %v2385_v13  ;;  %v3207_v6 = vadd.bf16 %v3191_v1, %v3150_v29  ;;  %v4247_v58 = vrot.slane %v4245_v21, 4  ;;  %v4252_v31 = vrot.slane %v4250_v19, 3  ;;  %v15475_v49 = vld [vmem:[#allocation131_spill] sm:$0xff] }
 0x546   : > { %v3659_v4 = vadd.bf16 %v3643_v33, %v3605_v16  ;;  %v4255_v40 = vrot.slane %v4253_v36, 4  ;;  %v4373_v10 = vmul.bf16 %v15474_v56, %v15473_v9  ;;  %v4425_v0 = vmul.bf16 %v15475_v49, %v15291_v24  ;;  %v15478_v38 = vld [vmem:[#allocation215_spill] sm:$0xff]  ;;  %v15479_v24 = vld [vmem:[#allocation61_spill] sm:$0xff] }
 0x547   : > { %v12776_v18 = vmin.bf16 %v14114_v50, %v2401_v8  ;;  %v3263_v52 = vadd.bf16 %v3247_v39, %v3207_v6  ;;  %v4248_v13 = vor.u32 %v4247_v58, %v4244_v12  ;;  %v4477_v54 = vmul.bf16 %v15290_v14, %v15390_v15  ;;  %v15480_v8 = vld [vmem:[#allocation221_spill] sm:$0xff]  ;;  %v15481_v12 = vld [vmem:[#allocation66_spill] sm:$0xff]  ;;  %v15482_v53 = vld [vmem:[#allocation171_spill] sm:$0xff] }
 0x548   : > { %v3714_v63 = vadd.bf16 %v3698_v23, %v3659_v4  ;;  %v4256_v1 = vor.u32 %v4255_v40, %v4252_v31  ;;  %v4389_v33 = vadd.bf16 %v4373_v10, %v4337_v22  ;;  %v4529_v32 = vmul.bf16 %v15476_v47, %v15392_v7  ;;  %v15483_v15 = vld [vmem:[#allocation75_spill] sm:$0xff]  ;;  %v5270_v4 = vld [vmem:[#allocation2 + $0x150] sm:$0xf0] }
 0x549   : > { %v4581_v29 = vmul.bf16 %v15478_v38, %v15477_v37  ;;  %v4817_v21 = vrot.slane %v4708_v17, 4  ;;  %v4818_v19 = vrot.slane %v4709_v60, 4  ;;  %v4899_v36 = vmul.bf16 %v15480_v8, %v15479_v24  ;;  %v15484_v22 = vld [vmem:[#allocation223_spill] sm:$0xff]  ;;  %v15485_v58 = vld [vmem:[#allocation170_spill] sm:$0xff] }
 0x54a   : > { %v3768_v16 = vadd.bf16 %v3752_v41, %v3714_v63  ;;  %v4257_v39 = vsel %vm1015_vm0, %v4248_v13, %v4256_v1  ;;  %v4441_v23 = vadd.bf16 %v4425_v0, %v4389_v33  ;;  %v4935_v14 = vmul.bf16 %v15482_v53, %v15481_v12  ;;  %v15486_v40 = vld [vmem:[#allocation174_spill] sm:$0xff]  ;;  %v15488_v60 = vld [vmem:[#allocation175_spill] sm:$0xff]  ;;  %v15489_v1 = vld [vmem:[#allocation225_spill] sm:$0xff] }
 0x54b   : > { %v4987_v6 = vmul.bf16 %v15484_v22, %v15483_v15  ;;  %v4633_v31 = vmul.bf16 %v15485_v58, %v4257_v39  ;;  %v4819_v41 = vsel %vm1578_vm1, %v4817_v21, %v4818_v19  ;;  %v5039_v9 = vmul.bf16 %v15486_v40, %v15403_v57  ;;  %v5271_v56 = vld [vmem:[#allocation2 + $0x158] sm:$0x1f] }
 0x54c   : > { %v3823_v7 = vadd.bf16 %v3807_v11, %v3768_v16  ;;  %v4493_v10 = vadd.bf16 %v4477_v54, %v4441_v23  ;;  %v4951_v49 = vadd.bf16 %v4935_v14, %v4899_v36  ;;  %v5091_v0 = vmul.bf16 %v15404_v59, %v12461_v28  ;;  %v15487_v17 = vld [vmem:[#allocation202_spill] sm:$0xff] }
 0x54d   : > { %v5143_v63 = vmul.bf16 %v15488_v60, %v15487_v17  ;;  %v5195_v33 = vmul.bf16 %v15489_v1, %v4819_v41  ;;  %v5630_v11 = vshrl.u32 %v5270_v4, 16  ;;  %v5633_v47 = vshll.u32 %v5270_v4, 16  ;;  %v6096_v36 = vld [vmem:[#allocation2 + $0x150] sm:$0xe0]  ;;  %v6097_v39 = vld [vmem:[#allocation2 + $0x158] sm:$0x1f] }
 0x54e   : > { %v3839_v13 = vadd.bf16 %v3823_v7, %v3263_v52  ;;  %v4545_v37 = vadd.bf16 %v4529_v32, %v4493_v10  ;;  %v5003_v38 = vadd.bf16 %v4987_v6, %v4951_v49  ;;  %v5638_v16 = vshrl.u32 %v5271_v56, 16  ;;  %v6659_v41 = vld [vmem:[#allocation2 + $0x150] sm:$0xe0]  ;;  %v6660_v40 = vld [vmem:[#allocation2 + $0x158] sm:$0x3f]  ;;  %v15496_v49 = vld [vmem:[#allocation32_spill] sm:$0xff] }
 0x54f   : > { %v5641_v21 = vshll.u32 %v5271_v56, 16  ;;  %v5632_v19 = vrot.slane %v5630_v11, 4  ;;  %v5635_v57 = vrot.slane %v5633_v47, 5  ;;  %v5725_v54 = vmul.bf16 %v15134_v5, %v11844_v27  ;;  %v15495_v10 = vld [vmem:[#allocation119_spill] sm:$0xff]  ;;  %v15497_v17 = vld [vmem:[#allocation122_spill] sm:$0xff]  ;;  %v15498_v60 = vld [vmem:[#allocation241_spill] sm:$0xff] }
 0x550   : > { %v5761_v28 = vmul.bf16 %v15135_v20, %v12015_v2  ;;  %v4597_v59 = vadd.bf16 %v4581_v29, %v4545_v37  ;;  %v5055_v24 = vadd.bf16 %v5039_v9, %v5003_v38  ;;  %v5640_v8 = vrot.slane %v5638_v16, 4  ;;  %v15494_v9 = vld [vmem:[#allocation239_spill] sm:$0xff] }
 0x551   : > { %v5643_v52 = vrot.slane %v5641_v21, 5  ;;  %v5636_v23 = vor.u32 %v5635_v57, %v5632_v19  ;;  %v5813_v32 = vmul.bf16 %v15407_v45, %v12178_v62  ;;  %v5865_v53 = vmul.bf16 %v15408_v35, %v12335_v44  ;;  %v15490_v45 = vld [vmem:[#allocation69_spill] sm:$0xff]  ;;  %v15500_v11 = vld [vmem:[#allocation243_spill] sm:$0xff] }
 0x552   : > { %v5777_v12 = vadd.bf16 %v5761_v28, %v5725_v54  ;;  %v4649_v14 = vadd.bf16 %v4633_v31, %v4597_v59  ;;  %v5107_v15 = vadd.bf16 %v5091_v0, %v5055_v24  ;;  %v5917_v2 = vmul.bf16 %v15308_v46, %v12490_v51  ;;  %v15491_v31 = vld [vmem:[#allocation203_spill] sm:$0xff]  ;;  %v15492_v46 = vld [vmem:[#allocation30_spill] sm:$0xff]  ;;  %v15501_v54 = vld [vmem:[#allocation73_spill] sm:$0xff] }
 0x553   : > { %v5644_v27 = vor.u32 %v5643_v52, %v5640_v8  ;;  %v5969_v20 = vmul.bf16 %v15222_v42, %v12683_v26  ;;  %v6206_v29 = vrot.slane %v6096_v36, 5  ;;  %v6207_v22 = vrot.slane %v6097_v39, 5  ;;  %v15493_v26 = vld [vmem:[#allocation74_spill] sm:$0xff]  ;;  %v15502_v28 = vld [vmem:[#allocation244_spill] sm:$0xff] }
 0x554   : > { %v5829_v5 = vadd.bf16 %v5813_v32, %v5777_v12  ;;  %v4665_v6 = vadd.bf16 %v4649_v14, %v3839_v13  ;;  %v5159_v4 = vadd.bf16 %v5143_v63, %v5107_v15  ;;  %v6288_v62 = vmul.bf16 %v15224_v61, %v15412_v30  ;;  %v15499_v13 = vld [vmem:[#allocation242_spill] sm:$0xff]  ;;  %v15503_v36 = vld [vmem:[#allocation76_spill] sm:$0xff]  ;;  %v12841_v15 = vld [vmem:[%s13017_s8] ss:$0 sm:$0xff] }
 0x555   : > { %v5645_v7 = vsel %vm1861_vm2, %v5636_v23, %v5644_v27  ;;  %v6208_v58 = vsel %vm6142_vm5, %v6206_v29, %v6207_v22  ;;  %v6324_v51 = vmul.bf16 %v15492_v46, %v15491_v31  ;;  %v6376_v56 = vmul.bf16 %v15494_v9, %v15493_v26  ;;  %v8114_v27 = vld [vmem:[%s8853_s28 + $0x8] sm:$0xff]   ;;  %v15510_v31 = vld [vmem:[#allocation123_spill] sm:$0xff]  ;;  %v15512_v26 = vld [vmem:[#allocation126_spill] sm:$0xff] }
 0x556   : > { %v5881_v44 = vadd.bf16 %v5865_v53, %v5829_v5  ;;  %v6021_v35 = vmul.bf16 %v15490_v45, %v5645_v7  ;;  %v5211_v42 = vadd.bf16 %v5195_v33, %v5159_v4  ;;  %v6428_v0 = vmul.bf16 %v15496_v49, %v15495_v10  ;;  %v15505_v53 = vld [vmem:[#allocation246_spill] sm:$0xff]  ;;  %v15506_v29 = vld [vmem:[#allocation240_spill] sm:$0xff]  ;;  %v15509_v45 = vld [vmem:[#allocation249_spill] sm:$0xff] }
 0x557   : > { %v6480_v61 = vmul.bf16 %v15498_v60, %v15497_v17  ;;  %v6340_v63 = vadd.bf16 %v6324_v51, %v6288_v62  ;;  %v6532_v1 = vmul.bf16 %v15499_v13, %v12686_v3  ;;  %v6584_v47 = vmul.bf16 %v15500_v11, %v6208_v58  ;;  %v15504_v3 = vld [vmem:[#allocation245_spill] sm:$0xff]  ;;  %v15507_v22 = vld [vmem:[#allocation248_spill] sm:$0xff]  ;;  %v15513_v49 = vld [vmem:[#allocation251_spill] sm:$0xff] }
 0x558   : > { %v5933_v30 = vadd.bf16 %v5917_v2, %v5881_v44  ;;  %v5227_v37 = vadd.bf16 %v5211_v42, %v4665_v6  ;;  %v7020_v38 = vshrl.u32 %v6659_v41, 16  ;;  %v7023_v33 = vshll.u32 %v6659_v41, 16  ;;  %v8051_v4 = vld [vmem:[%s8853_s28] sm:$0xff]   ;;  %v15508_v44 = vld [vmem:[#allocation105_spill] sm:$0xff]  ;;  %v15514_v13 = vld [vmem:[#allocation214_spill] sm:$0xff] }
 0x559   : > { %v7028_v16 = vshrl.u32 %v6660_v40, 16  ;;  %v6392_v19 = vadd.bf16 %v6376_v56, %v6340_v63  ;;  %v7031_v57 = vshll.u32 %v6660_v40, 16  ;;  %v7115_v59 = vmul.bf16 %v15502_v28, %v15501_v54  ;;  %v15511_v41 = vld [vmem:[#allocation125_spill] sm:$0xff]  ;;  %v8116_v56 = vld [vmem:[%s8853_s28 + $0x18] sm:$0xff]  }
 0x55a   : > { %v5985_v21 = vadd.bf16 %v5969_v20, %v5933_v30  ;;  %v7022_v24 = vrot.slane %v7020_v38, 5  ;;  %v7025_v8 = vrot.slane %v7023_v33, 6  ;;  %v7151_v39 = vmul.bf16 %v15504_v3, %v15503_v36  ;;  %v15515_v33 = vld [vmem:[#allocation121_spill] sm:$0xff] }
 0x55b   : > { %v7030_v52 = vrot.slane %v7028_v16, 5  ;;  %v6444_v12 = vadd.bf16 %v6428_v0, %v6392_v19  ;;  %v7033_v32 = vrot.slane %v7031_v57, 6  ;;  %v7203_v14 = vmul.bf16 %v15505_v53, %v15329_v34  ;;  %v15516_v57 = vld [vmem:[#allocation120_spill] sm:$0xff] }
 0x55c   : > { %v6037_v23 = vadd.bf16 %v6021_v35, %v5985_v21  ;;  %v7026_v2 = vor.u32 %v7025_v8, %v7022_v24  ;;  %v7167_v5 = vadd.bf16 %v7151_v39, %v7115_v59  ;;  %v7255_v20 = vmul.bf16 %v15425_v48, %v15426_v55  ;;  %v8118_v59 = vld [vmem:[%s8853_s28 + $0x28] sm:$0xff]   ;;  %v8117_v39 = vld [vmem:[%s8853_s28 + $0x20] sm:$0xff]  }
 0x55d   : > { %v7307_v6 = vmul.bf16 %v15507_v22, %v15506_v29  ;;  %v6496_v62 = vadd.bf16 %v6480_v61, %v6444_v12  ;;  %v7034_v34 = vor.u32 %v7033_v32, %v7030_v52  ;;  %v7359_v35 = vmul.bf16 %v15509_v45, %v15508_v44  ;;  %v8115_v61 = vld [vmem:[%s8853_s28 + $0x10] sm:$0xff]   ;;  %v15517_v52 = vld [vmem:[#allocation124_spill] sm:$0xff]  ;;  %v15518_v12 = vld [vmem:[#allocation127_spill] sm:$0xff] }
 0x55e   : > { %v6053_v7 = vadd.bf16 %v6037_v23, %v5227_v37  ;;  %v7219_v58 = vadd.bf16 %v7203_v14, %v7167_v5  ;;  %v7632_v46 = vadd.f32 %v15510_v31, %v12841_v15  ;;  %v8056_v51 = vunpack.c.l.bf16 %v8114_v27  ;;  %v15519_v14 = vld [vmem:[#allocation238_spill] sm:$0xff]  ;;  %v15520_v29 = vld [vmem:[#allocation216_spill] sm:$0xff]  ;;  %v15522_v31 = vld [vmem:[#allocation51_spill] sm:$0xff] }
 0x55f   : > { %v7624_v48 = vadd.f32 %v12841_v15, %v15511_v41  ;;  %v6548_v55 = vadd.bf16 %v6532_v1, %v6496_v62  ;;  %v7035_v40 = vsel %vm6661_vm6, %v7026_v2, %v7034_v34  ;;  %v8052_v42 = vunpack.c.l.bf16 %v8051_v4  ;;  %v15521_v62 = vld [vmem:[#allocation40_spill] sm:$0xff]  ;;  %v8119_v45 = vld [vmem:[%s8853_s28 + $0x30] sm:$0xff]  }
 0x560   : > { %v7635_v9 = vadd.f32 %v15512_v26, %v12841_v15  ;;  %v7271_v10 = vadd.bf16 %v7255_v20, %v7219_v58  ;;  %v7414_v0 = vmul.bf16 %v15513_v49, %v7035_v40  ;;  %v7816_v17 = vadd.f32 %v8056_v51, %v7632_v46 }
 0x561   : > { %v8057_v60 = vunpack.c.h.bf16 %v8114_v27  ;;  %v6600_v30 = vadd.bf16 %v6584_v47, %v6548_v55  ;;  %v7814_v63 = vadd.f32 %v8052_v42, %v7624_v48  ;;  %v7627_v11 = vadd.f32 %v12841_v15, %v15514_v13  ;;  %v15523_v55 = vld [vmem:[#allocation210_spill] sm:$0xff]  ;;  %v15526_v13 = vld [vmem:[#allocation101_spill] sm:$0xff] }
 0x562   : > { %v8053_v1 = vunpack.c.h.bf16 %v8051_v4  ;;  %v7323_v37 = vadd.bf16 %v7307_v6, %v7271_v10  ;;  %7848 = vst [vmem:[%s12864_s25 + $0x10] sm:$0xff] %v7816_v17  ;;  %v7648_v16 = vadd.f32 %v15515_v33, %v12841_v15  ;;  %v8064_v21 = vunpack.c.l.bf16 %v8116_v56  ;;  %v8120_v6 = vld [vmem:[%s8853_s28 + $0x38] sm:$0xff]   ;;  %v8121_v17 = vld [vmem:[%s8853_s28 + $0x40] sm:$0xff]  }
 0x563   : > { %v7817_v38 = vadd.f32 %v8057_v60, %v7635_v9  ;;  %v6616_v47 = vadd.bf16 %v6600_v30, %v6053_v7  ;;  %7846 = vst [vmem:[%s12864_s25] sm:$0xff] %v7814_v63  ;;  %v7640_v54 = vadd.f32 %v12841_v15, %v15516_v57  ;;  %v8060_v28 = vunpack.c.l.bf16 %v8115_v61 }
 0x564   : > { %v7815_v19 = vadd.f32 %v8053_v1, %v7627_v11  ;;  %v7375_v24 = vadd.bf16 %v7359_v35, %v7323_v37  ;;  %v7820_v8 = vadd.f32 %v8064_v21, %v7648_v16  ;;  %v7651_v36 = vadd.f32 %v15517_v52, %v12841_v15 }
 0x565   : > { %7849 = vst [vmem:[%s12864_s25 + $0x18] sm:$0xff] %v7817_v38  ;;  %v8065_v3 = vunpack.c.h.bf16 %v8116_v56  ;;  %v7818_v23 = vadd.f32 %v8060_v28, %v7640_v54  ;;  %v7643_v32 = vadd.f32 %v12841_v15, %v15518_v12  ;;  %v8061_v53 = vunpack.c.h.bf16 %v8115_v61  ;;  %v15524_v56 = vld [vmem:[#allocation200_spill] sm:$0xff]  ;;  %v15525_v61 = vld [vmem:[#allocation103_spill] sm:$0xff]  ;;  %v15529_v28 = vld [vmem:[#allocation110_spill] sm:$0xff] }
 0x566   : > { %7847 = vst [vmem:[%s12864_s25 + $0x8] sm:$0xff] %v7815_v19  ;;  %v7664_v27 = vadd.f32 %v15519_v14, %v12841_v15  ;;  %v7430_v2 = vadd.bf16 %v7414_v0, %v7375_v24  ;;  %7852 = vst [vmem:[%s12864_s25 + $0x30] sm:$0xff] %v7820_v8  ;;  %v8072_v20 = vunpack.c.l.bf16 %v8118_v59  ;;  %v7656_v22 = vadd.f32 %v12841_v15, %v15520_v29  ;;  %v8122_v0 = vld [vmem:[%s8853_s28 + $0x48] sm:$0xff]   ;;  %v15527_v38 = vld [vmem:[#allocation107_spill] sm:$0xff] }
 0x567   : > { %v7821_v5 = vadd.f32 %v8065_v3, %v7651_v36  ;;  %7850 = vst [vmem:[%s12864_s25 + $0x20] sm:$0xff] %v7818_v23  ;;  %v7819_v4 = vadd.f32 %v8061_v53, %v7643_v32  ;;  %v8068_v7 = vunpack.c.l.bf16 %v8117_v39  ;;  %v7667_v34 = vadd.f32 %v15521_v62, %v12841_v15  ;;  %v15530_v36 = vld [vmem:[#allocation111_spill] sm:$0xff]  ;;  %v8123_v53 = vld [vmem:[%s8853_s28 + $0x50] sm:$0xff]  }
 0x568   : > { %v8073_v44 = vunpack.c.h.bf16 %v8118_v59  ;;  %v7446_v35 = vadd.bf16 %v7430_v2, %v6616_v47  ;;  %v7824_v58 = vadd.f32 %v8072_v20, %v7664_v27  ;;  %v7659_v46 = vadd.f32 %v12841_v15, %v15522_v31  ;;  %v15528_v47 = vld [vmem:[#allocation108_spill] sm:$0xff]  ;;  %v8124_v32 = vld [vmem:[%s8853_s28 + $0x58] sm:$0xff]  }
 0x569   : > { %7853 = vst [vmem:[%s12864_s25 + $0x38] sm:$0xff] %v7821_v5  ;;  %v8069_v51 = vunpack.c.h.bf16 %v8117_v39  ;;  %7851 = vst [vmem:[%s12864_s25 + $0x28] sm:$0xff] %v7819_v4  ;;  %v7822_v41 = vadd.f32 %v8068_v7, %v7656_v22  ;;  %v7680_v40 = vadd.f32 %v15523_v55, %v12841_v15  ;;  %v8080_v42 = vunpack.c.l.bf16 %v8120_v6  ;;  %v8125_v31 = vld [vmem:[%s8853_s28 + $0x60] sm:$0xff]  }
 0x56a   : > { %v7825_v48 = vadd.f32 %v8073_v44, %v7667_v34  ;;  %v7469_v26 = vadd.bf16 %v15444_v25, %v7446_v35  ;;  %7856 = vst [vmem:[%s12864_s25 + $0x50] sm:$0xff] %v7824_v58  ;;  %v7672_v10 = vadd.f32 %v12841_v15, %v15524_v56  ;;  %v8076_v49 = vunpack.c.l.bf16 %v8119_v45  ;;  %v8126_v58 = vld [vmem:[%s8853_s28 + $0x68] sm:$0xff]  }
 0x56b   : > { %v7823_v9 = vadd.f32 %v8069_v51, %v7659_v46  ;;  %7854 = vst [vmem:[%s12864_s25 + $0x40] sm:$0xff] %v7822_v41  ;;  %v7828_v60 = vadd.f32 %v8080_v42, %v7680_v40  ;;  %v7683_v30 = vadd.f32 %v15525_v61, %v12841_v15  ;;  %v8081_v63 = vunpack.c.h.bf16 %v8120_v6 }
 0x56c   : > { %7857 = vst [vmem:[%s12864_s25 + $0x58] sm:$0xff] %v7825_v48  ;;  %v7675_v25 = vadd.f32 %v12841_v15, %v15526_v13  ;;  %v7485_v11 = vmax.bf16 %v15356_v43, %v7469_v26  ;;  %v7826_v1 = vadd.f32 %v8076_v49, %v7672_v10  ;;  %v8077_v37 = vunpack.c.h.bf16 %v8119_v45 }
 0x56d   : > { %7855 = vst [vmem:[%s12864_s25 + $0x48] sm:$0xff] %v7823_v9  ;;  %v7696_v33 = vadd.f32 %v15527_v38, %v12841_v15  ;;  %7860 = vst [vmem:[%s12864_s25 + $0x70] sm:$0xff] %v7828_v60  ;;  %v7829_v16 = vadd.f32 %v8081_v63, %v7683_v30  ;;  %v8088_v21 = vunpack.c.l.bf16 %v8122_v0  ;;  %v7688_v19 = vadd.f32 %v12841_v15, %v15528_v47  ;;  %v8128_v30 = vld [vmem:[%s8853_s28 + $0x78] sm:$0xff]   ;;  %v8127_v63 = vld [vmem:[%s8853_s28 + $0x70] sm:$0xff]  }
 0x56e   : > { %v8084_v57 = vunpack.c.l.bf16 %v8121_v17  ;;  %v7501_v54 = vmin.bf16 %v14114_v50, %v7485_v11  ;;  %7858 = vst [vmem:[%s12864_s25 + $0x60] sm:$0xff] %v7826_v1  ;;  %v7827_v43 = vadd.f32 %v8077_v37, %v7675_v25  ;;  %v7699_v59 = vadd.f32 %v15529_v28, %v12841_v15 }
 0x56f   : > { %v8089_v24 = vunpack.c.h.bf16 %v8122_v0  ;;  %7861 = vst [vmem:[%s12864_s25 + $0x78] sm:$0xff] %v7829_v16  ;;  %v7832_v8 = vadd.f32 %v8088_v21, %v7696_v33  ;;  %v7691_v3 = vadd.f32 %v12841_v15, %v15530_v36  ;;  %v8085_v39 = vunpack.c.h.bf16 %v8121_v17 }
 0x570   : > { %v7830_v52 = vadd.f32 %v8084_v57, %v7688_v19  ;;  %v7517_v23 = vadd.bf16 %v7501_v54, %v12776_v18  ;;  %7859 = vst [vmem:[%s12864_s25 + $0x68] sm:$0xff] %v7827_v43  ;;  %v8096_v14 = vunpack.c.l.bf16 %v8124_v32  ;;  %v8092_v2 = vunpack.c.l.bf16 %v8123_v53 }
 0x571   : > { %v7833_v50 = vadd.f32 %v8089_v24, %v7699_v59  ;;  %7864 = vst [vmem:[%s12864_s25 + $0x90] sm:$0xff] %v7832_v8  ;;  %v7831_v12 = vadd.f32 %v8085_v39, %v7691_v3  ;;  %v8097_v20 = vunpack.c.h.bf16 %v8124_v32  ;;  %v8093_v6 = vunpack.c.h.bf16 %v8123_v53 }
 0x572   : > { %7862 = vst [vmem:[%s12864_s25 + $0x80] sm:$0xff] %v7830_v52  ;;  %8270 = vmatmul.mubr.bf16.gmra.mrb[28].mxu1 %v7517_v23  ;;  %v8104_v46 = vunpack.c.l.bf16 %v8126_v58  ;;  %v8100_v41 = vunpack.c.l.bf16 %v8125_v31  ;;  %v8105_v40 = vunpack.c.h.bf16 %v8126_v58  ;;  %v8101_v9 = vunpack.c.h.bf16 %v8125_v31 }
 0x573   : > { %7865 = vst [vmem:[%s12864_s25 + $0x98] sm:$0xff] %v7833_v50  ;;  %7863 = vst [vmem:[%s12864_s25 + $0x88] sm:$0xff] %v7831_v12  ;;  %v8112_v13 = vunpack.c.l.bf16 %v8128_v30  ;;  %v8108_v11 = vunpack.c.l.bf16 %v8127_v63  ;;  %v8113_v38 = vunpack.c.h.bf16 %v8128_v30  ;;  %v8109_v21 = vunpack.c.h.bf16 %v8127_v63 }
 0x57d   : > { %v8263_v27 = vpop.f32.mrb[20].mxu1 }
 0x57e   : > { %v7712_v5 = vadd.f32 %v8263_v27, %v12841_v15  ;;  %v7703_v18 = vpop.f32.mrb[21].mxu1 }
 0x57f   : > { %v7704_v29 = vadd.f32 %v12841_v15, %v7703_v18  ;;  %v8264_v22 = vpop.f32.mrb[22].mxu1 }
 0x580   : > { %v7836_v4 = vadd.f32 %v8096_v14, %v7712_v5  ;;  %v7715_v7 = vadd.f32 %v8264_v22, %v12841_v15  ;;  %v7706_v62 = vpop.f32.mrb[23].mxu1 }
 0x581   : > { %v7834_v34 = vadd.f32 %v8092_v2, %v7704_v29  ;;  %v7707_v44 = vadd.f32 %v12841_v15, %v7706_v62 }
 0x582   : > { %7868 = vst [vmem:[%s12864_s25 + $0xb0] sm:$0xff] %v7836_v4  ;;  %v7837_v45 = vadd.f32 %v8097_v20, %v7715_v7 }
 0x583   : > { %7866 = vst [vmem:[%s12864_s25 + $0xa0] sm:$0xff] %v7834_v34  ;;  %v7835_v35 = vadd.f32 %v8093_v6, %v7707_v44 }
 0x584   : > { %7869 = vst [vmem:[%s12864_s25 + $0xb8] sm:$0xff] %v7837_v45 }
 0x585   : > { %7867 = vst [vmem:[%s12864_s25 + $0xa8] sm:$0xff] %v7835_v35 }
 0x5e3   : > { %v8267_v51 = vpop.f32.mrb[24].mxu1 }
 0x5e4   : > { %v7728_v48 = vadd.f32 %v8267_v51, %v12841_v15  ;;  %v7719_v55 = vpop.f32.mrb[25].mxu1 }
 0x5e5   : > { %v7720_v42 = vadd.f32 %v12841_v15, %v7719_v55  ;;  %v8268_v26 = vpop.f32.mrb[26].mxu1 }
 0x5e6   : > { %v7840_v56 = vadd.f32 %v8104_v46, %v7728_v48  ;;  %v7731_v10 = vadd.f32 %v8268_v26, %v12841_v15  ;;  %v7722_v49 = vpop.f32.mrb[27].mxu1 }
 0x5e7   : > { %v7838_v0 = vadd.f32 %v8100_v41, %v7720_v42  ;;  %v7723_v17 = vadd.f32 %v12841_v15, %v7722_v49 }
 0x5e8   : > { %7872 = vst [vmem:[%s12864_s25 + $0xd0] sm:$0xff] %v7840_v56  ;;  %v7841_v60 = vadd.f32 %v8105_v40, %v7731_v10 }
 0x5e9   : > { %7870 = vst [vmem:[%s12864_s25 + $0xc0] sm:$0xff] %v7838_v0  ;;  %v7839_v61 = vadd.f32 %v8101_v9, %v7723_v17 }
 0x5ea   : > { %7873 = vst [vmem:[%s12864_s25 + $0xd8] sm:$0xff] %v7841_v60 }
 0x5eb   : > { %7871 = vst [vmem:[%s12864_s25 + $0xc8] sm:$0xff] %v7839_v61 }
 0x645   : > { %v8271_v25 = vpop.f32.mrb[28].mxu1 }
 0x646   : > { %v7744_v1 = vadd.f32 %v8271_v25, %v12841_v15  ;;  %v7735_v37 = vpop.f32.mrb[29].mxu1 }
 0x647   : > { %v7736_v33 = vadd.f32 %v12841_v15, %v7735_v37  ;;  %v8272_v16 = vpop.f32.mrb[30].mxu1 }
 0x648   : > { %v7844_v47 = vadd.f32 %v8112_v13, %v7744_v1  ;;  %v7747_v19 = vadd.f32 %v8272_v16, %v12841_v15  ;;  %v7738_v57 = vpop.f32.mrb[31].mxu1 }
 0x649   : > { %v7842_v54 = vadd.f32 %v8108_v11, %v7736_v33  ;;  %v7739_v43 = vadd.f32 %v12841_v15, %v7738_v57 }
 0x64a   : > { %7876 = vst [vmem:[%s12864_s25 + $0xf0] sm:$0xff] %v7844_v47  ;;  %v7845_v28 = vadd.f32 %v8113_v38, %v7747_v19 }
 0x64b   : > { %7874 = vst [vmem:[%s12864_s25 + $0xe0] sm:$0xff] %v7842_v54  ;;  %v7843_v59 = vadd.f32 %v8109_v21, %v7739_v43 }
 0x64c   : > { %7877 = vst [vmem:[%s12864_s25 + $0xf8] sm:$0xff] %v7845_v28 }
 0x64d   : > { %7875 = vst [vmem:[%s12864_s25 + $0xe8] sm:$0xff] %v7843_v59 }
 0x64e   : > { %8520 = shalt.err (!%p8517_p4)
}
 0x64f   : > { %s8521_s19 = scalar_lea.hbm %s12960_s20, 4096  ;;  %s8525_s25 = scalar_lea.hbm %s15531_s9, 8192 }
 0x650   : > { %p8522_p9 = scmp.ne.s32.totalorder %s12960_s20, %s8521_s19  ;;  %p8526_p8 = scmp.lt.u32.totalorder %s12960_s20, %s15531_s9 }
 0x651   : > { %p8527_p13 = scmp.lt.u32.totalorder %s8525_s25, %s8521_s19  ;;  %p8529_p10 = scmp.lt.u32.totalorder %s8521_s19, %s12960_s20 }
 0x652   : > { %p8523_p0 = pnand %p8522_p9, %p8798_p5 }
 0x653   : > { %p8528_p6 = por %p8527_p13, %p8526_p8 }
 0x654   : > { %p8524_p11 = pneg %p8523_p0 }
 0x655   : > { %p8530_p3 = por %p8529_p10, %p8528_p6 }
 0x657   : > { %p8531_p7 = pnand %p8530_p3, %p8524_p11 }
 0x659   : > { %8534 = shalt.err (!%p8531_p7)
}
 0x65a   : > { %s8592_s22 = smov 128   ;;  %s8593_s29 = smov 8  }
 0x65b   : > { %8287 = dma.vmem_to_hbm [thread:$0]  (%p8798_p5), %s12962_s23, 4096, %s12960_s20, %s7879_s13, %s8592_s22, %s8592_s22, %s8593_s29  }
 0x65c PF: > { %s15532_s24 = sld [smem:[#allocation17_spill]]  ;;  %s15533_s21 = sld [smem:[#allocation18_spill]] }
 0x65d   : > { %p15535_p1 = scmp.ge.s32.totalorder %s8581_s12, 2 }
 0x662   : > { %s7907_s18 = sand.u32 1, %s15532_s24   ;;  %p15534_p12 = scmp.ne.s32.totalorder %s15533_s21, 0 }
 0x663   : > { %s7908_s19 = scalar_lea.sflag [#allocation6], %s7907_s18 }
 0x664   : > { %p8304_p2 = pnand %p15535_p1, %p15534_p12 }
 0x666   : > { %8564 = dma.done.wait (!%p8304_p2), %s7908_s19, 4096  }
 0x667   : > { %8566 = vsyncadd (!%p8304_p2), %s7908_s19, 4294963200  ;;  %p24_p4 = scmp.ge.s32.totalorder %s8784_s14, 4   ;;  %s15536_s30 = smov %s8573_s10 }
 0x668   : > { %s15537_s10 = smov %s8577_s11  ;;  %s15538_s11 = smov %s8794_s16 }
 0x669   : > { %s15539_s12 = smov %s8784_s14  ;;  %26 = sbr.rel (!%p24_p4) target bundleno = 9 (0x9), region = 122 }
 0x670   :  { %7913 = vsyncpa [#allocation5], 1 }
 0x671   :  { %7915 = vsyncpa [#allocation5 + $0x1], 1 }
 0x672   :  { %7916 = vsyncpa [#allocation8], 1 }
 0x673   :  { %7917 = vsyncpa [#allocation11], 1 }
 0x674   :  { %7918 = vsyncpa [#allocation6], 1 }
 0x675   :  { %7920 = vsyncpa [#allocation6 + $0x1], 1 }

</bundles_post_ra>
